<compile_context>
chip_gen: v6e
topology: v6e:2x2x1
jax: 0.10.0
libtpu: 0.0.40
codegen_flags: <defaults>
</compile_context>

<pallas_src>
import functools

import jax
import jax.numpy as jnp
from jax.experimental import pallas as pl
from jax.experimental.pallas import tpu as pltpu

_LANE = 128


def _round_up(x, m):
    return (x + m - 1) // m * m


def _conv3x3(src_ref, w_ref, bias, H, W, TOP, mask_l, mask_r):
    """3x3 stride-1 'SAME' conv on a row-halo (ROWS, Cpad) slab via 9 matmuls.

    src_ref holds the image flattened to (H*W, Cpad) rows starting at row TOP,
    with zero rows above/below (vertical halo). Horizontal borders are masked.
    w_ref is (9, Cpad, Cpad) with the BN scale already folded in.
    """
    HW = H * W
    acc = None
    for kh in range(3):
        for kw in range(3):
            start = TOP + (kh - 1) * W + (kw - 1)
            patch = src_ref[pl.ds(start, HW), :]
            if kw == 0:          # reads column w-1 -> invalid at w == 0
                patch = jnp.where(mask_l, patch, 0.0)
            elif kw == 2:        # reads column w+1 -> invalid at w == W-1
                patch = jnp.where(mask_r, patch, 0.0)
            contrib = jnp.dot(patch, w_ref[kh * 3 + kw],
                              preferred_element_type=jnp.float32)
            acc = contrib if acc is None else acc + contrib
    return acc + bias


def basic_block_kernel(H, W, TOP, xh_ref, w1_ref, b1_ref, w2_ref, b2_ref,
                       out_ref, h1_ref):
    HW = H * W
    ROWS, C = h1_ref.shape

    w_idx = jax.lax.broadcasted_iota(jnp.int32, (HW, 1), 0) % W
    mask_l = w_idx > 0
    mask_r = w_idx < (W - 1)

    # conv1 -> bn1 (scale folded into w1, bias added here) -> relu
    y1 = jnp.maximum(
        _conv3x3(xh_ref, w1_ref, b1_ref[...], H, W, TOP, mask_l, mask_r), 0.0)

    # Stage y1 in the row-halo scratch for conv2. Halo rows are re-zeroed each
    # grid step (cheap, and keeps per-core scratch correct under megacore).
    h1_ref[pl.ds(0, TOP), :] = jnp.zeros((TOP, C), jnp.float32)
    h1_ref[pl.ds(TOP + HW, ROWS - TOP - HW), :] = jnp.zeros(
        (ROWS - TOP - HW, C), jnp.float32)
    h1_ref[pl.ds(TOP, HW), :] = y1

    # conv2 -> bn2 -> + identity shortcut -> relu
    y2 = _conv3x3(h1_ref, w2_ref, b2_ref[...], H, W, TOP, mask_l, mask_r)
    y2 = y2 + xh_ref[pl.ds(TOP, HW), :]          # identity shortcut = x
    out_ref[...] = jnp.maximum(y2, 0.0).astype(out_ref.dtype)


def _fold_bn(gamma, beta, mean, var, eps=1e-5):
    scale = gamma / jnp.sqrt(var + eps)
    bias = beta - mean * scale
    return scale, bias


def _prep_weight(w, scale, c_pad):
    """Fold BN scale into HWIO conv weight, pad channels, flatten taps -> (9,Cp,Cp)."""
    kh, kw, ci, co = w.shape
    wf = (w * scale[None, None, None, :]).reshape(kh * kw, ci, co)
    return jnp.zeros((kh * kw, c_pad, c_pad), w.dtype).at[:, :ci, :co].set(wf)


def _prep_bias(b, c_pad):
    return jnp.zeros((1, c_pad), b.dtype).at[0, :b.shape[0]].set(b)


def basic_block_forward(x_nchw, params):
    """BasicBlock forward. x_nchw: (N, C, H, W) float32 -> (N, C, H, W)."""
    N, C, H, W = x_nchw.shape
    dtype = x_nchw.dtype
    HW = H * W
    c_pad = _round_up(C, _LANE)
    top = _round_up(W + 1, 8)                 # vertical halo above the image
    rows = _round_up(top + HW + W + 1, 8)     # total rows incl. bottom halo

    s1, b1 = _fold_bn(params["bn1_gamma"], params["bn1_beta"],
                      params["bn1_mean"], params["bn1_var"])
    s2, b2 = _fold_bn(params["bn2_gamma"], params["bn2_beta"],
                      params["bn2_mean"], params["bn2_var"])
    w1 = _prep_weight(params["conv1_w"], s1, c_pad)
    w2 = _prep_weight(params["conv2_w"], s2, c_pad)
    b1 = _prep_bias(b1, c_pad)
    b2 = _prep_bias(b2, c_pad)

    # NCHW -> lane-dense (N, rows, Cpad) row-halo layout (zero rows top/bottom,
    # zero-padded channels). Left/right borders are handled in-kernel by masks.
    x_flat = jnp.transpose(x_nchw, (0, 2, 3, 1)).reshape(N, HW, C)
    xh = jnp.zeros((N, rows, c_pad), dtype).at[:, top:top + HW, :C].set(x_flat)

    kernel = functools.partial(basic_block_kernel, H, W, top)

    out = pl.pallas_call(
        kernel,
        out_shape=jax.ShapeDtypeStruct((N, HW, c_pad), dtype),
        grid_spec=pltpu.PrefetchScalarGridSpec(
            num_scalar_prefetch=0,
            grid=(N,),
            in_specs=[
                pl.BlockSpec((None, rows, c_pad), lambda n: (n, 0, 0)),   # x (halo)
                pl.BlockSpec((9, c_pad, c_pad), lambda n: (0, 0, 0)),     # w1 (BN folded)
                pl.BlockSpec((1, c_pad), lambda n: (0, 0)),               # b1
                pl.BlockSpec((9, c_pad, c_pad), lambda n: (0, 0, 0)),     # w2 (BN folded)
                pl.BlockSpec((1, c_pad), lambda n: (0, 0)),               # b2
            ],
            out_specs=pl.BlockSpec((None, HW, c_pad), lambda n: (n, 0, 0)),
            scratch_shapes=[pltpu.VMEM((rows, c_pad), jnp.float32)],
        ),
        compiler_params=pltpu.CompilerParams(
            dimension_semantics=("parallel",)),
    )(xh, w1, b1, w2, b2)

    out = out[:, :, :C].reshape(N, H, W, C)
    return jnp.transpose(out, (0, 3, 1, 2))   # NHWC -> NCHW


def _reference_forward(x_nchw, params):
    """Pure-JAX reference (NHWC conv via lax) for a correctness check."""
    x = jnp.transpose(x_nchw, (0, 2, 3, 1))
    dn = jax.lax.conv_dimension_numbers(x.shape, params["conv1_w"].shape,
                                        ("NHWC", "HWIO", "NHWC"))

    def conv(a, w):
        return jax.lax.conv_general_dilated(a, w, (1, 1), "SAME",
                                            dimension_numbers=dn)

    s1, b1 = _fold_bn(params["bn1_gamma"], params["bn1_beta"],
                      params["bn1_mean"], params["bn1_var"])
    s2, b2 = _fold_bn(params["bn2_gamma"], params["bn2_beta"],
                      params["bn2_mean"], params["bn2_var"])

    out = jnp.maximum(conv(x, params["conv1_w"]) * s1 + b1, 0.0)
    out = conv(out, params["conv2_w"]) * s2 + b2
    out = jnp.maximum(out + x, 0.0)
    return jnp.transpose(out, (0, 3, 1, 2))


def init_params(key, in_planes, planes):
    ks = jax.random.split(key, 6)
    fan1 = 3 * 3 * in_planes
    fan2 = 3 * 3 * planes
    return {
        # Conv weights in HWIO layout (kh, kw, Cin, Cout).
        "conv1_w": jax.random.normal(ks[0], (3, 3, in_planes, planes),
                                     jnp.float32) / jnp.sqrt(fan1),
        "conv2_w": jax.random.normal(ks[1], (3, 3, planes, planes),
                                     jnp.float32) / jnp.sqrt(fan2),
        # BatchNorm (inference / running-stats) parameters.
        "bn1_gamma": 1.0 + 0.1 * jax.random.normal(ks[2], (planes,), jnp.float32),
        "bn1_beta": 0.1 * jax.random.normal(ks[3], (planes,), jnp.float32),
        "bn1_mean": jnp.zeros((planes,), jnp.float32),
        "bn1_var": jnp.ones((planes,), jnp.float32),
        "bn2_gamma": 1.0 + 0.1 * jax.random.normal(ks[4], (planes,), jnp.float32),
        "bn2_beta": 0.1 * jax.random.normal(ks[5], (planes,), jnp.float32),
        "bn2_mean": jnp.zeros((planes,), jnp.float32),
        "bn2_var": jnp.ones((planes,), jnp.float32),
    }


if __name__ == "__main__":
    key = jax.random.PRNGKey(0)
    k_x, k_p = jax.random.split(key)

    N, C, H, W = 2, 4, 16, 16          # in_planes == planes, stride == 1
    x = jax.random.normal(k_x, (N, C, H, W), jnp.float32)
    params = init_params(k_p, in_planes=C, planes=C)

    out = jax.block_until_ready(basic_block_forward(x, params))
    ref = jax.block_until_ready(_reference_forward(x, params))

    assert out.shape == (N, C, H, W)
    assert jnp.allclose(out, ref, rtol=1e-4, atol=1e-4), "mismatch vs reference"
    print("KERNEL_OK")
</pallas_src>

<mosaic_0001>
module attributes {stable_mosaic.version = 11 : i64} {
  func.func @basic_block_kernel(%arg0: i32, %arg1: memref<1x304x128xf32, #tpu.memory_space<vmem>>, %arg2: memref<9x128x128xf32, #tpu.memory_space<vmem>>, %arg3: memref<1x128xf32, #tpu.memory_space<vmem>>, %arg4: memref<9x128x128xf32, #tpu.memory_space<vmem>>, %arg5: memref<1x128xf32, #tpu.memory_space<vmem>>, %arg6: memref<1x256x128xf32, #tpu.memory_space<vmem>>, %arg7: memref<304x128xf32, #tpu.memory_space<vmem>>) attributes {dimension_semantics = [#tpu.dimension_semantics<parallel>], iteration_bounds = array<i64: 2>, scalar_prefetch = 0 : i64, scratch_operands = 1 : i64, tpu.core_type = #tpu.core_type<tc>, window_params = [{transform_indices = @transform_0, window_bounds = array<i64: 1, 304, 128>}, {pipeline_mode = #tpu.pipeline_mode<synchronous>, transform_indices = @transform_1, window_bounds = array<i64: 9, 128, 128>}, {pipeline_mode = #tpu.pipeline_mode<synchronous>, transform_indices = @transform_2, window_bounds = array<i64: 1, 128>}, {pipeline_mode = #tpu.pipeline_mode<synchronous>, transform_indices = @transform_3, window_bounds = array<i64: 9, 128, 128>}, {pipeline_mode = #tpu.pipeline_mode<synchronous>, transform_indices = @transform_4, window_bounds = array<i64: 1, 128>}, {transform_indices = @transform_5, window_bounds = array<i64: 1, 256, 128>}]} {
    %0 = tpu.iota {dimensions = array<i32: 0>} : vector<256x1xi32>
    %c16_i32 = arith.constant 16 : i32
    %c0_i32 = arith.constant 0 : i32
    %1 = arith.cmpi eq, %c16_i32, %c0_i32 : i32
    %c1_i32 = arith.constant 1 : i32
    %2 = arith.select %1, %c1_i32, %c16_i32 : i32
    %3 = vector.broadcast %2 : i32 to vector<256x1xi32>
    %4 = arith.remsi %0, %3 : vector<256x1xi32>
    %c0_i32_0 = arith.constant 0 : i32
    %5 = vector.broadcast %c0_i32_0 : i32 to vector<256x1xi32>
    %6 = arith.cmpi ne, %4, %5 : vector<256x1xi32>
    %c0_i32_1 = arith.constant 0 : i32
    %7 = vector.broadcast %c0_i32_1 : i32 to vector<256x1xi32>
    %8 = arith.cmpi slt, %4, %7 : vector<256x1xi32>
    %c0_i32_2 = arith.constant 0 : i32
    %9 = arith.cmpi slt, %2, %c0_i32_2 : i32
    %10 = vector.broadcast %9 : i1 to vector<256x1xi1>
    %11 = vector.broadcast %10 : vector<256x1xi1> to vector<256x1xi1>
    %12 = arith.xori %8, %11 : vector<256x1xi1>
    %13 = arith.andi %12, %6 : vector<256x1xi1>
    %14 = vector.broadcast %2 : i32 to vector<256x1xi32>
    %15 = arith.addi %4, %14 : vector<256x1xi32>
    %16 = arith.select %13, %15, %4 : vector<256x1xi1>, vector<256x1xi32>
    %c0_i32_3 = arith.constant 0 : i32
    %17 = vector.broadcast %c0_i32_3 : i32 to vector<256x1xi32>
    %18 = arith.cmpi sgt, %16, %17 : vector<256x1xi32>
    %c15_i32 = arith.constant 15 : i32
    %19 = vector.broadcast %c15_i32 : i32 to vector<256x1xi32>
    %20 = arith.cmpi slt, %16, %19 : vector<256x1xi32>
    %c0 = arith.constant 0 : index
    %c0_4 = arith.constant 0 : index
    %21 = vector.load %arg3[%c0, %c0_4] : memref<1x128xf32, #tpu.memory_space<vmem>>, vector<1x128xf32>
    %c0_5 = arith.constant 0 : index
    %c7 = arith.constant 7 : index
    %c0_6 = arith.constant 0 : index
    %22 = vector.load %arg1[%c0_5, %c7, %c0_6] : memref<1x304x128xf32, #tpu.memory_space<vmem>>, vector<1x256x128xf32>
    %23 = vector.shape_cast %22 : vector<1x256x128xf32> to vector<256x128xf32>
    %cst = arith.constant 0.000000e+00 : f32
    %24 = vector.shape_cast %18 : vector<256x1xi1> to vector<256x1xi1>
    %25 = vector.broadcast %24 : vector<256x1xi1> to vector<256x128xi1>
    %26 = vector.broadcast %cst : f32 to vector<256x128xf32>
    %27 = arith.select %25, %23, %26 : vector<256x128xi1>, vector<256x128xf32>
    %c0_7 = arith.constant 0 : index
    %c0_8 = arith.constant 0 : index
    %c0_9 = arith.constant 0 : index
    %28 = vector.load %arg2[%c0_7, %c0_8, %c0_9] : memref<9x128x128xf32, #tpu.memory_space<vmem>>, vector<1x128x128xf32>
    %29 = vector.shape_cast %28 : vector<1x128x128xf32> to vector<128x128xf32>
    %cst_10 = arith.constant dense<0.000000e+00> : vector<256x128xf32>
    %30 = tpu.matmul %27, %29, %cst_10 {dimension_numbers = #tpu.dot_dimension_numbers<[1], [0], [0], [1], [0, 0, 1, 1], [], []>} : vector<256x128xf32>, vector<128x128xf32>, vector<256x128xf32> -> vector<256x128xf32>
    %c0_11 = arith.constant 0 : index
    %c8 = arith.constant 8 : index
    %c0_12 = arith.constant 0 : index
    %31 = vector.load %arg1[%c0_11, %c8, %c0_12] : memref<1x304x128xf32, #tpu.memory_space<vmem>>, vector<1x256x128xf32>
    %32 = vector.shape_cast %31 : vector<1x256x128xf32> to vector<256x128xf32>
    %c1 = arith.constant 1 : index
    %c0_13 = arith.constant 0 : index
    %c0_14 = arith.constant 0 : index
    %33 = vector.load %arg2[%c1, %c0_13, %c0_14] : memref<9x128x128xf32, #tpu.memory_space<vmem>>, vector<1x128x128xf32>
    %34 = vector.shape_cast %33 : vector<1x128x128xf32> to vector<128x128xf32>
    %cst_15 = arith.constant dense<0.000000e+00> : vector<256x128xf32>
    %35 = tpu.matmul %32, %34, %cst_15 {dimension_numbers = #tpu.dot_dimension_numbers<[1], [0], [0], [1], [0, 0, 1, 1], [], []>} : vector<256x128xf32>, vector<128x128xf32>, vector<256x128xf32> -> vector<256x128xf32>
    %36 = arith.addf %30, %35 : vector<256x128xf32>
    %c0_16 = arith.constant 0 : index
    %c9 = arith.constant 9 : index
    %c0_17 = arith.constant 0 : index
    %37 = vector.load %arg1[%c0_16, %c9, %c0_17] : memref<1x304x128xf32, #tpu.memory_space<vmem>>, vector<1x256x128xf32>
    %38 = vector.shape_cast %37 : vector<1x256x128xf32> to vector<256x128xf32>
    %cst_18 = arith.constant 0.000000e+00 : f32
    %39 = vector.shape_cast %20 : vector<256x1xi1> to vector<256x1xi1>
    %40 = vector.broadcast %39 : vector<256x1xi1> to vector<256x128xi1>
    %41 = vector.broadcast %cst_18 : f32 to vector<256x128xf32>
    %42 = arith.select %40, %38, %41 : vector<256x128xi1>, vector<256x128xf32>
    %c2 = arith.constant 2 : index
    %c0_19 = arith.constant 0 : index
    %c0_20 = arith.constant 0 : index
    %43 = vector.load %arg2[%c2, %c0_19, %c0_20] : memref<9x128x128xf32, #tpu.memory_space<vmem>>, vector<1x128x128xf32>
    %44 = vector.shape_cast %43 : vector<1x128x128xf32> to vector<128x128xf32>
    %cst_21 = arith.constant dense<0.000000e+00> : vector<256x128xf32>
    %45 = tpu.matmul %42, %44, %cst_21 {dimension_numbers = #tpu.dot_dimension_numbers<[1], [0], [0], [1], [0, 0, 1, 1], [], []>} : vector<256x128xf32>, vector<128x128xf32>, vector<256x128xf32> -> vector<256x128xf32>
    %46 = arith.addf %36, %45 : vector<256x128xf32>
    %c0_22 = arith.constant 0 : index
    %c23 = arith.constant 23 : index
    %c0_23 = arith.constant 0 : index
    %47 = vector.load %arg1[%c0_22, %c23, %c0_23] : memref<1x304x128xf32, #tpu.memory_space<vmem>>, vector<1x256x128xf32>
    %48 = vector.shape_cast %47 : vector<1x256x128xf32> to vector<256x128xf32>
    %cst_24 = arith.constant 0.000000e+00 : f32
    %49 = vector.shape_cast %18 : vector<256x1xi1> to vector<256x1xi1>
    %50 = vector.broadcast %49 : vector<256x1xi1> to vector<256x128xi1>
    %51 = vector.broadcast %cst_24 : f32 to vector<256x128xf32>
    %52 = arith.select %50, %48, %51 : vector<256x128xi1>, vector<256x128xf32>
    %c3 = arith.constant 3 : index
    %c0_25 = arith.constant 0 : index
    %c0_26 = arith.constant 0 : index
    %53 = vector.load %arg2[%c3, %c0_25, %c0_26] : memref<9x128x128xf32, #tpu.memory_space<vmem>>, vector<1x128x128xf32>
    %54 = vector.shape_cast %53 : vector<1x128x128xf32> to vector<128x128xf32>
    %cst_27 = arith.constant dense<0.000000e+00> : vector<256x128xf32>
    %55 = tpu.matmul %52, %54, %cst_27 {dimension_numbers = #tpu.dot_dimension_numbers<[1], [0], [0], [1], [0, 0, 1, 1], [], []>} : vector<256x128xf32>, vector<128x128xf32>, vector<256x128xf32> -> vector<256x128xf32>
    %56 = arith.addf %46, %55 : vector<256x128xf32>
    %c0_28 = arith.constant 0 : index
    %c24 = arith.constant 24 : index
    %c0_29 = arith.constant 0 : index
    %57 = vector.load %arg1[%c0_28, %c24, %c0_29] : memref<1x304x128xf32, #tpu.memory_space<vmem>>, vector<1x256x128xf32>
    %58 = vector.shape_cast %57 : vector<1x256x128xf32> to vector<256x128xf32>
    %c4 = arith.constant 4 : index
    %c0_30 = arith.constant 0 : index
    %c0_31 = arith.constant 0 : index
    %59 = vector.load %arg2[%c4, %c0_30, %c0_31] : memref<9x128x128xf32, #tpu.memory_space<vmem>>, vector<1x128x128xf32>
    %60 = vector.shape_cast %59 : vector<1x128x128xf32> to vector<128x128xf32>
    %cst_32 = arith.constant dense<0.000000e+00> : vector<256x128xf32>
    %61 = tpu.matmul %58, %60, %cst_32 {dimension_numbers = #tpu.dot_dimension_numbers<[1], [0], [0], [1], [0, 0, 1, 1], [], []>} : vector<256x128xf32>, vector<128x128xf32>, vector<256x128xf32> -> vector<256x128xf32>
    %62 = arith.addf %56, %61 : vector<256x128xf32>
    %c0_33 = arith.constant 0 : index
    %c25 = arith.constant 25 : index
    %c0_34 = arith.constant 0 : index
    %63 = vector.load %arg1[%c0_33, %c25, %c0_34] : memref<1x304x128xf32, #tpu.memory_space<vmem>>, vector<1x256x128xf32>
    %64 = vector.shape_cast %63 : vector<1x256x128xf32> to vector<256x128xf32>
    %cst_35 = arith.constant 0.000000e+00 : f32
    %65 = vector.shape_cast %20 : vector<256x1xi1> to vector<256x1xi1>
    %66 = vector.broadcast %65 : vector<256x1xi1> to vector<256x128xi1>
    %67 = vector.broadcast %cst_35 : f32 to vector<256x128xf32>
    %68 = arith.select %66, %64, %67 : vector<256x128xi1>, vector<256x128xf32>
    %c5 = arith.constant 5 : index
    %c0_36 = arith.constant 0 : index
    %c0_37 = arith.constant 0 : index
    %69 = vector.load %arg2[%c5, %c0_36, %c0_37] : memref<9x128x128xf32, #tpu.memory_space<vmem>>, vector<1x128x128xf32>
    %70 = vector.shape_cast %69 : vector<1x128x128xf32> to vector<128x128xf32>
    %cst_38 = arith.constant dense<0.000000e+00> : vector<256x128xf32>
    %71 = tpu.matmul %68, %70, %cst_38 {dimension_numbers = #tpu.dot_dimension_numbers<[1], [0], [0], [1], [0, 0, 1, 1], [], []>} : vector<256x128xf32>, vector<128x128xf32>, vector<256x128xf32> -> vector<256x128xf32>
    %72 = arith.addf %62, %71 : vector<256x128xf32>
    %c0_39 = arith.constant 0 : index
    %c39 = arith.constant 39 : index
    %c0_40 = arith.constant 0 : index
    %73 = vector.load %arg1[%c0_39, %c39, %c0_40] : memref<1x304x128xf32, #tpu.memory_space<vmem>>, vector<1x256x128xf32>
    %74 = vector.shape_cast %73 : vector<1x256x128xf32> to vector<256x128xf32>
    %cst_41 = arith.constant 0.000000e+00 : f32
    %75 = vector.shape_cast %18 : vector<256x1xi1> to vector<256x1xi1>
    %76 = vector.broadcast %75 : vector<256x1xi1> to vector<256x128xi1>
    %77 = vector.broadcast %cst_41 : f32 to vector<256x128xf32>
    %78 = arith.select %76, %74, %77 : vector<256x128xi1>, vector<256x128xf32>
    %c6 = arith.constant 6 : index
    %c0_42 = arith.constant 0 : index
    %c0_43 = arith.constant 0 : index
    %79 = vector.load %arg2[%c6, %c0_42, %c0_43] : memref<9x128x128xf32, #tpu.memory_space<vmem>>, vector<1x128x128xf32>
    %80 = vector.shape_cast %79 : vector<1x128x128xf32> to vector<128x128xf32>
    %cst_44 = arith.constant dense<0.000000e+00> : vector<256x128xf32>
    %81 = tpu.matmul %78, %80, %cst_44 {dimension_numbers = #tpu.dot_dimension_numbers<[1], [0], [0], [1], [0, 0, 1, 1], [], []>} : vector<256x128xf32>, vector<128x128xf32>, vector<256x128xf32> -> vector<256x128xf32>
    %82 = arith.addf %72, %81 : vector<256x128xf32>
    %c0_45 = arith.constant 0 : index
    %c40 = arith.constant 40 : index
    %c0_46 = arith.constant 0 : index
    %83 = vector.load %arg1[%c0_45, %c40, %c0_46] : memref<1x304x128xf32, #tpu.memory_space<vmem>>, vector<1x256x128xf32>
    %84 = vector.shape_cast %83 : vector<1x256x128xf32> to vector<256x128xf32>
    %c7_47 = arith.constant 7 : index
    %c0_48 = arith.constant 0 : index
    %c0_49 = arith.constant 0 : index
    %85 = vector.load %arg2[%c7_47, %c0_48, %c0_49] : memref<9x128x128xf32, #tpu.memory_space<vmem>>, vector<1x128x128xf32>
    %86 = vector.shape_cast %85 : vector<1x128x128xf32> to vector<128x128xf32>
    %cst_50 = arith.constant dense<0.000000e+00> : vector<256x128xf32>
    %87 = tpu.matmul %84, %86, %cst_50 {dimension_numbers = #tpu.dot_dimension_numbers<[1], [0], [0], [1], [0, 0, 1, 1], [], []>} : vector<256x128xf32>, vector<128x128xf32>, vector<256x128xf32> -> vector<256x128xf32>
    %88 = arith.addf %82, %87 : vector<256x128xf32>
    %c0_51 = arith.constant 0 : index
    %c41 = arith.constant 41 : index
    %c0_52 = arith.constant 0 : index
    %89 = vector.load %arg1[%c0_51, %c41, %c0_52] : memref<1x304x128xf32, #tpu.memory_space<vmem>>, vector<1x256x128xf32>
    %90 = vector.shape_cast %89 : vector<1x256x128xf32> to vector<256x128xf32>
    %cst_53 = arith.constant 0.000000e+00 : f32
    %91 = vector.shape_cast %20 : vector<256x1xi1> to vector<256x1xi1>
    %92 = vector.broadcast %91 : vector<256x1xi1> to vector<256x128xi1>
    %93 = vector.broadcast %cst_53 : f32 to vector<256x128xf32>
    %94 = arith.select %92, %90, %93 : vector<256x128xi1>, vector<256x128xf32>
    %c8_54 = arith.constant 8 : index
    %c0_55 = arith.constant 0 : index
    %c0_56 = arith.constant 0 : index
    %95 = vector.load %arg2[%c8_54, %c0_55, %c0_56] : memref<9x128x128xf32, #tpu.memory_space<vmem>>, vector<1x128x128xf32>
    %96 = vector.shape_cast %95 : vector<1x128x128xf32> to vector<128x128xf32>
    %cst_57 = arith.constant dense<0.000000e+00> : vector<256x128xf32>
    %97 = tpu.matmul %94, %96, %cst_57 {dimension_numbers = #tpu.dot_dimension_numbers<[1], [0], [0], [1], [0, 0, 1, 1], [], []>} : vector<256x128xf32>, vector<128x128xf32>, vector<256x128xf32> -> vector<256x128xf32>
    %98 = arith.addf %88, %97 : vector<256x128xf32>
    %99 = vector.broadcast %21 : vector<1x128xf32> to vector<256x128xf32>
    %100 = arith.addf %98, %99 : vector<256x128xf32>
    %cst_58 = arith.constant 0.000000e+00 : f32
    %101 = vector.broadcast %cst_58 : f32 to vector<256x128xf32>
    %102 = arith.maximumf %100, %101 : vector<256x128xf32>
    %cst_59 = arith.constant 0.000000e+00 : f32
    %103 = vector.broadcast %cst_59 : f32 to vector<24x128xf32>
    %c0_60 = arith.constant 0 : index
    %c0_61 = arith.constant 0 : index
    %104 = vector.load %arg7[%c0_60, %c0_61] : memref<304x128xf32, #tpu.memory_space<vmem>>, vector<24x128xf32>
    tpu.vector_store %arg7[%c0_60, %c0_61], %103 {strides = array<i32>} : memref<304x128xf32, #tpu.memory_space<vmem>>, vector<24x128xf32>,
    %cst_62 = arith.constant 0.000000e+00 : f32
    %105 = vector.broadcast %cst_62 : f32 to vector<24x128xf32>
    %c280 = arith.constant 280 : index
    %c0_63 = arith.constant 0 : index
    %106 = vector.load %arg7[%c280, %c0_63] : memref<304x128xf32, #tpu.memory_space<vmem>>, vector<24x128xf32>
    tpu.vector_store %arg7[%c280, %c0_63], %105 {strides = array<i32>} : memref<304x128xf32, #tpu.memory_space<vmem>>, vector<24x128xf32>,
    %c24_64 = arith.constant 24 : index
    %c0_65 = arith.constant 0 : index
    %107 = vector.load %arg7[%c24_64, %c0_65] : memref<304x128xf32, #tpu.memory_space<vmem>>, vector<256x128xf32>
    tpu.vector_store %arg7[%c24_64, %c0_65], %102 {strides = array<i32>} : memref<304x128xf32, #tpu.memory_space<vmem>>, vector<256x128xf32>,
    %c0_66 = arith.constant 0 : index
    %c0_67 = arith.constant 0 : index
    %108 = vector.load %arg5[%c0_66, %c0_67] : memref<1x128xf32, #tpu.memory_space<vmem>>, vector<1x128xf32>
    %c7_68 = arith.constant 7 : index
    %c0_69 = arith.constant 0 : index
    %109 = vector.load %arg7[%c7_68, %c0_69] : memref<304x128xf32, #tpu.memory_space<vmem>>, vector<256x128xf32>
    %cst_70 = arith.constant 0.000000e+00 : f32
    %110 = vector.shape_cast %18 : vector<256x1xi1> to vector<256x1xi1>
    %111 = vector.broadcast %110 : vector<256x1xi1> to vector<256x128xi1>
    %112 = vector.broadcast %cst_70 : f32 to vector<256x128xf32>
    %113 = arith.select %111, %109, %112 : vector<256x128xi1>, vector<256x128xf32>
    %c0_71 = arith.constant 0 : index
    %c0_72 = arith.constant 0 : index
    %c0_73 = arith.constant 0 : index
    %114 = vector.load %arg4[%c0_71, %c0_72, %c0_73] : memref<9x128x128xf32, #tpu.memory_space<vmem>>, vector<1x128x128xf32>
    %115 = vector.shape_cast %114 : vector<1x128x128xf32> to vector<128x128xf32>
    %cst_74 = arith.constant dense<0.000000e+00> : vector<256x128xf32>
    %116 = tpu.matmul %113, %115, %cst_74 {dimension_numbers = #tpu.dot_dimension_numbers<[1], [0], [0], [1], [0, 0, 1, 1], [], []>} : vector<256x128xf32>, vector<128x128xf32>, vector<256x128xf32> -> vector<256x128xf32>
    %c8_75 = arith.constant 8 : index
    %c0_76 = arith.constant 0 : index
    %117 = vector.load %arg7[%c8_75, %c0_76] : memref<304x128xf32, #tpu.memory_space<vmem>>, vector<256x128xf32>
    %c1_77 = arith.constant 1 : index
    %c0_78 = arith.constant 0 : index
    %c0_79 = arith.constant 0 : index
    %118 = vector.load %arg4[%c1_77, %c0_78, %c0_79] : memref<9x128x128xf32, #tpu.memory_space<vmem>>, vector<1x128x128xf32>
    %119 = vector.shape_cast %118 : vector<1x128x128xf32> to vector<128x128xf32>
    %cst_80 = arith.constant dense<0.000000e+00> : vector<256x128xf32>
    %120 = tpu.matmul %117, %119, %cst_80 {dimension_numbers = #tpu.dot_dimension_numbers<[1], [0], [0], [1], [0, 0, 1, 1], [], []>} : vector<256x128xf32>, vector<128x128xf32>, vector<256x128xf32> -> vector<256x128xf32>
    %121 = arith.addf %116, %120 : vector<256x128xf32>
    %c9_81 = arith.constant 9 : index
    %c0_82 = arith.constant 0 : index
    %122 = vector.load %arg7[%c9_81, %c0_82] : memref<304x128xf32, #tpu.memory_space<vmem>>, vector<256x128xf32>
    %cst_83 = arith.constant 0.000000e+00 : f32
    %123 = vector.shape_cast %20 : vector<256x1xi1> to vector<256x1xi1>
    %124 = vector.broadcast %123 : vector<256x1xi1> to vector<256x128xi1>
    %125 = vector.broadcast %cst_83 : f32 to vector<256x128xf32>
    %126 = arith.select %124, %122, %125 : vector<256x128xi1>, vector<256x128xf32>
    %c2_84 = arith.constant 2 : index
    %c0_85 = arith.constant 0 : index
    %c0_86 = arith.constant 0 : index
    %127 = vector.load %arg4[%c2_84, %c0_85, %c0_86] : memref<9x128x128xf32, #tpu.memory_space<vmem>>, vector<1x128x128xf32>
    %128 = vector.shape_cast %127 : vector<1x128x128xf32> to vector<128x128xf32>
    %cst_87 = arith.constant dense<0.000000e+00> : vector<256x128xf32>
    %129 = tpu.matmul %126, %128, %cst_87 {dimension_numbers = #tpu.dot_dimension_numbers<[1], [0], [0], [1], [0, 0, 1, 1], [], []>} : vector<256x128xf32>, vector<128x128xf32>, vector<256x128xf32> -> vector<256x128xf32>
    %130 = arith.addf %121, %129 : vector<256x128xf32>
    %c23_88 = arith.constant 23 : index
    %c0_89 = arith.constant 0 : index
    %131 = vector.load %arg7[%c23_88, %c0_89] : memref<304x128xf32, #tpu.memory_space<vmem>>, vector<256x128xf32>
    %cst_90 = arith.constant 0.000000e+00 : f32
    %132 = vector.shape_cast %18 : vector<256x1xi1> to vector<256x1xi1>
    %133 = vector.broadcast %132 : vector<256x1xi1> to vector<256x128xi1>
    %134 = vector.broadcast %cst_90 : f32 to vector<256x128xf32>
    %135 = arith.select %133, %131, %134 : vector<256x128xi1>, vector<256x128xf32>
    %c3_91 = arith.constant 3 : index
    %c0_92 = arith.constant 0 : index
    %c0_93 = arith.constant 0 : index
    %136 = vector.load %arg4[%c3_91, %c0_92, %c0_93] : memref<9x128x128xf32, #tpu.memory_space<vmem>>, vector<1x128x128xf32>
    %137 = vector.shape_cast %136 : vector<1x128x128xf32> to vector<128x128xf32>
    %cst_94 = arith.constant dense<0.000000e+00> : vector<256x128xf32>
    %138 = tpu.matmul %135, %137, %cst_94 {dimension_numbers = #tpu.dot_dimension_numbers<[1], [0], [0], [1], [0, 0, 1, 1], [], []>} : vector<256x128xf32>, vector<128x128xf32>, vector<256x128xf32> -> vector<256x128xf32>
    %139 = arith.addf %130, %138 : vector<256x128xf32>
    %c24_95 = arith.constant 24 : index
    %c0_96 = arith.constant 0 : index
    %140 = vector.load %arg7[%c24_95, %c0_96] : memref<304x128xf32, #tpu.memory_space<vmem>>, vector<256x128xf32>
    %c4_97 = arith.constant 4 : index
    %c0_98 = arith.constant 0 : index
    %c0_99 = arith.constant 0 : index
    %141 = vector.load %arg4[%c4_97, %c0_98, %c0_99] : memref<9x128x128xf32, #tpu.memory_space<vmem>>, vector<1x128x128xf32>
    %142 = vector.shape_cast %141 : vector<1x128x128xf32> to vector<128x128xf32>
    %cst_100 = arith.constant dense<0.000000e+00> : vector<256x128xf32>
    %143 = tpu.matmul %140, %142, %cst_100 {dimension_numbers = #tpu.dot_dimension_numbers<[1], [0], [0], [1], [0, 0, 1, 1], [], []>} : vector<256x128xf32>, vector<128x128xf32>, vector<256x128xf32> -> vector<256x128xf32>
    %144 = arith.addf %139, %143 : vector<256x128xf32>
    %c25_101 = arith.constant 25 : index
    %c0_102 = arith.constant 0 : index
    %145 = vector.load %arg7[%c25_101, %c0_102] : memref<304x128xf32, #tpu.memory_space<vmem>>, vector<256x128xf32>
    %cst_103 = arith.constant 0.000000e+00 : f32
    %146 = vector.shape_cast %20 : vector<256x1xi1> to vector<256x1xi1>
    %147 = vector.broadcast %146 : vector<256x1xi1> to vector<256x128xi1>
    %148 = vector.broadcast %cst_103 : f32 to vector<256x128xf32>
    %149 = arith.select %147, %145, %148 : vector<256x128xi1>, vector<256x128xf32>
    %c5_104 = arith.constant 5 : index
    %c0_105 = arith.constant 0 : index
    %c0_106 = arith.constant 0 : index
    %150 = vector.load %arg4[%c5_104, %c0_105, %c0_106] : memref<9x128x128xf32, #tpu.memory_space<vmem>>, vector<1x128x128xf32>
    %151 = vector.shape_cast %150 : vector<1x128x128xf32> to vector<128x128xf32>
    %cst_107 = arith.constant dense<0.000000e+00> : vector<256x128xf32>
    %152 = tpu.matmul %149, %151, %cst_107 {dimension_numbers = #tpu.dot_dimension_numbers<[1], [0], [0], [1], [0, 0, 1, 1], [], []>} : vector<256x128xf32>, vector<128x128xf32>, vector<256x128xf32> -> vector<256x128xf32>
    %153 = arith.addf %144, %152 : vector<256x128xf32>
    %c39_108 = arith.constant 39 : index
    %c0_109 = arith.constant 0 : index
    %154 = vector.load %arg7[%c39_108, %c0_109] : memref<304x128xf32, #tpu.memory_space<vmem>>, vector<256x128xf32>
    %cst_110 = arith.constant 0.000000e+00 : f32
    %155 = vector.shape_cast %18 : vector<256x1xi1> to vector<256x1xi1>
    %156 = vector.broadcast %155 : vector<256x1xi1> to vector<256x128xi1>
    %157 = vector.broadcast %cst_110 : f32 to vector<256x128xf32>
    %158 = arith.select %156, %154, %157 : vector<256x128xi1>, vector<256x128xf32>
    %c6_111 = arith.constant 6 : index
    %c0_112 = arith.constant 0 : index
    %c0_113 = arith.constant 0 : index
    %159 = vector.load %arg4[%c6_111, %c0_112, %c0_113] : memref<9x128x128xf32, #tpu.memory_space<vmem>>, vector<1x128x128xf32>
    %160 = vector.shape_cast %159 : vector<1x128x128xf32> to vector<128x128xf32>
    %cst_114 = arith.constant dense<0.000000e+00> : vector<256x128xf32>
    %161 = tpu.matmul %158, %160, %cst_114 {dimension_numbers = #tpu.dot_dimension_numbers<[1], [0], [0], [1], [0, 0, 1, 1], [], []>} : vector<256x128xf32>, vector<128x128xf32>, vector<256x128xf32> -> vector<256x128xf32>
    %162 = arith.addf %153, %161 : vector<256x128xf32>
    %c40_115 = arith.constant 40 : index
    %c0_116 = arith.constant 0 : index
    %163 = vector.load %arg7[%c40_115, %c0_116] : memref<304x128xf32, #tpu.memory_space<vmem>>, vector<256x128xf32>
    %c7_117 = arith.constant 7 : index
    %c0_118 = arith.constant 0 : index
    %c0_119 = arith.constant 0 : index
    %164 = vector.load %arg4[%c7_117, %c0_118, %c0_119] : memref<9x128x128xf32, #tpu.memory_space<vmem>>, vector<1x128x128xf32>
    %165 = vector.shape_cast %164 : vector<1x128x128xf32> to vector<128x128xf32>
    %cst_120 = arith.constant dense<0.000000e+00> : vector<256x128xf32>
    %166 = tpu.matmul %163, %165, %cst_120 {dimension_numbers = #tpu.dot_dimension_numbers<[1], [0], [0], [1], [0, 0, 1, 1], [], []>} : vector<256x128xf32>, vector<128x128xf32>, vector<256x128xf32> -> vector<256x128xf32>
    %167 = arith.addf %162, %166 : vector<256x128xf32>
    %c41_121 = arith.constant 41 : index
    %c0_122 = arith.constant 0 : index
    %168 = vector.load %arg7[%c41_121, %c0_122] : memref<304x128xf32, #tpu.memory_space<vmem>>, vector<256x128xf32>
    %cst_123 = arith.constant 0.000000e+00 : f32
    %169 = vector.shape_cast %20 : vector<256x1xi1> to vector<256x1xi1>
    %170 = vector.broadcast %169 : vector<256x1xi1> to vector<256x128xi1>
    %171 = vector.broadcast %cst_123 : f32 to vector<256x128xf32>
    %172 = arith.select %170, %168, %171 : vector<256x128xi1>, vector<256x128xf32>
    %c8_124 = arith.constant 8 : index
    %c0_125 = arith.constant 0 : index
    %c0_126 = arith.constant 0 : index
    %173 = vector.load %arg4[%c8_124, %c0_125, %c0_126] : memref<9x128x128xf32, #tpu.memory_space<vmem>>, vector<1x128x128xf32>
    %174 = vector.shape_cast %173 : vector<1x128x128xf32> to vector<128x128xf32>
    %cst_127 = arith.constant dense<0.000000e+00> : vector<256x128xf32>
    %175 = tpu.matmul %172, %174, %cst_127 {dimension_numbers = #tpu.dot_dimension_numbers<[1], [0], [0], [1], [0, 0, 1, 1], [], []>} : vector<256x128xf32>, vector<128x128xf32>, vector<256x128xf32> -> vector<256x128xf32>
    %176 = arith.addf %167, %175 : vector<256x128xf32>
    %177 = vector.broadcast %108 : vector<1x128xf32> to vector<256x128xf32>
    %178 = arith.addf %176, %177 : vector<256x128xf32>
    %c0_128 = arith.constant 0 : index
    %c24_129 = arith.constant 24 : index
    %c0_130 = arith.constant 0 : index
    %179 = vector.load %arg1[%c0_128, %c24_129, %c0_130] : memref<1x304x128xf32, #tpu.memory_space<vmem>>, vector<1x256x128xf32>
    %180 = vector.shape_cast %179 : vector<1x256x128xf32> to vector<256x128xf32>
    %181 = arith.addf %178, %180 : vector<256x128xf32>
    %cst_131 = arith.constant 0.000000e+00 : f32
    %182 = vector.broadcast %cst_131 : f32 to vector<256x128xf32>
    %183 = arith.maximumf %181, %182 : vector<256x128xf32>
    %c0_132 = arith.constant 0 : index
    %c0_133 = arith.constant 0 : index
    %c0_134 = arith.constant 0 : index
    %184 = vector.load %arg6[%c0_132, %c0_133, %c0_134] : memref<1x256x128xf32, #tpu.memory_space<vmem>>, vector<1x256x128xf32>
    %185 = vector.shape_cast %184 : vector<1x256x128xf32> to vector<256x128xf32>
    %186 = vector.shape_cast %183 : vector<256x128xf32> to vector<1x256x128xf32>
    tpu.vector_store %arg6[%c0_132, %c0_133, %c0_134], %186 {strides = array<i32>} : memref<1x256x128xf32, #tpu.memory_space<vmem>>, vector<1x256x128xf32>,
    return
  }
  func.func @transform_0(%arg0: i32) -> (i32, i32, i32) {
    %c0_i32 = arith.constant 0 : i32
    %c0_i32_0 = arith.constant 0 : i32
    %c0_i32_1 = arith.constant 0 : i32
    return %arg0, %c0_i32, %c0_i32_0 : i32, i32, i32
  }
  func.func @transform_1(%arg0: i32) -> (i32, i32, i32) {
    %c0_i32 = arith.constant 0 : i32
    %c0_i32_0 = arith.constant 0 : i32
    %c0_i32_1 = arith.constant 0 : i32
    %c0_i32_2 = arith.constant 0 : i32
    return %c0_i32, %c0_i32_0, %c0_i32_1 : i32, i32, i32
  }
  func.func @transform_2(%arg0: i32) -> (i32, i32) {
    %c0_i32 = arith.constant 0 : i32
    %c0_i32_0 = arith.constant 0 : i32
    %c0_i32_1 = arith.constant 0 : i32
    return %c0_i32, %c0_i32_0 : i32, i32
  }
  func.func @transform_3(%arg0: i32) -> (i32, i32, i32) {
    %c0_i32 = arith.constant 0 : i32
    %c0_i32_0 = arith.constant 0 : i32
    %c0_i32_1 = arith.constant 0 : i32
    %c0_i32_2 = arith.constant 0 : i32
    return %c0_i32, %c0_i32_0, %c0_i32_1 : i32, i32, i32
  }
  func.func @transform_4(%arg0: i32) -> (i32, i32) {
    %c0_i32 = arith.constant 0 : i32
    %c0_i32_0 = arith.constant 0 : i32
    %c0_i32_1 = arith.constant 0 : i32
    return %c0_i32, %c0_i32_0 : i32, i32
  }
  func.func @transform_5(%arg0: i32) -> (i32, i32, i32) {
    %c0_i32 = arith.constant 0 : i32
    %c0_i32_0 = arith.constant 0 : i32
    %c0_i32_1 = arith.constant 0 : i32
    return %arg0, %c0_i32, %c0_i32_0 : i32, i32, i32
  }
}

</mosaic_0001>

<bundles_post_ra>
// kernel: tpu_custom_call.1
= control target key start
LH: loop header
LB: loop body
LE: loop exit
PB: predicated region body
PF: predicated region fallthrough
CT: control target
= control target key end

     0   :  { %10 = vsyncpa [#allocation4], 0  ;;  %s12857_s0 = inlined_call_operand.hbm [shape: f32[2,304,128], index: 0, kind: input, shape index: {}]   ;;  %s12858_s1 = inlined_call_operand.hbm [shape: f32[9,128,128], index: 1, kind: input, shape index: {}]   ;;  %s12859_s2 = inlined_call_operand.vmem [shape: f32[1,128], index: 2, kind: input, shape index: {}]   ;;  %s12860_s3 = inlined_call_operand.hbm [shape: f32[9,128,128], index: 3, kind: input, shape index: {}]   ;;  %s12861_s4 = inlined_call_operand.vmem [shape: f32[1,128], index: 4, kind: input, shape index: {}]   ;;  %s12862_s5 = inlined_call_operand.hbm [shape: f32[2,256,128], index: 5, kind: output, shape index: {}]  }
   0x1   :  { %12 = vsyncpa [#allocation4 + $0x1], 0 }
   0x2   :  { %13 = vsyncpa [#allocation7], 0 }
   0x3   :  { %14 = vsyncpa [#allocation5], 0 }
   0x4   :  { %16 = vsyncpa [#allocation5 + $0x1], 0  ;;  %s9804_s18 = smov 0   ;;  %s9806_s19 = smov 0  }
   0x5   :  { %s9808_s20 = smov 0   ;;  %s9810_s21 = smov 0  }
   0x6 LB: > { %s9825_s22 = sadd.s32 4294967295, %s9763_s21   ;;  %s7025_s23 = sadd.s32 4294967294, %s9763_s21   ;;  %s9763_s21 = sphi %s9810_s21, %s13614_s21   ;;  %s9759_s20 = sphi %s9808_s20, %s13613_s20   ;;  %s9755_s19 = sphi %s9806_s19, %s13612_s19   ;;  %s9751_s18 = sphi %s9804_s18, %s13611_s18  }
   0x7   : > { %p42_p0 = scmp.ne.s32.totalorder %s9755_s19, %s9751_s18  ;;  %p12864_p1 = scmp.eq.s32.totalorder %s9825_s22, 0 }
   0x8   : > { %p150_p2 = scmp.eq.s32.totalorder %s9825_s22, 1  ;;  %p156_p3 = scmp.eq.s32.totalorder %s7025_s23, 1 }
   0x9   : > { %p9834_p4 = por %p12864_p1, %p42_p0  ;;  %p7026_p5 = scmp.ge.s32.totalorder %s9763_s21, 1 }
   0xa   : > { %p9839_p6 = por %p156_p3, %p42_p0  ;;  %p163_p7 = scmp.lt.s32.totalorder %s9763_s21, 3 }
   0xb   : > { %s13024_s24 = scalar_select %p9834_p4, 1, 0 }
   0xc   : > { %s13025_s25 = scalar_select %p9839_p6, 1, 0 }
   0xd   : > { %p9844_p8 = pnand %p7026_p5, %p163_p7  ;;  %s9765_s27 = smov [#allocation6]  }
   0xe   : > { %s175_s28 = sshll.u32 %s9765_s27, 4  ;;  %s9766_s30 = smov [#allocation8]   ;;  %s176_s28 = int_to_ptr.vmem [resolvable:$true] %s175_s28 }
   0xf   : > { %s13026_s26 = scalar_select %p9844_p8, 1, 0 }
  0x10   : > { %p9554_p9 = pneg %p9844_p8  ;;  %s191_s6 = sshll.u32 %s9766_s30, 4  ;;  %s192_s6 = int_to_ptr.vmem [resolvable:$true] %s191_s6 }
  0x11   : > { %s9626_s7 = scalar_lea.vmem %s176_s28, 18432  ;;  %p9634_p5 = scmp.lt.s32.totalorder %s176_s28, %s176_s28 }
  0x12   : > { %p9853_p11 = pnand %p9554_p9, %p12864_p1  ;;  %p9627_p13 = scmp.ne.s32.totalorder %s176_s28, %s9626_s7 }
  0x13   : > { %p9635_p7 = scmp.lt.s32.totalorder %s9626_s7, %s9626_s7 }
  0x14   : > { %p9617_p12 = pneg %p9853_p11 }
  0x15   : > { %p9636_p10 = por %p9635_p7, %p9634_p5 }
  0x16   : > { %p9629_p0 = pnand %p9627_p13, %p9617_p12 }
  0x18   : > { %p9630_p3 = pneg %p9629_p0 }
  0x1a   : > { %p9637_p9 = pnand %p9636_p10, %p9630_p3 }
  0x1c   : > { %9640 = shalt.err (!%p9637_p9)
}
  0x1d   : > { %s12863_s8 = smov 128   ;;  %s9768_s9 = smov 8  }
  0x1e   : > { %9557 = dma.hbm_to_vmem [thread:$0]  (!%p9853_p11), %s12858_s1, 18432, %s176_s28, [#allocation7], %s12863_s8, %s12863_s8, %s9768_s9  }
  0x1f   : > { %s9652_s12 = scalar_lea.vmem %s192_s6, 18432  ;;  %p9660_p10 = scmp.lt.s32.totalorder %s192_s6, %s192_s6 }
  0x20   : > { %p9653_p13 = scmp.ne.s32.totalorder %s192_s6, %s9652_s12  ;;  %p9661_p3 = scmp.lt.s32.totalorder %s9652_s12, %s9652_s12 }
  0x22   : > { %p9655_p0 = pnand %p9653_p13, %p9617_p12  ;;  %p9662_p7 = por %p9661_p3, %p9660_p10 }
  0x24   : > { %p9656_p5 = pneg %p9655_p0 }
  0x26   : > { %p9663_p9 = pnand %p9662_p7, %p9656_p5 }
  0x28   : > { %9666 = shalt.err (!%p9663_p9)
}
  0x29   : > { %9560 = dma.hbm_to_vmem [thread:$0]  (!%p9853_p11), %s12860_s3, 18432, %s192_s6, [#allocation7], %s12863_s8, %s12863_s8, %s9768_s9  }
  0x2a   : > { %s9882_s15 = sadd.s32 1, %s9763_s21   ;;  %s29_s16 = sadd.s32 1, %s9759_s20 }
  0x2b   : > { %s26_s17 = ssub.s32 %s9763_s21, %s9882_s15  ;;  %p36_p12 = scmp.ne.s32.totalorder %s9759_s20, %s9755_s19 }
  0x2c   : > { %p27_p13 = scmp.eq.s32.totalorder %s26_s17, 0  ;;  %p37_p0 = scmp.eq.s32.totalorder %s9763_s21, 0 }
  0x2d   : > { %p9892_p5 = por %p150_p2, %p36_p12  ;;  %p9571_p10 = scmp.lt.s32.totalorder %s9763_s21, 2 }
  0x2e   : > { %s9898_s27 = scalar_select %p27_p13, %s9759_s20, %s29_s16  }
  0x2f   : > { %s13028_s23 = scalar_select %p9892_p5, 1, 0 }
  0x30   : > { %p38_p3 = por %p37_p0, %p36_p12  ;;  %s208_s28 = sand.u32 1, %s9759_s20  }
  0x31   : > { %s9539_s29 = smul.u32 304, %s208_s28  ;;  %s9913_s14 = scalar_lea.sflag [#allocation4], %s208_s28 }
  0x32   : > { %s9540_s30 = smul.u32 4864, %s9763_s21  ;;  %p9902_p11 = pnand %p9571_p10, %p38_p3 }
  0x33   : > { %s212_s12 = scalar_lea.vmem [#allocation3], %s9539_s29 }
  0x34   : > { %s9909_s11 = scalar_lea.hbm %s12857_s0, %s9540_s30  ;;  %s219_s13 = sshll.u32 %s212_s12, 4  ;;  %s9911_s13 = int_to_ptr.vmem [resolvable:$true] %s219_s13 }
  0x35   : > { %s9667_s16 = scalar_lea.hbm %s9909_s11, 4864  ;;  %p9669_p7 = pneg %p9902_p11 }
  0x36   : > { %p9668_p2 = scmp.ne.s32.totalorder %s9909_s11, %s9667_s16  ;;  %s9672_s30 = scalar_lea.hbm %s12857_s0, 9728 }
  0x37   : > { %p9673_p13 = scmp.lt.s32.totalorder %s9909_s11, %s12857_s0  ;;  %p9674_p0 = scmp.lt.s32.totalorder %s9672_s30, %s9667_s16 }
  0x38   : > { %p9670_p9 = pnand %p9669_p7, %p9668_p2 }
  0x39   : > { %p9675_p10 = por %p9674_p0, %p9673_p13 }
  0x3a   : > { %p9671_p12 = pneg %p9670_p9 }
  0x3c   : > { %p9676_p3 = pnand %p9675_p10, %p9671_p12 }
  0x3e   : > { %9679 = shalt.err (!%p9676_p3)
}
  0x3f   : > { %s9680_s28 = scalar_lea.vmem %s9911_s13, 4864  ;;  %s9769_s29 = smov [#allocation3]  }
  0x40   : > { %p9681_p1 = scmp.ne.s32.totalorder %s9911_s13, %s9680_s28  ;;  %s9685_s12 = sshll.u32 %s9769_s29, 4  ;;  %s9686_s12 = int_to_ptr.vmem [resolvable:$false] %s9685_s12 }
  0x41   : > { %s9687_s17 = scalar_lea.vmem %s9686_s12, 9728  ;;  %p9688_p9 = scmp.lt.s32.totalorder %s9911_s13, %s9686_s12 }
  0x42   : > { %p9683_p6 = pnand %p9681_p1, %p9669_p7  ;;  %p9689_p5 = scmp.lt.s32.totalorder %s9687_s17, %s9680_s28 }
  0x44   : > { %p9684_p2 = pneg %p9683_p6  ;;  %p9690_p4 = por %p9689_p5, %p9688_p9 }
  0x46   : > { %p9691_p8 = pnand %p9690_p4, %p9684_p2 }
  0x48   : > { %9694 = shalt.err (!%p9691_p8)
}
  0x49   : > { %s13030_s8 = smov 128   ;;  %p13031_p1 = scmp.ne.s32.totalorder %s13026_s26, 0 }
  0x4a   : > { %9564 = dma.hbm_to_vmem [thread:$0]  (!%p9902_p11), %s9909_s11, 4864, %s9911_s13, %s9913_s14, %s13030_s8, %s13030_s8, %s9768_s9  }
  0x4b   : > { %231 = sbr.rel (%p13031_p1) target bundleno = 1114 (0x45a), region = 40 }
  0x50   : > { %s9940_s16 = sand.u32 1, %s9755_s19   ;;  %p13032_p4 = scmp.ne.s32.totalorder %s13024_s24, 0 }
  0x51   : > { %s9541_s7 = smul.u32 304, %s9940_s16  ;;  %s234_s30 = scalar_lea.sflag [#allocation4], %s9940_s16 }
  0x53   : > { %s9944_s10 = scalar_lea.vmem [#allocation3], %s9541_s7 }
  0x54   : > { %9738 = dma.done.wait (%p13032_p4), %s234_s30, 4864  }
  0x55   : > { %9740 = vsyncadd (%p13032_p4), %s234_s30, 4294962432  ;;  %p13033_p6 = scmp.eq.s32.totalorder %s9825_s22, 0 }
  0x57   : > { %9742 = dma.done.wait (%p13033_p6), [#allocation7], 36864   ;;  %p13034_p8 = pmov %p13033_p6 }
  0x58   : > { %v946_v0 = vld [vmem:[#allocation6 + $0xf8] sm:$0xff]  ;;  %v945_v2 = vld [vmem:[#allocation6 + $0xf0] sm:$0xff]  ;;  %v944_v4 = vld [vmem:[#allocation6 + $0xe8] sm:$0xff]  ;;  %v272_v22 = vlaneseq  ;;  %v13035_v39 = vmov 0  ;;  %v13038_v46 = vmov 0  ;;  %v13041_v56 = vmov 0 }
  0x59   : > { %9744 = vsyncadd (%p13034_p8), [#allocation7], 4294930432  ;;  %v897_v1 = vld [vmem:[#allocation6 + $0x78] sm:$0xff]  ;;  %8099 = vmatprep.subr.mxu0 %v946_v0  ;;  %v896_v3 = vld [vmem:[#allocation6 + $0x70] sm:$0xff]  ;;  %v13044_v62 = vmov 0  ;;  %s7034_s11 = sshll.u32 %s9940_s16, 8 }
  0x5a   : > { %8179 = vmatprep.subr.mxu1 %v897_v1  ;;  %8100 = vmatpush3.msra.mxu0 %v946_v0  ;;  %v895_v5 = vld [vmem:[#allocation6 + $0x68] sm:$0xff]  ;;  %v943_v6 = vld [vmem:[#allocation6 + $0xe0] sm:$0xff]  ;;  %v942_v8 = vld [vmem:[#allocation6 + $0xd8] sm:$0xff]  ;;  %v9954_v27 = vshrl.u32 %v272_v22, 7  ;;  %s12608_s13 = scalar_lea.vmem [#allocation9], %s7034_s11  ;;  %s7234_s14 = sshll.u32 %s9825_s22, 12 }
  0x5b   : > { %8180 = vmatpush3.msra.mxu1 %v897_v1  ;;  %8101 = vmatprep.subr.mxu0 %v945_v2  ;;  %v894_v7 = vld [vmem:[#allocation6 + $0x60] sm:$0xff]  ;;  %v893_v9 = vld [vmem:[#allocation6 + $0x58] sm:$0xff]  ;;  %v941_v10 = vld [vmem:[#allocation6 + $0xd0] sm:$0xff]  ;;  %s6933_s28 = sshll.u32 %s12608_s13, 4  ;;  %s12810_s17 = scalar_lea.hbm %s12862_s5, %s7234_s14  ;;  %s12812_s28 = int_to_ptr.vmem [resolvable:$true] %s6933_s28 }
  0x5c   : > { %8181 = vmatprep.subr.mxu1 %v896_v3  ;;  %8102 = vmatpush3.msra.mxu0 %v945_v2  ;;  %v892_v11 = vld [vmem:[#allocation6 + $0x50] sm:$0xff]  ;;  %v940_v12 = vld [vmem:[#allocation6 + $0xc8] sm:$0xff]  ;;  %v939_v14 = vld [vmem:[#allocation6 + $0xc0] sm:$0xff]  ;;  %v275_v30 = vadd.s32 16, %v9954_v27  ;;  %v309_v33 = vand.u32 15, %v9954_v27  ;;  %v277_v38 = vadd.s32 32, %v9954_v27 }
  0x5d   : > { %8182 = vmatpush3.msra.mxu1 %v896_v3  ;;  %8103 = vmatprep.subr.mxu0 %v944_v4  ;;  %v891_v13 = vld [vmem:[#allocation6 + $0x48] sm:$0xff]  ;;  %v890_v15 = vld [vmem:[#allocation6 + $0x40] sm:$0xff]  ;;  %v938_v16 = vld [vmem:[#allocation6 + $0xb8] sm:$0xff]  ;;  %v279_v45 = vadd.s32 48, %v9954_v27  ;;  %v281_v55 = vadd.s32 64, %v9954_v27  ;;  %v283_v1 = vadd.s32 80, %v9954_v27 }
  0x5e   : > { %8183 = vmatprep.subr.mxu1 %v895_v5  ;;  %8104 = vmatpush3.msra.mxu0 %v944_v4  ;;  %v889_v17 = vld [vmem:[#allocation6 + $0x38] sm:$0xff]  ;;  %v937_v18 = vld [vmem:[#allocation6 + $0xb0] sm:$0xff]  ;;  %v936_v20 = vld [vmem:[#allocation6 + $0xa8] sm:$0xff]  ;;  %v323_v37 = vand.u32 15, %v275_v30  ;;  %vm9960_vm0 = vcmp.gt.s32.totalorder %v309_v33, 0  ;;  %v337_v48 = vand.u32 15, %v277_v38 }
  0x5f   : > { %8184 = vmatpush3.msra.mxu1 %v895_v5  ;;  %8105 = vmatprep.subr.mxu0 %v943_v6  ;;  %v888_v19 = vld [vmem:[#allocation6 + $0x30] sm:$0xff]  ;;  %v887_v21 = vld [vmem:[#allocation6 + $0x28] sm:$0xff]  ;;  %v935_v23 = vld [vmem:[#allocation6 + $0xa0] sm:$0xff]  ;;  %v13036_v39 = vsel %vm9960_vm0, 4294967295, %v13035_v39  ;;  %v351_v54 = vand.u32 15, %v279_v45  ;;  %v365_v0 = vand.u32 15, %v281_v55 }
  0x60   : > { %8185 = vmatprep.subr.mxu1 %v894_v7  ;;  %8106 = vmatpush3.msra.mxu0 %v943_v6  ;;  %v886_v24 = vld [vmem:[#allocation6 + $0x20] sm:$0xff]  ;;  %v934_v25 = vld [vmem:[#allocation6 + $0x98] sm:$0xff]  ;;  %v933_v28 = vld [vmem:[#allocation6 + $0x90] sm:$0xff]  ;;  %13037 = vst [vmem:[#allocation13_spill] sm:$0xff] %v13036_v39  ;;  %vm9971_vm1 = vcmp.gt.s32.totalorder %v323_v37, 0  ;;  %vm9987_vm2 = vcmp.gt.s32.totalorder %v337_v48, 0 }
  0x61   : > { %8186 = vmatpush3.msra.mxu1 %v894_v7  ;;  %8107 = vmatprep.subr.mxu0 %v942_v8  ;;  %v885_v26 = vld [vmem:[#allocation6 + $0x18] sm:$0xff]  ;;  %v884_v29 = vld [vmem:[#allocation6 + $0x10] sm:$0xff]  ;;  %v932_v31 = vld [vmem:[#allocation6 + $0x88] sm:$0xff]  ;;  %v13039_v46 = vsel %vm9971_vm1, 4294967295, %v13038_v46  ;;  %v13042_v56 = vsel %vm9987_vm2, 4294967295, %v13041_v56  ;;  %vm10003_vm3 = vcmp.gt.s32.totalorder %v351_v54, 0 }
  0x62   : > { %8187 = vmatprep.subr.mxu1 %v893_v9  ;;  %8108 = vmatpush3.msra.mxu0 %v942_v8  ;;  %v883_v32 = vld [vmem:[#allocation6 + $0x8] sm:$0xff]  ;;  %v931_v34 = vld [vmem:[#allocation6 + $0x80] sm:$0xff]  ;;  %v1541_v43 = vld [vmem:[#allocation6 + $0x178] sm:$0xff]  ;;  %13040 = vst [vmem:[#allocation14_spill] sm:$0xff] %v13039_v46  ;;  %v13045_v62 = vsel %vm10003_vm3, 4294967295, %v13044_v62  ;;  %vm10020_vm4 = vcmp.gt.s32.totalorder %v365_v0, 0 }
  0x63   : > { %8188 = vmatpush3.msra.mxu1 %v893_v9  ;;  %8109 = vmatprep.subr.mxu0 %v941_v10  ;;  %v882_v35 = vld [vmem:[#allocation6] sm:$0xff]  ;;  %v898_v36 = vld [vmem:[%s9944_s10 + $0x8] sm:$0xff]  ;;  %v900_v44 = vld [vmem:[%s9944_s10 + $0x18] sm:$0xff]  ;;  %13043 = vst [vmem:[#allocation15_spill] sm:$0xff] %v13042_v56  ;;  %v13047_v7 = vmov 0  ;;  %v379_v9 = vand.u32 15, %v283_v1 }
  0x64   : > { %8189 = vmatprep.subr.mxu1 %v892_v11  ;;  %8110 = vmatpush3.msra.mxu0 %v941_v10  ;;  %v754_v40 = vld [vmem:[%s9944_s10 + $0x7] sm:$0xff]  ;;  %v899_v41 = vld [vmem:[%s9944_s10 + $0x10] sm:$0xff]  ;;  %v9980_v52 = vld [vmem:[%s9944_s10 + $0x1f] sm:$0xff]  ;;  %13046 = vst [vmem:[#allocation16_spill] sm:$0xff] %v13045_v62  ;;  %v13048_v7 = vsel %vm10020_vm4, 4294967295, %v13047_v7  ;;  %v285_v10 = vadd.s32 96, %v9954_v27 }
  0x65   : > { %8190 = vmatpush3.msra.mxu1 %v892_v11  ;;  %8111 = vmatprep.subr.mxu0 %v940_v12  ;;  %v755_v42 = vld [vmem:[%s9944_s10 + $0xf] sm:$0xff]  ;;  %v9976_v47 = vld [vmem:[%s9944_s10 + $0x17] sm:$0xff]  ;;  %v901_v51 = vld [vmem:[%s9944_s10 + $0x20] sm:$0xff]  ;;  %13049 = vst [vmem:[#allocation17_spill] sm:$0xff] %v13048_v7  ;;  %vm10037_vm5 = vcmp.gt.s32.totalorder %v379_v9, 0  ;;  %v291_v38 = vadd.s32 144, %v9954_v27 }
  0x66   : > { %8191 = vmatprep.subr.mxu1 %v891_v13  ;;  %8112 = vmatpush3.msra.mxu0 %v940_v12  ;;  %v1540_v49 = vld [vmem:[#allocation6 + $0x170] sm:$0xff]  ;;  %v1879_v50 = vld [vmem:[#allocation6 + $0x1f8] sm:$0xff]  ;;  %v1539_v58 = vld [vmem:[#allocation6 + $0x168] sm:$0xff]  ;;  %v13059_v45 = vmov 0  ;;  %v295_v1 = vadd.s32 176, %v9954_v27  ;;  %v284_v56 = vadd.s32 88, %v9954_v27 }
  0x67   : > { %8192 = vmatpush3.msra.mxu1 %v891_v13  ;;  %8113 = vmatprep.subr.mxu0 %v939_v14  ;;  %v902_v53 = vld [vmem:[%s9944_s10 + $0x28] sm:$0xff]  ;;  %v903_v59 = vld [vmem:[%s9944_s10 + $0x30] sm:$0xff]  ;;  %v904_v61 = vld [vmem:[%s9944_s10 + $0x38] sm:$0xff]  ;;  %v286_v62 = vadd.s32 104, %v9954_v27  ;;  %v288_v7 = vadd.s32 120, %v9954_v27  ;;  %s6920_s8 = scalar_lea.sflag [#allocation5], %s9940_s16 }
  0x68   : > { %8193 = vmatprep.subr.mxu1 %v890_v15  ;;  %8114 = vmatpush3.msra.mxu0 %v939_v14  ;;  %v9992_v57 = vld [vmem:[%s9944_s10 + $0x27] sm:$0xff]  ;;  %v9997_v60 = vld [vmem:[%s9944_s10 + $0x2f] sm:$0xff]  ;;  %v10008_v63 = vld [vmem:[%s9944_s10 + $0x37] sm:$0xff]  ;;  %s9695_s7 = scalar_lea.vmem %s12812_s28, 4096  ;;  %p13608_p11 = scmp.ne.s32.totalorder %s13028_s23, 0 }
  0x69   : > { %8194 = vmatpush3.msra.mxu1 %v890_v15  ;;  %8115 = vmatprep.subr.mxu0 %v938_v16  ;;  %v1538_v2 = vld [vmem:[#allocation6 + $0x160] sm:$0xff]  ;;  %v1878_v3 = vld [vmem:[#allocation6 + $0x1f0] sm:$0xff]  ;;  %v906_v6 = vld [vmem:[%s9944_s10 + $0x48] sm:$0xff]  ;;  %p9696_p5 = scmp.ne.s32.totalorder %s12812_s28, %s9695_s7  ;;  %s9771_s22 = smov [#allocation9]  }
  0x6a   : > { %8195 = vmatprep.subr.mxu1 %v889_v17  ;;  %8116 = vmatpush3.msra.mxu0 %v938_v16  ;;  %v905_v4 = vld [vmem:[%s9944_s10 + $0x40] sm:$0xff]  ;;  %v1537_v11 = vld [vmem:[#allocation6 + $0x158] sm:$0xff]  ;;  %v1877_v12 = vld [vmem:[#allocation6 + $0x1e8] sm:$0xff]  ;;  %v13050_v16 = vmov 0  ;;  %s9699_s30 = sshll.u32 %s9771_s22, 4  ;;  %s9700_s30 = int_to_ptr.vmem [resolvable:$false] %s9699_s30 }
  0x6b   : > { %8196 = vmatpush3.msra.mxu1 %v889_v17  ;;  %8117 = vmatprep.subr.mxu0 %v937_v18  ;;  %v10017_v5 = vld [vmem:[%s9944_s10 + $0x3f] sm:$0xff]  ;;  %v10025_v8 = vld [vmem:[%s9944_s10 + $0x47] sm:$0xff]  ;;  %v907_v13 = vld [vmem:[%s9944_s10 + $0x50] sm:$0xff]  ;;  %v13051_v16 = vsel %vm10037_vm5, 4294967295, %v13050_v16  ;;  %p9697_p7 = pnand %p9696_p5, %p13608_p11  ;;  %p9702_p13 = scmp.lt.s32.totalorder %s12812_s28, %s9700_s30 }
  0x6c   : > { %8197 = vmatprep.subr.mxu1 %v888_v19  ;;  %8118 = vmatpush3.msra.mxu0 %v937_v18  ;;  %v10034_v14 = vld [vmem:[%s9944_s10 + $0x4f] sm:$0xff]  ;;  %v908_v15 = vld [vmem:[%s9944_s10 + $0x58] sm:$0xff]  ;;  %13052 = vst [vmem:[#allocation18_spill] sm:$0xff] %v13051_v16  ;;  %v393_v18 = vand.u32 15, %v285_v10  ;;  %v909_v22 = vld [vmem:[%s9944_s10 + $0x60] sm:$0xff]  ;;  %v13069_v10 = vmov 0 }
  0x6d   : > { %8198 = vmatpush3.msra.mxu1 %v888_v19  ;;  %8119 = vmatprep.subr.mxu0 %v936_v20  ;;  %v10042_v17 = vld [vmem:[%s9944_s10 + $0x57] sm:$0xff]  ;;  %v287_v19 = vadd.s32 112, %v9954_v27  ;;  %v10070_v33 = vld [vmem:[%s9944_s10 + $0x6f] sm:$0xff]  ;;  %v10103_v48 = vld [vmem:[%s9944_s10 + $0x87] sm:$0xff]  ;;  %v290_v16 = vadd.s32 136, %v9954_v27  ;;  %p9698_p12 = pneg %p9697_p7 }
  0x6e   : > { %8199 = vmatprep.subr.mxu1 %v887_v21  ;;  %8120 = vmatpush3.msra.mxu0 %v936_v20  ;;  %v1536_v20 = vld [vmem:[#allocation6 + $0x150] sm:$0xff]  ;;  %vm10054_vm6 = vcmp.gt.s32.totalorder %v393_v18, 0  ;;  %v1535_v30 = vld [vmem:[#allocation6 + $0x148] sm:$0xff]  ;;  %v1871_v18 = vld [vmem:[#allocation6 + $0x1b8] sm:$0xff] }
  0x6f   : > { %8200 = vmatpush3.msra.mxu1 %v887_v21  ;;  %8121 = vmatprep.subr.mxu0 %v935_v23  ;;  %v1876_v21 = vld [vmem:[#allocation6 + $0x1e0] sm:$0xff]  ;;  %v10142_v9 = vld [vmem:[%s9944_s10 + $0xa8] sm:$0xff] }
  0x70   : > { %8201 = vmatprep.subr.mxu1 %v886_v24  ;;  %8122 = vmatpush3.msra.mxu0 %v935_v23  ;;  %v10051_v23 = vld [vmem:[%s9944_s10 + $0x5f] sm:$0xff]  ;;  %v10113_v54 = vld [vmem:[%s9944_s10 + $0x90] sm:$0xff]  ;;  %13068 = vst [vmem:[#allocation26_spill] sm:$0xff] %v10142_v9 }
  0x71   : > { %8202 = vmatpush3.msra.mxu1 %v886_v24  ;;  %8123 = vmatprep.subr.mxu0 %v934_v25  ;;  %v910_v24 = vld [vmem:[%s9944_s10 + $0x68] sm:$0xff]  ;;  %13062 = vst [vmem:[#allocation22_spill] sm:$0xff] %v10113_v54 }
  0x72   : > { %8203 = vmatprep.subr.mxu1 %v885_v26  ;;  %8124 = vmatpush3.msra.mxu0 %v934_v25  ;;  %v13053_v25 = vmov 0  ;;  %v10116_v55 = vld [vmem:[%s9944_s10 + $0x8f] sm:$0xff] }
  0x73   : > { %8204 = vmatpush3.msra.mxu1 %v885_v26  ;;  %8125 = vmatprep.subr.mxu0 %v933_v28  ;;  %v13054_v25 = vsel %vm10054_vm6, 4294967295, %v13053_v25  ;;  %v10059_v26 = vld [vmem:[%s9944_s10 + $0x67] sm:$0xff] }
  0x74   : > { %8205 = vmatprep.subr.mxu1 %v884_v29  ;;  %8126 = vmatpush3.msra.mxu0 %v933_v28  ;;  %13055 = vst [vmem:[#allocation19_spill] sm:$0xff] %v13054_v25  ;;  %v407_v28 = vand.u32 15, %v287_v19  ;;  %v10159_v19 = vld [vmem:[%s9944_s10 + $0xb0] sm:$0xff]  ;;  %v292_v25 = vadd.s32 152, %v9954_v27 }
  0x75   : > { %8206 = vmatpush3.msra.mxu1 %v884_v29  ;;  %8127 = vmatprep.subr.mxu0 %v932_v31  ;;  %v289_v29 = vadd.s32 128, %v9954_v27  ;;  %13072 = vst [vmem:[#allocation28_spill] sm:$0xff] %v10159_v19 }
  0x76   : > { %8207 = vmatprep.subr.mxu1 %v883_v32  ;;  %8128 = vmatpush3.msra.mxu0 %v932_v31  ;;  %v1875_v31 = vld [vmem:[#allocation6 + $0x1d8] sm:$0xff]  ;;  %vm10075_vm7 = vcmp.gt.s32.totalorder %v407_v28, 0 }
  0x77   : > { %8208 = vmatpush3.msra.mxu1 %v883_v32  ;;  %8129 = vmatprep.subr.mxu0 %v931_v34  ;;  %v10067_v32 = vld [vmem:[%s9944_s10 + $0x70] sm:$0xff]  ;;  %v421_v37 = vand.u32 15, %v289_v29  ;;  %v299_v29 = vadd.s32 208, %v9954_v27 }
  0x78   : > { %8209 = vmatprep.subr.mxu1 %v882_v35  ;;  %8130 = vmatpush3.msra.mxu0 %v931_v34  ;;  %v10073_v34 = vld [vmem:[%s9944_s10 + $0x78] sm:$0xff] }
  0x79   : > { %8131 = vmatprep.mubr.f32.mxu0 %v898_v36  ;;  %8210 = vmatpush3.msra.mxu1 %v882_v35  ;;  %v13056_v35 = vmov 0  ;;  %v10080_v36 = vld [vmem:[%s9944_s10 + $0x77] sm:$0xff]  ;;  %vm10098_vm8 = vcmp.gt.s32.totalorder %v421_v37, 0  ;;  %v10182_v37 = vld [vmem:[%s9944_s10 + $0xc0] sm:$0xff] }
  0x7a   : > { %8211 = vmatprep.mubr.msk.f32.mxu1 %vm9960_vm0, %v754_v40  ;;  %8132 = vmatmul.mubr.f32.vlgmr.msra.gmra.mxu0 %v899_v41  ;;  %v13057_v35 = vsel %vm10075_vm7, 4294967295, %v13056_v35  ;;  %v1534_v40 = vld [vmem:[#allocation6 + $0x140] sm:$0xff]  ;;  %v1874_v41 = vld [vmem:[#allocation6 + $0x1d0] sm:$0xff]  ;;  %v13060_v45 = vsel %vm10098_vm8, 4294967295, %v13059_v45  ;;  %13077 = vst [vmem:[#allocation31_spill] sm:$0xff] %v10182_v37 }
  0x7b   : > { %8212 = vmatmul.mubr.f32.vlgmr.msra.gmra.mxu1 %v755_v42  ;;  %8259 = vmatprep.subr.mxu0 %v1541_v43  ;;  %13058 = vst [vmem:[#allocation20_spill] sm:$0xff] %v13057_v35  ;;  %v10090_v42 = vld [vmem:[%s9944_s10 + $0x80] sm:$0xff]  ;;  %13061 = vst [vmem:[#allocation21_spill] sm:$0xff] %v13060_v45  ;;  %v294_v35 = vadd.s32 168, %v9954_v27  ;;  %v296_v45 = vadd.s32 184, %v9954_v27 }
  0x7c   : > { %8134 = vmatprep.mubr.f32.mxu0 %v900_v44  ;;  %8260 = vmatpush3.msra.mxu0 %v1541_v43  ;;  %v10093_v43 = vld [vmem:[%s9944_s10 + $0x7f] sm:$0xff]  ;;  %v10096_v44 = vld [vmem:[%s9944_s10 + $0x88] sm:$0xff] }
  0x7d   : > { %8214 = vmatprep.mubr.msk.f32.mxu1 %vm9971_vm1, %v9976_v47  ;;  %8261 = vmatprep.subr.mxu0 %v1540_v49 }
  0x7e   : > { %8339 = vmatprep.subr.mxu1 %v1879_v50  ;;  %8135 = vmatmul.mubr.f32.gmra.mxu0 %v901_v51  ;;  %v1533_v51 = vld [vmem:[#allocation6 + $0x138] sm:$0xff] }
  0x7f   : > { %8215 = vmatmul.mubr.f32.gmra.mxu1 %v9980_v52  ;;  %8262 = vmatpush3.msra.mxu0 %v1540_v49  ;;  %v435_v49 = vand.u32 15, %v291_v38  ;;  %v10185_v38 = vld [vmem:[%s9944_s10 + $0xbf] sm:$0xff] }
  0x80   : > { %8137 = vmatprep.mubr.f32.mxu0 %v902_v53  ;;  %8217 = vmatprep.mubr.msk.f32.mxu1 %vm9987_vm2, %v9992_v57  ;;  %v1873_v53 = vld [vmem:[#allocation6 + $0x1c8] sm:$0xff] }
  0x81   : > { %8263 = vmatprep.subr.mxu0 %v1539_v58  ;;  %8340 = vmatpush3.msra.mxu1 %v1879_v50  ;;  %v293_v50 = vadd.s32 160, %v9954_v27  ;;  %vm10121_vm9 = vcmp.gt.s32.totalorder %v435_v49, 0  ;;  %v10195_v49 = vld [vmem:[%s9944_s10 + $0xc7] sm:$0xff] }
  0x82   : > { %8264 = vmatpush3.msra.mxu0 %v1539_v58  ;;  %8341 = vmatprep.subr.mxu1 %v1878_v3  ;;  %v10119_v58 = vld [vmem:[%s9944_s10 + $0x98] sm:$0xff] }
  0x83   : > { %8138 = vmatmul.mubr.f32.gmra.mxu0 %v903_v59  ;;  %8218 = vmatmul.mubr.f32.gmra.mxu1 %v9997_v60  ;;  %13063 = vst [vmem:[#allocation23_spill] sm:$0xff] %v10119_v58  ;;  %v13064_v59 = vmov 0  ;;  %v449_v0 = vand.u32 15, %v293_v50  ;;  %v491_v50 = vand.u32 15, %v299_v29  ;;  %v1868_v29 = vld [vmem:[#allocation6 + $0x1a0] sm:$0xff] }
  0x84   : > { %8140 = vmatprep.mubr.f32.mxu0 %v904_v61  ;;  %8220 = vmatprep.mubr.msk.f32.mxu1 %vm10003_vm3, %v10008_v63  ;;  %v13065_v59 = vsel %vm10121_vm9, 4294967295, %v13064_v59  ;;  %v10126_v61 = vld [vmem:[%s9944_s10 + $0x97] sm:$0xff] }
  0x85   : > { %8265 = vmatprep.subr.mxu0 %v1538_v2  ;;  %8342 = vmatpush3.msra.mxu1 %v1878_v3  ;;  %13066 = vst [vmem:[#allocation24_spill] sm:$0xff] %v13065_v59  ;;  %v1872_v3 = vld [vmem:[#allocation6 + $0x1c0] sm:$0xff]  ;;  %vm10144_vm10 = vcmp.gt.s32.totalorder %v449_v0, 0  ;;  %v1869_v0 = vld [vmem:[#allocation6 + $0x1a8] sm:$0xff]  ;;  %vm10213_vm13 = vcmp.gt.s32.totalorder %v491_v50, 0  ;;  %v298_v59 = vadd.s32 200, %v9954_v27 }
  0x86   : > { %8266 = vmatpush3.msra.mxu0 %v1538_v2  ;;  %8343 = vmatprep.subr.mxu1 %v1877_v12  ;;  %v1532_v2 = vld [vmem:[#allocation6 + $0x130] sm:$0xff]  ;;  %v13070_v10 = vsel %vm10144_vm10, 4294967295, %v13069_v10  ;;  %v10234_v50 = vld [vmem:[%s9944_s10 + $0xe8] sm:$0xff] }
  0x87   : > { %8141 = vmatmul.mubr.f32.gmra.mxu0 %v905_v4  ;;  %8221 = vmatmul.mubr.f32.gmra.mxu1 %v10017_v5  ;;  %v10136_v4 = vld [vmem:[%s9944_s10 + $0xa0] sm:$0xff]  ;;  %13071 = vst [vmem:[#allocation27_spill] sm:$0xff] %v13070_v10  ;;  %13088 = vst [vmem:[#allocation38_spill] sm:$0xff] %v10234_v50  ;;  %v300_v10 = vadd.s32 216, %v9954_v27 }
  0x88   : > { %8143 = vmatprep.mubr.f32.mxu0 %v906_v6  ;;  %8223 = vmatprep.mubr.msk.f32.mxu1 %vm10020_vm4, %v10025_v8  ;;  %13067 = vst [vmem:[#allocation25_spill] sm:$0xff] %v10136_v4  ;;  %v10139_v6 = vld [vmem:[%s9944_s10 + $0x9f] sm:$0xff] }
  0x89   : > { %8267 = vmatprep.subr.mxu0 %v1537_v11  ;;  %8344 = vmatpush3.msra.mxu1 %v1877_v12  ;;  %v463_v12 = vand.u32 15, %v295_v1  ;;  %v10205_v1 = vld [vmem:[%s9944_s10 + $0xd0] sm:$0xff] }
  0x8a   : > { %8268 = vmatpush3.msra.mxu0 %v1537_v11  ;;  %8345 = vmatprep.subr.mxu1 %v1876_v21  ;;  %v10149_v11 = vld [vmem:[%s9944_s10 + $0xa7] sm:$0xff]  ;;  %13082 = vst [vmem:[#allocation34_spill] sm:$0xff] %v10205_v1 }
  0x8b   : > { %8144 = vmatmul.mubr.f32.gmra.mxu0 %v907_v13  ;;  %8224 = vmatmul.mubr.f32.gmra.mxu1 %v10034_v14  ;;  %v297_v13 = vadd.s32 192, %v9954_v27  ;;  %vm10167_vm11 = vcmp.gt.s32.totalorder %v463_v12, 0  ;;  %v13084_v12 = vmov 0 }
  0x8c   : > { %8146 = vmatprep.mubr.f32.mxu0 %v908_v15  ;;  %8226 = vmatprep.mubr.msk.f32.mxu1 %vm10037_vm5, %v10042_v17  ;;  %v1531_v15 = vld [vmem:[#allocation6 + $0x128] sm:$0xff]  ;;  %v13085_v12 = vsel %vm10213_vm13, 4294967295, %v13084_v12 }
  0x8d   : > { %8269 = vmatprep.subr.mxu0 %v1536_v20  ;;  %8346 = vmatpush3.msra.mxu1 %v1876_v21  ;;  %v10165_v21 = vld [vmem:[%s9944_s10 + $0xb8] sm:$0xff]  ;;  %v477_v28 = vand.u32 15, %v297_v13  ;;  %13086 = vst [vmem:[#allocation36_spill] sm:$0xff] %v13085_v12 }
  0x8e   : > { %8270 = vmatpush3.msra.mxu0 %v1536_v20  ;;  %8347 = vmatprep.subr.mxu1 %v1875_v31  ;;  %v10162_v20 = vld [vmem:[%s9944_s10 + $0xaf] sm:$0xff]  ;;  %13073 = vst [vmem:[#allocation29_spill] sm:$0xff] %v10165_v21  ;;  %v10218_v13 = vld [vmem:[%s9944_s10 + $0xd7] sm:$0xff] }
  0x8f   : > { %8147 = vmatmul.mubr.f32.gmra.mxu0 %v909_v22  ;;  %8227 = vmatmul.mubr.f32.gmra.mxu1 %v10051_v23  ;;  %v13074_v22 = vmov 0  ;;  %vm10190_vm12 = vcmp.gt.s32.totalorder %v477_v28, 0  ;;  %v1528_v28 = vld [vmem:[#allocation6 + $0x110] sm:$0xff] }
  0x90   : > { %8149 = vmatprep.mubr.f32.mxu0 %v910_v24  ;;  %8229 = vmatprep.mubr.msk.f32.mxu1 %vm10054_vm6, %v10059_v26  ;;  %v13075_v22 = vsel %vm10167_vm11, 4294967295, %v13074_v22  ;;  %v10172_v24 = vld [vmem:[%s9944_s10 + $0xb7] sm:$0xff] }
  0x91   : > { %8271 = vmatprep.subr.mxu0 %v1535_v30  ;;  %8348 = vmatpush3.msra.mxu1 %v1875_v31  ;;  %13076 = vst [vmem:[#allocation30_spill] sm:$0xff] %v13075_v22  ;;  %v1870_v31 = vld [vmem:[#allocation6 + $0x1b0] sm:$0xff]  ;;  %v302_v22 = vadd.s32 232, %v9954_v27 }
  0x92   : > { %8272 = vmatpush3.msra.mxu0 %v1535_v30  ;;  %8349 = vmatprep.subr.mxu1 %v1874_v41  ;;  %v1530_v30 = vld [vmem:[#allocation6 + $0x120] sm:$0xff] }
  0x93   : > { %8150 = vmatmul.mubr.f32.gmra.mxu0 %v10067_v32  ;;  %8230 = vmatmul.mubr.f32.gmra.mxu1 %v10070_v33 }
  0x94   : > { %8152 = vmatprep.mubr.f32.mxu0 %v10073_v34  ;;  %8232 = vmatprep.mubr.msk.f32.mxu1 %vm10075_vm7, %v10080_v36 }
  0x95   : > { %8273 = vmatprep.subr.mxu0 %v1534_v40  ;;  %8350 = vmatpush3.msra.mxu1 %v1874_v41  ;;  %v13079_v41 = vmov 0 }
  0x96   : > { %8274 = vmatpush3.msra.mxu0 %v1534_v40  ;;  %8351 = vmatprep.subr.mxu1 %v1873_v53  ;;  %v10188_v40 = vld [vmem:[%s9944_s10 + $0xc8] sm:$0xff]  ;;  %v13080_v41 = vsel %vm10190_vm12, 4294967295, %v13079_v41 }
  0x97   : > { %8153 = vmatmul.mubr.f32.gmra.mxu0 %v10090_v42  ;;  %8233 = vmatmul.mubr.f32.gmra.mxu1 %v10093_v43  ;;  %13078 = vst [vmem:[#allocation32_spill] sm:$0xff] %v10188_v40  ;;  %13081 = vst [vmem:[#allocation33_spill] sm:$0xff] %v13080_v41  ;;  %v304_v41 = vadd.s32 248, %v9954_v27 }
  0x98   : > { %8155 = vmatprep.mubr.f32.mxu0 %v10096_v44  ;;  %8235 = vmatprep.mubr.msk.f32.mxu1 %vm10098_vm8, %v10103_v48 }
  0x99   : > { %8275 = vmatprep.subr.mxu0 %v1533_v51  ;;  %8352 = vmatpush3.msra.mxu1 %v1873_v53  ;;  %v1529_v53 = vld [vmem:[#allocation6 + $0x118] sm:$0xff] }
  0x9a   : > { %8276 = vmatpush3.msra.mxu0 %v1533_v51  ;;  %8353 = vmatprep.subr.mxu1 %v1872_v3  ;;  %v301_v51 = vadd.s32 224, %v9954_v27 }
  0x9b   : > { %8156 = vmatmul.mubr.f32.gmra.mxu0 %v10113_v54  ;;  %8236 = vmatmul.mubr.f32.gmra.mxu1 %v10116_v55  ;;  %v278_v54 = vadd.s32 40, %v9954_v27 }
  0x9c   : > { %8158 = vmatprep.mubr.f32.mxu0 %v10119_v58  ;;  %8238 = vmatprep.mubr.msk.f32.mxu1 %vm10121_vm9, %v10126_v61 }
  0x9d   : > { %8277 = vmatprep.subr.mxu0 %v1532_v2  ;;  %8354 = vmatpush3.msra.mxu1 %v1872_v3  ;;  %v10211_v3 = vld [vmem:[%s9944_s10 + $0xd8] sm:$0xff] }
  0x9e   : > { %8278 = vmatpush3.msra.mxu0 %v1532_v2  ;;  %8355 = vmatprep.subr.mxu1 %v1871_v18  ;;  %v10208_v2 = vld [vmem:[%s9944_s10 + $0xcf] sm:$0xff]  ;;  %13083 = vst [vmem:[#allocation35_spill] sm:$0xff] %v10211_v3 }
  0x9f   : > { %8159 = vmatmul.mubr.f32.gmra.mxu0 %v10136_v4  ;;  %8239 = vmatmul.mubr.f32.gmra.mxu1 %v10139_v6  ;;  %v1398_v4 = vld [vmem:[%s9944_s10 + $0x11] sm:$0xff] }
  0xa0   : > { %8161 = vmatprep.mubr.f32.mxu0 %v10142_v9  ;;  %8241 = vmatprep.mubr.msk.f32.mxu1 %vm10144_vm10, %v10149_v11  ;;  %v1864_v9 = vld [vmem:[#allocation6 + $0x180] sm:$0xff] }
  0xa1   : > { %8279 = vmatprep.subr.mxu0 %v1531_v15  ;;  %8356 = vmatpush3.msra.mxu1 %v1871_v18  ;;  %v303_v18 = vadd.s32 240, %v9954_v27 }
  0xa2   : > { %8280 = vmatpush3.msra.mxu0 %v1531_v15  ;;  %8357 = vmatprep.subr.mxu1 %v1870_v31  ;;  %v505_v15 = vand.u32 15, %v301_v51  ;;  %v13089_v51 = vmov 0 }
  0xa3   : > { %8162 = vmatmul.mubr.f32.gmra.mxu0 %v10159_v19  ;;  %8242 = vmatmul.mubr.f32.gmra.mxu1 %v10162_v20 }
  0xa4   : > { %8164 = vmatprep.mubr.f32.mxu0 %v10165_v21  ;;  %8244 = vmatprep.mubr.msk.f32.mxu1 %vm10167_vm11, %v10172_v24  ;;  %vm10236_vm14 = vcmp.gt.s32.totalorder %v505_v15, 0  ;;  %v10250_v15 = vld [vmem:[%s9944_s10 + $0xf0] sm:$0xff]  ;;  %v10276_v21 = vld [vmem:[%s9944_s10 + $0xff] sm:$0xff] }
  0xa5   : > { %8281 = vmatprep.subr.mxu0 %v1530_v30  ;;  %8358 = vmatpush3.msra.mxu1 %v1870_v31  ;;  %v10231_v31 = vld [vmem:[%s9944_s10 + $0xdf] sm:$0xff]  ;;  %v13090_v51 = vsel %vm10236_vm14, 4294967295, %v13089_v51  ;;  %13092 = vst [vmem:[#allocation40_spill] sm:$0xff] %v10250_v15 }
  0xa6   : > { %8282 = vmatpush3.msra.mxu0 %v1530_v30  ;;  %8359 = vmatprep.subr.mxu1 %v1869_v0  ;;  %v10228_v30 = vld [vmem:[%s9944_s10 + $0xe0] sm:$0xff]  ;;  %13091 = vst [vmem:[#allocation39_spill] sm:$0xff] %v13090_v51 }
  0xa7   : > { %8165 = vmatmul.mubr.f32.gmra.mxu0 %v10182_v37  ;;  %8245 = vmatmul.mubr.f32.gmra.mxu1 %v10185_v38  ;;  %13087 = vst [vmem:[#allocation37_spill] sm:$0xff] %v10228_v30  ;;  %v1866_v37 = vld [vmem:[#allocation6 + $0x190] sm:$0xff] }
  0xa8   : > { %8167 = vmatprep.mubr.f32.mxu0 %v10188_v40  ;;  %8247 = vmatprep.mubr.msk.f32.mxu1 %vm10190_vm12, %v10195_v49  ;;  %v10253_v40 = vld [vmem:[%s9944_s10 + $0xef] sm:$0xff] }
  0xa9   : > { %8283 = vmatprep.subr.mxu0 %v1529_v53  ;;  %8360 = vmatpush3.msra.mxu1 %v1869_v0  ;;  %v519_v0 = vand.u32 15, %v303_v18  ;;  %v274_v18 = vadd.s32 8, %v9954_v27 }
  0xaa   : > { %8284 = vmatpush3.msra.mxu0 %v1529_v53  ;;  %v10241_v53 = vld [vmem:[%s9944_s10 + $0xe7] sm:$0xff]  ;;  %8361 = vmatprep.subr.mxu1 %v1868_v29 }
  0xab   : > { %8168 = vmatmul.mubr.f32.gmra.mxu0 %v10205_v1  ;;  %8248 = vmatmul.mubr.f32.gmra.mxu1 %v10208_v2  ;;  %v1867_v1 = vld [vmem:[#allocation6 + $0x198] sm:$0xff]  ;;  %vm10259_vm15 = vcmp.gt.s32.totalorder %v519_v0, 0  ;;  %v10273_v0 = vld [vmem:[%s9944_s10 + $0x100] sm:$0xff]  ;;  %v316_v19 = vand.u32 15, %v274_v18  ;;  %v13097_v18 = vmov 0 }
  0xac   : > { %8170 = vmatprep.mubr.f32.mxu0 %v10211_v3  ;;  %8250 = vmatprep.mubr.msk.f32.mxu1 %vm10213_vm13, %v10218_v13  ;;  %v1527_v3 = vld [vmem:[#allocation6 + $0x108] sm:$0xff] }
  0xad   : > { %8285 = vmatprep.subr.mxu0 %v1528_v28  ;;  %8362 = vmatpush3.msra.mxu1 %v1868_v29  ;;  %v13094_v29 = vmov 0 }
  0xae   : > { %8286 = vmatpush3.msra.mxu0 %v1528_v28  ;;  %8363 = vmatprep.subr.mxu1 %v1867_v1  ;;  %v10257_v28 = vld [vmem:[%s9944_s10 + $0xf8] sm:$0xff]  ;;  %v13095_v29 = vsel %vm10259_vm15, 4294967295, %v13094_v29 }
  0xaf   : > { %8171 = vmatmul.mubr.f32.gmra.mxu0 %v10228_v30  ;;  %8251 = vmatmul.mubr.f32.gmra.mxu1 %v10231_v31  ;;  %13093 = vst [vmem:[#allocation41_spill] sm:$0xff] %v10257_v28  ;;  %13096 = vst [vmem:[#allocation42_spill] sm:$0xff] %v13095_v29  ;;  %v1526_v30 = vld [vmem:[#allocation6 + $0x100] sm:$0xff] }
  0xb0   : > { %8173 = vmatprep.mubr.f32.mxu0 %v10234_v50  ;;  %8253 = vmatprep.mubr.msk.f32.mxu1 %vm10236_vm14, %v10241_v53  ;;  %v10264_v50 = vld [vmem:[%s9944_s10 + $0xf7] sm:$0xff] }
  0xb1   : > { %8287 = vmatprep.subr.mxu0 %v1527_v3  ;;  %8364 = vmatpush3.msra.mxu1 %v1867_v1  ;;  %v276_v1 = vadd.s32 24, %v9954_v27 }
  0xb2   : > { %8288 = vmatpush3.msra.mxu0 %v1527_v3  ;;  %8365 = vmatprep.subr.mxu1 %v1866_v37  ;;  %v1865_v3 = vld [vmem:[#allocation6 + $0x188] sm:$0xff] }
  0xb3   : > { %8174 = vmatmul.mubr.f32.gmra.mxu0 %v10250_v15  ;;  %8254 = vmatmul.mubr.f32.gmra.mxu1 %v10253_v40  ;;  %v1397_v15 = vld [vmem:[%s9944_s10 + $0x9] sm:$0xff]  ;;  %v330_v58 = vand.u32 15, %v276_v1  ;;  %v344_v1 = vand.u32 15, %v278_v54 }
  0xb4   : > { %8176 = vmatprep.mubr.f32.mxu0 %v10257_v28  ;;  %8256 = vmatprep.mubr.msk.f32.mxu1 %vm10259_vm15, %v10264_v50  ;;  %v2185_v28 = vld [vmem:[#allocation6 + $0x278] sm:$0xff]  ;;  %vm10282_vm15 = vcmp.lt.s32.totalorder %v316_v19, 15  ;;  %v13100_v19 = vmov 0 }
  0xb5   : > { %8289 = vmatprep.subr.mxu0 %v1526_v30  ;;  %8366 = vmatpush3.msra.mxu1 %v1866_v37  ;;  %v13098_v18 = vsel %vm10282_vm15, 4294967295, %v13097_v18  ;;  %v10292_v37 = vld [vmem:[%s9944_s10 + $0x19] sm:$0xff]  ;;  %vm10297_vm14 = vcmp.lt.s32.totalorder %v330_v58, 15  ;;  %v13103_v58 = vmov 0 }
  0xb6   : > { %8290 = vmatpush3.msra.mxu0 %v1526_v30  ;;  %8367 = vmatprep.subr.mxu1 %v1865_v3  ;;  %13099 = vst [vmem:[#allocation43_spill] sm:$0xff] %v13098_v18  ;;  %v2184_v30 = vld [vmem:[#allocation6 + $0x270] sm:$0xff]  ;;  %v13101_v19 = vsel %vm10297_vm14, 4294967295, %v13100_v19  ;;  %v2523_v54 = vld [vmem:[#allocation6 + $0x2f8] sm:$0xff] }
  0xb7   : > { %8177 = vmatmul.mubr.f32.gmra.mxu0 %v10273_v0  ;;  %8257 = vmatmul.mubr.f32.gmra.mxu1 %v10276_v21  ;;  %13102 = vst [vmem:[#allocation44_spill] sm:$0xff] %v13101_v19  ;;  %v3431_v18 = vld [vmem:[%s9944_s10 + $0x59] sm:$0xff]  ;;  %v3433_v19 = vld [vmem:[%s9944_s10 + $0x69] sm:$0xff] }
  0xb8   : > { %8291 = vmatprep.mubr.f32.mxu0 %v1397_v15  ;;  %8368 = vmatpush3.msra.mxu1 %v1865_v3  ;;  %v10302_v15 = vld [vmem:[%s9944_s10 + $0x21] sm:$0xff] }
  0xb9   : > { %8419 = vmatprep.subr.mxu0 %v2185_v28  ;;  %8369 = vmatprep.subr.mxu1 %v1864_v9  ;;  %v2183_v3 = vld [vmem:[#allocation6 + $0x268] sm:$0xff] }
  0xba   : > { %8371 = vmatprep.mubr.msk.f32.mxu1 %vm9960_vm0, %v9976_v47  ;;  %8370 = vmatpush3.msra.mxu1 %v1864_v9  ;;  %v280_v47 = vadd.s32 56, %v9954_v27  ;;  %vm10317_vm0 = vcmp.lt.s32.totalorder %v344_v1, 15  ;;  %v10322_v9 = vld [vmem:[%s9944_s10 + $0x31] sm:$0xff] }
  0xbb   : > { %8292 = vmatmul.mubr.msk.f32.vlgmr.msra.gmra.mxu0 %vm10282_vm15, %v1398_v4  ;;  %8372 = vmatmul.mubr.f32.vlgmr.msra.gmra.mxu1 %v9980_v52  ;;  %v10307_v4 = vld [vmem:[%s9944_s10 + $0x29] sm:$0xff]  ;;  %v13104_v58 = vsel %vm10317_vm0, 4294967295, %v13103_v58 }
  0xbc   : > { %8420 = vmatpush3.msra.mxu0 %v2185_v28  ;;  %8294 = vmatprep.mubr.f32.mxu0 %v10292_v37  ;;  %v2182_v52 = vld [vmem:[#allocation6 + $0x260] sm:$0xff]  ;;  %13105 = vst [vmem:[#allocation45_spill] sm:$0xff] %v13104_v58  ;;  %v282_v28 = vadd.s32 72, %v9954_v27  ;;  %v2522_v1 = vld [vmem:[#allocation6 + $0x2f0] sm:$0xff]  ;;  %v13139_v27 = vmov 0 }
  0xbd   : > { %8421 = vmatprep.subr.mxu0 %v2184_v30  ;;  %8374 = vmatprep.mubr.msk.f32.mxu1 %vm9971_vm1, %v9992_v57  ;;  %v358_v57 = vand.u32 15, %v280_v47  ;;  %v13106_v47 = vmov 0  ;;  %v3435_v58 = vld [vmem:[%s9944_s10 + $0x79] sm:$0xff] }
  0xbe   : > { %8422 = vmatpush3.msra.mxu0 %v2184_v30  ;;  %v10329_v30 = vld [vmem:[%s9944_s10 + $0x39] sm:$0xff]  ;;  %8499 = vmatprep.subr.mxu1 %v2523_v54 }
  0xbf   : > { %8295 = vmatmul.mubr.msk.f32.gmra.mxu0 %vm10297_vm14, %v10302_v15  ;;  %8423 = vmatprep.subr.mxu0 %v2183_v3  ;;  %vm10336_vm1 = vcmp.lt.s32.totalorder %v358_v57, 15  ;;  %v2521_v57 = vld [vmem:[#allocation6 + $0x2e8] sm:$0xff] }
  0xc0   : > { %8375 = vmatmul.mubr.f32.gmra.mxu1 %v9997_v60  ;;  %8297 = vmatprep.mubr.f32.mxu0 %v10307_v4  ;;  %v2181_v60 = vld [vmem:[#allocation6 + $0x258] sm:$0xff]  ;;  %v13107_v47 = vsel %vm10336_vm1, 4294967295, %v13106_v47 }
  0xc1   : > { %8377 = vmatprep.mubr.msk.f32.mxu1 %vm9987_vm2, %v10008_v63  ;;  %8424 = vmatpush3.msra.mxu0 %v2183_v3  ;;  %13108 = vst [vmem:[#allocation46_spill] sm:$0xff] %v13107_v47  ;;  %v10341_v63 = vld [vmem:[%s9944_s10 + $0x41] sm:$0xff]  ;;  %v372_v3 = vand.u32 15, %v282_v28  ;;  %v13109_v28 = vmov 0 }
  0xc2   : > { %8425 = vmatprep.subr.mxu0 %v2182_v52  ;;  %8500 = vmatpush3.msra.mxu1 %v2523_v54  ;;  %v10348_v54 = vld [vmem:[%s9944_s10 + $0x49] sm:$0xff] }
  0xc3   : > { %8298 = vmatmul.mubr.msk.f32.gmra.mxu0 %vm10317_vm0, %v10322_v9  ;;  %8501 = vmatprep.subr.mxu1 %v2522_v1  ;;  %vm10355_vm2 = vcmp.lt.s32.totalorder %v372_v3, 15  ;;  %v2520_v3 = vld [vmem:[#allocation6 + $0x2e0] sm:$0xff]  ;;  %v3951_v47 = vld [vmem:[#allocation8 + $0x78] sm:$0xff] }
  0xc4   : > { %8378 = vmatmul.mubr.f32.gmra.mxu1 %v10017_v5  ;;  %8300 = vmatprep.mubr.f32.mxu0 %v10329_v30  ;;  %v2180_v5 = vld [vmem:[#allocation6 + $0x250] sm:$0xff]  ;;  %v13110_v28 = vsel %vm10355_vm2, 4294967295, %v13109_v28 }
  0xc5   : > { %8380 = vmatprep.mubr.msk.f32.mxu1 %vm10003_vm3, %v10025_v8  ;;  %8426 = vmatpush3.msra.mxu0 %v2182_v52  ;;  %13111 = vst [vmem:[#allocation47_spill] sm:$0xff] %v13110_v28  ;;  %v10360_v8 = vld [vmem:[%s9944_s10 + $0x51] sm:$0xff]  ;;  %v386_v52 = vand.u32 15, %v284_v56  ;;  %v13112_v56 = vmov 0 }
  0xc6   : > { %8427 = vmatprep.subr.mxu0 %v2181_v60  ;;  %8502 = vmatpush3.msra.mxu1 %v2522_v1  ;;  %v10367_v1 = vld [vmem:[%s9944_s10 + $0x59] sm:$0xff] }
  0xc7   : > { %8301 = vmatmul.mubr.msk.f32.gmra.mxu0 %vm10336_vm1, %v10341_v63  ;;  %8503 = vmatprep.subr.mxu1 %v2521_v57  ;;  %vm10374_vm3 = vcmp.lt.s32.totalorder %v386_v52, 15  ;;  %v2519_v52 = vld [vmem:[#allocation6 + $0x2d8] sm:$0xff]  ;;  %v3999_v28 = vld [vmem:[#allocation8 + $0xf0] sm:$0xff] }
  0xc8   : > { %8381 = vmatmul.mubr.f32.gmra.mxu1 %v10034_v14  ;;  %8303 = vmatprep.mubr.f32.mxu0 %v10348_v54  ;;  %v2179_v14 = vld [vmem:[#allocation6 + $0x248] sm:$0xff]  ;;  %v13113_v56 = vsel %vm10374_vm3, 4294967295, %v13112_v56 }
  0xc9   : > { %8383 = vmatprep.mubr.msk.f32.mxu1 %vm10020_vm4, %v10042_v17  ;;  %8428 = vmatpush3.msra.mxu0 %v2181_v60  ;;  %13114 = vst [vmem:[#allocation48_spill] sm:$0xff] %v13113_v56  ;;  %v10379_v17 = vld [vmem:[%s9944_s10 + $0x61] sm:$0xff]  ;;  %v400_v60 = vand.u32 15, %v286_v62  ;;  %v13115_v62 = vmov 0 }
  0xca   : > { %8429 = vmatprep.subr.mxu0 %v2180_v5  ;;  %8504 = vmatpush3.msra.mxu1 %v2521_v57  ;;  %v10386_v57 = vld [vmem:[%s9944_s10 + $0x69] sm:$0xff] }
  0xcb   : > { %8304 = vmatmul.mubr.msk.f32.gmra.mxu0 %vm10355_vm2, %v10360_v8  ;;  %8505 = vmatprep.subr.mxu1 %v2520_v3  ;;  %vm10393_vm4 = vcmp.lt.s32.totalorder %v400_v60, 15  ;;  %v2518_v60 = vld [vmem:[#allocation6 + $0x2d0] sm:$0xff]  ;;  %v3998_v56 = vld [vmem:[#allocation8 + $0xe8] sm:$0xff] }
  0xcc   : > { %8384 = vmatmul.mubr.f32.gmra.mxu1 %v10051_v23  ;;  %8306 = vmatprep.mubr.f32.mxu0 %v10367_v1  ;;  %v2178_v23 = vld [vmem:[#allocation6 + $0x240] sm:$0xff]  ;;  %v13116_v62 = vsel %vm10393_vm4, 4294967295, %v13115_v62 }
  0xcd   : > { %8386 = vmatprep.mubr.msk.f32.mxu1 %vm10037_vm5, %v10059_v26  ;;  %8430 = vmatpush3.msra.mxu0 %v2180_v5  ;;  %13117 = vst [vmem:[#allocation49_spill] sm:$0xff] %v13116_v62  ;;  %v10398_v26 = vld [vmem:[%s9944_s10 + $0x71] sm:$0xff]  ;;  %v414_v5 = vand.u32 15, %v288_v7  ;;  %v13118_v7 = vmov 0 }
  0xce   : > { %8431 = vmatprep.subr.mxu0 %v2179_v14  ;;  %8506 = vmatpush3.msra.mxu1 %v2520_v3  ;;  %v10405_v3 = vld [vmem:[%s9944_s10 + $0x79] sm:$0xff] }
  0xcf   : > { %8307 = vmatmul.mubr.msk.f32.gmra.mxu0 %vm10374_vm3, %v10379_v17  ;;  %8507 = vmatprep.subr.mxu1 %v2519_v52  ;;  %vm10412_vm5 = vcmp.lt.s32.totalorder %v414_v5, 15  ;;  %v2517_v5 = vld [vmem:[#allocation6 + $0x2c8] sm:$0xff]  ;;  %v3997_v62 = vld [vmem:[#allocation8 + $0xe0] sm:$0xff] }
  0xd0   : > { %8387 = vmatmul.mubr.f32.gmra.mxu1 %v10070_v33  ;;  %8309 = vmatprep.mubr.f32.mxu0 %v10386_v57  ;;  %v2177_v33 = vld [vmem:[#allocation6 + $0x238] sm:$0xff]  ;;  %v13119_v7 = vsel %vm10412_vm5, 4294967295, %v13118_v7 }
  0xd1   : > { %8389 = vmatprep.mubr.msk.f32.mxu1 %vm10054_vm6, %v10080_v36  ;;  %8432 = vmatpush3.msra.mxu0 %v2179_v14  ;;  %13120 = vst [vmem:[#allocation50_spill] sm:$0xff] %v13119_v7  ;;  %v10417_v36 = vld [vmem:[%s9944_s10 + $0x81] sm:$0xff]  ;;  %v428_v14 = vand.u32 15, %v290_v16  ;;  %v13121_v16 = vmov 0 }
  0xd2   : > { %8433 = vmatprep.subr.mxu0 %v2178_v23  ;;  %8508 = vmatpush3.msra.mxu1 %v2519_v52  ;;  %v10424_v52 = vld [vmem:[%s9944_s10 + $0x89] sm:$0xff] }
  0xd3   : > { %8310 = vmatmul.mubr.msk.f32.gmra.mxu0 %vm10393_vm4, %v10398_v26  ;;  %8509 = vmatprep.subr.mxu1 %v2518_v60  ;;  %vm10431_vm6 = vcmp.lt.s32.totalorder %v428_v14, 15  ;;  %v2516_v14 = vld [vmem:[#allocation6 + $0x2c0] sm:$0xff]  ;;  %v3996_v7 = vld [vmem:[#allocation8 + $0xd8] sm:$0xff] }
  0xd4   : > { %8390 = vmatmul.mubr.f32.gmra.mxu1 %v10093_v43  ;;  %8312 = vmatprep.mubr.f32.mxu0 %v10405_v3  ;;  %v2176_v43 = vld [vmem:[#allocation6 + $0x230] sm:$0xff]  ;;  %v13122_v16 = vsel %vm10431_vm6, 4294967295, %v13121_v16 }
  0xd5   : > { %8392 = vmatprep.mubr.msk.f32.mxu1 %vm10075_vm7, %v10103_v48  ;;  %8434 = vmatpush3.msra.mxu0 %v2178_v23  ;;  %13123 = vst [vmem:[#allocation51_spill] sm:$0xff] %v13122_v16  ;;  %v10436_v48 = vld [vmem:[%s9944_s10 + $0x91] sm:$0xff]  ;;  %v442_v23 = vand.u32 15, %v292_v25  ;;  %v13124_v25 = vmov 0 }
  0xd6   : > { %8435 = vmatprep.subr.mxu0 %v2177_v33  ;;  %8510 = vmatpush3.msra.mxu1 %v2518_v60  ;;  %v10443_v60 = vld [vmem:[%s9944_s10 + $0x99] sm:$0xff] }
  0xd7   : > { %8313 = vmatmul.mubr.msk.f32.gmra.mxu0 %vm10412_vm5, %v10417_v36  ;;  %8511 = vmatprep.subr.mxu1 %v2517_v5  ;;  %vm10450_vm7 = vcmp.lt.s32.totalorder %v442_v23, 15  ;;  %v2515_v23 = vld [vmem:[#allocation6 + $0x2b8] sm:$0xff] }
  0xd8   : > { %8393 = vmatmul.mubr.f32.gmra.mxu1 %v10116_v55  ;;  %8315 = vmatprep.mubr.f32.mxu0 %v10424_v52  ;;  %v2175_v55 = vld [vmem:[#allocation6 + $0x228] sm:$0xff]  ;;  %v13125_v25 = vsel %vm10450_vm7, 4294967295, %v13124_v25 }
  0xd9   : > { %8395 = vmatprep.mubr.msk.f32.mxu1 %vm10098_vm8, %v10126_v61  ;;  %8436 = vmatpush3.msra.mxu0 %v2177_v33  ;;  %13126 = vst [vmem:[#allocation52_spill] sm:$0xff] %v13125_v25  ;;  %v10455_v61 = vld [vmem:[%s9944_s10 + $0xa1] sm:$0xff]  ;;  %v456_v33 = vand.u32 15, %v294_v35  ;;  %v13127_v35 = vmov 0 }
  0xda   : > { %8437 = vmatprep.subr.mxu0 %v2176_v43  ;;  %8512 = vmatpush3.msra.mxu1 %v2517_v5  ;;  %v10462_v5 = vld [vmem:[%s9944_s10 + $0xa9] sm:$0xff] }
  0xdb   : > { %8316 = vmatmul.mubr.msk.f32.gmra.mxu0 %vm10431_vm6, %v10436_v48  ;;  %8513 = vmatprep.subr.mxu1 %v2516_v14  ;;  %vm10469_vm8 = vcmp.lt.s32.totalorder %v456_v33, 15  ;;  %v2514_v33 = vld [vmem:[#allocation6 + $0x2b0] sm:$0xff]  ;;  %v3992_v25 = vld [vmem:[#allocation8 + $0xb8] sm:$0xff] }
  0xdc   : > { %8396 = vmatmul.mubr.f32.gmra.mxu1 %v10139_v6  ;;  %8318 = vmatprep.mubr.f32.mxu0 %v10443_v60  ;;  %v2174_v6 = vld [vmem:[#allocation6 + $0x220] sm:$0xff]  ;;  %v13128_v35 = vsel %vm10469_vm8, 4294967295, %v13127_v35 }
  0xdd   : > { %8398 = vmatprep.mubr.msk.f32.mxu1 %vm10121_vm9, %v10149_v11  ;;  %8438 = vmatpush3.msra.mxu0 %v2176_v43  ;;  %13129 = vst [vmem:[#allocation53_spill] sm:$0xff] %v13128_v35  ;;  %v10474_v11 = vld [vmem:[%s9944_s10 + $0xb1] sm:$0xff]  ;;  %v470_v43 = vand.u32 15, %v296_v45  ;;  %v13130_v45 = vmov 0 }
  0xde   : > { %8439 = vmatprep.subr.mxu0 %v2175_v55  ;;  %8514 = vmatpush3.msra.mxu1 %v2516_v14  ;;  %v10481_v14 = vld [vmem:[%s9944_s10 + $0xb9] sm:$0xff] }
  0xdf   : > { %8319 = vmatmul.mubr.msk.f32.gmra.mxu0 %vm10450_vm7, %v10455_v61  ;;  %8515 = vmatprep.subr.mxu1 %v2515_v23  ;;  %vm10488_vm9 = vcmp.lt.s32.totalorder %v470_v43, 15  ;;  %v2513_v43 = vld [vmem:[#allocation6 + $0x2a8] sm:$0xff] }
  0xe0   : > { %8399 = vmatmul.mubr.f32.gmra.mxu1 %v10162_v20  ;;  %8321 = vmatprep.mubr.f32.mxu0 %v10462_v5  ;;  %v2173_v20 = vld [vmem:[#allocation6 + $0x218] sm:$0xff]  ;;  %v13131_v45 = vsel %vm10488_vm9, 4294967295, %v13130_v45 }
  0xe1   : > { %8401 = vmatprep.mubr.msk.f32.mxu1 %vm10144_vm10, %v10172_v24  ;;  %8440 = vmatpush3.msra.mxu0 %v2175_v55  ;;  %13132 = vst [vmem:[#allocation54_spill] sm:$0xff] %v13131_v45  ;;  %v10493_v24 = vld [vmem:[%s9944_s10 + $0xc1] sm:$0xff]  ;;  %v484_v55 = vand.u32 15, %v298_v59  ;;  %v13133_v59 = vmov 0 }
  0xe2   : > { %8441 = vmatprep.subr.mxu0 %v2174_v6  ;;  %8516 = vmatpush3.msra.mxu1 %v2515_v23  ;;  %v10500_v23 = vld [vmem:[%s9944_s10 + $0xc9] sm:$0xff] }
  0xe3   : > { %8322 = vmatmul.mubr.msk.f32.gmra.mxu0 %vm10469_vm8, %v10474_v11  ;;  %8517 = vmatprep.subr.mxu1 %v2514_v33  ;;  %vm10507_vm10 = vcmp.lt.s32.totalorder %v484_v55, 15  ;;  %v2512_v55 = vld [vmem:[#allocation6 + $0x2a0] sm:$0xff] }
  0xe4   : > { %8402 = vmatmul.mubr.f32.gmra.mxu1 %v10185_v38  ;;  %8324 = vmatprep.mubr.f32.mxu0 %v10481_v14  ;;  %v2172_v38 = vld [vmem:[#allocation6 + $0x210] sm:$0xff]  ;;  %v13134_v59 = vsel %vm10507_vm10, 4294967295, %v13133_v59 }
  0xe5   : > { %8404 = vmatprep.mubr.msk.f32.mxu1 %vm10167_vm11, %v10195_v49  ;;  %8442 = vmatpush3.msra.mxu0 %v2174_v6  ;;  %13135 = vst [vmem:[#allocation55_spill] sm:$0xff] %v13134_v59  ;;  %v10512_v49 = vld [vmem:[%s9944_s10 + $0xd1] sm:$0xff]  ;;  %v498_v6 = vand.u32 15, %v300_v10  ;;  %v13136_v10 = vmov 0 }
  0xe6   : > { %8443 = vmatprep.subr.mxu0 %v2173_v20  ;;  %8518 = vmatpush3.msra.mxu1 %v2514_v33  ;;  %v10519_v33 = vld [vmem:[%s9944_s10 + $0xd9] sm:$0xff] }
  0xe7   : > { %8325 = vmatmul.mubr.msk.f32.gmra.mxu0 %vm10488_vm9, %v10493_v24  ;;  %8519 = vmatprep.subr.mxu1 %v2513_v43  ;;  %vm10526_vm11 = vcmp.lt.s32.totalorder %v498_v6, 15  ;;  %v10556_v6 = vld [vmem:[%s9944_s10 + $0xf9] sm:$0xff] }
  0xe8   : > { %8405 = vmatmul.mubr.f32.gmra.mxu1 %v10208_v2  ;;  %8327 = vmatprep.mubr.f32.mxu0 %v10500_v23  ;;  %v2171_v2 = vld [vmem:[#allocation6 + $0x208] sm:$0xff]  ;;  %v13137_v10 = vsel %vm10526_vm11, 4294967295, %v13136_v10 }
  0xe9   : > { %8407 = vmatprep.mubr.msk.f32.mxu1 %vm10190_vm12, %v10218_v13  ;;  %8444 = vmatpush3.msra.mxu0 %v2173_v20  ;;  %13138 = vst [vmem:[#allocation56_spill] sm:$0xff] %v13137_v10  ;;  %v10531_v13 = vld [vmem:[%s9944_s10 + $0xe1] sm:$0xff]  ;;  %v512_v20 = vand.u32 15, %v302_v22  ;;  %vm13142_vm12 = vnez %v13090_v51 }
  0xea   : > { %8445 = vmatprep.subr.mxu0 %v2172_v38  ;;  %8520 = vmatpush3.msra.mxu1 %v2513_v43  ;;  %v10538_v43 = vld [vmem:[%s9944_s10 + $0xe9] sm:$0xff] }
  0xeb   : > { %8328 = vmatmul.mubr.msk.f32.gmra.mxu0 %vm10507_vm10, %v10512_v49  ;;  %8521 = vmatprep.subr.mxu1 %v2512_v55  ;;  %v2170_v22 = vld [vmem:[#allocation6 + $0x200] sm:$0xff] }
  0xec   : > { %8408 = vmatmul.mubr.f32.gmra.mxu1 %v10231_v31  ;;  %8330 = vmatprep.mubr.f32.mxu0 %v10519_v33  ;;  %v2511_v31 = vld [vmem:[#allocation6 + $0x298] sm:$0xff] }
  0xed   : > { %8410 = vmatprep.mubr.msk.f32.mxu1 %vm10213_vm13, %v10241_v53  ;;  %8446 = vmatpush3.msra.mxu0 %v2172_v38  ;;  %vm10545_vm13 = vcmp.lt.s32.totalorder %v512_v20, 15  ;;  %v10550_v53 = vld [vmem:[%s9944_s10 + $0xf1] sm:$0xff]  ;;  %v526_v38 = vand.u32 15, %v304_v41  ;;  %v13143_v41 = vmov 0 }
  0xee   : > { %8447 = vmatprep.subr.mxu0 %v2171_v2  ;;  %8522 = vmatpush3.msra.mxu1 %v2512_v55  ;;  %v13140_v27 = vsel %vm10545_vm13, 4294967295, %v13139_v27  ;;  %v10559_v55 = vld [vmem:[%s9944_s10 + $0x107] sm:$0xff]  ;;  %v10577_v20 = vld [vmem:[%s9944_s10 + $0x10f] sm:$0xff] }
  0xef   : > { %8331 = vmatmul.mubr.msk.f32.gmra.mxu0 %vm10526_vm11, %v10531_v13  ;;  %13141 = vst [vmem:[#allocation57_spill] sm:$0xff] %v13140_v27  ;;  %8523 = vmatprep.subr.mxu1 %v2511_v31  ;;  %vm13146_vm11 = vnez %v13095_v29  ;;  %13147 = vst [vmem:[#allocation59_spill] sm:$0xff] %v10577_v20  ;;  %v2138_v29 = vld [vmem:[%s9944_s10 + $0x20] sm:$0xff] }
  0xf0   : > { %8411 = vmatmul.mubr.f32.gmra.mxu1 %v10253_v40  ;;  %8333 = vmatprep.mubr.f32.mxu0 %v10538_v43  ;;  %v2510_v40 = vld [vmem:[#allocation6 + $0x290] sm:$0xff] }
  0xf1   : > { %8413 = vmatprep.mubr.msk.f32.mxu1 %vm13142_vm12, %v10264_v50  ;;  %8448 = vmatpush3.msra.mxu0 %v2171_v2  ;;  %vm10566_vm12 = vcmp.lt.s32.totalorder %v526_v38, 15  ;;  %v10571_v50 = vld [vmem:[%s9944_s10 + $0x101] sm:$0xff] }
  0xf2   : > { %8449 = vmatprep.subr.mxu0 %v2170_v22  ;;  %8524 = vmatpush3.msra.mxu1 %v2511_v31  ;;  %v13144_v41 = vsel %vm10566_vm12, 4294967295, %v13143_v41  ;;  %v2509_v2 = vld [vmem:[#allocation6 + $0x288] sm:$0xff]  ;;  %v2508_v38 = vld [vmem:[#allocation6 + $0x280] sm:$0xff] }
  0xf3   : > { %8334 = vmatmul.mubr.msk.f32.gmra.mxu0 %vm10545_vm13, %v10550_v53  ;;  %13145 = vst [vmem:[#allocation58_spill] sm:$0xff] %v13144_v41  ;;  %8525 = vmatprep.subr.mxu1 %v2510_v40  ;;  %v2137_v31 = vld [vmem:[%s9944_s10 + $0x18] sm:$0xff] }
  0xf4   : > { %8414 = vmatmul.mubr.f32.gmra.mxu1 %v10276_v21  ;;  %8336 = vmatprep.mubr.f32.mxu0 %v10556_v6  ;;  %v2861_v21 = vld [vmem:[#allocation6 + $0x378] sm:$0xff] }
  0xf5   : > { %8416 = vmatprep.mubr.msk.f32.mxu1 %vm13146_vm11, %v10559_v55  ;;  %8450 = vmatpush3.msra.mxu0 %v2170_v22  ;;  %v10587_v22 = vld [vmem:[%s9944_s10 + $0x28] sm:$0xff] }
  0xf6   : > { %8526 = vmatpush3.msra.mxu1 %v2510_v40  ;;  %8579 = vmatprep.subr.mxu0 %v2861_v21  ;;  %v2860_v40 = vld [vmem:[#allocation6 + $0x370] sm:$0xff] }
  0xf7   : > { %8337 = vmatmul.mubr.msk.f32.gmra.mxu0 %vm10566_vm12, %v10571_v50  ;;  %8527 = vmatprep.subr.mxu1 %v2509_v2 }
  0xf8   : > { %8417 = vmatmul.mubr.f32.gmra.mxu1 %v10577_v20  ;;  %8451 = vmatprep.mubr.f32.mxu0 %v2137_v31  ;;  %v10593_v20 = vld [vmem:[%s9944_s10 + $0x30] sm:$0xff]  ;;  %v2859_v31 = vld [vmem:[#allocation6 + $0x368] sm:$0xff] }
  0xf9   : > { %8528 = vmatpush3.msra.mxu1 %v2509_v2  ;;  %8531 = vmatprep.mubr.f32.mxu1 %v10292_v37  ;;  %v10597_v2 = vld [vmem:[%s9944_s10 + $0x38] sm:$0xff] }
  0xfa   : > { %8529 = vmatprep.subr.mxu1 %v2508_v38  ;;  %v3167_v37 = vld [vmem:[#allocation6 + $0x3f8] sm:$0xff] }
  0xfb   : > { %8452 = vmatmul.mubr.f32.vlgmr.msra.gmra.mxu0 %v2138_v29  ;;  %8530 = vmatpush3.msra.mxu1 %v2508_v38  ;;  %v2858_v29 = vld [vmem:[#allocation6 + $0x360] sm:$0xff]  ;;  %v3166_v38 = vld [vmem:[#allocation6 + $0x3f0] sm:$0xff] }
  0xfc   : > { %8580 = vmatpush3.msra.mxu0 %v2861_v21  ;;  %8532 = vmatmul.mubr.msk.f32.vlgmr.msra.gmra.mxu1 %vm10282_vm15, %v10302_v15  ;;  %v10606_v15 = vld [vmem:[%s9944_s10 + $0x40] sm:$0xff]  ;;  %v2857_v21 = vld [vmem:[#allocation6 + $0x358] sm:$0xff] }
  0xfd   : > { %8454 = vmatprep.mubr.f32.mxu0 %v10587_v22  ;;  %8581 = vmatprep.subr.mxu0 %v2860_v40 }
  0xfe   : > { %8534 = vmatprep.mubr.f32.mxu1 %v10307_v4  ;;  %8582 = vmatpush3.msra.mxu0 %v2860_v40  ;;  %v10610_v4 = vld [vmem:[%s9944_s10 + $0x48] sm:$0xff]  ;;  %v2856_v40 = vld [vmem:[#allocation6 + $0x350] sm:$0xff] }
  0xff   : > { %8455 = vmatmul.mubr.f32.gmra.mxu0 %v10593_v20  ;;  %8583 = vmatprep.subr.mxu0 %v2859_v31 }
 0x100   : > { %8535 = vmatmul.mubr.msk.f32.gmra.mxu1 %vm10297_vm14, %v10322_v9  ;;  %8457 = vmatprep.mubr.f32.mxu0 %v10597_v2  ;;  %v10618_v9 = vld [vmem:[%s9944_s10 + $0x50] sm:$0xff] }
 0x101   : > { %8537 = vmatprep.mubr.f32.mxu1 %v10329_v30  ;;  %8584 = vmatpush3.msra.mxu0 %v2859_v31  ;;  %v10622_v30 = vld [vmem:[%s9944_s10 + $0x58] sm:$0xff] }
 0x102   : > { %8585 = vmatprep.subr.mxu0 %v2858_v29  ;;  %8659 = vmatprep.subr.mxu1 %v3167_v37  ;;  %v3165_v31 = vld [vmem:[#allocation6 + $0x3e8] sm:$0xff] }
 0x103   : > { %8458 = vmatmul.mubr.f32.gmra.mxu0 %v10606_v15  ;;  %8660 = vmatpush3.msra.mxu1 %v3167_v37  ;;  %v3164_v37 = vld [vmem:[#allocation6 + $0x3e0] sm:$0xff] }
 0x104   : > { %8538 = vmatmul.mubr.msk.f32.gmra.mxu1 %vm10317_vm0, %v10341_v63  ;;  %8460 = vmatprep.mubr.f32.mxu0 %v10610_v4  ;;  %v10630_v63 = vld [vmem:[%s9944_s10 + $0x60] sm:$0xff] }
 0x105   : > { %8540 = vmatprep.mubr.f32.mxu1 %v10348_v54  ;;  %8586 = vmatpush3.msra.mxu0 %v2858_v29  ;;  %v10634_v54 = vld [vmem:[%s9944_s10 + $0x68] sm:$0xff] }
 0x106   : > { %8587 = vmatprep.subr.mxu0 %v2857_v21  ;;  %8661 = vmatprep.subr.mxu1 %v3166_v38  ;;  %v2855_v29 = vld [vmem:[#allocation6 + $0x348] sm:$0xff] }
 0x107   : > { %8461 = vmatmul.mubr.f32.gmra.mxu0 %v10618_v9  ;;  %8662 = vmatpush3.msra.mxu1 %v3166_v38  ;;  %v13153_v38 = vld [vmem:[#allocation29_spill] sm:$0xff] }
 0x108   : > { %8541 = vmatmul.mubr.msk.f32.gmra.mxu1 %vm10336_vm1, %v10360_v8  ;;  %8463 = vmatprep.mubr.f32.mxu0 %v10622_v30  ;;  %v2854_v8 = vld [vmem:[#allocation6 + $0x340] sm:$0xff] }
 0x109   : > { %8543 = vmatprep.mubr.f32.mxu1 %v10367_v1  ;;  %8588 = vmatpush3.msra.mxu0 %v2857_v21  ;;  %v3163_v1 = vld [vmem:[#allocation6 + $0x3d8] sm:$0xff] }
 0x10a   : > { %8589 = vmatprep.subr.mxu0 %v2856_v40  ;;  %8663 = vmatprep.subr.mxu1 %v3165_v31  ;;  %v3159_v21 = vld [vmem:[#allocation6 + $0x3b8] sm:$0xff] }
 0x10b   : > { %8464 = vmatmul.mubr.f32.gmra.mxu0 %v10630_v63  ;;  %8664 = vmatpush3.msra.mxu1 %v3165_v31  ;;  %v13155_v31 = vld [vmem:[#allocation32_spill] sm:$0xff] }
 0x10c   : > { %8544 = vmatmul.mubr.msk.f32.gmra.mxu1 %vm10355_vm2, %v10379_v17  ;;  %8466 = vmatprep.mubr.f32.mxu0 %v10634_v54  ;;  %v2853_v17 = vld [vmem:[#allocation6 + $0x338] sm:$0xff] }
 0x10d   : > { %8546 = vmatprep.mubr.f32.mxu1 %v10386_v57  ;;  %8590 = vmatpush3.msra.mxu0 %v2856_v40  ;;  %v3162_v57 = vld [vmem:[#allocation6 + $0x3d0] sm:$0xff] }
 0x10e   : > { %8591 = vmatprep.subr.mxu0 %v2855_v29  ;;  %8665 = vmatprep.subr.mxu1 %v3164_v37  ;;  %v3158_v40 = vld [vmem:[#allocation6 + $0x3b0] sm:$0xff] }
 0x10f   : > { %8467 = vmatmul.mubr.f32.gmra.mxu0 %v10067_v32  ;;  %8666 = vmatpush3.msra.mxu1 %v3164_v37  ;;  %v13148_v32 = vld [vmem:[#allocation22_spill] sm:$0xff]  ;;  %v13157_v37 = vld [vmem:[#allocation35_spill] sm:$0xff] }
 0x110   : > { %8547 = vmatmul.mubr.msk.f32.gmra.mxu1 %vm10374_vm3, %v10398_v26  ;;  %8469 = vmatprep.mubr.f32.mxu0 %v10073_v34  ;;  %v2852_v34 = vld [vmem:[#allocation6 + $0x330] sm:$0xff]  ;;  %v3161_v26 = vld [vmem:[#allocation6 + $0x3c8] sm:$0xff] }
 0x111   : > { %8549 = vmatprep.mubr.f32.mxu1 %v10405_v3  ;;  %8592 = vmatpush3.msra.mxu0 %v2855_v29  ;;  %v2851_v3 = vld [vmem:[#allocation6 + $0x328] sm:$0xff] }
 0x112   : > { %8593 = vmatprep.subr.mxu0 %v2854_v8  ;;  %8667 = vmatprep.subr.mxu1 %v3163_v1  ;;  %v3157_v29 = vld [vmem:[#allocation6 + $0x3a8] sm:$0xff] }
 0x113   : > { %8470 = vmatmul.mubr.f32.gmra.mxu0 %v10090_v42  ;;  %8668 = vmatpush3.msra.mxu1 %v3163_v1  ;;  %v13149_v42 = vld [vmem:[#allocation23_spill] sm:$0xff]  ;;  %v13159_v1 = vld [vmem:[#allocation38_spill] sm:$0xff] }
 0x114   : > { %8550 = vmatmul.mubr.msk.f32.gmra.mxu1 %vm10393_vm4, %v10417_v36  ;;  %8472 = vmatprep.mubr.f32.mxu0 %v10096_v44  ;;  %v13150_v44 = vld [vmem:[#allocation25_spill] sm:$0xff] }
 0x115   : > { %8552 = vmatprep.mubr.f32.mxu1 %v10424_v52  ;;  %8594 = vmatpush3.msra.mxu0 %v2854_v8  ;;  %v3160_v36 = vld [vmem:[#allocation6 + $0x3c0] sm:$0xff]  ;;  %v13151_v52 = vld [vmem:[#allocation26_spill] sm:$0xff] }
 0x116   : > { %8595 = vmatprep.subr.mxu0 %v2853_v17  ;;  %8669 = vmatprep.subr.mxu1 %v3162_v57  ;;  %v3156_v8 = vld [vmem:[#allocation6 + $0x3a0] sm:$0xff] }
 0x117   : > { %8473 = vmatmul.mubr.f32.gmra.mxu0 %v13148_v32  ;;  %8670 = vmatpush3.msra.mxu1 %v3162_v57  ;;  %v13162_v57 = vld [vmem:[#allocation41_spill] sm:$0xff] }
 0x118   : > { %8553 = vmatmul.mubr.msk.f32.gmra.mxu1 %vm10412_vm5, %v10436_v48  ;;  %8475 = vmatprep.mubr.f32.mxu0 %v13149_v42  ;;  %v13152_v48 = vld [vmem:[#allocation28_spill] sm:$0xff] }
 0x119   : > { %8555 = vmatprep.mubr.f32.mxu1 %v10443_v60  ;;  %8596 = vmatpush3.msra.mxu0 %v2853_v17  ;;  %v2850_v60 = vld [vmem:[#allocation6 + $0x320] sm:$0xff] }
 0x11a   : > { %8597 = vmatprep.subr.mxu0 %v2852_v34  ;;  %8671 = vmatprep.subr.mxu1 %v3161_v26  ;;  %v2846_v17 = vld [vmem:[#allocation6 + $0x300] sm:$0xff] }
 0x11b   : > { %8476 = vmatmul.mubr.f32.gmra.mxu0 %v13150_v44  ;;  %8672 = vmatpush3.msra.mxu1 %v3161_v26  ;;  %v10700_v32 = vld [vmem:[%s9944_s10 + $0x109] sm:$0xff]  ;;  %v2783_v44 = vld [vmem:[%s9944_s10 + $0x37] sm:$0xff] }
 0x11c   : > { %8556 = vmatmul.mubr.msk.f32.gmra.mxu1 %vm10431_vm6, %v10455_v61  ;;  %8478 = vmatprep.mubr.f32.mxu0 %v13151_v52  ;;  %v13154_v61 = vld [vmem:[#allocation31_spill] sm:$0xff] }
 0x11d   : > { %8558 = vmatprep.mubr.f32.mxu1 %v10462_v5  ;;  %8598 = vmatpush3.msra.mxu0 %v2852_v34  ;;  %v2849_v5 = vld [vmem:[#allocation6 + $0x318] sm:$0xff] }
 0x11e   : > { %8599 = vmatprep.subr.mxu0 %v2851_v3  ;;  %8673 = vmatprep.subr.mxu1 %v3160_v36  ;;  %v10712_v34 = vld [vmem:[%s9944_s10 + $0x111] sm:$0xff]  ;;  %v2781_v26 = vld [vmem:[%s9944_s10 + $0x27] sm:$0xff] }
 0x11f   : > { %8479 = vmatmul.mubr.f32.gmra.mxu0 %v13152_v48  ;;  %8674 = vmatpush3.msra.mxu1 %v3160_v36  ;;  %v2782_v42 = vld [vmem:[%s9944_s10 + $0x2f] sm:$0xff] }
 0x120   : > { %8559 = vmatmul.mubr.msk.f32.gmra.mxu1 %vm10450_vm7, %v10474_v11  ;;  %8481 = vmatprep.mubr.f32.mxu0 %v13153_v38  ;;  %v13156_v11 = vld [vmem:[#allocation34_spill] sm:$0xff] }
 0x121   : > { %8561 = vmatprep.mubr.f32.mxu1 %v10481_v14  ;;  %8600 = vmatpush3.msra.mxu0 %v2851_v3  ;;  %v2848_v14 = vld [vmem:[#allocation6 + $0x310] sm:$0xff] }
 0x122   : > { %8601 = vmatprep.subr.mxu0 %v2850_v60  ;;  %8675 = vmatprep.subr.mxu1 %v3159_v21  ;;  %v3504_v3 = vld [vmem:[#allocation6 + $0x470] sm:$0xff] }
 0x123   : > { %8482 = vmatmul.mubr.f32.gmra.mxu0 %v13154_v61  ;;  %8676 = vmatpush3.msra.mxu1 %v3159_v21  ;;  %v3503_v21 = vld [vmem:[#allocation6 + $0x468] sm:$0xff] }
 0x124   : > { %8562 = vmatmul.mubr.msk.f32.gmra.mxu1 %vm10469_vm8, %v10493_v24  ;;  %8484 = vmatprep.mubr.f32.mxu0 %v13155_v31  ;;  %v13158_v24 = vld [vmem:[#allocation37_spill] sm:$0xff] }
 0x125   : > { %8564 = vmatprep.mubr.f32.mxu1 %v10500_v23  ;;  %8602 = vmatpush3.msra.mxu0 %v2850_v60  ;;  %v2847_v23 = vld [vmem:[#allocation6 + $0x308] sm:$0xff] }
 0x126   : > { %8603 = vmatprep.subr.mxu0 %v2849_v5  ;;  %8677 = vmatprep.subr.mxu1 %v3158_v40  ;;  %v2784_v60 = vld [vmem:[%s9944_s10 + $0x3f] sm:$0xff] }
 0x127   : > { %8485 = vmatmul.mubr.f32.gmra.mxu0 %v13156_v11  ;;  %8678 = vmatpush3.msra.mxu1 %v3158_v40 }
 0x128   : > { %8565 = vmatmul.mubr.msk.f32.gmra.mxu1 %vm10488_vm9, %v10512_v49  ;;  %8487 = vmatprep.mubr.f32.mxu0 %v13157_v37  ;;  %v13160_v49 = vld [vmem:[#allocation40_spill] sm:$0xff]  ;;  %vm13161_vm9 = vnez %v13137_v10 }
 0x129   : > { %8567 = vmatprep.mubr.f32.mxu1 %v10519_v33  ;;  %8604 = vmatpush3.msra.mxu0 %v2849_v5  ;;  %v3155_v33 = vld [vmem:[#allocation6 + $0x398] sm:$0xff] }
 0x12a   : > { %8605 = vmatprep.subr.mxu0 %v2848_v14  ;;  %8679 = vmatprep.subr.mxu1 %v3157_v29 }
 0x12b   : > { %8488 = vmatmul.mubr.f32.gmra.mxu0 %v13158_v24  ;;  %8680 = vmatpush3.msra.mxu1 %v3157_v29  ;;  %v2786_v29 = vld [vmem:[%s9944_s10 + $0x4f] sm:$0xff] }
 0x12c   : > { %8568 = vmatmul.mubr.msk.f32.gmra.mxu1 %vm10507_vm10, %v10531_v13  ;;  %8490 = vmatprep.mubr.f32.mxu0 %v13159_v1  ;;  %v10697_v13 = vld [vmem:[%s9944_s10 + $0x108] sm:$0xff] }
 0x12d   : > { %8570 = vmatprep.mubr.f32.mxu1 %v10538_v43  ;;  %8606 = vmatpush3.msra.mxu0 %v2848_v14  ;;  %v3154_v43 = vld [vmem:[#allocation6 + $0x390] sm:$0xff] }
 0x12e   : > { %8607 = vmatprep.subr.mxu0 %v2847_v23  ;;  %8681 = vmatprep.subr.mxu1 %v3156_v8  ;;  %v13165_v14 = vld [vmem:[#allocation15_spill] sm:$0xff] }
 0x12f   : > { %8491 = vmatmul.mubr.f32.gmra.mxu0 %v13160_v49  ;;  %8682 = vmatpush3.msra.mxu1 %v3156_v8  ;;  %v3501_v49 = vld [vmem:[#allocation6 + $0x458] sm:$0xff] }
 0x130   : > { %8571 = vmatmul.mubr.msk.f32.gmra.mxu1 %vm13161_vm9, %v10550_v53  ;;  %8493 = vmatprep.mubr.f32.mxu0 %v13162_v57  ;;  %v10708_v53 = vld [vmem:[%s9944_s10 + $0x110] sm:$0xff] }
 0x131   : > { %8573 = vmatprep.mubr.f32.mxu1 %v10556_v6  ;;  %8608 = vmatpush3.msra.mxu0 %v2847_v23  ;;  %v3153_v6 = vld [vmem:[#allocation6 + $0x388] sm:$0xff] }
 0x132   : > { %8683 = vmatprep.subr.mxu1 %v3155_v33  ;;  %8609 = vmatprep.subr.mxu0 %v2846_v17 }
 0x133   : > { %8494 = vmatmul.mubr.f32.gmra.mxu0 %v10273_v0  ;;  %8684 = vmatpush3.msra.mxu1 %v3155_v33  ;;  %v3505_v0 = vld [vmem:[#allocation6 + $0x478] sm:$0xff] }
 0x134   : > { %8574 = vmatmul.mubr.msk.f32.gmra.mxu1 %vm10545_vm13, %v10571_v50  ;;  %8496 = vmatprep.mubr.f32.mxu0 %v10697_v13  ;;  %v3152_v50 = vld [vmem:[#allocation6 + $0x380] sm:$0xff]  ;;  %vm13163_vm13 = vnez %v13036_v39  ;;  %v13167_v33 = vld [vmem:[#allocation16_spill] sm:$0xff] }
 0x135   : > { %8685 = vmatprep.subr.mxu1 %v3154_v43  ;;  %8576 = vmatprep.mubr.f32.mxu1 %v10700_v32 }
 0x136   : > { %8610 = vmatpush3.msra.mxu0 %v2846_v17  ;;  %8686 = vmatpush3.msra.mxu1 %v3154_v43  ;;  %v2788_v17 = vld [vmem:[%s9944_s10 + $0x5f] sm:$0xff]  ;;  %v2789_v43 = vld [vmem:[%s9944_s10 + $0x67] sm:$0xff] }
 0x137   : > { %8497 = vmatmul.mubr.f32.gmra.mxu0 %v10708_v53  ;;  %8687 = vmatprep.subr.mxu1 %v3153_v6 }
 0x138   : > { %8577 = vmatmul.mubr.msk.f32.gmra.mxu1 %vm10566_vm12, %v10712_v34  ;;  %8611 = vmatprep.mubr.msk.f32.mxu0 %vm13163_vm13, %v2781_v26  ;;  %vm13164_vm13 = vnez %v13039_v46  ;;  %vm13166_vm12 = vnez %v13165_v14  ;;  %v3144_v14 = vld [vmem:[%s9944_s10 + $0xf0] sm:$0xff] }
 0x139   : > { %8688 = vmatpush3.msra.mxu1 %v3153_v6  ;;  %8739 = vmatprep.subr.mxu0 %v3505_v0  ;;  %v2807_v46 = vld [vmem:[%s9944_s10 + $0xf7] sm:$0xff] }
 0x13a   : > { %8689 = vmatprep.subr.mxu1 %v3152_v50  ;;  %8691 = vmatprep.mubr.f32.mxu1 %v10587_v22  ;;  %v8133_v36 = vpop.f32.mrf.mxu0  ;;  %v2785_v22 = vld [vmem:[%s9944_s10 + $0x47] sm:$0xff] }
 0x13b   : > { %v8213_v52 = vpop.f32.mrf.mxu1  ;;  %8612 = vmatmul.mubr.f32.vlgmr.msra.gmra.mxu0 %v2782_v42  ;;  %8690 = vmatpush3.msra.mxu1 %v3152_v50  ;;  %v13169_v42 = vld [vmem:[#allocation17_spill] sm:$0xff] }
 0x13c   : > { %v10724_v48 = vadd.f32 %v8213_v52, %v8133_v36  ;;  %8740 = vmatpush3.msra.mxu0 %v3505_v0  ;;  %8692 = vmatmul.mubr.f32.vlgmr.msra.gmra.mxu1 %v10593_v20  ;;  %v1013_v38 = vpop.f32.mrf.mxu0  ;;  %v3502_v20 = vld [vmem:[#allocation6 + $0x460] sm:$0xff] }
 0x13d   : > { %v1238_v61 = vpop.f32.mrf.mxu1  ;;  %8614 = vmatprep.mubr.msk.f32.mxu0 %vm13164_vm13, %v2783_v44  ;;  %8741 = vmatprep.subr.mxu0 %v3504_v3  ;;  %v3128_v36 = vld [vmem:[%s9944_s10 + $0x70] sm:$0xff] }
 0x13e   : > { %v10731_v5 = vadd.f32 %v1238_v61, %v1013_v38  ;;  %8694 = vmatprep.mubr.f32.mxu1 %v10597_v2  ;;  %8742 = vmatpush3.msra.mxu0 %v3504_v3  ;;  %v8136_v40 = vpop.f32.mrf.mxu0  ;;  %v2787_v2 = vld [vmem:[%s9944_s10 + $0x57] sm:$0xff] }
 0x13f   : > { %v8216_v31 = vpop.f32.mrf.mxu1  ;;  %8615 = vmatmul.mubr.f32.gmra.mxu0 %v2784_v60  ;;  %8743 = vmatprep.subr.mxu0 %v3503_v21  ;;  %v2791_v52 = vld [vmem:[%s9944_s10 + $0x77] sm:$0xff] }
 0x140   : > { %v10734_v11 = vadd.f32 %v8216_v31, %v8136_v40  ;;  %8695 = vmatmul.mubr.f32.gmra.mxu1 %v10606_v15  ;;  %8617 = vmatprep.mubr.msk.f32.mxu0 %vm13166_vm12, %v2785_v22  ;;  %v1023_v37 = vpop.f32.mrf.mxu0  ;;  %vm13168_vm12 = vnez %v13167_v33  ;;  %v3499_v61 = vld [vmem:[#allocation6 + $0x448] sm:$0xff] }
 0x141   : > { %v1248_v24 = vpop.f32.mrf.mxu1  ;;  %8697 = vmatprep.mubr.f32.mxu1 %v10610_v4  ;;  %8744 = vmatpush3.msra.mxu0 %v3503_v21  ;;  %v3129_v21 = vld [vmem:[%s9944_s10 + $0x78] sm:$0xff]  ;;  %v2806_v33 = vld [vmem:[%s9944_s10 + $0xef] sm:$0xff] }
 0x142   : > { %v10742_v23 = vadd.f32 %v1248_v24, %v1023_v37  ;;  %8745 = vmatprep.subr.mxu0 %v3502_v20  ;;  %v13171_v40 = vld [vmem:[#allocation18_spill] sm:$0xff] }
 0x143   : > { %v8139_v8 = vpop.f32.mrf.mxu0  ;;  %v8219_v1 = vpop.f32.mrf.mxu1  ;;  %8618 = vmatmul.mubr.f32.gmra.mxu0 %v2786_v29  ;;  %v3130_v29 = vld [vmem:[%s9944_s10 + $0x80] sm:$0xff] }
 0x144   : > { %v10744_v15 = vadd.f32 %v8219_v1, %v8139_v8  ;;  %8698 = vmatmul.mubr.f32.gmra.mxu1 %v10618_v9  ;;  %8620 = vmatprep.mubr.msk.f32.mxu0 %vm13168_vm12, %v2787_v2  ;;  %v3500_v9 = vld [vmem:[#allocation6 + $0x450] sm:$0xff]  ;;  %vm13170_vm12 = vnez %v13169_v42  ;;  %v3131_v2 = vld [vmem:[%s9944_s10 + $0x88] sm:$0xff] }
 0x145   : > { %v1033_v4 = vpop.f32.mrf.mxu0  ;;  %v1258_v57 = vpop.f32.mrf.mxu1  ;;  %8700 = vmatprep.mubr.f32.mxu1 %v10622_v30  ;;  %8746 = vmatpush3.msra.mxu0 %v3502_v20  ;;  %v2790_v30 = vld [vmem:[%s9944_s10 + $0x6f] sm:$0xff]  ;;  %v2793_v37 = vld [vmem:[%s9944_s10 + $0x87] sm:$0xff] }
 0x146   : > { %v10752_v6 = vadd.f32 %v1258_v57, %v1033_v4  ;;  %8747 = vmatprep.subr.mxu0 %v3501_v49  ;;  %v13173_v4 = vld [vmem:[#allocation19_spill] sm:$0xff] }
 0x147   : > { %v8142_v26 = vpop.f32.mrf.mxu0  ;;  %v8222_v0 = vpop.f32.mrf.mxu1  ;;  %8621 = vmatmul.mubr.f32.gmra.mxu0 %v2788_v17  ;;  %v2794_v57 = vld [vmem:[%s9944_s10 + $0x8f] sm:$0xff]  ;;  %v2805_v42 = vld [vmem:[%s9944_s10 + $0xe7] sm:$0xff] }
 0x148   : > { %v10754_v50 = vadd.f32 %v8222_v0, %v8142_v26  ;;  %8701 = vmatmul.mubr.f32.gmra.mxu1 %v10630_v63  ;;  %8623 = vmatprep.mubr.msk.f32.mxu0 %vm13170_vm12, %v2789_v43  ;;  %vm13172_vm12 = vnez %v13171_v40  ;;  %v3132_v0 = vld [vmem:[%s9944_s10 + $0x90] sm:$0xff]  ;;  %v3142_v40 = vld [vmem:[%s9944_s10 + $0xe0] sm:$0xff] }
 0x149   : > { %v1043_v44 = vpop.f32.mrf.mxu0  ;;  %v1268_v3 = vpop.f32.mrf.mxu1  ;;  %8703 = vmatprep.mubr.f32.mxu1 %v10634_v54  ;;  %8748 = vmatpush3.msra.mxu0 %v3501_v49  ;;  %v2792_v54 = vld [vmem:[%s9944_s10 + $0x7f] sm:$0xff] }
 0x14a   : > { %v10763_v60 = vadd.f32 %v1268_v3, %v1043_v44  ;;  %8749 = vmatprep.subr.mxu0 %v3500_v9  ;;  %v3498_v49 = vld [vmem:[#allocation6 + $0x440] sm:$0xff]  ;;  %v3133_v44 = vld [vmem:[%s9944_s10 + $0x98] sm:$0xff] }
 0x14b   : > { %v8145_v38 = vpop.f32.mrf.mxu0  ;;  %v8225_v63 = vpop.f32.mrf.mxu1  ;;  %8624 = vmatmul.mubr.f32.gmra.mxu0 %v2790_v30 }
 0x14c   : > { %v10766_v22 = vadd.f32 %v8225_v63, %v8145_v38  ;;  %8704 = vmatmul.mubr.f32.gmra.mxu1 %v3128_v36  ;;  %8626 = vmatprep.mubr.msk.f32.mxu0 %vm13172_vm12, %v2791_v52  ;;  %vm13174_vm12 = vnez %v13173_v4  ;;  %v3497_v52 = vld [vmem:[#allocation6 + $0x438] sm:$0xff] }
 0x14d   : > { %v1053_v31 = vpop.f32.mrf.mxu0  ;;  %v1278_v20 = vpop.f32.mrf.mxu1  ;;  %8706 = vmatprep.mubr.f32.mxu1 %v3129_v21  ;;  %8750 = vmatpush3.msra.mxu0 %v3500_v9  ;;  %v2795_v9 = vld [vmem:[%s9944_s10 + $0x97] sm:$0xff]  ;;  %v2796_v63 = vld [vmem:[%s9944_s10 + $0x9f] sm:$0xff] }
 0x14e   : > { %v10773_v24 = vadd.f32 %v1278_v20, %v1053_v31  ;;  %8751 = vmatprep.subr.mxu0 %v3499_v61  ;;  %v13175_v38 = vld [vmem:[#allocation20_spill] sm:$0xff]  ;;  %v3134_v31 = vld [vmem:[%s9944_s10 + $0xa0] sm:$0xff] }
 0x14f   : > { %v8148_v8 = vpop.f32.mrf.mxu0  ;;  %v8228_v1 = vpop.f32.mrf.mxu1  ;;  %8627 = vmatmul.mubr.f32.gmra.mxu0 %v2792_v54  ;;  %v2797_v20 = vld [vmem:[%s9944_s10 + $0xa7] sm:$0xff]  ;;  %v2804_v4 = vld [vmem:[%s9944_s10 + $0xdf] sm:$0xff] }
 0x150   : > { %v10776_v17 = vadd.f32 %v8228_v1, %v8148_v8  ;;  %8707 = vmatmul.mubr.f32.gmra.mxu1 %v3130_v29  ;;  %8629 = vmatprep.mubr.msk.f32.mxu0 %vm13174_vm12, %v2793_v37  ;;  %vm13176_vm12 = vnez %v13175_v38  ;;  %v3135_v37 = vld [vmem:[%s9944_s10 + $0xa8] sm:$0xff]  ;;  %v3496_v1 = vld [vmem:[#allocation6 + $0x430] sm:$0xff] }
 0x151   : > { %v1063_v43 = vpop.f32.mrf.mxu0  ;;  %v1288_v26 = vpop.f32.mrf.mxu1  ;;  %8709 = vmatprep.mubr.f32.mxu1 %v3131_v2  ;;  %8752 = vmatpush3.msra.mxu0 %v3499_v61  ;;  %v2803_v38 = vld [vmem:[%s9944_s10 + $0xd7] sm:$0xff] }
 0x152   : > { %v10783_v30 = vadd.f32 %v1288_v26, %v1063_v43  ;;  %8753 = vmatprep.subr.mxu0 %v3498_v49  ;;  %v13177_v43 = vld [vmem:[#allocation21_spill] sm:$0xff] }
 0x153   : > { %v8151_v3 = vpop.f32.mrf.mxu0  ;;  %v8231_v36 = vpop.f32.mrf.mxu1  ;;  %8630 = vmatmul.mubr.f32.gmra.mxu0 %v2794_v57 }
 0x154   : > { %v10786_v21 = vadd.f32 %v8231_v36, %v8151_v3  ;;  %8710 = vmatmul.mubr.f32.gmra.mxu1 %v3132_v0  ;;  %8632 = vmatprep.mubr.msk.f32.mxu0 %vm13176_vm12, %v2795_v9  ;;  %vm13178_vm12 = vnez %v13177_v43  ;;  %v3136_v9 = vld [vmem:[%s9944_s10 + $0xb0] sm:$0xff]  ;;  %v3137_v36 = vld [vmem:[%s9944_s10 + $0xb8] sm:$0xff] }
 0x155   : > { %v1073_v61 = vpop.f32.mrf.mxu0  ;;  %v1298_v54 = vpop.f32.mrf.mxu1  ;;  %8712 = vmatprep.mubr.f32.mxu1 %v3133_v44  ;;  %8754 = vmatpush3.msra.mxu0 %v3498_v49  ;;  %v2798_v49 = vld [vmem:[%s9944_s10 + $0xaf] sm:$0xff]  ;;  %v2799_v44 = vld [vmem:[%s9944_s10 + $0xb7] sm:$0xff] }
 0x156   : > { %v10793_v29 = vadd.f32 %v1298_v54, %v1073_v61  ;;  %8755 = vmatprep.subr.mxu0 %v3497_v52  ;;  %v3495_v54 = vld [vmem:[#allocation6 + $0x428] sm:$0xff]  ;;  %v3140_v43 = vld [vmem:[%s9944_s10 + $0xd0] sm:$0xff] }
 0x157   : > { %v8154_v2 = vpop.f32.mrf.mxu0  ;;  %v8234_v8 = vpop.f32.mrf.mxu1  ;;  %8633 = vmatmul.mubr.f32.gmra.mxu0 %v2796_v63 }
 0x158   : > { %v10796_v57 = vadd.f32 %v8234_v8, %v8154_v2  ;;  %8713 = vmatmul.mubr.f32.gmra.mxu1 %v3134_v31  ;;  %8635 = vmatprep.mubr.msk.f32.mxu0 %vm13178_vm12, %v2797_v20  ;;  %v13179_v20 = vld [vmem:[#allocation24_spill] sm:$0xff]  ;;  %v3138_v8 = vld [vmem:[%s9944_s10 + $0xc0] sm:$0xff] }
 0x159   : > { %v1083_v26 = vpop.f32.mrf.mxu0  ;;  %v1308_v0 = vpop.f32.mrf.mxu1  ;;  %8715 = vmatprep.mubr.f32.mxu1 %v3135_v37  ;;  %8756 = vmatpush3.msra.mxu0 %v3497_v52  ;;  %vm13180_vm12 = vnez %v13179_v20  ;;  %v2800_v52 = vld [vmem:[%s9944_s10 + $0xbf] sm:$0xff]  ;;  %v2802_v20 = vld [vmem:[%s9944_s10 + $0xcf] sm:$0xff] }
 0x15a   : > { %v10803_v3 = vadd.f32 %v1308_v0, %v1083_v26  ;;  %8757 = vmatprep.subr.mxu0 %v3496_v1  ;;  %v2801_v26 = vld [vmem:[%s9944_s10 + $0xc7] sm:$0xff] }
 0x15b   : > { %v8157_v63 = vpop.f32.mrf.mxu0  ;;  %v8237_v61 = vpop.f32.mrf.mxu1  ;;  %8636 = vmatmul.mubr.f32.gmra.mxu0 %v2798_v49  ;;  %v3139_v49 = vld [vmem:[%s9944_s10 + $0xc8] sm:$0xff] }
 0x15c   : > { %v10806_v31 = vadd.f32 %v8237_v61, %v8157_v63  ;;  %8716 = vmatmul.mubr.f32.gmra.mxu1 %v3136_v9  ;;  %8638 = vmatprep.mubr.msk.f32.mxu0 %vm13180_vm12, %v2799_v44  ;;  %v3494_v63 = vld [vmem:[#allocation6 + $0x420] sm:$0xff]  ;;  %v13181_v61 = vld [vmem:[#allocation27_spill] sm:$0xff] }
 0x15d   : > { %v10811_v37 = vpop.f32.mrf.mxu0  ;;  %v10813_v2 = vpop.f32.mrf.mxu1  ;;  %8718 = vmatprep.mubr.f32.mxu1 %v3137_v36  ;;  %8758 = vmatpush3.msra.mxu0 %v3496_v1  ;;  %vm13182_vm12 = vnez %v13181_v61  ;;  %v13183_v61 = vld [vmem:[#allocation30_spill] sm:$0xff] }
 0x15e   : > { %8759 = vmatprep.subr.mxu0 %v3495_v54 }
 0x15f   : > { %v8160_v0 = vpop.f32.mrf.mxu0  ;;  %v8240_v9 = vpop.f32.mrf.mxu1  ;;  %8639 = vmatmul.mubr.f32.gmra.mxu0 %v2800_v52  ;;  %v3141_v52 = vld [vmem:[%s9944_s10 + $0xd8] sm:$0xff] }
 0x160   : > { %v10818_v44 = vadd.f32 %v8240_v9, %v8160_v0  ;;  %8719 = vmatmul.mubr.f32.gmra.mxu1 %v3138_v8  ;;  %8641 = vmatprep.mubr.msk.f32.mxu0 %vm13182_vm12, %v2801_v26  ;;  %v3493_v9 = vld [vmem:[#allocation6 + $0x418] sm:$0xff]  ;;  %vm13184_vm12 = vnez %v13183_v61  ;;  %v13186_v61 = vld [vmem:[#allocation33_spill] sm:$0xff] }
 0x161   : > { %v10823_v1 = vpop.f32.mrf.mxu0  ;;  %v10825_v36 = vpop.f32.mrf.mxu1  ;;  %8721 = vmatprep.mubr.f32.mxu1 %v3139_v49  ;;  %8760 = vmatpush3.msra.mxu0 %v3495_v54 }
 0x162   : > { %8761 = vmatprep.subr.mxu0 %v3494_v63 }
 0x163   : > { %v8163_v0 = vpop.f32.mrf.mxu0  ;;  %v8243_v8 = vpop.f32.mrf.mxu1  ;;  %8642 = vmatmul.mubr.f32.gmra.mxu0 %v2802_v20  ;;  %v3143_v20 = vld [vmem:[%s9944_s10 + $0xe8] sm:$0xff] }
 0x164   : > { %v10830_v26 = vadd.f32 %v8243_v8, %v8163_v0  ;;  %8722 = vmatmul.mubr.f32.gmra.mxu1 %v3140_v43  ;;  %8644 = vmatprep.mubr.msk.f32.mxu0 %vm13184_vm12, %v2803_v38  ;;  %v3492_v8 = vld [vmem:[#allocation6 + $0x410] sm:$0xff]  ;;  %vm13187_vm12 = vnez %v13186_v61 }
 0x165   : > { %v10835_v54 = vpop.f32.mrf.mxu0  ;;  %v10837_v49 = vpop.f32.mrf.mxu1  ;;  %8724 = vmatprep.mubr.f32.mxu1 %v3141_v52  ;;  %8762 = vmatpush3.msra.mxu0 %v3494_v63 }
 0x166   : > { %13185 = vst [vmem:[#allocation22_spill] sm:$0xff] %v10837_v49  ;;  %8763 = vmatprep.subr.mxu0 %v3493_v9 }
 0x167   : > { %v8166_v0 = vpop.f32.mrf.mxu0  ;;  %v8246_v43 = vpop.f32.mrf.mxu1  ;;  %8645 = vmatmul.mubr.f32.gmra.mxu0 %v2804_v4  ;;  %v3145_v4 = vld [vmem:[%s9944_s10 + $0xf8] sm:$0xff] }
 0x168   : > { %v10842_v38 = vadd.f32 %v8246_v43, %v8166_v0  ;;  %8725 = vmatmul.mubr.f32.gmra.mxu1 %v3142_v40  ;;  %8647 = vmatprep.mubr.msk.f32.mxu0 %vm13187_vm12, %v2805_v42  ;;  %v3491_v40 = vld [vmem:[#allocation6 + $0x408] sm:$0xff]  ;;  %vm13189_vm12 = vnez %v13085_v12  ;;  %v3150_v12 = vld [vmem:[%s9944_s10 + $0x120] sm:$0xff] }
 0x169   : > { %v10847_v63 = vpop.f32.mrf.mxu0  ;;  %v10849_v52 = vpop.f32.mrf.mxu1  ;;  %8727 = vmatprep.mubr.f32.mxu1 %v3143_v20  ;;  %8764 = vmatpush3.msra.mxu0 %v3493_v9  ;;  %v2808_v42 = vld [vmem:[%s9944_s10 + $0xff] sm:$0xff] }
 0x16a   : > { %13188 = vst [vmem:[#allocation23_spill] sm:$0xff] %v10849_v52  ;;  %8765 = vmatprep.subr.mxu0 %v3492_v8  ;;  %v3146_v9 = vld [vmem:[%s9944_s10 + $0x100] sm:$0xff] }
 0x16b   : > { %v8169_v49 = vpop.f32.mrf.mxu0  ;;  %v8249_v0 = vpop.f32.mrf.mxu1  ;;  %8648 = vmatmul.mubr.f32.gmra.mxu0 %v2806_v33 }
 0x16c   : > { %v10854_v43 = vadd.f32 %v8249_v0, %v8169_v49  ;;  %8728 = vmatmul.mubr.f32.gmra.mxu1 %v3144_v14  ;;  %8650 = vmatprep.mubr.msk.f32.mxu0 %vm13189_vm12, %v2807_v46  ;;  %v3490_v49 = vld [vmem:[#allocation6 + $0x400] sm:$0xff]  ;;  %vm13190_vm12 = vnez %v13090_v51 }
 0x16d   : > { %v10859_v61 = vpop.f32.mrf.mxu0  ;;  %v10861_v20 = vpop.f32.mrf.mxu1  ;;  %8730 = vmatprep.mubr.f32.mxu1 %v3145_v4  ;;  %8766 = vmatpush3.msra.mxu0 %v3492_v8  ;;  %v2811_v8 = vld [vmem:[%s9944_s10 + $0x117] sm:$0xff] }
 0x16e   : > { %8767 = vmatprep.subr.mxu0 %v3491_v40  ;;  %v3149_v4 = vld [vmem:[%s9944_s10 + $0x118] sm:$0xff] }
 0x16f   : > { %v8172_v52 = vpop.f32.mrf.mxu0  ;;  %v8252_v33 = vpop.f32.mrf.mxu1  ;;  %8651 = vmatmul.mubr.f32.gmra.mxu0 %v2808_v42 }
 0x170   : > { %v10864_v0 = vadd.f32 %v8252_v33, %v8172_v52  ;;  %8731 = vmatmul.mubr.f32.gmra.mxu1 %v3146_v9  ;;  %8653 = vmatprep.mubr.msk.f32.mxu0 %vm13190_vm12, %v10559_v55  ;;  %v13193_v33 = vld [vmem:[#allocation59_spill] sm:$0xff] }
 0x171   : > { %v10869_v46 = vpop.f32.mrf.mxu0  ;;  %v10871_v14 = vpop.f32.mrf.mxu1  ;;  %8733 = vmatprep.mubr.f32.mxu1 %v10697_v13  ;;  %8768 = vmatpush3.msra.mxu0 %v3491_v40  ;;  %v2812_v13 = vld [vmem:[%s9944_s10 + $0x11f] sm:$0xff] }
 0x172   : > { %13191 = vst [vmem:[#allocation25_spill] sm:$0xff] %v10869_v46  ;;  %13192 = vst [vmem:[#allocation26_spill] sm:$0xff] %v10871_v14  ;;  %8769 = vmatprep.subr.mxu0 %v3490_v49  ;;  %v3425_v14 = vld [vmem:[%s9944_s10 + $0x29] sm:$0xff]  ;;  %v3427_v55 = vld [vmem:[%s9944_s10 + $0x39] sm:$0xff] }
 0x173   : > { %v8175_v52 = vpop.f32.mrf.mxu0  ;;  %v8255_v42 = vpop.f32.mrf.mxu1  ;;  %8654 = vmatmul.mubr.f32.gmra.mxu0 %v13193_v33 }
 0x174   : > { %v10877_v9 = vadd.f32 %v8255_v42, %v8175_v52  ;;  %8734 = vmatmul.mubr.f32.gmra.mxu1 %v10708_v53  ;;  %8656 = vmatprep.mubr.msk.f32.mxu0 %vm13146_vm11, %v2811_v8  ;;  %v3426_v53 = vld [vmem:[%s9944_s10 + $0x31] sm:$0xff] }
 0x175   : > { %v10883_v51 = vpop.f32.mrf.mxu0  ;;  %v10885_v40 = vpop.f32.mrf.mxu1  ;;  %8736 = vmatprep.mubr.f32.mxu1 %v3149_v4  ;;  %8770 = vmatpush3.msra.mxu0 %v3490_v49 }
 0x176   : > { %13195 = vst [vmem:[#allocation28_spill] sm:$0xff] %v10883_v51  ;;  %13196 = vst [vmem:[#allocation29_spill] sm:$0xff] %v10885_v40  ;;  %8899 = vmatprep.subr.mxu0 %v3951_v47 }
 0x177   : > { %v8178_v33 = vpop.f32.mrf.mxu0  ;;  %v8258_v52 = vpop.f32.mrf.mxu1  ;;  %8657 = vmatmul.mubr.f32.gmra.mxu0 %v2812_v13  ;;  %v3428_v13 = vld [vmem:[%s9944_s10 + $0x41] sm:$0xff] }
 0x178   : > { %v10889_v42 = vadd.f32 %v8258_v52, %v8178_v33  ;;  %8737 = vmatmul.mubr.f32.gmra.mxu1 %v3150_v12  ;;  %8771 = vmatprep.mubr.f32.mxu0 %v3425_v14  ;;  %v3429_v12 = vld [vmem:[%s9944_s10 + $0x49] sm:$0xff] }
 0x179   : > { %v10892_v8 = vpop.f32.mrf.mxu0  ;;  %v10895_v51 = vpop.f32.mrf.mxu1 }
 0x17a   : > { %13197 = vst [vmem:[#allocation31_spill] sm:$0xff] %v10892_v8  ;;  %13198 = vst [vmem:[#allocation32_spill] sm:$0xff] %v10895_v51 }
 0x17b   : > { %v8293_v40 = vpop.f32.mrf.mxu0  ;;  %8772 = vmatmul.mubr.msk.f32.vlgmr.msra.gmra.mxu0 %vm10282_vm15, %v3426_v53  ;;  %v8373_v4 = vpop.f32.mrf.mxu1 }
 0x17c   : > { %v1768_v49 = vadd.f32 %v8293_v40, %v10724_v48  ;;  %8774 = vmatprep.mubr.f32.mxu0 %v3427_v55  ;;  %v3430_v55 = vld [vmem:[%s9944_s10 + $0x51] sm:$0xff]  ;;  %8900 = vmatpush3.msra.mxu0 %v3951_v47 }
 0x17d   : > { %v1608_v33 = vpop.f32.mrf.mxu0  ;;  %v10907_v8 = vpop.f32.mrf.mxu1 }
 0x17e   : > { %v10903_v14 = vadd.f32 %v1608_v33, %v10731_v5  ;;  %v10905_v52 = vadd.f32 %v8373_v4, %v1768_v49 }
 0x17f   : > { %v8296_v51 = vpop.f32.mrf.mxu0  ;;  %8775 = vmatmul.mubr.msk.f32.gmra.mxu0 %vm10297_vm14, %v3428_v13  ;;  %v3432_v13 = vld [vmem:[%s9944_s10 + $0x61] sm:$0xff] }
 0x180   : > { %v1770_v48 = vadd.f32 %v8296_v51, %v10734_v11  ;;  %v8376_v40 = vpop.f32.mrf.mxu1  ;;  %8777 = vmatprep.mubr.f32.mxu0 %v3429_v12 }
 0x181   : > { %v1618_v53 = vpop.f32.mrf.mxu0 }
 0x182   : > { %v10915_v5 = vadd.f32 %v1618_v53, %v10742_v23  ;;  %v10917_v49 = vadd.f32 %v8376_v40, %v1770_v48  ;;  %v10919_v4 = vpop.f32.mrf.mxu1 }
 0x183   : > { %v8299_v33 = vpop.f32.mrf.mxu0  ;;  %8778 = vmatmul.mubr.msk.f32.gmra.mxu0 %vm10317_vm0, %v3430_v55 }
 0x184   : > { %v1772_v51 = vadd.f32 %v8299_v33, %v10744_v15  ;;  %v8379_v11 = vpop.f32.mrf.mxu1  ;;  %8780 = vmatprep.mubr.f32.mxu0 %v3431_v18  ;;  %v3434_v18 = vld [vmem:[%s9944_s10 + $0x71] sm:$0xff] }
 0x185   : > { %v1628_v12 = vpop.f32.mrf.mxu0 }
 0x186   : > { %v10927_v23 = vadd.f32 %v1628_v12, %v10752_v6  ;;  %v10929_v48 = vadd.f32 %v8379_v11, %v1772_v51  ;;  %v10931_v40 = vpop.f32.mrf.mxu1  ;;  %v4000_v12 = vld [vmem:[#allocation8 + $0xf8] sm:$0xff] }
 0x187   : > { %v8302_v53 = vpop.f32.mrf.mxu0  ;;  %8781 = vmatmul.mubr.msk.f32.gmra.mxu0 %vm10336_vm1, %v3432_v13  ;;  %8819 = vmatprep.subr.mxu1 %v4000_v12  ;;  %v3436_v13 = vld [vmem:[%s9944_s10 + $0x81] sm:$0xff] }
 0x188   : > { %v1774_v55 = vadd.f32 %v8302_v53, %v10754_v50  ;;  %v8382_v15 = vpop.f32.mrf.mxu1  ;;  %8783 = vmatprep.mubr.f32.mxu0 %v3433_v19  ;;  %8820 = vmatpush3.msra.mxu1 %v4000_v12  ;;  %v3437_v53 = vld [vmem:[%s9944_s10 + $0x89] sm:$0xff]  ;;  %v3439_v12 = vld [vmem:[%s9944_s10 + $0x99] sm:$0xff] }
 0x189   : > { %v1638_v33 = vpop.f32.mrf.mxu0  ;;  %8821 = vmatprep.subr.mxu1 %v3999_v28 }
 0x18a   : > { %v10939_v6 = vadd.f32 %v1638_v33, %v10763_v60  ;;  %v10941_v51 = vadd.f32 %v8382_v15, %v1774_v55  ;;  %v10943_v11 = vpop.f32.mrf.mxu1  ;;  %8822 = vmatpush3.msra.mxu1 %v3999_v28  ;;  %v3440_v28 = vld [vmem:[%s9944_s10 + $0xa1] sm:$0xff] }
 0x18b   : > { %v8305_v46 = vpop.f32.mrf.mxu0  ;;  %8784 = vmatmul.mubr.msk.f32.gmra.mxu0 %vm10355_vm2, %v3434_v18  ;;  %8823 = vmatprep.subr.mxu1 %v3998_v56 }
 0x18c   : > { %v1776_v50 = vadd.f32 %v8305_v46, %v10766_v22  ;;  %v8385_v19 = vpop.f32.mrf.mxu1  ;;  %8786 = vmatprep.mubr.f32.mxu0 %v3435_v58  ;;  %v3438_v46 = vld [vmem:[%s9944_s10 + $0x91] sm:$0xff]  ;;  %8824 = vmatpush3.msra.mxu1 %v3998_v56 }
 0x18d   : > { %v1648_v60 = vpop.f32.mrf.mxu0  ;;  %8825 = vmatprep.subr.mxu1 %v3997_v62  ;;  %v3442_v56 = vld [vmem:[%s9944_s10 + $0xb1] sm:$0xff] }
 0x18e   : > { %v10951_v55 = vadd.f32 %v1648_v60, %v10773_v24  ;;  %v10953_v15 = vadd.f32 %v8385_v19, %v1776_v50  ;;  %v10955_v33 = vpop.f32.mrf.mxu1  ;;  %8826 = vmatpush3.msra.mxu1 %v3997_v62 }
 0x18f   : > { %v8308_v18 = vpop.f32.mrf.mxu0  ;;  %8787 = vmatmul.mubr.msk.f32.gmra.mxu0 %vm10374_vm3, %v3436_v13  ;;  %8827 = vmatprep.subr.mxu1 %v3996_v7 }
 0x190   : > { %v1778_v58 = vadd.f32 %v8308_v18, %v10776_v17  ;;  %v8388_v22 = vpop.f32.mrf.mxu1  ;;  %8789 = vmatprep.mubr.f32.mxu0 %v3437_v53  ;;  %v3441_v18 = vld [vmem:[%s9944_s10 + $0xa9] sm:$0xff]  ;;  %8828 = vmatpush3.msra.mxu1 %v3996_v7  ;;  %v3446_v7 = vld [vmem:[%s9944_s10 + $0xd1] sm:$0xff] }
 0x191   : > { %v1658_v24 = vpop.f32.mrf.mxu0 }
 0x192   : > { %v10963_v50 = vadd.f32 %v1658_v24, %v10783_v30  ;;  %v10965_v19 = vadd.f32 %v8388_v22, %v1778_v58  ;;  %v10967_v60 = vpop.f32.mrf.mxu1 }
 0x193   : > { %v8311_v13 = vpop.f32.mrf.mxu0  ;;  %8790 = vmatmul.mubr.msk.f32.gmra.mxu0 %vm10393_vm4, %v3438_v46 }
 0x194   : > { %v1780_v17 = vadd.f32 %v8311_v13, %v10786_v21  ;;  %v8391_v53 = vpop.f32.mrf.mxu1  ;;  %8792 = vmatprep.mubr.f32.mxu0 %v3439_v12 }
 0x195   : > { %v1668_v30 = vpop.f32.mrf.mxu0 }
 0x196   : > { %v10975_v58 = vadd.f32 %v1668_v30, %v10793_v29  ;;  %v10977_v22 = vadd.f32 %v8391_v53, %v1780_v17  ;;  %v10979_v24 = vpop.f32.mrf.mxu1  ;;  %v3443_v29 = vld [vmem:[%s9944_s10 + $0xb9] sm:$0xff] }
 0x197   : > { %13200 = vst [vmem:[#allocation35_spill] sm:$0xff] %v10979_v24  ;;  %v8314_v46 = vpop.f32.mrf.mxu0  ;;  %8793 = vmatmul.mubr.msk.f32.gmra.mxu0 %vm10412_vm5, %v3440_v28 }
 0x198   : > { %13199 = vst [vmem:[#allocation34_spill] sm:$0xff] %v10975_v58  ;;  %v1782_v21 = vadd.f32 %v8314_v46, %v10796_v57  ;;  %v8394_v12 = vpop.f32.mrf.mxu1  ;;  %8795 = vmatprep.mubr.f32.mxu0 %v3441_v18  ;;  %v1319_v57 = vadd.f32 %v10813_v2, %v10811_v37 }
 0x199   : > { %v1678_v13 = vpop.f32.mrf.mxu0 }
 0x19a   : > { %v10987_v17 = vadd.f32 %v1678_v13, %v10803_v3  ;;  %v10989_v53 = vadd.f32 %v8394_v12, %v1782_v21  ;;  %v10991_v30 = vpop.f32.mrf.mxu1  ;;  %v3444_v3 = vld [vmem:[%s9944_s10 + $0xc1] sm:$0xff]  ;;  %v3445_v21 = vld [vmem:[%s9944_s10 + $0xc9] sm:$0xff] }
 0x19b   : > { %13202 = vst [vmem:[#allocation38_spill] sm:$0xff] %v10991_v30  ;;  %v8317_v28 = vpop.f32.mrf.mxu0  ;;  %8796 = vmatmul.mubr.msk.f32.gmra.mxu0 %vm10431_vm6, %v3442_v56  ;;  %v3995_v56 = vld [vmem:[#allocation8 + $0xd0] sm:$0xff] }
 0x19c   : > { %13201 = vst [vmem:[#allocation37_spill] sm:$0xff] %v10987_v17  ;;  %v1784_v62 = vadd.f32 %v8317_v28, %v10806_v31  ;;  %v8397_v18 = vpop.f32.mrf.mxu1  ;;  %8798 = vmatprep.mubr.f32.mxu0 %v3443_v29  ;;  %8829 = vmatprep.subr.mxu1 %v3995_v56  ;;  %v3447_v29 = vld [vmem:[%s9944_s10 + $0xd9] sm:$0xff] }
 0x19d   : > { %v1688_v46 = vpop.f32.mrf.mxu0  ;;  %8830 = vmatpush3.msra.mxu1 %v3995_v56  ;;  %v3449_v56 = vld [vmem:[%s9944_s10 + $0xe9] sm:$0xff] }
 0x19e   : > { %v11000_v12 = vadd.f32 %v1688_v46, %v1319_v57  ;;  %v11002_v13 = vadd.f32 %v8397_v18, %v1784_v62  ;;  %v11004_v16 = vpop.f32.mrf.mxu1  ;;  %v3994_v62 = vld [vmem:[#allocation8 + $0xc8] sm:$0xff]  ;;  %v3950_v18 = vld [vmem:[#allocation8 + $0x70] sm:$0xff] }
 0x19f   : > { %13204 = vst [vmem:[#allocation41_spill] sm:$0xff] %v11004_v16  ;;  %v8320_v30 = vpop.f32.mrf.mxu0  ;;  %8799 = vmatmul.mubr.msk.f32.gmra.mxu0 %vm10450_vm7, %v3444_v3  ;;  %8831 = vmatprep.subr.mxu1 %v3994_v62  ;;  %v3448_v46 = vld [vmem:[%s9944_s10 + $0xe1] sm:$0xff] }
 0x1a0   : > { %13203 = vst [vmem:[#allocation40_spill] sm:$0xff] %v11000_v12  ;;  %v1786_v31 = vadd.f32 %v8320_v30, %v10818_v44  ;;  %v8400_v37 = vpop.f32.mrf.mxu1  ;;  %8801 = vmatprep.mubr.f32.mxu0 %v3445_v21  ;;  %8832 = vmatpush3.msra.mxu1 %v3994_v62  ;;  %v3450_v62 = vld [vmem:[%s9944_s10 + $0xf1] sm:$0xff] }
 0x1a1   : > { %v11010_v2 = vpop.f32.mrf.mxu0  ;;  %8901 = vmatprep.subr.mxu0 %v3950_v18 }
 0x1a2   : > { %13205 = vst [vmem:[#allocation59_spill] sm:$0xff] %v11010_v2  ;;  %v11013_v28 = vadd.f32 %v8400_v37, %v1786_v31  ;;  %v11015_v57 = vpop.f32.mrf.mxu1  ;;  %v3993_v37 = vld [vmem:[#allocation8 + $0xc0] sm:$0xff]  ;;  %8902 = vmatpush3.msra.mxu0 %v3950_v18  ;;  %v4530_v2 = vld [vmem:[#allocation8 + $0x170] sm:$0xff] }
 0x1a3   : > { %13206 = vst [vmem:[#allocation60_spill] sm:$0xff] %v11015_v57  ;;  %v8323_v3 = vpop.f32.mrf.mxu0  ;;  %8802 = vmatmul.mubr.msk.f32.gmra.mxu0 %vm10469_vm8, %v3446_v7  ;;  %v3949_v7 = vld [vmem:[#allocation8 + $0x68] sm:$0xff]  ;;  %vm13209_vm8 = vnez %v13131_v45  ;;  %8833 = vmatprep.subr.mxu1 %v3993_v37  ;;  %v3948_v45 = vld [vmem:[#allocation8 + $0x60] sm:$0xff] }
 0x1a4   : > { %v1788_v44 = vadd.f32 %v8323_v3, %v10830_v26  ;;  %v8403_v30 = vpop.f32.mrf.mxu1  ;;  %8804 = vmatprep.mubr.f32.mxu0 %v3447_v29  ;;  %8834 = vmatpush3.msra.mxu1 %v3993_v37 }
 0x1a5   : > { %v11021_v21 = vpop.f32.mrf.mxu0  ;;  %8903 = vmatprep.subr.mxu0 %v3949_v7  ;;  %8835 = vmatprep.subr.mxu1 %v3992_v25 }
 0x1a6   : > { %13207 = vst [vmem:[#allocation61_spill] sm:$0xff] %v11021_v21  ;;  %v11024_v31 = vadd.f32 %v8403_v30, %v1788_v44  ;;  %v11026_v47 = vpop.f32.mrf.mxu1  ;;  %v3451_v44 = vld [vmem:[%s9944_s10 + $0xf9] sm:$0xff]  ;;  %8904 = vmatpush3.msra.mxu0 %v3949_v7  ;;  %8836 = vmatpush3.msra.mxu1 %v3992_v25 }
 0x1a7   : > { %13208 = vst [vmem:[#allocation62_spill] sm:$0xff] %v11026_v47  ;;  %v8326_v35 = vpop.f32.mrf.mxu0  ;;  %8805 = vmatmul.mubr.msk.f32.gmra.mxu0 %vm13209_vm8, %v3448_v46  ;;  %8905 = vmatprep.subr.mxu0 %v3948_v45  ;;  %v3991_v7 = vld [vmem:[#allocation8 + $0xb0] sm:$0xff]  ;;  %v4531_v21 = vld [vmem:[#allocation8 + $0x178] sm:$0xff] }
 0x1a8   : > { %v1790_v26 = vadd.f32 %v8326_v35, %v10842_v38  ;;  %v8406_v29 = vpop.f32.mrf.mxu1  ;;  %8807 = vmatprep.mubr.f32.mxu0 %v3449_v56  ;;  %v3452_v56 = vld [vmem:[%s9944_s10 + $0x101] sm:$0xff]  ;;  %8906 = vmatpush3.msra.mxu0 %v3948_v45 }
 0x1a9   : > { %v11032_v3 = vpop.f32.mrf.mxu0  ;;  %8837 = vmatprep.subr.mxu1 %v3991_v7 }
 0x1aa   : > { %13210 = vst [vmem:[#allocation63_spill] sm:$0xff] %v11032_v3  ;;  %v11035_v30 = vadd.f32 %v8406_v29, %v1790_v26  ;;  %v11037_v18 = vpop.f32.mrf.mxu1  ;;  %8838 = vmatpush3.msra.mxu1 %v3991_v7  ;;  %v3945_v7 = vld [vmem:[#allocation8 + $0x48] sm:$0xff] }
 0x1ab   : > { %13211 = vst [vmem:[#allocation64_spill] sm:$0xff] %v11037_v18  ;;  %v8329_v46 = vpop.f32.mrf.mxu0  ;;  %8808 = vmatmul.mubr.msk.f32.gmra.mxu0 %vm10507_vm10, %v3450_v62  ;;  %v3947_v18 = vld [vmem:[#allocation8 + $0x58] sm:$0xff] }
 0x1ac   : > { %v1792_v35 = vadd.f32 %v8329_v46, %v10854_v43  ;;  %v8409_v38 = vpop.f32.mrf.mxu1  ;;  %8810 = vmatprep.mubr.f32.mxu0 %v3451_v44  ;;  %v3455_v44 = vld [vmem:[%s9944_s10 + $0x119] sm:$0xff]  ;;  %8907 = vmatprep.subr.mxu0 %v3947_v18 }
 0x1ad   : > { %v11043_v37 = vpop.f32.mrf.mxu0  ;;  %8908 = vmatpush3.msra.mxu0 %v3947_v18 }
 0x1ae   : > { %13212 = vst [vmem:[#allocation65_spill] sm:$0xff] %v11043_v37  ;;  %v11045_v26 = vadd.f32 %v8409_v38, %v1792_v35  ;;  %v11047_v29 = vpop.f32.mrf.mxu1  ;;  %v3990_v35 = vld [vmem:[#allocation8 + $0xa8] sm:$0xff]  ;;  %v3946_v38 = vld [vmem:[#allocation8 + $0x50] sm:$0xff] }
 0x1af   : > { %13213 = vst [vmem:[#allocation66_spill] sm:$0xff] %v11047_v29  ;;  %v8332_v59 = vpop.f32.mrf.mxu0  ;;  %8811 = vmatmul.mubr.msk.f32.gmra.mxu0 %vm13161_vm9, %v3452_v56  ;;  %vm13216_vm9 = vnez %v13140_v27  ;;  %8839 = vmatprep.subr.mxu1 %v3990_v35  ;;  %v3988_v27 = vld [vmem:[#allocation8 + $0x98] sm:$0xff] }
 0x1b0   : > { %v1794_v43 = vadd.f32 %v8332_v59, %v10864_v0  ;;  %v8412_v62 = vpop.f32.mrf.mxu1  ;;  %8813 = vmatprep.mubr.f32.mxu0 %v10700_v32  ;;  %v3456_v0 = vld [vmem:[%s9944_s10 + $0x121] sm:$0xff]  ;;  %8840 = vmatpush3.msra.mxu1 %v3990_v35 }
 0x1b1   : > { %v11053_v25 = vpop.f32.mrf.mxu0  ;;  %8909 = vmatprep.subr.mxu0 %v3946_v38 }
 0x1b2   : > { %13214 = vst [vmem:[#allocation67_spill] sm:$0xff] %v11053_v25  ;;  %v11056_v46 = vadd.f32 %v8412_v62, %v1794_v43  ;;  %v11058_v45 = vpop.f32.mrf.mxu1  ;;  %v3989_v43 = vld [vmem:[#allocation8 + $0xa0] sm:$0xff]  ;;  %8910 = vmatpush3.msra.mxu0 %v3946_v38  ;;  %v3943_v38 = vld [vmem:[#allocation8 + $0x38] sm:$0xff] }
 0x1b3   : > { %13215 = vst [vmem:[#allocation68_spill] sm:$0xff] %v11058_v45  ;;  %v8335_v56 = vpop.f32.mrf.mxu0  ;;  %8814 = vmatmul.mubr.msk.f32.gmra.mxu0 %vm13216_vm9, %v10712_v34  ;;  %8841 = vmatprep.subr.mxu1 %v3989_v43  ;;  %v3944_v34 = vld [vmem:[#allocation8 + $0x40] sm:$0xff]  ;;  %v9770_v45 = vmov 0.0   ;;  %vm13219_vm9 = vnez %v13144_v41 }
 0x1b4   : > { %v1796_v59 = vadd.f32 %v8335_v56, %v10877_v9  ;;  %v8415_v32 = vpop.f32.mrf.mxu1  ;;  %8816 = vmatprep.mubr.f32.mxu0 %v3455_v44  ;;  %8842 = vmatpush3.msra.mxu1 %v3989_v43  ;;  %3834 = vst [vmem:[#allocation2 + $0x8] sm:$0xff] %v9770_v45  ;;  %3833 = vst [vmem:[#allocation2] sm:$0xff] %v9770_v45  ;;  %v3987_v56 = vld [vmem:[#allocation8 + $0x90] sm:$0xff] }
 0x1b5   : > { %v11065_v62 = vpop.f32.mrf.mxu0  ;;  %3835 = vst [vmem:[#allocation2 + $0x10] sm:$0xff] %v9770_v45  ;;  %3836 = vst [vmem:[#allocation2 + $0x118] sm:$0xff] %v9770_v45  ;;  %8911 = vmatprep.subr.mxu0 %v3945_v7  ;;  %8843 = vmatprep.subr.mxu1 %v3988_v27 }
 0x1b6   : > { %13217 = vst [vmem:[#allocation69_spill] sm:$0xff] %v11065_v62  ;;  %v11067_v18 = vadd.f32 %v8415_v32, %v1796_v59  ;;  %v11069_v10 = vpop.f32.mrf.mxu1  ;;  %3837 = vst [vmem:[#allocation2 + $0x120] sm:$0xff] %v9770_v45  ;;  %8912 = vmatpush3.msra.mxu0 %v3945_v7  ;;  %8844 = vmatpush3.msra.mxu1 %v3988_v27  ;;  %v3985_v27 = vld [vmem:[#allocation8 + $0x80] sm:$0xff] }
 0x1b7   : > { %13218 = vst [vmem:[#allocation70_spill] sm:$0xff] %v11069_v10  ;;  %3838 = vst [vmem:[#allocation2 + $0x128] sm:$0xff] %v9770_v45  ;;  %v8338_v9 = vpop.f32.mrf.mxu0  ;;  %8817 = vmatmul.mubr.msk.f32.gmra.mxu0 %vm13219_vm9, %v3456_v0  ;;  %8913 = vmatprep.subr.mxu0 %v3944_v34  ;;  %v3942_v10 = vld [vmem:[#allocation8 + $0x30] sm:$0xff]  ;;  %v3986_v0 = vld [vmem:[#allocation8 + $0x88] sm:$0xff]  ;;  %vm13222_vm9 = vnez %v13036_v39 }
 0x1b8   : > { %v1798_v44 = vadd.f32 %v8338_v9, %v10889_v42  ;;  %v8418_v35 = vpop.f32.mrf.mxu1  ;;  %8914 = vmatpush3.msra.mxu0 %v3944_v34  ;;  %8845 = vmatprep.subr.mxu1 %v3987_v56  ;;  %v3941_v9 = vld [vmem:[#allocation8 + $0x28] sm:$0xff] }
 0x1b9   : > { %v11074_v59 = vpop.f32.mrf.mxu0  ;;  %8915 = vmatprep.subr.mxu0 %v3943_v38  ;;  %8846 = vmatpush3.msra.mxu1 %v3987_v56 }
 0x1ba   : > { %13220 = vst [vmem:[#allocation71_spill] sm:$0xff] %v11074_v59  ;;  %v11076_v32 = vadd.f32 %v8418_v35, %v1798_v44  ;;  %v11078_v43 = vpop.f32.mrf.mxu1  ;;  %8916 = vmatpush3.msra.mxu0 %v3943_v38  ;;  %8847 = vmatprep.subr.mxu1 %v3986_v0  ;;  %v3940_v35 = vld [vmem:[#allocation8 + $0x20] sm:$0xff]  ;;  %v3939_v38 = vld [vmem:[#allocation8 + $0x18] sm:$0xff] }
 0x1bb   : > { %13221 = vst [vmem:[#allocation72_spill] sm:$0xff] %v11078_v43  ;;  %v8453_v41 = vpop.f32.mrf.mxu0  ;;  %8917 = vmatprep.subr.mxu0 %v3942_v10  ;;  %8848 = vmatpush3.msra.mxu1 %v3986_v0  ;;  %v3872_v43 = vld [vmem:[#allocation2 + $0x7] sm:$0xff] }
 0x1bc   : > { %v11081_v42 = vadd.f32 %v8453_v41, %v10905_v52  ;;  %v11083_v7 = vpop.f32.mrf.mxu1  ;;  %8918 = vmatpush3.msra.mxu0 %v3942_v10  ;;  %8849 = vmatprep.subr.mxu1 %v3985_v27  ;;  %v3938_v0 = vld [vmem:[#allocation8 + $0x10] sm:$0xff] }
 0x1bd   : > { %v11085_v44 = vpop.f32.mrf.mxu0  ;;  %8919 = vmatprep.subr.mxu0 %v3941_v9  ;;  %8850 = vmatpush3.msra.mxu1 %v3985_v27 }
 0x1be   : > { %v11087_v34 = vpop.f32.mrf.mxu1  ;;  %8920 = vmatpush3.msra.mxu0 %v3941_v9  ;;  %8851 = vmatprep.mubr.f32.mxu1 %v9770_v45  ;;  %v3937_v9 = vld [vmem:[#allocation8 + $0x8] sm:$0xff] }
 0x1bf   : > { %v8456_v56 = vpop.f32.mrf.mxu0  ;;  %8921 = vmatprep.subr.mxu0 %v3940_v35  ;;  %8931 = vmatprep.mubr.msk.f32.mxu0 %vm13222_vm9, %v3872_v43  ;;  %v3936_v43 = vld [vmem:[#allocation8] sm:$0xff] }
 0x1c0   : > { %v11090_v41 = vadd.f32 %v8456_v56, %v10917_v49  ;;  %v11092_v52 = vpop.f32.mrf.mxu1  ;;  %8922 = vmatpush3.msra.mxu0 %v3940_v35  ;;  %8852 = vmatmul.mubr.f32.vlgmr.msra.gmra.mxu1 %v9770_v45 }
 0x1c1   : > { %v11094_v59 = vpop.f32.mrf.mxu0  ;;  %8923 = vmatprep.subr.mxu0 %v3939_v38  ;;  %8979 = vmatprep.subr.mxu1 %v4531_v21 }
 0x1c2   : > { %v11098_v10 = vpop.f32.mrf.mxu1  ;;  %8924 = vmatpush3.msra.mxu0 %v3939_v38  ;;  %8980 = vmatpush3.msra.mxu1 %v4531_v21  ;;  %v4529_v21 = vld [vmem:[#allocation8 + $0x168] sm:$0xff] }
 0x1c3   : > { %v8459_v27 = vpop.f32.mrf.mxu0  ;;  %8925 = vmatprep.subr.mxu0 %v3938_v0  ;;  %8981 = vmatprep.subr.mxu1 %v4530_v2 }
 0x1c4   : > { %v11101_v49 = vadd.f32 %v8459_v27, %v10929_v48  ;;  %v11103_v56 = vpop.f32.mrf.mxu1  ;;  %8926 = vmatpush3.msra.mxu0 %v3938_v0  ;;  %v3873_v48 = vld [vmem:[#allocation2 + $0xf] sm:$0xff]  ;;  %8982 = vmatpush3.msra.mxu1 %v4530_v2 }
 0x1c5   : > { %v11105_v62 = vpop.f32.mrf.mxu0  ;;  %8927 = vmatprep.subr.mxu0 %v3937_v9  ;;  %8983 = vmatprep.subr.mxu1 %v4529_v21  ;;  %v4528_v2 = vld [vmem:[#allocation8 + $0x160] sm:$0xff] }
 0x1c6   : > { %v11107_v25 = vpop.f32.mrf.mxu1  ;;  %8928 = vmatpush3.msra.mxu0 %v3937_v9  ;;  %8984 = vmatpush3.msra.mxu1 %v4529_v21  ;;  %v4527_v21 = vld [vmem:[#allocation8 + $0x158] sm:$0xff] }
 0x1c7   : > { %v8462_v39 = vpop.f32.mrf.mxu0  ;;  %8929 = vmatprep.subr.mxu0 %v3936_v43  ;;  %8985 = vmatprep.subr.mxu1 %v4528_v2 }
 0x1c8   : > { %v11110_v45 = vadd.f32 %v8462_v39, %v10941_v51  ;;  %v11112_v35 = vpop.f32.mrf.mxu1  ;;  %8930 = vmatpush3.msra.mxu0 %v3936_v43  ;;  %8986 = vmatpush3.msra.mxu1 %v4528_v2  ;;  %v4526_v2 = vld [vmem:[#allocation8 + $0x150] sm:$0xff] }
 0x1c9   : > { %v11114_v27 = vpop.f32.mrf.mxu0  ;;  %8932 = vmatmul.mubr.f32.vlgmr.msra.gmra.mxu0 %v3873_v48  ;;  %8987 = vmatprep.subr.mxu1 %v4527_v21 }
 0x1ca   : > { %v11116_v38 = vpop.f32.mrf.mxu1  ;;  %8988 = vmatpush3.msra.mxu1 %v4527_v21  ;;  %v4525_v21 = vld [vmem:[#allocation8 + $0x148] sm:$0xff] }
 0x1cb   : > { %v8465_v29 = vpop.f32.mrf.mxu0  ;;  %8989 = vmatprep.subr.mxu1 %v4526_v2 }
 0x1cc   : > { %v11119_v0 = vadd.f32 %v8465_v29, %v10953_v15  ;;  %v11121_v37 = vpop.f32.mrf.mxu1  ;;  %8990 = vmatpush3.msra.mxu1 %v4526_v2 }
 0x1cd   : > { %v11123_v3 = vpop.f32.mrf.mxu0  ;;  %8991 = vmatprep.subr.mxu1 %v4525_v21 }
 0x1ce   : > { %v11125_v39 = vpop.f32.mrf.mxu1  ;;  %8992 = vmatpush3.msra.mxu1 %v4525_v21 }
 0x1cf   : > { %v8468_v51 = vpop.f32.mrf.mxu0 }
 0x1d0   : > { %v11128_v9 = vadd.f32 %v8468_v51, %v10965_v19  ;;  %v11130_v47 = vpop.f32.mrf.mxu1 }
 0x1d1   : > { %13224 = vst [vmem:[#allocation74_spill] sm:$0xff] %v11130_v47  ;;  %v11132_v57 = vpop.f32.mrf.mxu0 }
 0x1d2   : > { %13223 = vst [vmem:[#allocation73_spill] sm:$0xff] %v11128_v9  ;;  %v11134_v43 = vpop.f32.mrf.mxu1 }
 0x1d3   : > { %13225 = vst [vmem:[#allocation75_spill] sm:$0xff] %v11134_v43  ;;  %v8471_v15 = vpop.f32.mrf.mxu0 }
 0x1d4   : > { %v11137_v29 = vadd.f32 %v8471_v15, %v10977_v22  ;;  %v11139_v48 = vpop.f32.mrf.mxu1 }
 0x1d5   : > { %13227 = vst [vmem:[#allocation77_spill] sm:$0xff] %v11139_v48  ;;  %v11141_v16 = vpop.f32.mrf.mxu0 }
 0x1d6   : > { %13226 = vst [vmem:[#allocation76_spill] sm:$0xff] %v11137_v29  ;;  %13228 = vst [vmem:[#allocation78_spill] sm:$0xff] %v11141_v16  ;;  %v11143_v19 = vpop.f32.mrf.mxu1 }
 0x1d7   : > { %13229 = vst [vmem:[#allocation79_spill] sm:$0xff] %v11143_v19  ;;  %v8474_v51 = vpop.f32.mrf.mxu0 }
 0x1d8   : > { %v11146_v12 = vadd.f32 %v8474_v51, %v10989_v53  ;;  %v11148_v17 = vpop.f32.mrf.mxu1 }
 0x1d9   : > { %13231 = vst [vmem:[#allocation81_spill] sm:$0xff] %v11148_v17  ;;  %v11150_v43 = vpop.f32.mrf.mxu0 }
 0x1da   : > { %13230 = vst [vmem:[#allocation80_spill] sm:$0xff] %v11146_v12  ;;  %13232 = vst [vmem:[#allocation82_spill] sm:$0xff] %v11150_v43  ;;  %v11152_v22 = vpop.f32.mrf.mxu1 }
 0x1db   : > { %13233 = vst [vmem:[#allocation83_spill] sm:$0xff] %v11152_v22  ;;  %v8477_v15 = vpop.f32.mrf.mxu0 }
 0x1dc   : > { %v11155_v48 = vadd.f32 %v8477_v15, %v11002_v13  ;;  %v11157_v29 = vpop.f32.mrf.mxu1 }
 0x1dd   : > { %13235 = vst [vmem:[#allocation85_spill] sm:$0xff] %v11157_v29  ;;  %v11159_v19 = vpop.f32.mrf.mxu0 }
 0x1de   : > { %13234 = vst [vmem:[#allocation84_spill] sm:$0xff] %v11155_v48  ;;  %13236 = vst [vmem:[#allocation86_spill] sm:$0xff] %v11159_v19  ;;  %v11161_v53 = vpop.f32.mrf.mxu1 }
 0x1df   : > { %13237 = vst [vmem:[#allocation87_spill] sm:$0xff] %v11161_v53  ;;  %v8480_v51 = vpop.f32.mrf.mxu0 }
 0x1e0   : > { %v11164_v17 = vadd.f32 %v8480_v51, %v11013_v28  ;;  %v11166_v12 = vpop.f32.mrf.mxu1 }
 0x1e1   : > { %13239 = vst [vmem:[#allocation89_spill] sm:$0xff] %v11166_v12  ;;  %v11168_v22 = vpop.f32.mrf.mxu0 }
 0x1e2   : > { %13238 = vst [vmem:[#allocation88_spill] sm:$0xff] %v11164_v17  ;;  %13240 = vst [vmem:[#allocation90_spill] sm:$0xff] %v11168_v22  ;;  %v11170_v13 = vpop.f32.mrf.mxu1 }
 0x1e3   : > { %13241 = vst [vmem:[#allocation91_spill] sm:$0xff] %v11170_v13  ;;  %v8483_v15 = vpop.f32.mrf.mxu0  ;;  %v4869_v13 = vld [vmem:[#allocation8 + $0x1f8] sm:$0xff] }
 0x1e4   : > { %v11173_v29 = vadd.f32 %v8483_v15, %v11024_v31  ;;  %v11175_v48 = vpop.f32.mrf.mxu1  ;;  %9059 = vmatprep.subr.mxu0 %v4869_v13  ;;  %v4868_v15 = vld [vmem:[#allocation8 + $0x1f0] sm:$0xff] }
 0x1e5   : > { %13243 = vst [vmem:[#allocation93_spill] sm:$0xff] %v11175_v48  ;;  %v11177_v53 = vpop.f32.mrf.mxu0  ;;  %9060 = vmatpush3.msra.mxu0 %v4869_v13  ;;  %v4866_v13 = vld [vmem:[#allocation8 + $0x1e0] sm:$0xff] }
 0x1e6   : > { %13242 = vst [vmem:[#allocation92_spill] sm:$0xff] %v11173_v29  ;;  %13244 = vst [vmem:[#allocation94_spill] sm:$0xff] %v11177_v53  ;;  %v11179_v28 = vpop.f32.mrf.mxu1  ;;  %9061 = vmatprep.subr.mxu0 %v4868_v15 }
 0x1e7   : > { %13245 = vst [vmem:[#allocation95_spill] sm:$0xff] %v11179_v28  ;;  %v8486_v51 = vpop.f32.mrf.mxu0  ;;  %9062 = vmatpush3.msra.mxu0 %v4868_v15  ;;  %v4865_v15 = vld [vmem:[#allocation8 + $0x1d8] sm:$0xff] }
 0x1e8   : > { %v11182_v12 = vadd.f32 %v8486_v51, %v11035_v30  ;;  %v11184_v17 = vpop.f32.mrf.mxu1  ;;  %v4524_v51 = vld [vmem:[#allocation8 + $0x140] sm:$0xff] }
 0x1e9   : > { %13247 = vst [vmem:[#allocation97_spill] sm:$0xff] %v11184_v17  ;;  %v11186_v22 = vpop.f32.mrf.mxu0  ;;  %v4867_v17 = vld [vmem:[#allocation8 + $0x1e8] sm:$0xff]  ;;  %8993 = vmatprep.subr.mxu1 %v4524_v51 }
 0x1ea   : > { %13246 = vst [vmem:[#allocation96_spill] sm:$0xff] %v11182_v12  ;;  %13248 = vst [vmem:[#allocation98_spill] sm:$0xff] %v11186_v22  ;;  %v11188_v31 = vpop.f32.mrf.mxu1  ;;  %9063 = vmatprep.subr.mxu0 %v4867_v17  ;;  %8994 = vmatpush3.msra.mxu1 %v4524_v51  ;;  %v4522_v51 = vld [vmem:[#allocation8 + $0x130] sm:$0xff] }
 0x1eb   : > { %13249 = vst [vmem:[#allocation99_spill] sm:$0xff] %v11188_v31  ;;  %v8489_v48 = vpop.f32.mrf.mxu0  ;;  %9064 = vmatpush3.msra.mxu0 %v4867_v17  ;;  %v4864_v17 = vld [vmem:[#allocation8 + $0x1d0] sm:$0xff] }
 0x1ec   : > { %v11191_v2 = vadd.f32 %v8489_v48, %v11045_v26  ;;  %v11193_v30 = vpop.f32.mrf.mxu1  ;;  %9065 = vmatprep.subr.mxu0 %v4866_v13  ;;  %v4523_v48 = vld [vmem:[#allocation8 + $0x138] sm:$0xff] }
 0x1ed   : > { %13251 = vst [vmem:[#allocation101_spill] sm:$0xff] %v11193_v30  ;;  %v11195_v12 = vpop.f32.mrf.mxu0  ;;  %9066 = vmatpush3.msra.mxu0 %v4866_v13  ;;  %8995 = vmatprep.subr.mxu1 %v4523_v48  ;;  %v4521_v13 = vld [vmem:[#allocation8 + $0x128] sm:$0xff] }
 0x1ee   : > { %13250 = vst [vmem:[#allocation100_spill] sm:$0xff] %v11191_v2  ;;  %13252 = vst [vmem:[#allocation102_spill] sm:$0xff] %v11195_v12  ;;  %v11197_v22 = vpop.f32.mrf.mxu1  ;;  %9067 = vmatprep.subr.mxu0 %v4865_v15  ;;  %8996 = vmatpush3.msra.mxu1 %v4523_v48 }
 0x1ef   : > { %13253 = vst [vmem:[#allocation103_spill] sm:$0xff] %v11197_v22  ;;  %v8492_v21 = vpop.f32.mrf.mxu0  ;;  %9068 = vmatpush3.msra.mxu0 %v4865_v15  ;;  %8997 = vmatprep.subr.mxu1 %v4522_v51  ;;  %v4520_v15 = vld [vmem:[#allocation8 + $0x120] sm:$0xff] }
 0x1f0   : > { %v11200_v31 = vadd.f32 %v8492_v21, %v11056_v46  ;;  %v11202_v26 = vpop.f32.mrf.mxu1  ;;  %9069 = vmatprep.subr.mxu0 %v4864_v17  ;;  %8998 = vmatpush3.msra.mxu1 %v4522_v51  ;;  %v4519_v51 = vld [vmem:[#allocation8 + $0x118] sm:$0xff] }
 0x1f1   : > { %13255 = vst [vmem:[#allocation105_spill] sm:$0xff] %v11202_v26  ;;  %v11204_v30 = vpop.f32.mrf.mxu0  ;;  %9070 = vmatpush3.msra.mxu0 %v4864_v17  ;;  %v4863_v26 = vld [vmem:[#allocation8 + $0x1c8] sm:$0xff]  ;;  %8999 = vmatprep.subr.mxu1 %v4521_v13  ;;  %v4861_v17 = vld [vmem:[#allocation8 + $0x1b8] sm:$0xff] }
 0x1f2   : > { %13254 = vst [vmem:[#allocation104_spill] sm:$0xff] %v11200_v31  ;;  %13256 = vst [vmem:[#allocation106_spill] sm:$0xff] %v11204_v30  ;;  %v11206_v2 = vpop.f32.mrf.mxu1  ;;  %9071 = vmatprep.subr.mxu0 %v4863_v26  ;;  %9000 = vmatpush3.msra.mxu1 %v4521_v13 }
 0x1f3   : > { %13257 = vst [vmem:[#allocation107_spill] sm:$0xff] %v11206_v2  ;;  %v8495_v22 = vpop.f32.mrf.mxu0  ;;  %9072 = vmatpush3.msra.mxu0 %v4863_v26  ;;  %v4862_v2 = vld [vmem:[#allocation8 + $0x1c0] sm:$0xff]  ;;  %9001 = vmatprep.subr.mxu1 %v4520_v15  ;;  %v4860_v26 = vld [vmem:[#allocation8 + $0x1b0] sm:$0xff] }
 0x1f4   : > { %v11209_v46 = vadd.f32 %v8495_v22, %v11067_v18  ;;  %v11211_v21 = vpop.f32.mrf.mxu1  ;;  %9073 = vmatprep.subr.mxu0 %v4862_v2  ;;  %9002 = vmatpush3.msra.mxu1 %v4520_v15 }
 0x1f5   : > { %13259 = vst [vmem:[#allocation109_spill] sm:$0xff] %v11211_v21  ;;  %v11213_v31 = vpop.f32.mrf.mxu0  ;;  %9074 = vmatpush3.msra.mxu0 %v4862_v2  ;;  %9003 = vmatprep.subr.mxu1 %v4519_v51  ;;  %v4859_v2 = vld [vmem:[#allocation8 + $0x1a8] sm:$0xff] }
 0x1f6   : > { %13258 = vst [vmem:[#allocation108_spill] sm:$0xff] %v11209_v46  ;;  %13260 = vst [vmem:[#allocation110_spill] sm:$0xff] %v11213_v31  ;;  %v11215_v48 = vpop.f32.mrf.mxu1  ;;  %9075 = vmatprep.subr.mxu0 %v4861_v17  ;;  %9004 = vmatpush3.msra.mxu1 %v4519_v51  ;;  %v4858_v51 = vld [vmem:[#allocation8 + $0x1a0] sm:$0xff] }
 0x1f7   : > { %13261 = vst [vmem:[#allocation111_spill] sm:$0xff] %v11215_v48  ;;  %v8498_v30 = vpop.f32.mrf.mxu0  ;;  %9076 = vmatpush3.msra.mxu0 %v4861_v17  ;;  %v4518_v48 = vld [vmem:[#allocation8 + $0x110] sm:$0xff]  ;;  %v4516_v17 = vld [vmem:[#allocation8 + $0x100] sm:$0xff] }
 0x1f8   : > { %v11218_v18 = vadd.f32 %v8498_v30, %v11076_v32  ;;  %v11220_v22 = vpop.f32.mrf.mxu1  ;;  %9077 = vmatprep.subr.mxu0 %v4860_v26  ;;  %9005 = vmatprep.subr.mxu1 %v4518_v48  ;;  %v4517_v30 = vld [vmem:[#allocation8 + $0x108] sm:$0xff] }
 0x1f9   : > { %13263 = vst [vmem:[#allocation113_spill] sm:$0xff] %v11220_v22  ;;  %v11222_v21 = vpop.f32.mrf.mxu0  ;;  %9078 = vmatpush3.msra.mxu0 %v4860_v26  ;;  %9006 = vmatpush3.msra.mxu1 %v4518_v48 }
 0x1fa   : > { %13262 = vst [vmem:[#allocation112_spill] sm:$0xff] %v11218_v18  ;;  %13264 = vst [vmem:[#allocation114_spill] sm:$0xff] %v11222_v21  ;;  %v11224_v13 = vpop.f32.mrf.mxu1  ;;  %9079 = vmatprep.subr.mxu0 %v4859_v2  ;;  %9007 = vmatprep.subr.mxu1 %v4517_v30  ;;  %v4857_v18 = vld [vmem:[#allocation8 + $0x198] sm:$0xff]  ;;  %v4856_v21 = vld [vmem:[#allocation8 + $0x190] sm:$0xff] }
 0x1fb   : > { %13265 = vst [vmem:[#allocation115_spill] sm:$0xff] %v11224_v13  ;;  %v11226_v46 = vpop.f32.mrf.mxu0  ;;  %9080 = vmatpush3.msra.mxu0 %v4859_v2  ;;  %9008 = vmatpush3.msra.mxu1 %v4517_v30  ;;  %v4855_v2 = vld [vmem:[#allocation8 + $0x188] sm:$0xff] }
 0x1fc   : > { %v11228_v32 = vpop.f32.mrf.mxu1  ;;  %9081 = vmatprep.subr.mxu0 %v4858_v51  ;;  %9009 = vmatprep.subr.mxu1 %v4516_v17 }
 0x1fd   : > { %v11230_v15 = vpop.f32.mrf.mxu0  ;;  %9082 = vmatpush3.msra.mxu0 %v4858_v51  ;;  %9010 = vmatpush3.msra.mxu1 %v4516_v17  ;;  %v4854_v51 = vld [vmem:[#allocation8 + $0x180] sm:$0xff] }
 0x1fe   : > { %v11232_v22 = vpop.f32.mrf.mxu1  ;;  %9083 = vmatprep.subr.mxu0 %v4857_v18 }
 0x1ff   : > { %v11234_v13 = vpop.f32.mrf.mxu0  ;;  %9084 = vmatpush3.msra.mxu0 %v4857_v18  ;;  %v11252_v18 = vld [vmem:[#allocation8 + $0x278] sm:$0xff] }
 0x200   : > { %v11238_v48 = vpop.f32.mrf.mxu1  ;;  %9085 = vmatprep.subr.mxu0 %v4856_v21  ;;  %13266 = vst [vmem:[#allocation116_spill] sm:$0xff] %v11252_v18  ;;  %9139 = vmatprep.subr.mxu1 %v11252_v18 }
 0x201   : > { %v11236_v26 = vpop.f32.mrf.mxu0  ;;  %9086 = vmatpush3.msra.mxu0 %v4856_v21 }
 0x202   : > { %v11242_v30 = vpop.f32.mrf.mxu1  ;;  %9087 = vmatprep.subr.mxu0 %v4855_v2 }
 0x203   : > { %v11240_v31 = vpop.f32.mrf.mxu0  ;;  %9088 = vmatpush3.msra.mxu0 %v4855_v2 }
 0x204   : > { %9089 = vmatprep.subr.mxu0 %v4854_v51  ;;  %v11248_v28 = vpop.f32.mrf.mxu1 }
 0x205   : > { %v11244_v12 = vpop.f32.mrf.mxu0  ;;  %9090 = vmatpush3.msra.mxu0 %v4854_v51 }
 0x206   : > { %v11257_v53 = vpop.f32.mrf.mxu1 }
 0x207   : > { %v11246_v17 = vpop.f32.mrf.mxu0 }
 0x208   : > { %v11263_v43 = vpop.f32.mrf.mxu1 }
 0x209   : > { %v11250_v29 = vpop.f32.mrf.mxu0  ;;  %13270 = vst [vmem:[#allocation120_spill] sm:$0xff] %v11263_v43 }
 0x20a   : > { %v11269_v47 = vpop.f32.mrf.mxu1 }
 0x20b   : > { %v11255_v21 = vpop.f32.mrf.mxu0  ;;  %13273 = vst [vmem:[#allocation123_spill] sm:$0xff] %v11269_v47 }
 0x20c   : > { %13267 = vst [vmem:[#allocation117_spill] sm:$0xff] %v11255_v21  ;;  %v11275_v18 = vpop.f32.mrf.mxu1 }
 0x20d   : > { %v11259_v19 = vpop.f32.mrf.mxu0  ;;  %13276 = vst [vmem:[#allocation126_spill] sm:$0xff] %v11275_v18 }
 0x20e   : > { %13268 = vst [vmem:[#allocation118_spill] sm:$0xff] %v11259_v19  ;;  %v11281_v19 = vpop.f32.mrf.mxu1 }
 0x20f   : > { %v11261_v2 = vpop.f32.mrf.mxu0  ;;  %13279 = vst [vmem:[#allocation129_spill] sm:$0xff] %v11281_v19  ;;  %v11303_v19 = vld [vmem:[#allocation8 + $0x2f8] sm:$0xff] }
 0x210   : > { %13269 = vst [vmem:[#allocation119_spill] sm:$0xff] %v11261_v2  ;;  %13289 = vst [vmem:[#allocation139_spill] sm:$0xff] %v11303_v19  ;;  %9219 = vmatprep.subr.mxu0 %v11303_v19  ;;  %v2107_v19 = vadd.f32 %v10919_v4, %v10915_v5  ;;  %v2752_v5 = vadd.f32 %v11092_v52, %v11090_v41 }
 0x211   : > { %v11265_v16 = vpop.f32.mrf.mxu0 }
 0x212   : > { %13271 = vst [vmem:[#allocation121_spill] sm:$0xff] %v11265_v16  ;;  %v11287_v16 = vpop.f32.mrf.mxu1 }
 0x213   : > { %v11267_v51 = vpop.f32.mrf.mxu0 }
 0x214   : > { %13272 = vst [vmem:[#allocation122_spill] sm:$0xff] %v11267_v51 }
 0x215   : > { %v11271_v9 = vpop.f32.mrf.mxu0 }
 0x216   : > { %13274 = vst [vmem:[#allocation124_spill] sm:$0xff] %v11271_v9  ;;  %v11293_v9 = vpop.f32.mrf.mxu1 }
 0x217   : > { %v11273_v24 = vpop.f32.mrf.mxu0  ;;  %13284 = vst [vmem:[#allocation134_spill] sm:$0xff] %v11293_v9 }
 0x218   : > { %13275 = vst [vmem:[#allocation125_spill] sm:$0xff] %v11273_v24 }
 0x219   : > { %v11277_v58 = vpop.f32.mrf.mxu0 }
 0x21a   : > { %13277 = vst [vmem:[#allocation127_spill] sm:$0xff] %v11277_v58  ;;  %v11299_v58 = vpop.f32.mrf.mxu1 }
 0x21b   : > { %v11279_v21 = vpop.f32.mrf.mxu0  ;;  %13287 = vst [vmem:[#allocation137_spill] sm:$0xff] %v11299_v58 }
 0x21c   : > { %13278 = vst [vmem:[#allocation128_spill] sm:$0xff] %v11279_v21 }
 0x21d   : > { %v11283_v2 = vpop.f32.mrf.mxu0 }
 0x21e   : > { %13280 = vst [vmem:[#allocation130_spill] sm:$0xff] %v11283_v2  ;;  %v11308_v2 = vpop.f32.mrf.mxu1 }
 0x21f   : > { %v11285_v43 = vpop.f32.mrf.mxu0 }
 0x220   : > { %13281 = vst [vmem:[#allocation131_spill] sm:$0xff] %v11285_v43 }
 0x221   : > { %v11289_v51 = vpop.f32.mrf.mxu0 }
 0x222   : > { %13282 = vst [vmem:[#allocation132_spill] sm:$0xff] %v11289_v51 }
 0x223   : > { %v11291_v47 = vpop.f32.mrf.mxu0 }
 0x224   : > { %13283 = vst [vmem:[#allocation133_spill] sm:$0xff] %v11291_v47 }
 0x225   : > { %v11295_v24 = vpop.f32.mrf.mxu0 }
 0x226   : > { %13285 = vst [vmem:[#allocation135_spill] sm:$0xff] %v11295_v24  ;;  %v2105_v24 = vadd.f32 %v10907_v8, %v10903_v14  ;;  %v2413_v14 = vadd.f32 %v11094_v59, %v2107_v19 }
 0x227   : > { %v11297_v18 = vpop.f32.mrf.mxu0 }
 0x228   : > { %13286 = vst [vmem:[#allocation136_spill] sm:$0xff] %v11297_v18  ;;  %v11316_v18 = vpop.f32.mrf.mxu1  ;;  %v2751_v59 = vadd.f32 %v11098_v10, %v2413_v14  ;;  %v13295_v14 = vld [vmem:[#allocation22_spill] sm:$0xff] }
 0x229   : > { %v11301_v21 = vpop.f32.mrf.mxu0 }
 0x22a   : > { %13288 = vst [vmem:[#allocation138_spill] sm:$0xff] %v11301_v21  ;;  %v2411_v21 = vadd.f32 %v11085_v44, %v2105_v24  ;;  %v2109_v24 = vadd.f32 %v10931_v40, %v10927_v23  ;;  %v2111_v23 = vadd.f32 %v10943_v11, %v10939_v6  ;;  %v2754_v40 = vadd.f32 %v11103_v56, %v11101_v49 }
 0x22b   : > { %v11306_v43 = vpop.f32.mrf.mxu0  ;;  %v3089_v10 = vadd.f32 %v11236_v26, %v2751_v59 }
 0x22c   : > { %13290 = vst [vmem:[#allocation140_spill] sm:$0xff] %v11306_v43  ;;  %v2750_v43 = vadd.f32 %v11083_v7, %v11081_v42  ;;  %v2749_v8 = vadd.f32 %v11087_v34, %v2411_v21  ;;  %v2415_v42 = vadd.f32 %v11105_v62, %v2109_v24  ;;  %v11356_v62 = vld [vmem:[%s12859_s2] ss:$0 sm:$0xff]  ;;  %v3092_v6 = vadd.f32 %v11240_v31, %v2754_v40 }
 0x22d   : > { %v11310_v51 = vpop.f32.mrf.mxu0  ;;  %v3395_v26 = vadd.f32 %v11242_v30, %v3089_v10  ;;  %v11380_v24 = vadd.f32 %v13295_v14, %v10835_v54  ;;  %v13309_v14 = vld [vmem:[#allocation75_spill] sm:$0xff] }
 0x22e   : > { %13291 = vst [vmem:[#allocation141_spill] sm:$0xff] %v11310_v51  ;;  %v11327_v51 = vpop.f32.mrf.mxu1  ;;  %v3087_v4 = vadd.f32 %v11230_v15, %v2749_v8  ;;  %v2113_v15 = vadd.f32 %v10955_v33, %v10951_v55  ;;  %v3398_v55 = vadd.f32 %v11248_v28, %v3092_v6  ;;  %v13304_v6 = vld [vmem:[#allocation74_spill] sm:$0xff] }
 0x22f   : > { %v11312_v47 = vpop.f32.mrf.mxu0 }
 0x230   : > { %13292 = vst [vmem:[#allocation142_spill] sm:$0xff] %v11312_v47  ;;  %v11342_v7 = vpop.f32.mrf.mxu1  ;;  %v3393_v52 = vadd.f32 %v11232_v22, %v3087_v4  ;;  %v11369_v22 = vadd.f32 %v10825_v36, %v10823_v1  ;;  %v2419_v36 = vadd.f32 %v11123_v3, %v2113_v15  ;;  %v13296_v4 = vld [vmem:[#allocation23_spill] sm:$0xff]  ;;  %v2758_v3 = vadd.f32 %v11121_v37, %v11119_v0  ;;  %v13297_v37 = vld [vmem:[#allocation117_spill] sm:$0xff] }
 0x231   : > { %v11318_v58 = vpop.f32.mrf.mxu0  ;;  %v11391_v54 = vadd.f32 %v13296_v4, %v10847_v63  ;;  %v11402_v63 = vadd.f32 %v10861_v20, %v10859_v61  ;;  %v13300_v61 = vld [vmem:[#allocation26_spill] sm:$0xff]  ;;  %v13306_v15 = vld [vmem:[#allocation123_spill] sm:$0xff] }
 0x232   : > { %13293 = vst [vmem:[#allocation143_spill] sm:$0xff] %v11318_v58  ;;  %v3088_v58 = vadd.f32 %v11226_v46, %v2750_v43  ;;  %v3090_v43 = vadd.f32 %v11234_v13, %v2752_v5  ;;  %v2417_v46 = vadd.f32 %v11114_v27, %v2111_v23  ;;  %v11363_v11 = vpop.f32.mrf.mxu1  ;;  %v3096_v0 = vadd.f32 %v13297_v37, %v2758_v3  ;;  %v13317_v37 = vld [vmem:[#allocation76_spill] sm:$0xff] }
 0x233   : > { %v11321_v9 = vpop.f32.mrf.mxu0 }
 0x234   : > { %v3394_v34 = vadd.f32 %v11228_v32, %v3088_v58  ;;  %v2753_v58 = vadd.f32 %v11107_v25, %v2415_v42  ;;  %v3396_v56 = vadd.f32 %v11238_v48, %v3090_v43  ;;  %v2756_v25 = vadd.f32 %v11112_v35, %v11110_v45  ;;  %v11385_v33 = vpop.f32.mrf.mxu1 }
 0x235   : > { %v11329_v47 = vpop.f32.mrf.mxu0  ;;  %v2755_v1 = vadd.f32 %v11116_v38, %v2417_v46  ;;  %v2115_v38 = vadd.f32 %v10967_v60, %v10963_v50  ;;  %v2757_v50 = vadd.f32 %v11125_v39, %v2419_v36  ;;  %v13301_v39 = vld [vmem:[#allocation34_spill] sm:$0xff]  ;;  %v13303_v46 = vld [vmem:[#allocation73_spill] sm:$0xff] }
 0x236   : > { %13294 = vst [vmem:[#allocation144_spill] sm:$0xff] %v11329_v47  ;;  %v3091_v27 = vadd.f32 %v11244_v12, %v2753_v58  ;;  %v3094_v45 = vadd.f32 %v11246_v17, %v2756_v25  ;;  %v13302_v58 = vld [vmem:[#allocation35_spill] sm:$0xff]  ;;  %v13310_v36 = vld [vmem:[#allocation78_spill] sm:$0xff] }
 0x237   : > { %v11336_v44 = vpop.f32.mrf.mxu0  ;;  %v3093_v17 = vadd.f32 %v11250_v29, %v2755_v1  ;;  %v2421_v60 = vadd.f32 %v11132_v57, %v2115_v38  ;;  %v13298_v29 = vld [vmem:[#allocation120_spill] sm:$0xff]  ;;  %v2117_v57 = vadd.f32 %v13302_v58, %v13301_v39 }
 0x238   : > { %v3397_v28 = vadd.f32 %v11257_v53, %v3091_v27  ;;  %v11407_v53 = vpop.f32.mrf.mxu1  ;;  %v3400_v40 = vadd.f32 %v13298_v29, %v3094_v45  ;;  %v13319_v29 = vld [vmem:[#allocation129_spill] sm:$0xff] }
 0x239   : > { %v11344_v47 = vpop.f32.mrf.mxu0  ;;  %v3399_v25 = vadd.f32 %v13306_v15, %v3093_v17  ;;  %v2759_v1 = vadd.f32 %v13309_v14, %v2421_v60  ;;  %v13314_v17 = vld [vmem:[#allocation32_spill] sm:$0xff] }
 0x23a   : > { %v13325_v14 = vld [vmem:[#allocation40_spill] sm:$0xff] }
 0x23b   : > { %v8773_v41 = vpop.f32.mrf.mxu0 }
 0x23c   : > { %v3732_v19 = vadd.f32 %v8773_v41, %v3394_v34 }
 0x23d   : > { %v3572_v49 = vpop.f32.mrf.mxu0 }
 0x23e   : > { %v3770_v13 = vadd.f32 %v11356_v62, %v3732_v19  ;;  %v3731_v32 = vadd.f32 %v3572_v49, %v3393_v52  ;;  %v13299_v19 = vld [vmem:[#allocation25_spill] sm:$0xff]  ;;  %v2760_v49 = vadd.f32 %v13304_v6, %v13303_v46  ;;  %v13322_v46 = vld [vmem:[#allocation79_spill] sm:$0xff] }
 0x23f   : > { %v8776_v31 = vpop.f32.mrf.mxu0  ;;  %v11413_v20 = vadd.f32 %v13300_v61, %v13299_v19 }
 0x240   : > { %v3802_v21 = vmax.f32 %v3770_v13, 0.0  ;;  %v3769_v48 = vadd.f32 %v11356_v62, %v3731_v32  ;;  %v3734_v8 = vadd.f32 %v8776_v31, %v3396_v56  ;;  %v13305_v56 = vld [vmem:[#allocation118_spill] sm:$0xff] }
 0x241   : > { %v3582_v12 = vpop.f32.mrf.mxu0  ;;  %v3095_v13 = vadd.f32 %v13305_v56, %v2757_v50  ;;  %v13316_v50 = vld [vmem:[#allocation38_spill] sm:$0xff] }
 0x242   : > { %3840 = vst [vmem:[#allocation2 + $0x20] sm:$0xff] %v3802_v21  ;;  %v3801_v35 = vmax.f32 %v3769_v48, 0.0  ;;  %v3772_v30 = vadd.f32 %v11356_v62, %v3734_v8  ;;  %v3733_v5 = vadd.f32 %v3582_v12, %v3395_v26  ;;  %v13308_v48 = vld [vmem:[#allocation29_spill] sm:$0xff]  ;;  %v13311_v12 = vld [vmem:[#allocation126_spill] sm:$0xff] }
 0x243   : > { %v8779_v42 = vpop.f32.mrf.mxu0  ;;  %v3402_v45 = vadd.f32 %v13311_v12, %v3096_v0  ;;  %v13318_v0 = vld [vmem:[#allocation77_spill] sm:$0xff] }
 0x244   : > { %3839 = vst [vmem:[#allocation2 + $0x18] sm:$0xff] %v3801_v35  ;;  %v3804_v59 = vmax.f32 %v3772_v30, 0.0  ;;  %v3771_v34 = vadd.f32 %v11356_v62, %v3733_v5  ;;  %v3736_v43 = vadd.f32 %v8779_v42, %v3398_v55  ;;  %8854 = vmatprep.mubr.f32.mxu1 %v3801_v35  ;;  %v2423_v55 = vadd.f32 %v13310_v36, %v2117_v57  ;;  %v11429_v35 = vpop.f32.mrf.mxu1  ;;  %v13312_v5 = vld [vmem:[#allocation119_spill] sm:$0xff]  ;;  %v5511_v57 = vld [vmem:[#allocation8 + $0x2e8] sm:$0xff] }
 0x245   : > { %v3592_v23 = vpop.f32.mrf.mxu0  ;;  %8855 = vmatmul.mubr.f32.gmra.mxu1 %v3802_v21  ;;  %v13307_v21 = vld [vmem:[#allocation28_spill] sm:$0xff]  ;;  %v3098_v4 = vadd.f32 %v13312_v5, %v2760_v49  ;;  %v13313_v42 = vld [vmem:[#allocation31_spill] sm:$0xff]  ;;  %v13323_v49 = vld [vmem:[#allocation82_spill] sm:$0xff] }
 0x246   : > { %3842 = vst [vmem:[#allocation2 + $0x30] sm:$0xff] %v3804_v59  ;;  %v3803_v41 = vmax.f32 %v3771_v34, 0.0  ;;  %v3774_v52 = vadd.f32 %v11356_v62, %v3736_v43  ;;  %v3735_v10 = vadd.f32 %v3592_v23, %v3397_v28  ;;  %v11424_v8 = vadd.f32 %v13308_v48, %v13307_v21  ;;  %v13315_v43 = vld [vmem:[#allocation37_spill] sm:$0xff]  ;;  %v11454_v15 = vpop.f32.mrf.mxu1 }
 0x247   : > { %v8782_v32 = vpop.f32.mrf.mxu0  ;;  %v11435_v34 = vadd.f32 %v13314_v17, %v13313_v42  ;;  %v2119_v60 = vadd.f32 %v13316_v50, %v13315_v43  ;;  %v2762_v23 = vadd.f32 %v13318_v0, %v13317_v37  ;;  %v2761_v6 = vadd.f32 %v13322_v46, %v2423_v55  ;;  %v13327_v55 = vld [vmem:[#allocation59_spill] sm:$0xff]  ;;  %v13335_v0 = vld [vmem:[#allocation86_spill] sm:$0xff] }
 0x248   : > { %3841 = vst [vmem:[#allocation2 + $0x28] sm:$0xff] %v3803_v41  ;;  %v3806_v27 = vmax.f32 %v3774_v52, 0.0  ;;  %v3773_v31 = vadd.f32 %v11356_v62, %v3735_v10  ;;  %v3738_v26 = vadd.f32 %v8782_v32, %v3400_v40  ;;  %8857 = vmatprep.mubr.f32.mxu1 %v3803_v41  ;;  %v3401_v40 = vadd.f32 %v13319_v29, %v3095_v13  ;;  %v13320_v10 = vld [vmem:[#allocation121_spill] sm:$0xff]  ;;  %v13324_v13 = vld [vmem:[#allocation122_spill] sm:$0xff] }
 0x249   : > { %v3602_v30 = vpop.f32.mrf.mxu0  ;;  %8858 = vmatmul.mubr.f32.gmra.mxu1 %v3804_v59  ;;  %v3097_v19 = vadd.f32 %v13320_v10, %v2759_v1  ;;  %v2425_v56 = vadd.f32 %v13323_v49, %v2119_v60  ;;  %v3100_v32 = vadd.f32 %v13324_v13, %v2762_v23  ;;  %v13326_v1 = vld [vmem:[#allocation41_spill] sm:$0xff]  ;;  %v1785_v12 = vadd.f32 %v13327_v55, %v11369_v22  ;;  %v13332_v60 = vld [vmem:[#allocation15_spill] sm:$0xff]  ;;  %v13338_v49 = vld [vmem:[#allocation60_spill] sm:$0xff] }
 0x24a   : > { %3844 = vst [vmem:[#allocation2 + $0x40] sm:$0xff] %v3806_v27  ;;  %v3805_v38 = vmax.f32 %v3773_v31, 0.0  ;;  %v3776_v3 = vadd.f32 %v11356_v62, %v3738_v26  ;;  %v3737_v28 = vadd.f32 %v3602_v30, %v3399_v25  ;;  %v3404_v31 = vadd.f32 %v11287_v16, %v3098_v4  ;;  %v13329_v30 = vld [vmem:[#allocation81_spill] sm:$0xff]  ;;  %v13331_v4 = vld [vmem:[#allocation134_spill] sm:$0xff]  ;;  %v13334_v22 = vld [vmem:[#allocation83_spill] sm:$0xff] }
 0x24b   : > { %v8785_v59 = vpop.f32.mrf.mxu0  ;;  %v11442_v41 = vld [vmem:[#allocation2 + $0x17] sm:$0xff]  ;;  %v11444_v52 = vld [vmem:[#allocation2 + $0x1f] sm:$0xff]  ;;  %v2121_v36 = vadd.f32 %v13326_v1, %v13325_v14  ;;  %v3403_v42 = vadd.f32 %v13331_v4, %v3097_v19  ;;  %vm13333_vm10 = vnez %v13332_v60  ;;  %v2763_v37 = vadd.f32 %v13334_v22, %v2425_v56 }
 0x24c   : > { %3843 = vst [vmem:[#allocation2 + $0x38] sm:$0xff] %v3805_v38  ;;  %v3808_v61 = vmax.f32 %v3776_v3, 0.0  ;;  %v3775_v39 = vadd.f32 %v11356_v62, %v3737_v28  ;;  %v3740_v58 = vadd.f32 %v8785_v59, %v3402_v45  ;;  %8934 = vmatprep.mubr.msk.f32.mxu0 %vm13164_vm13, %v11442_v41  ;;  %8860 = vmatprep.mubr.f32.mxu1 %v3805_v38  ;;  %v13328_v45 = vld [vmem:[#allocation80_spill] sm:$0xff]  ;;  %v13336_v29 = vld [vmem:[#allocation137_spill] sm:$0xff]  ;;  %v11478_v59 = vpop.f32.mrf.mxu1  ;;  %v13342_v1 = vld [vmem:[#allocation127_spill] sm:$0xff] }
 0x24d   : > { %v3612_v25 = vpop.f32.mrf.mxu0  ;;  %8935 = vmatmul.mubr.f32.gmra.mxu0 %v11444_v52  ;;  %8861 = vmatmul.mubr.f32.gmra.mxu1 %v3806_v27  ;;  %v2764_v5 = vadd.f32 %v13329_v30, %v13328_v45  ;;  %v13330_v38 = vld [vmem:[#allocation124_spill] sm:$0xff]  ;;  %v2427_v23 = vadd.f32 %v13335_v0, %v2121_v36  ;;  %v13337_v19 = vld [vmem:[#allocation125_spill] sm:$0xff]  ;;  %v2123_v13 = vadd.f32 %v13338_v49, %v1785_v12  ;;  %v13348_v0 = vld [vmem:[#allocation62_spill] sm:$0xff] }
 0x24e   : > { %3846 = vst [vmem:[#allocation2 + $0x50] sm:$0xff] %v3808_v61  ;;  %v3807_v26 = vmax.f32 %v3775_v39, 0.0  ;;  %v3778_v21 = vadd.f32 %v11356_v62, %v3740_v58  ;;  %v3739_v48 = vadd.f32 %v3612_v25, %v3401_v40  ;;  %v3099_v3 = vadd.f32 %v13330_v38, %v2761_v6  ;;  %v13339_v56 = vld [vmem:[#allocation61_spill] sm:$0xff]  ;;  %v13343_v30 = vld [vmem:[#allocation16_spill] sm:$0xff]  ;;  %v11501_v4 = vpop.f32.mrf.mxu1 }
 0x24f   : > { %v8788_v28 = vpop.f32.mrf.mxu0  ;;  %v11466_v27 = vld [vmem:[#allocation2 + $0x27] sm:$0xff]  ;;  %v11468_v16 = vld [vmem:[#allocation2 + $0x2f] sm:$0xff]  ;;  %v3406_v40 = vadd.f32 %v13336_v29, %v3100_v32  ;;  %v3102_v39 = vadd.f32 %v13337_v19, %v2764_v5  ;;  %v1787_v25 = vadd.f32 %v13339_v56, %v11380_v24  ;;  %v3101_v36 = vadd.f32 %v13342_v1, %v2763_v37 }
 0x250   : > { %3845 = vst [vmem:[#allocation2 + $0x48] sm:$0xff] %v3807_v26  ;;  %v3810_v17 = vmax.f32 %v3778_v21, 0.0  ;;  %v3777_v43 = vadd.f32 %v11356_v62, %v3739_v48  ;;  %v3742_v50 = vadd.f32 %v8788_v28, %v3404_v31  ;;  %8937 = vmatprep.mubr.msk.f32.mxu0 %vm13333_vm10, %v11466_v27  ;;  %8863 = vmatprep.mubr.f32.mxu1 %v3807_v26  ;;  %v13340_v31 = vld [vmem:[#allocation84_spill] sm:$0xff]  ;;  %v13341_v32 = vld [vmem:[#allocation85_spill] sm:$0xff]  ;;  %vm13344_vm8 = vnez %v13343_v30  ;;  %v13345_v24 = vld [vmem:[#allocation87_spill] sm:$0xff]  ;;  %v11524_v1 = vpop.f32.mrf.mxu1 }
 0x251   : > { %v3622_v10 = vpop.f32.mrf.mxu0  ;;  %8938 = vmatmul.mubr.f32.gmra.mxu0 %v11468_v16  ;;  %8864 = vmatmul.mubr.f32.gmra.mxu1 %v3808_v61  ;;  %v2766_v26 = vadd.f32 %v13341_v32, %v13340_v31  ;;  %v3405_v21 = vadd.f32 %v11308_v2, %v3099_v3  ;;  %v2765_v5 = vadd.f32 %v13345_v24, %v2427_v23  ;;  %v13346_v2 = vld [vmem:[#allocation90_spill] sm:$0xff]  ;;  %v13347_v3 = vld [vmem:[#allocation128_spill] sm:$0xff]  ;;  %v13349_v23 = vld [vmem:[#allocation63_spill] sm:$0xff] }
 0x252   : > { %3848 = vst [vmem:[#allocation2 + $0x60] sm:$0xff] %v3810_v17  ;;  %v3809_v58 = vmax.f32 %v3777_v43, 0.0  ;;  %v3780_v46 = vadd.f32 %v11356_v62, %v3742_v50  ;;  %v3741_v6 = vadd.f32 %v3622_v10, %v3403_v42  ;;  %v2429_v38 = vadd.f32 %v13346_v2, %v2123_v13  ;;  %v13350_v10 = vld [vmem:[#allocation88_spill] sm:$0xff]  ;;  %v13351_v19 = vld [vmem:[#allocation89_spill] sm:$0xff]  ;;  %v5508_v30 = vld [vmem:[#allocation8 + $0x2d0] sm:$0xff] }
 0x253   : > { %v8791_v48 = vpop.f32.mrf.mxu0  ;;  %v11489_v14 = vld [vmem:[#allocation2 + $0x37] sm:$0xff]  ;;  %v11491_v61 = vld [vmem:[#allocation2 + $0x3f] sm:$0xff]  ;;  %v3104_v28 = vadd.f32 %v13347_v3, %v2766_v26  ;;  %v3408_v43 = vadd.f32 %v11316_v18, %v3102_v39  ;;  %v2125_v29 = vadd.f32 %v13348_v0, %v1787_v25  ;;  %v3407_v18 = vadd.f32 %v11327_v51, %v3101_v36  ;;  %v13358_v2 = vld [vmem:[#allocation64_spill] sm:$0xff] }
 0x254   : > { %3847 = vst [vmem:[#allocation2 + $0x58] sm:$0xff] %v3809_v58  ;;  %v3812_v55 = vmax.f32 %v3780_v46, 0.0  ;;  %v3779_v45 = vadd.f32 %v11356_v62, %v3741_v6  ;;  %v3744_v12 = vadd.f32 %v8791_v48, %v3406_v40  ;;  %8940 = vmatprep.mubr.msk.f32.mxu0 %vm13344_vm8, %v11489_v14  ;;  %8866 = vmatprep.mubr.f32.mxu1 %v3809_v58  ;;  %v13352_v46 = vld [vmem:[#allocation130_spill] sm:$0xff]  ;;  %v13353_v31 = vld [vmem:[#allocation17_spill] sm:$0xff]  ;;  %v13357_v51 = vld [vmem:[#allocation131_spill] sm:$0xff] }
 0x255   : > { %v3632_v42 = vpop.f32.mrf.mxu0  ;;  %8941 = vmatmul.mubr.f32.gmra.mxu0 %v11491_v61  ;;  %8867 = vmatmul.mubr.f32.gmra.mxu1 %v3810_v17  ;;  %v1789_v40 = vadd.f32 %v13349_v23, %v11391_v54  ;;  %v2768_v58 = vadd.f32 %v13351_v19, %v13350_v10  ;;  %v3103_v6 = vadd.f32 %v13352_v46, %v2765_v5  ;;  %v13355_v54 = vld [vmem:[#allocation91_spill] sm:$0xff]  ;;  %v13356_v26 = vld [vmem:[#allocation94_spill] sm:$0xff]  ;;  %v13362_v0 = vld [vmem:[#allocation132_spill] sm:$0xff] }
 0x256   : > { %3850 = vst [vmem:[#allocation2 + $0x70] sm:$0xff] %v3812_v55  ;;  %v3811_v50 = vmax.f32 %v3779_v45, 0.0  ;;  %v3782_v22 = vadd.f32 %v11356_v62, %v3744_v12  ;;  %v3743_v37 = vadd.f32 %v3632_v42, %v3405_v21  ;;  %vm13354_vm7 = vnez %v13353_v31  ;;  %v13363_v19 = vld [vmem:[#allocation18_spill] sm:$0xff] }
 0x257   : > { %v8794_v49 = vpop.f32.mrf.mxu0  ;;  %v11512_v13 = vld [vmem:[#allocation2 + $0x47] sm:$0xff]  ;;  %v11514_v17 = vld [vmem:[#allocation2 + $0x4f] sm:$0xff]  ;;  %v2767_v32 = vadd.f32 %v13355_v54, %v2429_v38  ;;  %v2431_v21 = vadd.f32 %v13356_v26, %v2125_v29  ;;  %v3410_v48 = vadd.f32 %v11342_v7, %v3104_v28  ;;  %v3106_v36 = vadd.f32 %v13357_v51, %v2768_v58  ;;  %v5507_v31 = vld [vmem:[#allocation8 + $0x2c8] sm:$0xff] }
 0x258   : > { %3849 = vst [vmem:[#allocation2 + $0x68] sm:$0xff] %v3811_v50  ;;  %v3814_v39 = vmax.f32 %v3782_v22, 0.0  ;;  %v3781_v56 = vadd.f32 %v11356_v62, %v3743_v37  ;;  %v3746_v25 = vadd.f32 %v8794_v49, %v3408_v43  ;;  %8943 = vmatprep.mubr.msk.f32.mxu0 %vm13354_vm7, %v11512_v13  ;;  %8869 = vmatprep.mubr.f32.mxu1 %v3811_v50  ;;  %v13359_v38 = vld [vmem:[#allocation65_spill] sm:$0xff]  ;;  %v13360_v43 = vld [vmem:[#allocation92_spill] sm:$0xff]  ;;  %vm13364_vm6 = vnez %v13363_v19 }
 0x259   : > { %v3642_v45 = vpop.f32.mrf.mxu0  ;;  %8944 = vmatmul.mubr.f32.gmra.mxu0 %v11514_v17  ;;  %8870 = vmatmul.mubr.f32.gmra.mxu1 %v3812_v55  ;;  %v2127_v3 = vadd.f32 %v13358_v2, %v1789_v40  ;;  %v1791_v42 = vadd.f32 %v13359_v38, %v11402_v63  ;;  %v13361_v7 = vld [vmem:[#allocation93_spill] sm:$0xff]  ;;  %v3409_v50 = vadd.f32 %v11363_v11, %v3103_v6  ;;  %v13365_v63 = vld [vmem:[#allocation95_spill] sm:$0xff]  ;;  %v13366_v11 = vld [vmem:[#allocation98_spill] sm:$0xff] }
 0x25a   : > { %3852 = vst [vmem:[#allocation2 + $0x80] sm:$0xff] %v3814_v39  ;;  %v3813_v12 = vmax.f32 %v3781_v56, 0.0  ;;  %v3784_v24 = vadd.f32 %v11356_v62, %v3746_v25  ;;  %v3745_v5 = vadd.f32 %v3642_v45, %v3407_v18  ;;  %v2770_v28 = vadd.f32 %v13361_v7, %v13360_v43  ;;  %v13367_v6 = vld [vmem:[#allocation133_spill] sm:$0xff]  ;;  %v11547_v18 = vpop.f32.mrf.mxu1  ;;  %v13372_v2 = vld [vmem:[#allocation135_spill] sm:$0xff] }
 0x25b   : > { %v8797_v22 = vpop.f32.mrf.mxu0  ;;  %v11535_v37 = vld [vmem:[#allocation2 + $0x57] sm:$0xff]  ;;  %v11537_v55 = vld [vmem:[#allocation2 + $0x5f] sm:$0xff]  ;;  %v3105_v29 = vadd.f32 %v13362_v0, %v2767_v32  ;;  %v2769_v58 = vadd.f32 %v13365_v63, %v2431_v21  ;;  %v2433_v46 = vadd.f32 %v13366_v11, %v2127_v3  ;;  %v3412_v25 = vadd.f32 %v11385_v33, %v3106_v36 }
 0x25c   : > { %3851 = vst [vmem:[#allocation2 + $0x78] sm:$0xff] %v3813_v12  ;;  %v3816_v23 = vmax.f32 %v3784_v24, 0.0  ;;  %v3783_v10 = vadd.f32 %v11356_v62, %v3745_v5  ;;  %v3748_v40 = vadd.f32 %v8797_v22, %v3410_v48  ;;  %8946 = vmatprep.mubr.msk.f32.mxu0 %vm13364_vm6, %v11535_v37  ;;  %8872 = vmatprep.mubr.f32.mxu1 %v3813_v12  ;;  %v13368_v48 = vld [vmem:[#allocation66_spill] sm:$0xff]  ;;  %v13369_v21 = vld [vmem:[#allocation67_spill] sm:$0xff]  ;;  %v13370_v12 = vld [vmem:[#allocation96_spill] sm:$0xff] }
 0x25d   : > { %v3108_v49 = vadd.f32 %v13367_v6, %v2770_v28  ;;  %v3652_v56 = vpop.f32.mrf.mxu0  ;;  %8947 = vmatmul.mubr.f32.gmra.mxu0 %v11537_v55  ;;  %8873 = vmatmul.mubr.f32.gmra.mxu1 %v3814_v39  ;;  %v2129_v45 = vadd.f32 %v13368_v48, %v1791_v42  ;;  %v1793_v51 = vadd.f32 %v13369_v21, %v11413_v20  ;;  %v13371_v24 = vld [vmem:[#allocation97_spill] sm:$0xff]  ;;  %v13373_v28 = vld [vmem:[#allocation19_spill] sm:$0xff]  ;;  %v13376_v22 = vld [vmem:[#allocation102_spill] sm:$0xff] }
 0x25e   : > { %3854 = vst [vmem:[#allocation2 + $0x90] sm:$0xff] %v3816_v23  ;;  %v3815_v54 = vmax.f32 %v3783_v10, 0.0  ;;  %v3786_v32 = vadd.f32 %v11356_v62, %v3748_v40  ;;  %v3747_v26 = vadd.f32 %v3652_v56, %v3409_v50  ;;  %v2772_v5 = vadd.f32 %v13371_v24, %v13370_v12  ;;  %v13375_v20 = vld [vmem:[#allocation99_spill] sm:$0xff]  ;;  %v11570_v40 = vpop.f32.mrf.mxu1  ;;  %v13378_v56 = vld [vmem:[#allocation68_spill] sm:$0xff]  ;;  %v13382_v21 = vld [vmem:[#allocation138_spill] sm:$0xff] }
 0x25f   : > { %v3107_v3 = vadd.f32 %v13372_v2, %v2769_v58  ;;  %v8800_v38 = vpop.f32.mrf.mxu0  ;;  %v11558_v43 = vld [vmem:[#allocation2 + $0x67] sm:$0xff]  ;;  %v11560_v39 = vld [vmem:[#allocation2 + $0x6f] sm:$0xff]  ;;  %v3411_v33 = vadd.f32 %v11407_v53, %v3105_v29  ;;  %vm13374_vm5 = vnez %v13373_v28  ;;  %v2771_v50 = vadd.f32 %v13375_v20, %v2433_v46 }
 0x260   : > { %3853 = vst [vmem:[#allocation2 + $0x88] sm:$0xff] %v3815_v54  ;;  %v3818_v36 = vmax.f32 %v3786_v32, 0.0  ;;  %v3785_v7 = vadd.f32 %v11356_v62, %v3747_v26  ;;  %v3750_v42 = vadd.f32 %v8800_v38, %v3412_v25  ;;  %8949 = vmatprep.mubr.msk.f32.mxu0 %vm13374_vm5, %v11558_v43  ;;  %8875 = vmatprep.mubr.f32.mxu1 %v3815_v54  ;;  %v13377_v53 = vld [vmem:[#allocation136_spill] sm:$0xff]  ;;  %v13379_v46 = vld [vmem:[#allocation69_spill] sm:$0xff] }
 0x261   : > { %v2435_v0 = vadd.f32 %v13376_v22, %v2129_v45  ;;  %v3414_v10 = vadd.f32 %v11429_v35, %v3108_v49  ;;  %v3662_v63 = vpop.f32.mrf.mxu0  ;;  %8950 = vmatmul.mubr.f32.gmra.mxu0 %v11560_v39  ;;  %8876 = vmatmul.mubr.f32.gmra.mxu1 %v3816_v23  ;;  %v3110_v29 = vadd.f32 %v13377_v53, %v2772_v5  ;;  %v13380_v32 = vld [vmem:[#allocation100_spill] sm:$0xff]  ;;  %v13381_v35 = vld [vmem:[#allocation101_spill] sm:$0xff]  ;;  %v13388_v53 = vld [vmem:[#allocation70_spill] sm:$0xff] }
 0x262   : > { %3856 = vst [vmem:[#allocation2 + $0xa0] sm:$0xff] %v3818_v36  ;;  %v3817_v58 = vmax.f32 %v3785_v7, 0.0  ;;  %v3788_v11 = vadd.f32 %v11356_v62, %v3750_v42  ;;  %v3749_v6 = vadd.f32 %v3662_v63, %v3411_v33  ;;  %v2131_v25 = vadd.f32 %v13378_v56, %v1793_v51  ;;  %v13383_v2 = vld [vmem:[#allocation20_spill] sm:$0xff]  ;;  %v11593_v42 = vpop.f32.mrf.mxu1  ;;  %v13391_v56 = vld [vmem:[#allocation105_spill] sm:$0xff] }
 0x263   : > { %v1795_v54 = vadd.f32 %v13379_v46, %v11424_v8  ;;  %v2774_v49 = vadd.f32 %v13381_v35, %v13380_v32  ;;  %v3413_v26 = vadd.f32 %v11454_v15, %v3107_v3  ;;  %v8803_v48 = vpop.f32.mrf.mxu0  ;;  %v11581_v45 = vld [vmem:[#allocation2 + $0x77] sm:$0xff]  ;;  %v11583_v23 = vld [vmem:[#allocation2 + $0x7f] sm:$0xff]  ;;  %v3109_v12 = vadd.f32 %v13382_v21, %v2771_v50  ;;  %v13387_v33 = vld [vmem:[#allocation140_spill] sm:$0xff] }
 0x264   : > { %3855 = vst [vmem:[#allocation2 + $0x98] sm:$0xff] %v3817_v58  ;;  %v3820_v24 = vmax.f32 %v3788_v11, 0.0  ;;  %v3787_v5 = vadd.f32 %v11356_v62, %v3749_v6  ;;  %v3752_v51 = vadd.f32 %v8803_v48, %v3414_v10  ;;  %vm13384_vm5 = vnez %v13383_v2  ;;  %8878 = vmatprep.mubr.f32.mxu1 %v3817_v58  ;;  %v13385_v8 = vld [vmem:[#allocation103_spill] sm:$0xff]  ;;  %v13386_v15 = vld [vmem:[#allocation106_spill] sm:$0xff]  ;;  %v13390_v6 = vld [vmem:[#allocation104_spill] sm:$0xff] }
 0x265   : > { %8952 = vmatprep.mubr.msk.f32.mxu0 %vm13384_vm5, %v11581_v45  ;;  %v2773_v38 = vadd.f32 %v13385_v8, %v2435_v0  ;;  %v2437_v3 = vadd.f32 %v13386_v15, %v2131_v25  ;;  %v3112_v7 = vadd.f32 %v13387_v33, %v2774_v49  ;;  %v3672_v20 = vpop.f32.mrf.mxu0  ;;  %8879 = vmatmul.mubr.f32.gmra.mxu1 %v3818_v36  ;;  %v13389_v0 = vld [vmem:[#allocation71_spill] sm:$0xff]  ;;  %v13392_v46 = vld [vmem:[#allocation141_spill] sm:$0xff] }
 0x266   : > { %8953 = vmatmul.mubr.f32.gmra.mxu0 %v11583_v23  ;;  %v3416_v50 = vadd.f32 %v11478_v59, %v3110_v29  ;;  %3858 = vst [vmem:[#allocation2 + $0xb0] sm:$0xff] %v3820_v24  ;;  %v3819_v22 = vmax.f32 %v3787_v5, 0.0  ;;  %v3790_v10 = vadd.f32 %v11356_v62, %v3752_v51  ;;  %v3751_v63 = vadd.f32 %v3672_v20, %v3413_v26  ;;  %v13393_v48 = vld [vmem:[#allocation21_spill] sm:$0xff]  ;;  %v13396_v5 = vld [vmem:[#allocation110_spill] sm:$0xff] }
 0x267   : > { %v2133_v58 = vadd.f32 %v13388_v53, %v1795_v54  ;;  %v1797_v11 = vadd.f32 %v13389_v0, %v11435_v34  ;;  %v2776_v25 = vadd.f32 %v13391_v56, %v13390_v6  ;;  %v3111_v32 = vadd.f32 %v13392_v46, %v2773_v38  ;;  %v8806_v35 = vpop.f32.mrf.mxu0  ;;  %v11604_v49 = vld [vmem:[#allocation2 + $0x87] sm:$0xff]  ;;  %v11606_v36 = vld [vmem:[#allocation2 + $0x8f] sm:$0xff]  ;;  %v8735_v38 = vpop.f32.mrf.mxu1 }
 0x268   : > { %v3415_v59 = vadd.f32 %v11501_v4, %v3109_v12  ;;  %3857 = vst [vmem:[#allocation2 + $0xa8] sm:$0xff] %v3819_v22  ;;  %v3822_v29 = vmax.f32 %v3790_v10, 0.0  ;;  %v3789_v26 = vadd.f32 %v11356_v62, %v3751_v63  ;;  %v3754_v54 = vadd.f32 %v8806_v35, %v3416_v50  ;;  %8881 = vmatprep.mubr.f32.mxu1 %v3819_v22  ;;  %v13395_v34 = vld [vmem:[#allocation107_spill] sm:$0xff]  ;;  %v13397_v4 = vld [vmem:[#allocation142_spill] sm:$0xff]  ;;  %v13398_v10 = vld [vmem:[#allocation72_spill] sm:$0xff] }
 0x269   : > { %vm13394_vm5 = vnez %v13393_v48  ;;  %v2775_v21 = vadd.f32 %v13395_v34, %v2437_v3  ;;  %v2439_v51 = vadd.f32 %v13396_v5, %v2133_v58  ;;  %v3418_v8 = vadd.f32 %v11524_v1, %v3112_v7  ;;  %v3682_v15 = vpop.f32.mrf.mxu0  ;;  %8882 = vmatmul.mubr.f32.gmra.mxu1 %v3820_v24  ;;  %v13399_v63 = vld [vmem:[#allocation108_spill] sm:$0xff]  ;;  %v13400_v3 = vld [vmem:[#allocation109_spill] sm:$0xff]  ;;  %v13401_v24 = vld [vmem:[#allocation143_spill] sm:$0xff] }
 0x26a   : > { %8955 = vmatprep.mubr.msk.f32.mxu0 %vm13394_vm5, %v11604_v49  ;;  %v3114_v12 = vadd.f32 %v13397_v4, %v2776_v25  ;;  %3860 = vst [vmem:[#allocation2 + $0xc0] sm:$0xff] %v3822_v29  ;;  %v3821_v33 = vmax.f32 %v3789_v26, 0.0  ;;  %v3792_v20 = vadd.f32 %v11356_v62, %v3754_v54  ;;  %v3753_v50 = vadd.f32 %v3682_v15, %v3415_v59  ;;  %v13402_v35 = vld [vmem:[#allocation24_spill] sm:$0xff]  ;;  %v3374_v54 = vpop.f32.mrf.mxu1  ;;  %v5506_v19 = vld [vmem:[#allocation8 + $0x2c0] sm:$0xff] }
 0x26b   : > { %8956 = vmatmul.mubr.f32.gmra.mxu0 %v11606_v36  ;;  %v2135_v22 = vadd.f32 %v13398_v10, %v1797_v11  ;;  %v2778_v53 = vadd.f32 %v13400_v3, %v13399_v63  ;;  %v3417_v58 = vadd.f32 %v11547_v18, %v3111_v32  ;;  %v8809_v1 = vpop.f32.mrf.mxu0  ;;  %v11623_v7 = vld [vmem:[#allocation2 + $0x97] sm:$0xff]  ;;  %v11625_v0 = vld [vmem:[#allocation2 + $0x9f] sm:$0xff]  ;;  %v3113_v6 = vadd.f32 %v13401_v24, %v2775_v21  ;;  %v13406_v4 = vld [vmem:[#allocation112_spill] sm:$0xff] }
 0x26c   : > { %3859 = vst [vmem:[#allocation2 + $0xb8] sm:$0xff] %v3821_v33  ;;  %v3824_v56 = vmax.f32 %v3792_v20, 0.0  ;;  %v3791_v25 = vadd.f32 %v11356_v62, %v3753_v50  ;;  %v3756_v46 = vadd.f32 %v8809_v1, %v3418_v8  ;;  %vm13403_vm5 = vnez %v13402_v35  ;;  %8884 = vmatprep.mubr.f32.mxu1 %v3821_v33  ;;  %v13404_v11 = vld [vmem:[#allocation111_spill] sm:$0xff]  ;;  %v13405_v18 = vld [vmem:[#allocation114_spill] sm:$0xff]  ;;  %v13407_v33 = vld [vmem:[#allocation113_spill] sm:$0xff]  ;;  %v8738_v24 = vpop.f32.mrf.mxu1 }
 0x26d   : > { %8958 = vmatprep.mubr.msk.f32.mxu0 %vm13403_vm5, %v11623_v7  ;;  %v2777_v59 = vadd.f32 %v13404_v11, %v2439_v51  ;;  %v2441_v32 = vadd.f32 %v13405_v18, %v2135_v22  ;;  %v3116_v26 = vadd.f32 %v11321_v9, %v2778_v53  ;;  %v3692_v34 = vpop.f32.mrf.mxu0  ;;  %8885 = vmatmul.mubr.f32.gmra.mxu1 %v3822_v29  ;;  %v13408_v51 = vld [vmem:[#allocation144_spill] sm:$0xff]  ;;  %v13409_v3 = vld [vmem:[#allocation27_spill] sm:$0xff] }
 0x26e   : > { %v3420_v21 = vadd.f32 %v11570_v40, %v3114_v12  ;;  %3862 = vst [vmem:[#allocation2 + $0xd0] sm:$0xff] %v3824_v56  ;;  %v3823_v5 = vmax.f32 %v3791_v25, 0.0  ;;  %v3794_v8 = vadd.f32 %v11356_v62, %v3756_v46  ;;  %v3755_v15 = vadd.f32 %v3692_v34, %v3417_v58  ;;  %v13411_v53 = vld [vmem:[#allocation115_spill] sm:$0xff] }
 0x26f   : > { %8959 = vmatmul.mubr.f32.gmra.mxu0 %v11625_v0  ;;  %v2780_v20 = vadd.f32 %v13407_v33, %v13406_v4  ;;  %v3115_v50 = vadd.f32 %v13408_v51, %v2777_v59  ;;  %v8812_v10 = vpop.f32.mrf.mxu0  ;;  %v11641_v22 = vld [vmem:[#allocation2 + $0xa7] sm:$0xff]  ;;  %v11643_v9 = vld [vmem:[#allocation2 + $0xaf] sm:$0xff]  ;;  %v3419_v63 = vadd.f32 %v11593_v42, %v3113_v6  ;;  %vm13410_vm5 = vnez %v13409_v3 }
 0x270   : > { %3861 = vst [vmem:[#allocation2 + $0xc8] sm:$0xff] %v3823_v5  ;;  %v3826_v29 = vmax.f32 %v3794_v8, 0.0  ;;  %v3793_v40 = vadd.f32 %v11356_v62, %v3755_v15  ;;  %v3758_v12 = vadd.f32 %v8812_v10, %v3420_v21  ;;  %8961 = vmatprep.mubr.msk.f32.mxu0 %vm13410_vm5, %v11641_v22  ;;  %8887 = vmatprep.mubr.f32.mxu1 %v3823_v5  ;;  %v3384_v5 = vpop.f32.mrf.mxu1 }
 0x271   : > { %v2779_v58 = vadd.f32 %v13411_v53, %v2441_v32  ;;  %v3422_v1 = vadd.f32 %v8735_v38, %v3116_v26  ;;  %v3702_v25 = vpop.f32.mrf.mxu0  ;;  %8888 = vmatmul.mubr.f32.gmra.mxu1 %v3824_v56  ;;  %v3118_v42 = vadd.f32 %v11336_v44, %v2780_v20  ;;  %v3421_v59 = vadd.f32 %v3374_v54, %v3115_v50  ;;  %v13412_v44 = vld [vmem:[#allocation30_spill] sm:$0xff] }
 0x272   : > { %3864 = vst [vmem:[#allocation2 + $0xe0] sm:$0xff] %v3826_v29  ;;  %v3825_v6 = vmax.f32 %v3793_v40, 0.0  ;;  %v3796_v46 = vadd.f32 %v11356_v62, %v3758_v12  ;;  %v3757_v11 = vadd.f32 %v3702_v25, %v3419_v63  ;;  %vm13413_vm5 = vnez %v13412_v44 }
 0x273   : > { %8962 = vmatmul.mubr.f32.gmra.mxu0 %v11643_v9  ;;  %v8815_v18 = vpop.f32.mrf.mxu0  ;;  %v11654_v34 = vld [vmem:[#allocation2 + $0xb7] sm:$0xff]  ;;  %v11656_v21 = vld [vmem:[#allocation2 + $0xbf] sm:$0xff]  ;;  %v3117_v38 = vadd.f32 %v11344_v47, %v2779_v58  ;;  %v3424_v54 = vadd.f32 %v8738_v24, %v3118_v42  ;;  %v4451_v42 = vld [vmem:[#allocation2 + $0x9] sm:$0xff] }
 0x274   : > { %3863 = vst [vmem:[#allocation2 + $0xd8] sm:$0xff] %v3825_v6  ;;  %v3828_v32 = vmax.f32 %v3796_v46, 0.0  ;;  %v3795_v26 = vadd.f32 %v11356_v62, %v3757_v11  ;;  %v3760_v56 = vadd.f32 %v8815_v18, %v3422_v1  ;;  %8964 = vmatprep.mubr.msk.f32.mxu0 %vm13413_vm5, %v11654_v34  ;;  %8890 = vmatprep.mubr.f32.mxu1 %v3825_v6  ;;  %v13416_v11 = vld [vmem:[#allocation36_spill] sm:$0xff] }
 0x275   : > { %v3712_v8 = vpop.f32.mrf.mxu0  ;;  %8891 = vmatmul.mubr.f32.gmra.mxu1 %v3826_v29  ;;  %v3423_v50 = vadd.f32 %v3384_v5, %v3117_v38  ;;  %v13414_v29 = vld [vmem:[#allocation33_spill] sm:$0xff]  ;;  %v11712_v5 = vld [vmem:[#allocation2 + $0x19] sm:$0xff] }
 0x276   : > { %3866 = vst [vmem:[#allocation2 + $0xf0] sm:$0xff] %v3828_v32  ;;  %v11664_v15 = vmax.f32 %v3795_v26, 0.0  ;;  %v3798_v47 = vadd.f32 %v11356_v62, %v3760_v56  ;;  %v3759_v4 = vadd.f32 %v3712_v8, %v3421_v59  ;;  %vm13415_vm5 = vnez %v13414_v29  ;;  %v5174_v26 = vld [vmem:[#allocation8 + $0x270] sm:$0xff]  ;;  %v13420_v8 = vld [vmem:[#allocation116_spill] sm:$0xff] }
 0x277   : > { %8965 = vmatmul.mubr.f32.gmra.mxu0 %v11656_v21  ;;  %v8818_v33 = vpop.f32.mrf.mxu0  ;;  %v11667_v20 = vld [vmem:[#allocation2 + $0xc7] sm:$0xff]  ;;  %v11669_v51 = vld [vmem:[#allocation2 + $0xcf] sm:$0xff] }
 0x278   : > { %3865 = vst [vmem:[#allocation2 + $0xe8] sm:$0xff] %v11664_v15  ;;  %v3830_v10 = vmax.f32 %v3798_v47, 0.0  ;;  %v3797_v63 = vadd.f32 %v11356_v62, %v3759_v4  ;;  %v3762_v40 = vadd.f32 %v8818_v33, %v3424_v54  ;;  %8967 = vmatprep.mubr.msk.f32.mxu0 %vm13415_vm5, %v11667_v20  ;;  %8893 = vmatprep.mubr.f32.mxu1 %v11664_v15  ;;  %vm13417_vm5 = vnez %v13416_v11  ;;  %v11723_v33 = vld [vmem:[#allocation2 + $0x21] sm:$0xff] }
 0x279   : > { %v3722_v12 = vpop.f32.mrf.mxu0  ;;  %8894 = vmatmul.mubr.f32.gmra.mxu1 %v3828_v32  ;;  %v4452_v32 = vld [vmem:[#allocation2 + $0x11] sm:$0xff]  ;;  %v11903_v11 = vld [vmem:[#allocation8 + $0x3f8] sm:$0xff] }
 0x27a   : > { %3868 = vst [vmem:[#allocation2 + $0x100] sm:$0xff] %v3830_v10  ;;  %v11678_v53 = vmax.f32 %v3797_v63, 0.0  ;;  %v11681_v58 = vadd.f32 %v11356_v62, %v3762_v40  ;;  %v3761_v1 = vadd.f32 %v3722_v12, %v3423_v50  ;;  %v5173_v50 = vld [vmem:[#allocation8 + $0x268] sm:$0xff]  ;;  %v11729_v63 = vld [vmem:[#allocation2 + $0x29] sm:$0xff] }
 0x27b   : > { %8968 = vmatmul.mubr.f32.gmra.mxu0 %v11669_v51  ;;  %v11683_v24 = vld [vmem:[#allocation2 + $0xd7] sm:$0xff]  ;;  %v11685_v25 = vld [vmem:[#allocation2 + $0xdf] sm:$0xff]  ;;  %v5847_v4 = vld [vmem:[#allocation8 + $0x358] sm:$0xff] }
 0x27c   : > { %3867 = vst [vmem:[#allocation2 + $0xf8] sm:$0xff] %v11678_v53  ;;  %v13000_v6 = vmax.f32 %v11681_v58, 0.0  ;;  %v11690_v46 = vadd.f32 %v11356_v62, %v3761_v1  ;;  %8970 = vmatprep.mubr.msk.f32.mxu0 %vm13417_vm5, %v11683_v24  ;;  %8896 = vmatprep.mubr.f32.mxu1 %v11678_v53  ;;  %v11735_v12 = vld [vmem:[#allocation2 + $0x31] sm:$0xff]  ;;  %v5802_v62 = vld [vmem:[#allocation2 + $0x11f] sm:$0xff] }
 0x27d   : > { %8897 = vmatmul.mubr.f32.gmra.mxu1 %v3830_v10  ;;  %v5172_v1 = vld [vmem:[#allocation8 + $0x260] sm:$0xff]  ;;  %v6425_v40 = vld [vmem:[#allocation2 + $0x79] sm:$0xff] }
 0x27e   : > { %3870 = vst [vmem:[#allocation2 + $0x110] sm:$0xff] %v13000_v6  ;;  %v13001_v59 = vmax.f32 %v11690_v46, 0.0  ;;  %9011 = vmatprep.mubr.f32.mxu1 %v4451_v42  ;;  %v11748_v6 = vld [vmem:[#allocation2 + $0x41] sm:$0xff]  ;;  %v6423_v42 = vld [vmem:[#allocation2 + $0x69] sm:$0xff] }
 0x27f   : > { %8971 = vmatmul.mubr.f32.gmra.mxu0 %v11685_v25  ;;  %v11700_v18 = vld [vmem:[#allocation2 + $0xe7] sm:$0xff]  ;;  %v11702_v38 = vld [vmem:[#allocation2 + $0xef] sm:$0xff] }
 0x280   : > { %3869 = vst [vmem:[#allocation2 + $0x108] sm:$0xff] %v13001_v59  ;;  %8973 = vmatprep.mubr.msk.f32.mxu0 %vm13190_vm12, %v11700_v18 }
 0x281   : > { %9012 = vmatmul.mubr.msk.f32.vlgmr.msra.gmra.mxu1 %vm10282_vm15, %v4452_v32  ;;  %v11741_v32 = vld [vmem:[#allocation2 + $0x39] sm:$0xff] }
 0x282   : > { %9014 = vmatprep.mubr.f32.mxu1 %v11712_v5  ;;  %9140 = vmatpush3.msra.mxu1 %v13420_v8  ;;  %v8853_v8 = vpop.f32.mrf.mxu1 }
 0x283   : > { %8974 = vmatmul.mubr.f32.gmra.mxu0 %v11702_v38  ;;  %v11716_v54 = vld [vmem:[#allocation2 + $0xf7] sm:$0xff]  ;;  %v11718_v47 = vld [vmem:[#allocation2 + $0xff] sm:$0xff]  ;;  %9141 = vmatprep.subr.mxu1 %v5174_v26 }
 0x284   : > { %8976 = vmatprep.mubr.msk.f32.mxu0 %vm13146_vm11, %v11716_v54  ;;  %9142 = vmatpush3.msra.mxu1 %v5174_v26  ;;  %v5512_v26 = vld [vmem:[#allocation8 + $0x2f0] sm:$0xff] }
 0x285   : > { %9015 = vmatmul.mubr.msk.f32.gmra.mxu1 %vm10297_vm14, %v11723_v33  ;;  %9143 = vmatprep.subr.mxu1 %v5173_v50 }
 0x286   : > { %9017 = vmatprep.mubr.f32.mxu1 %v11729_v63  ;;  %9144 = vmatpush3.msra.mxu1 %v5173_v50 }
 0x287   : > { %8977 = vmatmul.mubr.f32.gmra.mxu0 %v11718_v47  ;;  %9145 = vmatprep.subr.mxu1 %v5172_v1 }
 0x288   : > { %9091 = vmatprep.mubr.msk.f32.mxu0 %vm13222_vm9, %v11442_v41  ;;  %v13425_v41 = vld [vmem:[#allocation139_spill] sm:$0xff]  ;;  %9146 = vmatpush3.msra.mxu1 %v5172_v1  ;;  %v11762_v1 = vld [vmem:[#allocation2 + $0x51] sm:$0xff] }
 0x289   : > { %9018 = vmatmul.mubr.msk.f32.gmra.mxu1 %vm10317_vm0, %v11735_v12  ;;  %v8933_v50 = vpop.f32.mrf.mxu0 }
 0x28a   : > { %9020 = vmatprep.mubr.f32.mxu1 %v11741_v32  ;;  %v11750_v59 = vadd.f32 %v8933_v50, %v8853_v8  ;;  %v11768_v8 = vld [vmem:[#allocation2 + $0x59] sm:$0xff]  ;;  %v5510_v50 = vld [vmem:[#allocation8 + $0x2e0] sm:$0xff] }
 0x28b   : > { %9092 = vmatmul.mubr.f32.vlgmr.msra.gmra.mxu0 %v11444_v52  ;;  %v5171_v52 = vld [vmem:[#allocation8 + $0x258] sm:$0xff] }
 0x28c   : > { %9094 = vmatprep.mubr.msk.f32.mxu0 %vm13164_vm13, %v11466_v27  ;;  %9220 = vmatpush3.msra.mxu0 %v13425_v41  ;;  %13426 = vst [vmem:[#allocation22_spill] sm:$0xff] %v11750_v59  ;;  %v11756_v27 = vld [vmem:[#allocation2 + $0x49] sm:$0xff]  ;;  %v5170_v41 = vld [vmem:[#allocation8 + $0x250] sm:$0xff] }
 0x28d   : > { %9221 = vmatprep.subr.mxu0 %v5512_v26  ;;  %9021 = vmatmul.mubr.msk.f32.gmra.mxu1 %vm10336_vm1, %v11748_v6  ;;  %v5509_v59 = vld [vmem:[#allocation8 + $0x2d8] sm:$0xff] }
 0x28e   : > { %9023 = vmatprep.mubr.f32.mxu1 %v11756_v27  ;;  %9147 = vmatprep.subr.mxu1 %v5171_v52 }
 0x28f   : > { %9095 = vmatmul.mubr.f32.gmra.mxu0 %v11468_v16  ;;  %9148 = vmatpush3.msra.mxu1 %v5171_v52  ;;  %v11780_v52 = vld [vmem:[#allocation2 + $0x69] sm:$0xff] }
 0x290   : > { %9097 = vmatprep.mubr.msk.f32.mxu0 %vm13333_vm10, %v11489_v14  ;;  %9222 = vmatpush3.msra.mxu0 %v5512_v26  ;;  %v11774_v14 = vld [vmem:[#allocation2 + $0x61] sm:$0xff]  ;;  %v5169_v26 = vld [vmem:[#allocation8 + $0x248] sm:$0xff]  ;;  %v6427_v16 = vld [vmem:[#allocation2 + $0x89] sm:$0xff] }
 0x291   : > { %9223 = vmatprep.subr.mxu0 %v5511_v57  ;;  %9024 = vmatmul.mubr.msk.f32.gmra.mxu1 %vm10355_vm2, %v11762_v1 }
 0x292   : > { %9026 = vmatprep.mubr.f32.mxu1 %v11768_v8  ;;  %9149 = vmatprep.subr.mxu1 %v5170_v41 }
 0x293   : > { %9098 = vmatmul.mubr.f32.gmra.mxu0 %v11491_v61  ;;  %9150 = vmatpush3.msra.mxu1 %v5170_v41  ;;  %v11792_v41 = vld [vmem:[#allocation2 + $0x79] sm:$0xff] }
 0x294   : > { %9100 = vmatprep.mubr.msk.f32.mxu0 %vm13344_vm8, %v11512_v13  ;;  %9224 = vmatpush3.msra.mxu0 %v5511_v57  ;;  %v11786_v57 = vld [vmem:[#allocation2 + $0x71] sm:$0xff]  ;;  %v6429_v61 = vld [vmem:[#allocation2 + $0x99] sm:$0xff] }
 0x295   : > { %9225 = vmatprep.subr.mxu0 %v5510_v50  ;;  %9027 = vmatmul.mubr.msk.f32.gmra.mxu1 %vm10374_vm3, %v11774_v14  ;;  %v5168_v13 = vld [vmem:[#allocation8 + $0x240] sm:$0xff] }
 0x296   : > { %9029 = vmatprep.mubr.f32.mxu1 %v11780_v52  ;;  %9151 = vmatprep.subr.mxu1 %v5169_v26 }
 0x297   : > { %9101 = vmatmul.mubr.f32.gmra.mxu0 %v11514_v17  ;;  %9152 = vmatpush3.msra.mxu1 %v5169_v26  ;;  %v11804_v26 = vld [vmem:[#allocation2 + $0x89] sm:$0xff] }
 0x298   : > { %9103 = vmatprep.mubr.msk.f32.mxu0 %vm13354_vm7, %v11535_v37  ;;  %9226 = vmatpush3.msra.mxu0 %v5510_v50  ;;  %v11798_v37 = vld [vmem:[#allocation2 + $0x81] sm:$0xff]  ;;  %v6431_v17 = vld [vmem:[#allocation2 + $0xa9] sm:$0xff] }
 0x299   : > { %9227 = vmatprep.subr.mxu0 %v5509_v59  ;;  %9030 = vmatmul.mubr.msk.f32.gmra.mxu1 %vm10393_vm4, %v11786_v57  ;;  %v5167_v50 = vld [vmem:[#allocation8 + $0x238] sm:$0xff] }
 0x29a   : > { %9032 = vmatprep.mubr.f32.mxu1 %v11792_v41  ;;  %9153 = vmatprep.subr.mxu1 %v5168_v13 }
 0x29b   : > { %9104 = vmatmul.mubr.f32.gmra.mxu0 %v11537_v55  ;;  %9154 = vmatpush3.msra.mxu1 %v5168_v13  ;;  %v13431_v55 = vld [vmem:[#allocation50_spill] sm:$0xff] }
 0x29c   : > { %9106 = vmatprep.mubr.msk.f32.mxu0 %vm13364_vm6, %v11558_v43  ;;  %9228 = vmatpush3.msra.mxu0 %v5509_v59  ;;  %vm13432_vm7 = vnez %v13431_v55  ;;  %vm13433_vm6 = vnez %v13373_v28  ;;  %v11810_v43 = vld [vmem:[#allocation2 + $0x91] sm:$0xff]  ;;  %v5166_v59 = vld [vmem:[#allocation8 + $0x230] sm:$0xff]  ;;  %v5505_v28 = vld [vmem:[#allocation8 + $0x2b8] sm:$0xff] }
 0x29d   : > { %9229 = vmatprep.subr.mxu0 %v5508_v30  ;;  %9033 = vmatmul.mubr.msk.f32.gmra.mxu1 %vm13432_vm7, %v11798_v37  ;;  %v11816_v13 = vld [vmem:[#allocation2 + $0x99] sm:$0xff] }
 0x29e   : > { %9035 = vmatprep.mubr.f32.mxu1 %v11804_v26  ;;  %9155 = vmatprep.subr.mxu1 %v5167_v50  ;;  %v6433_v55 = vld [vmem:[#allocation2 + $0xb9] sm:$0xff] }
 0x29f   : > { %9107 = vmatmul.mubr.f32.gmra.mxu0 %v11560_v39  ;;  %9156 = vmatpush3.msra.mxu1 %v5167_v50  ;;  %v13434_v39 = vld [vmem:[#allocation51_spill] sm:$0xff]  ;;  %v11828_v50 = vld [vmem:[#allocation2 + $0xa9] sm:$0xff] }
 0x2a0   : > { %9109 = vmatprep.mubr.msk.f32.mxu0 %vm13433_vm6, %v11581_v45  ;;  %9230 = vmatpush3.msra.mxu0 %v5508_v30  ;;  %vm13435_vm8 = vnez %v13434_v39  ;;  %vm13436_vm6 = vnez %v13383_v2  ;;  %v11822_v30 = vld [vmem:[#allocation2 + $0xa1] sm:$0xff]  ;;  %v5165_v45 = vld [vmem:[#allocation8 + $0x228] sm:$0xff]  ;;  %v6435_v39 = vld [vmem:[#allocation2 + $0xc9] sm:$0xff] }
 0x2a1   : > { %9231 = vmatprep.subr.mxu0 %v5507_v31  ;;  %9036 = vmatmul.mubr.msk.f32.gmra.mxu1 %vm13435_vm8, %v11810_v43  ;;  %v5504_v2 = vld [vmem:[#allocation8 + $0x2b0] sm:$0xff] }
 0x2a2   : > { %9038 = vmatprep.mubr.f32.mxu1 %v11816_v13  ;;  %9157 = vmatprep.subr.mxu1 %v5166_v59 }
 0x2a3   : > { %9110 = vmatmul.mubr.f32.gmra.mxu0 %v11583_v23  ;;  %9158 = vmatpush3.msra.mxu1 %v5166_v59  ;;  %v13437_v23 = vld [vmem:[#allocation52_spill] sm:$0xff]  ;;  %v11840_v59 = vld [vmem:[#allocation2 + $0xb9] sm:$0xff] }
 0x2a4   : > { %9112 = vmatprep.mubr.msk.f32.mxu0 %vm13436_vm6, %v11604_v49  ;;  %9232 = vmatpush3.msra.mxu0 %v5507_v31  ;;  %vm13438_vm10 = vnez %v13437_v23  ;;  %vm13439_vm6 = vnez %v13393_v48  ;;  %v11834_v31 = vld [vmem:[#allocation2 + $0xb1] sm:$0xff] }
 0x2a5   : > { %9233 = vmatprep.subr.mxu0 %v5506_v19  ;;  %9039 = vmatmul.mubr.msk.f32.gmra.mxu1 %vm13438_vm10, %v11822_v30  ;;  %v5164_v49 = vld [vmem:[#allocation8 + $0x220] sm:$0xff]  ;;  %v5503_v48 = vld [vmem:[#allocation8 + $0x2a8] sm:$0xff] }
 0x2a6   : > { %9041 = vmatprep.mubr.f32.mxu1 %v11828_v50  ;;  %9159 = vmatprep.subr.mxu1 %v5165_v45 }
 0x2a7   : > { %9113 = vmatmul.mubr.f32.gmra.mxu0 %v11606_v36  ;;  %9160 = vmatpush3.msra.mxu1 %v5165_v45  ;;  %v13440_v36 = vld [vmem:[#allocation53_spill] sm:$0xff] }
 0x2a8   : > { %9115 = vmatprep.mubr.msk.f32.mxu0 %vm13439_vm6, %v11623_v7  ;;  %9234 = vmatpush3.msra.mxu0 %v5506_v19  ;;  %vm13441_vm13 = vnez %v13440_v36  ;;  %vm13442_vm6 = vnez %v13402_v35  ;;  %v11846_v19 = vld [vmem:[#allocation2 + $0xc1] sm:$0xff]  ;;  %v11852_v45 = vld [vmem:[#allocation2 + $0xc9] sm:$0xff] }
 0x2a9   : > { %9235 = vmatprep.subr.mxu0 %v5505_v28  ;;  %9042 = vmatmul.mubr.msk.f32.gmra.mxu1 %vm13441_vm13, %v11834_v31  ;;  %v5163_v7 = vld [vmem:[#allocation8 + $0x218] sm:$0xff]  ;;  %v5502_v35 = vld [vmem:[#allocation8 + $0x2a0] sm:$0xff] }
 0x2aa   : > { %9044 = vmatprep.mubr.f32.mxu1 %v11840_v59  ;;  %9161 = vmatprep.subr.mxu1 %v5164_v49 }
 0x2ab   : > { %9116 = vmatmul.mubr.f32.gmra.mxu0 %v11625_v0  ;;  %9162 = vmatpush3.msra.mxu1 %v5164_v49  ;;  %v13443_v0 = vld [vmem:[#allocation54_spill] sm:$0xff] }
 0x2ac   : > { %9118 = vmatprep.mubr.msk.f32.mxu0 %vm13442_vm6, %v11641_v22  ;;  %9236 = vmatpush3.msra.mxu0 %v5505_v28  ;;  %vm13444_vm9 = vnez %v13443_v0  ;;  %vm13445_vm6 = vnez %v13409_v3  ;;  %v11858_v28 = vld [vmem:[#allocation2 + $0xd1] sm:$0xff]  ;;  %v5162_v22 = vld [vmem:[#allocation8 + $0x210] sm:$0xff]  ;;  %v5501_v3 = vld [vmem:[#allocation8 + $0x298] sm:$0xff] }
 0x2ad   : > { %9237 = vmatprep.subr.mxu0 %v5504_v2  ;;  %9045 = vmatmul.mubr.msk.f32.gmra.mxu1 %vm13444_vm9, %v11846_v19  ;;  %v11864_v49 = vld [vmem:[#allocation2 + $0xd9] sm:$0xff] }
 0x2ae   : > { %9047 = vmatprep.mubr.f32.mxu1 %v11852_v45  ;;  %9163 = vmatprep.subr.mxu1 %v5163_v7 }
 0x2af   : > { %9119 = vmatmul.mubr.f32.gmra.mxu0 %v11643_v9  ;;  %9164 = vmatpush3.msra.mxu1 %v5163_v7  ;;  %v13446_v9 = vld [vmem:[#allocation55_spill] sm:$0xff]  ;;  %v11876_v7 = vld [vmem:[#allocation2 + $0xe9] sm:$0xff] }
 0x2b0   : > { %9121 = vmatprep.mubr.msk.f32.mxu0 %vm13445_vm6, %v11654_v34  ;;  %9238 = vmatpush3.msra.mxu0 %v5504_v2  ;;  %vm13447_vm9 = vnez %v13446_v9  ;;  %vm13448_vm6 = vnez %v13412_v44  ;;  %v11870_v2 = vld [vmem:[#allocation2 + $0xe1] sm:$0xff]  ;;  %v5161_v34 = vld [vmem:[#allocation8 + $0x208] sm:$0xff] }
 0x2b1   : > { %9239 = vmatprep.subr.mxu0 %v5503_v48  ;;  %9048 = vmatmul.mubr.msk.f32.gmra.mxu1 %vm13447_vm9, %v11858_v28  ;;  %v5500_v44 = vld [vmem:[#allocation8 + $0x290] sm:$0xff] }
 0x2b2   : > { %9050 = vmatprep.mubr.f32.mxu1 %v11864_v49  ;;  %9165 = vmatprep.subr.mxu1 %v5162_v22 }
 0x2b3   : > { %9122 = vmatmul.mubr.f32.gmra.mxu0 %v11656_v21  ;;  %9166 = vmatpush3.msra.mxu1 %v5162_v22  ;;  %v13449_v21 = vld [vmem:[#allocation56_spill] sm:$0xff]  ;;  %v11888_v22 = vld [vmem:[#allocation2 + $0xf9] sm:$0xff] }
 0x2b4   : > { %9124 = vmatprep.mubr.msk.f32.mxu0 %vm13448_vm6, %v11667_v20  ;;  %9240 = vmatpush3.msra.mxu0 %v5503_v48  ;;  %vm13450_vm9 = vnez %v13449_v21  ;;  %vm13451_vm6 = vnez %v13414_v29  ;;  %v11882_v48 = vld [vmem:[#allocation2 + $0xf1] sm:$0xff] }
 0x2b5   : > { %9241 = vmatprep.subr.mxu0 %v5502_v35  ;;  %9051 = vmatmul.mubr.msk.f32.gmra.mxu1 %vm13450_vm9, %v11870_v2  ;;  %v5160_v20 = vld [vmem:[#allocation8 + $0x200] sm:$0xff] }
 0x2b6   : > { %9053 = vmatprep.mubr.f32.mxu1 %v11876_v7  ;;  %9242 = vmatpush3.msra.mxu0 %v5502_v35  ;;  %v11894_v35 = vld [vmem:[#allocation2 + $0x101] sm:$0xff] }
 0x2b7   : > { %9125 = vmatmul.mubr.f32.gmra.mxu0 %v11669_v51  ;;  %9167 = vmatprep.subr.mxu1 %v5161_v34  ;;  %v13452_v51 = vld [vmem:[#allocation57_spill] sm:$0xff] }
 0x2b8   : > { %9127 = vmatprep.mubr.msk.f32.mxu0 %vm13451_vm6, %v11683_v24  ;;  %9243 = vmatprep.subr.mxu0 %v5501_v3  ;;  %vm13453_vm9 = vnez %v13452_v51  ;;  %v5499_v24 = vld [vmem:[#allocation8 + $0x288] sm:$0xff] }
 0x2b9   : > { %9168 = vmatpush3.msra.mxu1 %v5161_v34  ;;  %9244 = vmatpush3.msra.mxu0 %v5501_v3  ;;  %v5851_v34 = vld [vmem:[#allocation8 + $0x378] sm:$0xff]  ;;  %v5498_v3 = vld [vmem:[#allocation8 + $0x280] sm:$0xff] }
 0x2ba   : > { %9054 = vmatmul.mubr.msk.f32.gmra.mxu1 %vm13453_vm9, %v11882_v48  ;;  %9169 = vmatprep.subr.mxu1 %v5160_v20 }
 0x2bb   : > { %9128 = vmatmul.mubr.f32.gmra.mxu0 %v11685_v25  ;;  %9056 = vmatprep.mubr.f32.mxu1 %v11888_v22  ;;  %v13454_v25 = vld [vmem:[#allocation58_spill] sm:$0xff] }
 0x2bc   : > { %9130 = vmatprep.mubr.msk.f32.mxu0 %vm13417_vm5, %v11700_v18  ;;  %9245 = vmatprep.subr.mxu0 %v5500_v44  ;;  %vm13455_vm6 = vnez %v13454_v25  ;;  %v5127_v18 = vld [vmem:[#allocation2 + $0x18] sm:$0xff] }
 0x2bd   : > { %9170 = vmatpush3.msra.mxu1 %v5160_v20  ;;  %9246 = vmatpush3.msra.mxu0 %v5500_v44  ;;  %v5850_v44 = vld [vmem:[#allocation8 + $0x370] sm:$0xff]  ;;  %v11911_v20 = vld [vmem:[#allocation2 + $0x28] sm:$0xff] }
 0x2be   : > { %9057 = vmatmul.mubr.msk.f32.gmra.mxu1 %vm13455_vm6, %v11894_v35  ;;  %9247 = vmatprep.subr.mxu0 %v5499_v24 }
 0x2bf   : > { %9131 = vmatmul.mubr.f32.gmra.mxu0 %v11702_v38  ;;  %9171 = vmatprep.mubr.f32.mxu1 %v5127_v18  ;;  %v11906_v38 = vld [vmem:[#allocation2 + $0x107] sm:$0xff]  ;;  %v11919_v18 = vld [vmem:[#allocation2 + $0x30] sm:$0xff] }
 0x2c0   : > { %9133 = vmatprep.mubr.msk.f32.mxu0 %vm13190_vm12, %v11716_v54  ;;  %9248 = vmatpush3.msra.mxu0 %v5499_v24  ;;  %v5128_v54 = vld [vmem:[#allocation2 + $0x20] sm:$0xff]  ;;  %v11914_v24 = vld [vmem:[#allocation2 + $0x10f] sm:$0xff] }
 0x2c1   : > { %9299 = vmatprep.subr.mxu1 %v5851_v34  ;;  %9249 = vmatprep.subr.mxu0 %v5498_v3 }
 0x2c2   : > { %9250 = vmatpush3.msra.mxu0 %v5498_v3  ;;  %9172 = vmatmul.mubr.f32.vlgmr.msra.gmra.mxu1 %v5128_v54  ;;  %v5848_v3 = vld [vmem:[#allocation8 + $0x360] sm:$0xff]  ;;  %v11922_v54 = vld [vmem:[#allocation2 + $0x38] sm:$0xff] }
 0x2c3   : > { %9134 = vmatmul.mubr.f32.gmra.mxu0 %v11718_v47  ;;  %9379 = vmatprep.subr.mxu0 %v11903_v11  ;;  %v5849_v47 = vld [vmem:[#allocation8 + $0x368] sm:$0xff] }
 0x2c4   : > { %9136 = vmatprep.mubr.msk.f32.mxu0 %vm13146_vm11, %v11906_v38  ;;  %9174 = vmatprep.mubr.f32.mxu1 %v11911_v20 }
 0x2c5   : > { %9300 = vmatpush3.msra.mxu1 %v5851_v34  ;;  %v5846_v34 = vld [vmem:[#allocation8 + $0x350] sm:$0xff] }
 0x2c6   : > { %9301 = vmatprep.subr.mxu1 %v5850_v44  ;;  %9175 = vmatmul.mubr.f32.gmra.mxu1 %v11919_v18 }
 0x2c7   : > { %9137 = vmatmul.mubr.f32.gmra.mxu0 %v11914_v24  ;;  %9302 = vmatpush3.msra.mxu1 %v5850_v44  ;;  %v11932_v44 = vld [vmem:[#allocation2 + $0x48] sm:$0xff] }
 0x2c8   : > { %9251 = vmatprep.mubr.f32.mxu0 %v11712_v5  ;;  %9303 = vmatprep.subr.mxu1 %v5849_v47  ;;  %v11929_v5 = vld [vmem:[#allocation2 + $0x40] sm:$0xff] }
 0x2c9   : > { %9177 = vmatprep.mubr.f32.mxu1 %v11922_v54  ;;  %9304 = vmatpush3.msra.mxu1 %v5849_v47  ;;  %v5845_v47 = vld [vmem:[#allocation8 + $0x348] sm:$0xff] }
 0x2ca   : > { %9305 = vmatprep.subr.mxu1 %v5848_v3  ;;  %9178 = vmatmul.mubr.f32.gmra.mxu1 %v11929_v5 }
 0x2cb   : > { %9252 = vmatmul.mubr.msk.f32.vlgmr.msra.gmra.mxu0 %vm10282_vm15, %v11723_v33  ;;  %9306 = vmatpush3.msra.mxu1 %v5848_v3  ;;  %v11939_v33 = vld [vmem:[#allocation2 + $0x50] sm:$0xff]  ;;  %v11942_v3 = vld [vmem:[#allocation2 + $0x58] sm:$0xff] }
 0x2cc   : > { %9254 = vmatprep.mubr.f32.mxu0 %v11729_v63  ;;  %9307 = vmatprep.subr.mxu1 %v5847_v4  ;;  %v5844_v63 = vld [vmem:[#allocation8 + $0x340] sm:$0xff] }
 0x2cd   : > { %9180 = vmatprep.mubr.f32.mxu1 %v11932_v44  ;;  %9308 = vmatpush3.msra.mxu1 %v5847_v4  ;;  %v5843_v4 = vld [vmem:[#allocation8 + $0x338] sm:$0xff] }
 0x2ce   : > { %9309 = vmatprep.subr.mxu1 %v5846_v34  ;;  %9181 = vmatmul.mubr.f32.gmra.mxu1 %v11939_v33 }
 0x2cf   : > { %9255 = vmatmul.mubr.msk.f32.gmra.mxu0 %vm10297_vm14, %v11735_v12  ;;  %9310 = vmatpush3.msra.mxu1 %v5846_v34  ;;  %v11949_v12 = vld [vmem:[#allocation2 + $0x60] sm:$0xff]  ;;  %v11952_v34 = vld [vmem:[#allocation2 + $0x68] sm:$0xff] }
 0x2d0   : > { %9257 = vmatprep.mubr.f32.mxu0 %v11741_v32  ;;  %9311 = vmatprep.subr.mxu1 %v5845_v47  ;;  %v5842_v32 = vld [vmem:[#allocation8 + $0x330] sm:$0xff] }
 0x2d1   : > { %9183 = vmatprep.mubr.f32.mxu1 %v11942_v3  ;;  %9312 = vmatpush3.msra.mxu1 %v5845_v47  ;;  %v6156_v47 = vld [vmem:[#allocation8 + $0x3f0] sm:$0xff] }
 0x2d2   : > { %9313 = vmatprep.subr.mxu1 %v5844_v63  ;;  %9184 = vmatmul.mubr.f32.gmra.mxu1 %v11949_v12 }
 0x2d3   : > { %9258 = vmatmul.mubr.msk.f32.gmra.mxu0 %vm10317_vm0, %v11748_v6  ;;  %9314 = vmatpush3.msra.mxu1 %v5844_v63  ;;  %v11959_v6 = vld [vmem:[#allocation2 + $0x70] sm:$0xff]  ;;  %v11963_v63 = vld [vmem:[#allocation2 + $0x78] sm:$0xff] }
 0x2d4   : > { %9260 = vmatprep.mubr.f32.mxu0 %v11756_v27  ;;  %9315 = vmatprep.subr.mxu1 %v5843_v4  ;;  %v6155_v27 = vld [vmem:[#allocation8 + $0x3e8] sm:$0xff] }
 0x2d5   : > { %9186 = vmatprep.mubr.f32.mxu1 %v11952_v34  ;;  %9316 = vmatpush3.msra.mxu1 %v5843_v4  ;;  %v11973_v4 = vld [vmem:[#allocation2 + $0x88] sm:$0xff] }
 0x2d6   : > { %9317 = vmatprep.subr.mxu1 %v5842_v32  ;;  %9380 = vmatpush3.msra.mxu0 %v11903_v11  ;;  %v5841_v11 = vld [vmem:[#allocation8 + $0x328] sm:$0xff] }
 0x2d7   : > { %9261 = vmatmul.mubr.msk.f32.gmra.mxu0 %vm10336_vm1, %v11762_v1  ;;  %9187 = vmatmul.mubr.f32.gmra.mxu1 %v11959_v6  ;;  %v6154_v1 = vld [vmem:[#allocation8 + $0x3e0] sm:$0xff] }
 0x2d8   : > { %9263 = vmatprep.mubr.f32.mxu0 %v11768_v8  ;;  %9381 = vmatprep.subr.mxu0 %v6156_v47  ;;  %v11970_v8 = vld [vmem:[#allocation2 + $0x80] sm:$0xff] }
 0x2d9   : > { %9189 = vmatprep.mubr.f32.mxu1 %v11963_v63  ;;  %9382 = vmatpush3.msra.mxu0 %v6156_v47  ;;  %v6153_v47 = vld [vmem:[#allocation8 + $0x3d8] sm:$0xff] }
 0x2da   : > { %9383 = vmatprep.subr.mxu0 %v6155_v27  ;;  %9318 = vmatpush3.msra.mxu1 %v5842_v32  ;;  %v11983_v32 = vld [vmem:[#allocation2 + $0x98] sm:$0xff] }
 0x2db   : > { %9264 = vmatmul.mubr.msk.f32.gmra.mxu0 %vm10355_vm2, %v11774_v14  ;;  %9190 = vmatmul.mubr.f32.gmra.mxu1 %v11970_v8  ;;  %v11980_v14 = vld [vmem:[#allocation2 + $0x90] sm:$0xff] }
 0x2dc   : > { %9266 = vmatprep.mubr.f32.mxu0 %v11780_v52  ;;  %9384 = vmatpush3.msra.mxu0 %v6155_v27  ;;  %v5840_v52 = vld [vmem:[#allocation8 + $0x320] sm:$0xff]  ;;  %v6152_v27 = vld [vmem:[#allocation8 + $0x3d0] sm:$0xff] }
 0x2dd   : > { %9192 = vmatprep.mubr.f32.mxu1 %v11973_v4  ;;  %9385 = vmatprep.subr.mxu0 %v6154_v1 }
 0x2de   : > { %9319 = vmatprep.subr.mxu1 %v5841_v11  ;;  %9386 = vmatpush3.msra.mxu0 %v6154_v1  ;;  %v11993_v1 = vld [vmem:[#allocation2 + $0xa8] sm:$0xff] }
 0x2df   : > { %9267 = vmatmul.mubr.msk.f32.gmra.mxu0 %vm10374_vm3, %v11786_v57  ;;  %9193 = vmatmul.mubr.f32.gmra.mxu1 %v11980_v14  ;;  %v11990_v57 = vld [vmem:[#allocation2 + $0xa0] sm:$0xff] }
 0x2e0   : > { %9269 = vmatprep.mubr.f32.mxu0 %v11792_v41  ;;  %9387 = vmatprep.subr.mxu0 %v6153_v47  ;;  %v6151_v41 = vld [vmem:[#allocation8 + $0x3c8] sm:$0xff] }
 0x2e1   : > { %9195 = vmatprep.mubr.f32.mxu1 %v11983_v32  ;;  %9320 = vmatpush3.msra.mxu1 %v5841_v11  ;;  %v5839_v11 = vld [vmem:[#allocation8 + $0x318] sm:$0xff] }
 0x2e2   : > { %9321 = vmatprep.subr.mxu1 %v5840_v52  ;;  %9388 = vmatpush3.msra.mxu0 %v6153_v47  ;;  %v12003_v47 = vld [vmem:[#allocation2 + $0xb8] sm:$0xff] }
 0x2e3   : > { %9270 = vmatmul.mubr.msk.f32.gmra.mxu0 %vm10393_vm4, %v11798_v37  ;;  %9196 = vmatmul.mubr.f32.gmra.mxu1 %v11990_v57  ;;  %v6150_v37 = vld [vmem:[#allocation8 + $0x3c0] sm:$0xff] }
 0x2e4   : > { %9272 = vmatprep.mubr.f32.mxu0 %v11804_v26  ;;  %9389 = vmatprep.subr.mxu0 %v6152_v27  ;;  %v12000_v26 = vld [vmem:[#allocation2 + $0xb0] sm:$0xff] }
 0x2e5   : > { %9198 = vmatprep.mubr.f32.mxu1 %v11993_v1  ;;  %9390 = vmatpush3.msra.mxu0 %v6152_v27  ;;  %v6149_v27 = vld [vmem:[#allocation8 + $0x3b8] sm:$0xff] }
 0x2e6   : > { %9391 = vmatprep.subr.mxu0 %v6151_v41  ;;  %9322 = vmatpush3.msra.mxu1 %v5840_v52  ;;  %v12013_v52 = vld [vmem:[#allocation2 + $0xc8] sm:$0xff] }
 0x2e7   : > { %9273 = vmatmul.mubr.msk.f32.gmra.mxu0 %vm13432_vm7, %v11810_v43  ;;  %9199 = vmatmul.mubr.f32.gmra.mxu1 %v12000_v26  ;;  %v12010_v43 = vld [vmem:[#allocation2 + $0xc0] sm:$0xff] }
 0x2e8   : > { %9275 = vmatprep.mubr.f32.mxu0 %v11816_v13  ;;  %9392 = vmatpush3.msra.mxu0 %v6151_v41  ;;  %v5838_v13 = vld [vmem:[#allocation8 + $0x310] sm:$0xff] }
 0x2e9   : > { %9201 = vmatprep.mubr.f32.mxu1 %v12003_v47  ;;  %9393 = vmatprep.subr.mxu0 %v6150_v37  ;;  %v6148_v41 = vld [vmem:[#allocation8 + $0x3b0] sm:$0xff] }
 0x2ea   : > { %9323 = vmatprep.subr.mxu1 %v5839_v11  ;;  %9394 = vmatpush3.msra.mxu0 %v6150_v37  ;;  %v12023_v37 = vld [vmem:[#allocation2 + $0xd8] sm:$0xff] }
 0x2eb   : > { %9276 = vmatmul.mubr.msk.f32.gmra.mxu0 %vm13435_vm8, %v11822_v30  ;;  %9202 = vmatmul.mubr.f32.gmra.mxu1 %v12010_v43  ;;  %v12020_v30 = vld [vmem:[#allocation2 + $0xd0] sm:$0xff] }
 0x2ec   : > { %9278 = vmatprep.mubr.f32.mxu0 %v11828_v50  ;;  %9395 = vmatprep.subr.mxu0 %v6149_v27  ;;  %v6147_v50 = vld [vmem:[#allocation8 + $0x3a8] sm:$0xff] }
 0x2ed   : > { %9204 = vmatprep.mubr.f32.mxu1 %v12013_v52  ;;  %9324 = vmatpush3.msra.mxu1 %v5839_v11  ;;  %v5837_v11 = vld [vmem:[#allocation8 + $0x308] sm:$0xff] }
 0x2ee   : > { %9325 = vmatprep.subr.mxu1 %v5838_v13  ;;  %9396 = vmatpush3.msra.mxu0 %v6149_v27  ;;  %v6145_v27 = vld [vmem:[#allocation8 + $0x398] sm:$0xff] }
 0x2ef   : > { %9279 = vmatmul.mubr.msk.f32.gmra.mxu0 %vm13438_vm10, %v11834_v31  ;;  %9205 = vmatmul.mubr.f32.gmra.mxu1 %v12020_v30  ;;  %v6146_v31 = vld [vmem:[#allocation8 + $0x3a0] sm:$0xff]  ;;  %vm13456_vm10 = vnez %v13443_v0 }
 0x2f0   : > { %9281 = vmatprep.mubr.f32.mxu0 %v11840_v59  ;;  %9397 = vmatprep.subr.mxu0 %v6148_v41  ;;  %v12030_v59 = vld [vmem:[#allocation2 + $0xe0] sm:$0xff] }
 0x2f1   : > { %9207 = vmatprep.mubr.f32.mxu1 %v12023_v37  ;;  %9398 = vmatpush3.msra.mxu0 %v6148_v41  ;;  %v5771_v41 = vld [vmem:[#allocation2 + $0x27] sm:$0xff] }
 0x2f2   : > { %9399 = vmatprep.subr.mxu0 %v6147_v50  ;;  %9326 = vmatpush3.msra.mxu1 %v5838_v13  ;;  %v13458_v13 = vmax.f32 %v11690_v46, 0.0  ;;  %v12062_v46 = vld [vmem:[#allocation2 + $0x109] sm:$0xff] }
 0x2f3   : > { %9282 = vmatmul.mubr.msk.f32.gmra.mxu0 %vm13441_vm13, %v11846_v19  ;;  %9208 = vmatmul.mubr.f32.gmra.mxu1 %v12030_v59  ;;  %v12038_v19 = vld [vmem:[#allocation2 + $0xf0] sm:$0xff]  ;;  %vm13457_vm13 = vnez %v13446_v9 }
 0x2f4   : > { %9284 = vmatprep.mubr.f32.mxu0 %v11852_v45  ;;  %9400 = vmatpush3.msra.mxu0 %v6147_v50  ;;  %v5836_v45 = vld [vmem:[#allocation8 + $0x300] sm:$0xff] }
 0x2f5   : > { %9210 = vmatprep.mubr.f32.mxu1 %v11664_v15  ;;  %9401 = vmatprep.subr.mxu0 %v6146_v31  ;;  %v6144_v15 = vld [vmem:[#allocation8 + $0x390] sm:$0xff]  ;;  %v13461_v50 = vld [vmem:[#allocation13_spill] sm:$0xff] }
 0x2f6   : > { %9327 = vmatprep.subr.mxu1 %v5837_v11  ;;  %9402 = vmatpush3.msra.mxu0 %v6146_v31  ;;  %v5773_v31 = vld [vmem:[#allocation2 + $0x37] sm:$0xff] }
 0x2f7   : > { %9285 = vmatmul.mubr.msk.f32.gmra.mxu0 %vm13456_vm10, %v11858_v28  ;;  %9211 = vmatmul.mubr.f32.gmra.mxu1 %v12038_v19  ;;  %v12046_v28 = vld [vmem:[#allocation2 + $0x100] sm:$0xff]  ;;  %vm13459_vm10 = vnez %v13449_v21 }
 0x2f8   : > { %9287 = vmatprep.mubr.f32.mxu0 %v11864_v49  ;;  %9403 = vmatprep.subr.mxu0 %v6145_v27  ;;  %v6143_v49 = vld [vmem:[#allocation8 + $0x388] sm:$0xff] }
 0x2f9   : > { %9213 = vmatprep.mubr.f32.mxu1 %v11678_v53  ;;  %9328 = vmatpush3.msra.mxu1 %v5837_v11  ;;  %v6142_v53 = vld [vmem:[#allocation8 + $0x380] sm:$0xff] }
 0x2fa   : > { %9329 = vmatprep.subr.mxu1 %v5836_v45  ;;  %9404 = vmatpush3.msra.mxu0 %v6145_v27  ;;  %v12067_v11 = vld [vmem:[#allocation2 + $0x111] sm:$0xff] }
 0x2fb   : > { %9288 = vmatmul.mubr.msk.f32.gmra.mxu0 %vm13457_vm13, %v11870_v2  ;;  %9214 = vmatmul.mubr.f32.gmra.mxu1 %v12046_v28  ;;  %v6495_v2 = vld [vmem:[#allocation8 + $0x478] sm:$0xff]  ;;  %vm13462_vm13 = vnez %v13461_v50  ;;  %v13463_v27 = vld [vmem:[#allocation14_spill] sm:$0xff]  ;;  %v12079_v50 = vpop.f32.mrf.mxu0 }
 0x2fc   : > { %9290 = vmatprep.mubr.f32.mxu0 %v11876_v7  ;;  %9405 = vmatprep.subr.mxu0 %v6144_v15  ;;  %v13460_v7 = vmax.f32 %v11681_v58, 0.0  ;;  %v12065_v58 = vpop.f32.mrf.mxu1 }
 0x2fd   : > { %9216 = vmatprep.mubr.f32.mxu1 %v13458_v13  ;;  %9406 = vmatpush3.msra.mxu0 %v6144_v15  ;;  %v5774_v15 = vld [vmem:[#allocation2 + $0x3f] sm:$0xff]  ;;  %v5775_v13 = vld [vmem:[#allocation2 + $0x47] sm:$0xff] }
 0x2fe   : > { %9407 = vmatprep.subr.mxu0 %v6143_v49  ;;  %9330 = vmatpush3.msra.mxu1 %v5836_v45  ;;  %v6493_v45 = vld [vmem:[#allocation8 + $0x468] sm:$0xff] }
 0x2ff   : > { %9291 = vmatmul.mubr.msk.f32.gmra.mxu0 %vm13459_vm10, %v11882_v48  ;;  %9217 = vmatmul.mubr.f32.gmra.mxu1 %v13460_v7  ;;  %v5772_v48 = vld [vmem:[#allocation2 + $0x2f] sm:$0xff] }
 0x300   : > { %9293 = vmatprep.mubr.f32.mxu0 %v11888_v22  ;;  %9408 = vmatpush3.msra.mxu0 %v6143_v49  ;;  %v6494_v22 = vld [vmem:[#allocation8 + $0x470] sm:$0xff]  ;;  %v6492_v49 = vld [vmem:[#allocation8 + $0x460] sm:$0xff] }
 0x301   : > { %9331 = vmatprep.mubr.msk.f32.mxu1 %vm13462_vm13, %v5771_v41  ;;  %9409 = vmatprep.subr.mxu0 %v6142_v53  ;;  %vm13464_vm13 = vnez %v13463_v27  ;;  %v5776_v41 = vld [vmem:[#allocation2 + $0x4f] sm:$0xff] }
 0x302   : > { %9459 = vmatprep.subr.mxu1 %v6495_v2  ;;  %9410 = vmatpush3.msra.mxu0 %v6142_v53 }
 0x303   : > { %9294 = vmatmul.mubr.msk.f32.gmra.mxu0 %vm13453_vm9, %v11894_v35  ;;  %9332 = vmatmul.mubr.f32.vlgmr.msra.gmra.mxu1 %v5772_v48  ;;  %vm13465_vm9 = vnez %v13332_v60  ;;  %v5777_v48 = vld [vmem:[#allocation2 + $0x57] sm:$0xff] }
 0x304   : > { %9296 = vmatprep.mubr.f32.mxu0 %v12062_v46  ;;  %9334 = vmatprep.mubr.msk.f32.mxu1 %vm13464_vm13, %v5773_v31  ;;  %v13466_v31 = vld [vmem:[#allocation16_spill] sm:$0xff]  ;;  %v6489_v60 = vld [vmem:[#allocation8 + $0x448] sm:$0xff] }
 0x305   : > { %9460 = vmatpush3.msra.mxu1 %v6495_v2  ;;  %v8856_v35 = vpop.f32.mrf.mxu1  ;;  %v6491_v2 = vld [vmem:[#allocation8 + $0x458] sm:$0xff]  ;;  %vm13467_vm13 = vnez %v13466_v31 }
 0x306   : > { %9461 = vmatprep.subr.mxu1 %v6494_v22 }
 0x307   : > { %9297 = vmatmul.mubr.msk.f32.gmra.mxu0 %vm13455_vm6, %v12067_v11  ;;  %9462 = vmatpush3.msra.mxu1 %v6494_v22  ;;  %v4077_v53 = vpop.f32.mrf.mxu1 }
 0x308   : > { %9411 = vmatprep.mubr.f32.mxu0 %v11911_v20  ;;  %9335 = vmatmul.mubr.f32.gmra.mxu1 %v5774_v15  ;;  %v6490_v20 = vld [vmem:[#allocation8 + $0x450] sm:$0xff]  ;;  %v6488_v15 = vld [vmem:[#allocation8 + $0x440] sm:$0xff] }
 0x309   : > { %9463 = vmatprep.subr.mxu1 %v6493_v45  ;;  %9337 = vmatprep.mubr.msk.f32.mxu1 %vm13465_vm9, %v5775_v13  ;;  %v8859_v7 = vpop.f32.mrf.mxu1  ;;  %v5779_v13 = vld [vmem:[#allocation2 + $0x67] sm:$0xff] }
 0x30a   : > { %9464 = vmatpush3.msra.mxu1 %v6493_v45  ;;  %v5778_v45 = vld [vmem:[#allocation2 + $0x5f] sm:$0xff] }
 0x30b   : > { %9412 = vmatmul.mubr.f32.vlgmr.msra.gmra.mxu0 %v11919_v18  ;;  %9465 = vmatprep.subr.mxu1 %v6492_v49  ;;  %v4087_v22 = vpop.f32.mrf.mxu1 }
 0x30c   : > { %9414 = vmatprep.mubr.f32.mxu0 %v11922_v54  ;;  %9466 = vmatpush3.msra.mxu1 %v6492_v49 }
 0x30d   : > { %9338 = vmatmul.mubr.f32.gmra.mxu1 %v5776_v41  ;;  %9467 = vmatprep.subr.mxu1 %v6491_v2  ;;  %v8936_v27 = vpop.f32.mrf.mxu0  ;;  %v8862_v18 = vpop.f32.mrf.mxu1 }
 0x30e   : > { %9340 = vmatprep.mubr.msk.f32.mxu1 %vm13467_vm13, %v5777_v48  ;;  %9468 = vmatpush3.msra.mxu1 %v6491_v2  ;;  %v12084_v54 = vadd.f32 %v8936_v27, %v8856_v35  ;;  %v13468_v2 = vld [vmem:[#allocation17_spill] sm:$0xff]  ;;  %v6486_v27 = vld [vmem:[#allocation8 + $0x430] sm:$0xff] }
 0x30f   : > { %9415 = vmatmul.mubr.f32.gmra.mxu0 %v11929_v5  ;;  %9469 = vmatprep.subr.mxu1 %v6490_v20  ;;  %v4302_v49 = vpop.f32.mrf.mxu0  ;;  %v4097_v41 = vpop.f32.mrf.mxu1  ;;  %vm13469_vm9 = vnez %v13468_v2  ;;  %v6487_v5 = vld [vmem:[#allocation8 + $0x438] sm:$0xff] }
 0x310   : > { %9417 = vmatprep.mubr.f32.mxu0 %v11932_v44  ;;  %9470 = vmatpush3.msra.mxu1 %v6490_v20  ;;  %v12087_v48 = vadd.f32 %v4302_v49, %v4077_v53  ;;  %v5780_v20 = vld [vmem:[#allocation2 + $0x6f] sm:$0xff]  ;;  %v5781_v53 = vld [vmem:[#allocation2 + $0x77] sm:$0xff] }
 0x311   : > { %9341 = vmatmul.mubr.f32.gmra.mxu1 %v5778_v45  ;;  %9471 = vmatprep.subr.mxu1 %v6489_v60  ;;  %v8939_v31 = vpop.f32.mrf.mxu0  ;;  %v8865_v35 = vpop.f32.mrf.mxu1 }
 0x312   : > { %9343 = vmatprep.mubr.msk.f32.mxu1 %vm13469_vm9, %v5779_v13  ;;  %9472 = vmatpush3.msra.mxu1 %v6489_v60  ;;  %v12092_v44 = vadd.f32 %v8939_v31, %v8859_v7  ;;  %v13470_v60 = vld [vmem:[#allocation18_spill] sm:$0xff]  ;;  %v6484_v31 = vld [vmem:[#allocation8 + $0x420] sm:$0xff] }
 0x313   : > { %9418 = vmatmul.mubr.f32.gmra.mxu0 %v11939_v33  ;;  %9473 = vmatprep.subr.mxu1 %v6488_v15  ;;  %v4312_v45 = vpop.f32.mrf.mxu0  ;;  %v4107_v49 = vpop.f32.mrf.mxu1  ;;  %vm13471_vm13 = vnez %v13470_v60  ;;  %v6485_v33 = vld [vmem:[#allocation8 + $0x428] sm:$0xff] }
 0x314   : > { %9420 = vmatprep.mubr.f32.mxu0 %v11942_v3  ;;  %9474 = vmatpush3.msra.mxu1 %v6488_v15  ;;  %v12095_v13 = vadd.f32 %v4312_v45, %v4087_v22  ;;  %v5782_v15 = vld [vmem:[#allocation2 + $0x7f] sm:$0xff]  ;;  %v5783_v22 = vld [vmem:[#allocation2 + $0x87] sm:$0xff] }
 0x315   : > { %9344 = vmatmul.mubr.f32.gmra.mxu1 %v5780_v20  ;;  %9475 = vmatprep.subr.mxu1 %v6487_v5  ;;  %v8942_v2 = vpop.f32.mrf.mxu0  ;;  %v8868_v7 = vpop.f32.mrf.mxu1 }
 0x316   : > { %9346 = vmatprep.mubr.msk.f32.mxu1 %vm13471_vm13, %v5781_v53  ;;  %9476 = vmatpush3.msra.mxu1 %v6487_v5  ;;  %v12100_v3 = vadd.f32 %v8942_v2, %v8862_v18  ;;  %v13472_v5 = vld [vmem:[#allocation19_spill] sm:$0xff] }
 0x317   : > { %9421 = vmatmul.mubr.f32.gmra.mxu0 %v11949_v12  ;;  %9477 = vmatprep.subr.mxu1 %v6486_v27  ;;  %v4322_v20 = vpop.f32.mrf.mxu0  ;;  %v4117_v45 = vpop.f32.mrf.mxu1  ;;  %vm13473_vm9 = vnez %v13472_v5  ;;  %v6483_v12 = vld [vmem:[#allocation8 + $0x418] sm:$0xff]  ;;  %v6482_v2 = vld [vmem:[#allocation8 + $0x410] sm:$0xff] }
 0x318   : > { %9423 = vmatprep.mubr.f32.mxu0 %v11952_v34  ;;  %9478 = vmatpush3.msra.mxu1 %v6486_v27  ;;  %v12103_v53 = vadd.f32 %v4322_v20, %v4097_v41  ;;  %v5784_v27 = vld [vmem:[#allocation2 + $0x8f] sm:$0xff]  ;;  %v5785_v41 = vld [vmem:[#allocation2 + $0x97] sm:$0xff] }
 0x319   : > { %9347 = vmatmul.mubr.f32.gmra.mxu1 %v5782_v15  ;;  %9479 = vmatprep.subr.mxu1 %v6485_v33  ;;  %v8945_v60 = vpop.f32.mrf.mxu0  ;;  %v8871_v18 = vpop.f32.mrf.mxu1 }
 0x31a   : > { %9349 = vmatprep.mubr.msk.f32.mxu1 %vm13473_vm9, %v5783_v22  ;;  %9480 = vmatpush3.msra.mxu1 %v6485_v33  ;;  %v12108_v34 = vadd.f32 %v8945_v60, %v8865_v35  ;;  %v13474_v33 = vld [vmem:[#allocation20_spill] sm:$0xff]  ;;  %v6480_v60 = vld [vmem:[#allocation8 + $0x400] sm:$0xff] }
 0x31b   : > { %9424 = vmatmul.mubr.f32.gmra.mxu0 %v11959_v6  ;;  %9481 = vmatprep.subr.mxu1 %v6484_v31  ;;  %v4332_v15 = vpop.f32.mrf.mxu0  ;;  %v4127_v20 = vpop.f32.mrf.mxu1  ;;  %vm13475_vm13 = vnez %v13474_v33  ;;  %v6481_v6 = vld [vmem:[#allocation8 + $0x408] sm:$0xff] }
 0x31c   : > { %9426 = vmatprep.mubr.f32.mxu0 %v11963_v63  ;;  %9482 = vmatpush3.msra.mxu1 %v6484_v31  ;;  %v12111_v22 = vadd.f32 %v4332_v15, %v4107_v49  ;;  %v5786_v31 = vld [vmem:[#allocation2 + $0x9f] sm:$0xff]  ;;  %v5787_v49 = vld [vmem:[#allocation2 + $0xa7] sm:$0xff] }
 0x31d   : > { %9350 = vmatmul.mubr.f32.gmra.mxu1 %v5784_v27  ;;  %9483 = vmatprep.subr.mxu1 %v6483_v12  ;;  %v8948_v5 = vpop.f32.mrf.mxu0  ;;  %v8874_v35 = vpop.f32.mrf.mxu1 }
 0x31e   : > { %9352 = vmatprep.mubr.msk.f32.mxu1 %vm13475_vm13, %v5785_v41  ;;  %9484 = vmatpush3.msra.mxu1 %v6483_v12  ;;  %v12116_v63 = vadd.f32 %v8948_v5, %v8868_v7  ;;  %v13476_v12 = vld [vmem:[#allocation21_spill] sm:$0xff] }
 0x31f   : > { %9427 = vmatmul.mubr.f32.gmra.mxu0 %v11970_v8  ;;  %9485 = vmatprep.subr.mxu1 %v6482_v2  ;;  %v4342_v27 = vpop.f32.mrf.mxu0  ;;  %v4137_v15 = vpop.f32.mrf.mxu1  ;;  %vm13477_vm9 = vnez %v13476_v12  ;;  %v5789_v5 = vld [vmem:[#allocation2 + $0xb7] sm:$0xff] }
 0x320   : > { %9429 = vmatprep.mubr.f32.mxu0 %v11973_v4  ;;  %9486 = vmatpush3.msra.mxu1 %v6482_v2  ;;  %v12119_v41 = vadd.f32 %v4342_v27, %v4117_v45  ;;  %v5788_v2 = vld [vmem:[#allocation2 + $0xaf] sm:$0xff] }
 0x321   : > { %9353 = vmatmul.mubr.f32.gmra.mxu1 %v5786_v31  ;;  %9487 = vmatprep.subr.mxu1 %v6481_v6  ;;  %v8951_v8 = vpop.f32.mrf.mxu0  ;;  %v8877_v7 = vpop.f32.mrf.mxu1  ;;  %v13478_v27 = vld [vmem:[#allocation24_spill] sm:$0xff] }
 0x322   : > { %9355 = vmatprep.mubr.msk.f32.mxu1 %vm13477_vm9, %v5787_v49  ;;  %9488 = vmatpush3.msra.mxu1 %v6481_v6  ;;  %v12124_v4 = vadd.f32 %v8951_v8, %v8871_v18  ;;  %vm13479_vm13 = vnez %v13478_v27 }
 0x323   : > { %9430 = vmatmul.mubr.f32.gmra.mxu0 %v11980_v14  ;;  %9489 = vmatprep.subr.mxu1 %v6480_v60  ;;  %v4352_v33 = vpop.f32.mrf.mxu0  ;;  %v4147_v45 = vpop.f32.mrf.mxu1 }
 0x324   : > { %9432 = vmatprep.mubr.f32.mxu0 %v11983_v32  ;;  %9490 = vmatpush3.msra.mxu1 %v6480_v60  ;;  %v12127_v31 = vadd.f32 %v4352_v33, %v4127_v20  ;;  %v5790_v32 = vld [vmem:[#allocation2 + $0xbf] sm:$0xff]  ;;  %v5791_v60 = vld [vmem:[#allocation2 + $0xc7] sm:$0xff] }
 0x325   : > { %9356 = vmatmul.mubr.f32.gmra.mxu1 %v5788_v2  ;;  %v8880_v14 = vpop.f32.mrf.mxu1  ;;  %v13480_v20 = vld [vmem:[#allocation27_spill] sm:$0xff] }
 0x326   : > { %9358 = vmatprep.mubr.msk.f32.mxu1 %vm13479_vm13, %v5789_v5  ;;  %v8954_v6 = vpop.f32.mrf.mxu0  ;;  %vm13481_vm9 = vnez %v13480_v20  ;;  %v5793_v5 = vld [vmem:[#allocation2 + $0xd7] sm:$0xff] }
 0x327   : > { %9433 = vmatmul.mubr.f32.gmra.mxu0 %v11990_v57  ;;  %v12132_v49 = vadd.f32 %v8954_v6, %v8874_v35  ;;  %v4157_v12 = vpop.f32.mrf.mxu1  ;;  %v5792_v35 = vld [vmem:[#allocation2 + $0xcf] sm:$0xff] }
 0x328   : > { %9435 = vmatprep.mubr.f32.mxu0 %v11993_v1  ;;  %v4362_v18 = vpop.f32.mrf.mxu0 }
 0x329   : > { %9359 = vmatmul.mubr.f32.gmra.mxu1 %v5790_v32  ;;  %v12135_v8 = vadd.f32 %v4362_v18, %v4137_v15  ;;  %v8883_v33 = vpop.f32.mrf.mxu1  ;;  %v13482_v15 = vld [vmem:[#allocation30_spill] sm:$0xff] }
 0x32a   : > { %9361 = vmatprep.mubr.msk.f32.mxu1 %vm13481_vm9, %v5791_v60  ;;  %vm13483_vm13 = vnez %v13482_v15  ;;  %v5795_v60 = vld [vmem:[#allocation2 + $0xe7] sm:$0xff]  ;;  %vm13484_vm9 = vnez %v13414_v29 }
 0x32b   : > { %v8957_v2 = vpop.f32.mrf.mxu0  ;;  %9436 = vmatmul.mubr.f32.gmra.mxu0 %v12000_v26  ;;  %v4167_v27 = vpop.f32.mrf.mxu1 }
 0x32c   : > { %v12140_v57 = vadd.f32 %v8957_v2, %v8877_v7  ;;  %9438 = vmatprep.mubr.f32.mxu0 %v12003_v47  ;;  %v5794_v7 = vld [vmem:[#allocation2 + $0xdf] sm:$0xff] }
 0x32d   : > { %v4372_v1 = vpop.f32.mrf.mxu0  ;;  %9362 = vmatmul.mubr.f32.gmra.mxu1 %v5792_v35  ;;  %v8886_v18 = vpop.f32.mrf.mxu1 }
 0x32e   : > { %v12143_v6 = vadd.f32 %v4372_v1, %v4147_v45  ;;  %9364 = vmatprep.mubr.msk.f32.mxu1 %vm13483_vm13, %v5793_v5  ;;  %v5797_v1 = vld [vmem:[#allocation2 + $0xf7] sm:$0xff] }
 0x32f   : > { %v8960_v32 = vpop.f32.mrf.mxu0  ;;  %9439 = vmatmul.mubr.f32.gmra.mxu0 %v12010_v43  ;;  %v4177_v20 = vpop.f32.mrf.mxu1 }
 0x330   : > { %v12148_v26 = vadd.f32 %v8960_v32, %v8880_v14  ;;  %9441 = vmatprep.mubr.f32.mxu0 %v12013_v52  ;;  %v5796_v14 = vld [vmem:[#allocation2 + $0xef] sm:$0xff] }
 0x331   : > { %v4382_v47 = vpop.f32.mrf.mxu0  ;;  %9365 = vmatmul.mubr.f32.gmra.mxu1 %v5794_v7  ;;  %v8889_v35 = vpop.f32.mrf.mxu1  ;;  %v6133_v32 = vld [vmem:[#allocation2 + $0xe8] sm:$0xff] }
 0x332   : > { %v12151_v2 = vadd.f32 %v4382_v47, %v4157_v12  ;;  %9367 = vmatprep.mubr.msk.f32.mxu1 %vm13484_vm9, %v5795_v60 }
 0x333   : > { %v8963_v45 = vpop.f32.mrf.mxu0  ;;  %9442 = vmatmul.mubr.f32.gmra.mxu0 %v12020_v30  ;;  %v4187_v5 = vpop.f32.mrf.mxu1 }
 0x334   : > { %v12156_v43 = vadd.f32 %v8963_v45, %v8883_v33  ;;  %9444 = vmatprep.mubr.f32.mxu0 %v12023_v37  ;;  %v5798_v33 = vld [vmem:[#allocation2 + $0xff] sm:$0xff] }
 0x335   : > { %v4392_v52 = vpop.f32.mrf.mxu0  ;;  %9368 = vmatmul.mubr.f32.gmra.mxu1 %v5796_v14  ;;  %v8892_v30 = vpop.f32.mrf.mxu1  ;;  %v6135_v45 = vld [vmem:[#allocation2 + $0xf8] sm:$0xff] }
 0x336   : > { %v12159_v15 = vadd.f32 %v4392_v52, %v4167_v27  ;;  %9370 = vmatprep.mubr.msk.f32.mxu1 %vm13417_vm5, %v5797_v1  ;;  %v5801_v52 = vld [vmem:[#allocation2 + $0x117] sm:$0xff] }
 0x337   : > { %v8966_v29 = vpop.f32.mrf.mxu0  ;;  %9445 = vmatmul.mubr.f32.gmra.mxu0 %v12030_v59  ;;  %v4197_v47 = vpop.f32.mrf.mxu1 }
 0x338   : > { %v12164_v7 = vadd.f32 %v8966_v29, %v8886_v18  ;;  %9447 = vmatprep.mubr.f32.mxu0 %v6133_v32 }
 0x339   : > { %v4402_v37 = vpop.f32.mrf.mxu0  ;;  %9371 = vmatmul.mubr.f32.gmra.mxu1 %v5798_v33  ;;  %v8895_v59 = vpop.f32.mrf.mxu1  ;;  %v6415_v33 = vld [vmem:[#allocation2 + $0x29] sm:$0xff] }
 0x33a   : > { %v12166_v60 = vadd.f32 %v4402_v37, %v4177_v20  ;;  %9373 = vmatprep.mubr.msk.f32.mxu1 %vm13190_vm12, %v11906_v38 }
 0x33b   : > { %v8969_v27 = vpop.f32.mrf.mxu0  ;;  %9448 = vmatmul.mubr.f32.gmra.mxu0 %v12038_v19  ;;  %v4207_v1 = vpop.f32.mrf.mxu1  ;;  %v6137_v19 = vld [vmem:[#allocation2 + $0x108] sm:$0xff] }
 0x33c   : > { %v12172_v14 = vadd.f32 %v8969_v27, %v8889_v35  ;;  %9450 = vmatprep.mubr.f32.mxu0 %v6135_v45 }
 0x33d   : > { %v4412_v18 = vpop.f32.mrf.mxu0  ;;  %9374 = vmatmul.mubr.f32.gmra.mxu1 %v11914_v24  ;;  %v8898_v29 = vpop.f32.mrf.mxu1 }
 0x33e   : > { %v12175_v12 = vadd.f32 %v4412_v18, %v4187_v5  ;;  %9376 = vmatprep.mubr.msk.f32.mxu1 %vm13146_vm11, %v5801_v52  ;;  %v6138_v5 = vld [vmem:[#allocation2 + $0x110] sm:$0xff]  ;;  %v9614_v52 = vld [vmem:[#allocation2 + $0x8] sm:$0xff] }
 0x33f   : > { %v8972_v38 = vpop.f32.mrf.mxu0  ;;  %9451 = vmatmul.mubr.f32.gmra.mxu0 %v12046_v28  ;;  %v4217_v24 = vpop.f32.mrf.mxu1  ;;  %v13487_v28 = vld [vmem:[#allocation22_spill] sm:$0xff] }
 0x340   : > { %v12180_v32 = vadd.f32 %v8972_v38, %v8892_v30  ;;  %9453 = vmatprep.mubr.f32.mxu0 %v6137_v19  ;;  %v6416_v30 = vld [vmem:[#allocation2 + $0x31] sm:$0xff] }
 0x341   : > { %v4422_v35 = vpop.f32.mrf.mxu0  ;;  %9377 = vmatmul.mubr.f32.gmra.mxu1 %v5802_v62  ;;  %v9013_v45 = vpop.f32.mrf.mxu1  ;;  %v6417_v62 = vld [vmem:[#allocation2 + $0x39] sm:$0xff] }
 0x342   : > { %v12182_v37 = vadd.f32 %v4422_v35, %v4197_v47  ;;  %9491 = vmatprep.mubr.f32.mxu1 %v6415_v33  ;;  %v4758_v20 = vadd.f32 %v9013_v45, %v13487_v28  ;;  %v6419_v45 = vld [vmem:[#allocation2 + $0x49] sm:$0xff]  ;;  %v4293_v28 = vadd.f32 %v12079_v50, %v12065_v58 }
 0x343   : > { %v8975_v27 = vpop.f32.mrf.mxu0  ;;  %9454 = vmatmul.mubr.f32.gmra.mxu0 %v6138_v5  ;;  %v4598_v19 = vpop.f32.mrf.mxu1 }
 0x344   : > { %v12184_v18 = vadd.f32 %v8975_v27, %v8895_v59  ;;  %9456 = vmatprep.mubr.f32.mxu0 %v9614_v52  ;;  %v6418_v27 = vld [vmem:[#allocation2 + $0x41] sm:$0xff] }
 0x345   : > { %v4432_v38 = vpop.f32.mrf.mxu0  ;;  %9492 = vmatmul.mubr.msk.f32.vlgmr.msra.gmra.mxu1 %vm10282_vm15, %v6416_v30  ;;  %v9016_v33 = vpop.f32.mrf.mxu1 }
 0x346   : > { %v12189_v47 = vadd.f32 %v4432_v38, %v4207_v1  ;;  %9494 = vmatprep.mubr.f32.mxu1 %v6417_v62  ;;  %v4760_v59 = vadd.f32 %v9016_v33, %v12084_v54  ;;  %v4757_v54 = vadd.f32 %v4598_v19, %v4293_v28  ;;  %v6421_v33 = vld [vmem:[#allocation2 + $0x59] sm:$0xff]  ;;  %v6422_v19 = vld [vmem:[#allocation2 + $0x61] sm:$0xff] }
 0x347   : > { %v8978_v35 = vpop.f32.mrf.mxu0  ;;  %9457 = vmatmul.mubr.f32.gmra.mxu0 %v9614_v52  ;;  %v4608_v56 = vpop.f32.mrf.mxu1 }
 0x348   : > { %v12191_v5 = vadd.f32 %v8978_v35, %v8898_v29  ;;  %v4759_v52 = vadd.f32 %v4608_v56, %v12087_v48  ;;  %v6420_v35 = vld [vmem:[#allocation2 + $0x51] sm:$0xff] }
 0x349   : > { %v4442_v25 = vpop.f32.mrf.mxu0  ;;  %9495 = vmatmul.mubr.msk.f32.gmra.mxu1 %vm10297_vm14, %v6418_v27  ;;  %v9019_v29 = vpop.f32.mrf.mxu1 }
 0x34a   : > { %v12198_v1 = vadd.f32 %v4442_v25, %v4217_v24  ;;  %9497 = vmatprep.mubr.f32.mxu1 %v6419_v45  ;;  %v4762_v62 = vadd.f32 %v9019_v29, %v12092_v44 }
 0x34b   : > { %v9093_v30 = vpop.f32.mrf.mxu0  ;;  %v4618_v27 = vpop.f32.mrf.mxu1 }
 0x34c   : > { %v12201_v38 = vadd.f32 %v9093_v30, %v4758_v20  ;;  %v4761_v25 = vadd.f32 %v4618_v27, %v12095_v13 }
 0x34d   : > { %v4936_v10 = vpop.f32.mrf.mxu0  ;;  %9498 = vmatmul.mubr.msk.f32.gmra.mxu1 %vm10317_vm0, %v6420_v35  ;;  %v9022_v48 = vpop.f32.mrf.mxu1  ;;  %vm13488_vm0 = vnez %v13437_v23  ;;  %v6437_v23 = vld [vmem:[#allocation2 + $0xd9] sm:$0xff] }
 0x34e   : > { %v12206_v58 = vadd.f32 %v4936_v10, %v4757_v54  ;;  %9500 = vmatprep.mubr.f32.mxu1 %v6421_v33  ;;  %v4764_v20 = vadd.f32 %v9022_v48, %v12100_v3  ;;  %v6424_v54 = vld [vmem:[#allocation2 + $0x71] sm:$0xff] }
 0x34f   : > { %v9096_v50 = vpop.f32.mrf.mxu0  ;;  %v4628_v45 = vpop.f32.mrf.mxu1 }
 0x350   : > { %v12209_v24 = vadd.f32 %v9096_v50, %v4760_v59  ;;  %v4763_v28 = vadd.f32 %v4628_v45, %v12103_v53  ;;  %v6426_v50 = vld [vmem:[#allocation2 + $0x81] sm:$0xff]  ;;  %v6428_v45 = vld [vmem:[#allocation2 + $0x91] sm:$0xff] }
 0x351   : > { %v4946_v44 = vpop.f32.mrf.mxu0  ;;  %9501 = vmatmul.mubr.msk.f32.gmra.mxu1 %vm10336_vm1, %v6422_v19  ;;  %v9025_v13 = vpop.f32.mrf.mxu1  ;;  %vm13489_vm1 = vnez %v13440_v36  ;;  %v6439_v36 = vld [vmem:[#allocation2 + $0xe9] sm:$0xff] }
 0x352   : > { %v12214_v56 = vadd.f32 %v4946_v44, %v4759_v52  ;;  %9503 = vmatprep.mubr.f32.mxu1 %v6423_v42  ;;  %v4766_v59 = vadd.f32 %v9025_v13, %v12108_v34 }
 0x353   : > { %v9099_v30 = vpop.f32.mrf.mxu0  ;;  %v4638_v35 = vpop.f32.mrf.mxu1 }
 0x354   : > { %v12217_v29 = vadd.f32 %v9099_v30, %v4762_v62  ;;  %v4765_v52 = vadd.f32 %v4638_v35, %v12111_v22 }
 0x355   : > { %v4956_v3 = vpop.f32.mrf.mxu0  ;;  %9504 = vmatmul.mubr.msk.f32.gmra.mxu1 %vm10355_vm2, %v6424_v54  ;;  %v9028_v53 = vpop.f32.mrf.mxu1  ;;  %vm13490_vm2 = vnez %v13443_v0  ;;  %v6441_v0 = vld [vmem:[#allocation2 + $0xf9] sm:$0xff] }
 0x356   : > { %v12222_v10 = vadd.f32 %v4956_v3, %v4761_v25  ;;  %9506 = vmatprep.mubr.f32.mxu1 %v6425_v40  ;;  %v4768_v62 = vadd.f32 %v9028_v53, %v12116_v63  ;;  %v6430_v40 = vld [vmem:[#allocation2 + $0xa1] sm:$0xff] }
 0x357   : > { %v9102_v33 = vpop.f32.mrf.mxu0  ;;  %v4648_v48 = vpop.f32.mrf.mxu1 }
 0x358   : > { %v12225_v27 = vadd.f32 %v9102_v33, %v4764_v20  ;;  %v4767_v25 = vadd.f32 %v4648_v48, %v12119_v41 }
 0x359   : > { %v4966_v34 = vpop.f32.mrf.mxu0  ;;  %9507 = vmatmul.mubr.msk.f32.gmra.mxu1 %vm10374_vm3, %v6426_v50  ;;  %v9031_v22 = vpop.f32.mrf.mxu1  ;;  %vm13491_vm3 = vnez %v13446_v9 }
 0x35a   : > { %v12230_v19 = vadd.f32 %v4966_v34, %v4763_v28  ;;  %9509 = vmatprep.mubr.f32.mxu1 %v6427_v16  ;;  %v4770_v20 = vadd.f32 %v9031_v22, %v12124_v4  ;;  %v6432_v34 = vld [vmem:[#allocation2 + $0xb1] sm:$0xff] }
 0x35b   : > { %v9105_v44 = vpop.f32.mrf.mxu0  ;;  %v4658_v30 = vpop.f32.mrf.mxu1 }
 0x35c   : > { %v12233_v42 = vadd.f32 %v9105_v44, %v4766_v59  ;;  %v4769_v28 = vadd.f32 %v4658_v30, %v12127_v31 }
 0x35d   : > { %v4976_v63 = vpop.f32.mrf.mxu0  ;;  %9510 = vmatmul.mubr.msk.f32.gmra.mxu1 %vm10393_vm4, %v6428_v45  ;;  %v9034_v41 = vpop.f32.mrf.mxu1  ;;  %v6434_v45 = vld [vmem:[#allocation2 + $0xc1] sm:$0xff]  ;;  %vm13492_vm4 = vnez %v13452_v51 }
 0x35e   : > { %v12238_v13 = vadd.f32 %v4976_v63, %v4765_v52  ;;  %9512 = vmatprep.mubr.f32.mxu1 %v6429_v61  ;;  %v4772_v59 = vadd.f32 %v9034_v41, %v12132_v49 }
 0x35f   : > { %v9108_v54 = vpop.f32.mrf.mxu0  ;;  %v4668_v35 = vpop.f32.mrf.mxu1 }
 0x360   : > { %v12241_v3 = vadd.f32 %v9108_v54, %v4768_v62  ;;  %v4771_v52 = vadd.f32 %v4668_v35, %v12135_v8 }
 0x361   : > { %v4986_v4 = vpop.f32.mrf.mxu0  ;;  %9513 = vmatmul.mubr.msk.f32.gmra.mxu1 %vm13432_vm7, %v6430_v40  ;;  %v9037_v31 = vpop.f32.mrf.mxu1 }
 0x362   : > { %v12246_v33 = vadd.f32 %v4986_v4, %v4767_v25  ;;  %9515 = vmatprep.mubr.f32.mxu1 %v6431_v17  ;;  %v4774_v62 = vadd.f32 %v9037_v31, %v12140_v57  ;;  %v6438_v31 = vld [vmem:[#allocation2 + $0xe1] sm:$0xff] }
 0x363   : > { %v9111_v53 = vpop.f32.mrf.mxu0  ;;  %v4678_v16 = vpop.f32.mrf.mxu1 }
 0x364   : > { %v12249_v50 = vadd.f32 %v9111_v53, %v4770_v20  ;;  %v4773_v25 = vadd.f32 %v4678_v16, %v12143_v6 }
 0x365   : > { %v4996_v49 = vpop.f32.mrf.mxu0  ;;  %9516 = vmatmul.mubr.msk.f32.gmra.mxu1 %vm13435_vm8, %v6432_v34  ;;  %v9040_v8 = vpop.f32.mrf.mxu1 }
 0x366   : > { %v12254_v48 = vadd.f32 %v4996_v49, %v4769_v28  ;;  %9518 = vmatprep.mubr.f32.mxu1 %v6433_v55  ;;  %v4776_v20 = vadd.f32 %v9040_v8, %v12148_v26 }
 0x367   : > { %v9114_v44 = vpop.f32.mrf.mxu0  ;;  %v4688_v63 = vpop.f32.mrf.mxu1 }
 0x368   : > { %v12257_v22 = vadd.f32 %v9114_v44, %v4772_v59  ;;  %v4775_v30 = vadd.f32 %v4688_v63, %v12151_v2  ;;  %v6436_v59 = vld [vmem:[#allocation2 + $0xd1] sm:$0xff] }
 0x369   : > { %v5006_v57 = vpop.f32.mrf.mxu0  ;;  %9519 = vmatmul.mubr.msk.f32.gmra.mxu1 %vm13488_vm0, %v6434_v45  ;;  %v9043_v6 = vpop.f32.mrf.mxu1  ;;  %v6440_v44 = vld [vmem:[#allocation2 + $0xf1] sm:$0xff] }
 0x36a   : > { %v12262_v61 = vadd.f32 %v5006_v57, %v4771_v52  ;;  %9521 = vmatprep.mubr.f32.mxu1 %v6435_v39  ;;  %v4778_v41 = vadd.f32 %v9043_v6, %v12156_v43 }
 0x36b   : > { %v9117_v28 = vpop.f32.mrf.mxu0  ;;  %v4698_v40 = vpop.f32.mrf.mxu1 }
 0x36c   : > { %v12265_v54 = vadd.f32 %v9117_v28, %v4774_v62  ;;  %v4777_v17 = vadd.f32 %v4698_v40, %v12159_v15 }
 0x36d   : > { %v5016_v26 = vpop.f32.mrf.mxu0  ;;  %9522 = vmatmul.mubr.msk.f32.gmra.mxu1 %vm13489_vm1, %v6436_v59  ;;  %v9046_v2 = vpop.f32.mrf.mxu1  ;;  %v6445_v59 = vld [vmem:[#allocation2 + $0x119] sm:$0xff] }
 0x36e   : > { %v12270_v4 = vadd.f32 %v5016_v26, %v4773_v25  ;;  %9524 = vmatprep.mubr.f32.mxu1 %v6437_v23  ;;  %v4780_v53 = vadd.f32 %v9046_v2, %v12164_v7 }
 0x36f   : > { %v9120_v35 = vpop.f32.mrf.mxu0  ;;  %v4708_v62 = vpop.f32.mrf.mxu1 }
 0x370   : > { %v12273_v52 = vadd.f32 %v9120_v35, %v4776_v20  ;;  %v4779_v49 = vadd.f32 %v4708_v62, %v12166_v60 }
 0x371   : > { %v5026_v43 = vpop.f32.mrf.mxu0  ;;  %9525 = vmatmul.mubr.msk.f32.gmra.mxu1 %vm13490_vm2, %v6438_v31  ;;  %v9049_v15 = vpop.f32.mrf.mxu1 }
 0x372   : > { %v12278_v34 = vadd.f32 %v5026_v43, %v4775_v30  ;;  %9527 = vmatprep.mubr.f32.mxu1 %v6439_v36  ;;  %v4782_v25 = vadd.f32 %v9049_v15, %v12172_v14  ;;  %v6442_v30 = vld [vmem:[#allocation2 + $0x101] sm:$0xff] }
 0x373   : > { %v9123_v55 = vpop.f32.mrf.mxu0  ;;  %v4718_v8 = vpop.f32.mrf.mxu1 }
 0x374   : > { %v12281_v16 = vadd.f32 %v9123_v55, %v4778_v41  ;;  %v4781_v45 = vadd.f32 %v4718_v8, %v12175_v12 }
 0x375   : > { %v5036_v7 = vpop.f32.mrf.mxu0  ;;  %9528 = vmatmul.mubr.msk.f32.gmra.mxu1 %vm13491_vm3, %v6440_v44  ;;  %v9052_v60 = vpop.f32.mrf.mxu1 }
 0x376   : > { %v12286_v20 = vadd.f32 %v5036_v7, %v4777_v17  ;;  %9530 = vmatprep.mubr.f32.mxu1 %v6441_v0  ;;  %v4784_v63 = vadd.f32 %v9052_v60, %v12180_v32 }
 0x377   : > { %v9126_v57 = vpop.f32.mrf.mxu0  ;;  %v4728_v9 = vpop.f32.mrf.mxu1 }
 0x378   : > { %v12289_v39 = vadd.f32 %v9126_v57, %v4780_v53  ;;  %v4783_v6 = vadd.f32 %v4728_v9, %v12182_v37 }
 0x379   : > { %v5046_v14 = vpop.f32.mrf.mxu0  ;;  %9531 = vmatmul.mubr.msk.f32.gmra.mxu1 %vm13459_vm10, %v6442_v30 }
 0x37a   : > { %v12294_v28 = vadd.f32 %v5046_v14, %v4779_v49  ;;  %9533 = vmatprep.mubr.f32.mxu1 %v12062_v46  ;;  %v9055_v12 = vpop.f32.mrf.mxu1  ;;  %v6446_v46 = vld [vmem:[#allocation2 + $0x121] sm:$0xff] }
 0x37b   : > { %v9129_v41 = vpop.f32.mrf.mxu0  ;;  %v4786_v23 = vadd.f32 %v9055_v12, %v12184_v18 }
 0x37c   : > { %v12298_v26 = vadd.f32 %v9129_v41, %v4782_v25  ;;  %v4738_v21 = vpop.f32.mrf.mxu1 }
 0x37d   : > { %v5056_v32 = vpop.f32.mrf.mxu0  ;;  %9534 = vmatmul.mubr.msk.f32.gmra.mxu1 %vm13492_vm4, %v12067_v11  ;;  %v4785_v17 = vadd.f32 %v4738_v21, %v12189_v47 }
 0x37e   : > { %v12304_v40 = vadd.f32 %v5056_v32, %v4781_v45  ;;  %9536 = vmatprep.mubr.f32.mxu1 %v6445_v59  ;;  %v9058_v35 = vpop.f32.mrf.mxu1 }
 0x37f   : > { %v9132_v37 = vpop.f32.mrf.mxu0  ;;  %v4788_v53 = vadd.f32 %v9058_v35, %v12191_v5 }
 0x380   : > { %v12307_v2 = vadd.f32 %v9132_v37, %v4784_v63  ;;  %v4748_v43 = vpop.f32.mrf.mxu1 }
 0x381   : > { %v5066_v31 = vpop.f32.mrf.mxu0  ;;  %9537 = vmatmul.mubr.msk.f32.gmra.mxu1 %vm13455_vm6, %v6446_v46  ;;  %v4787_v11 = vadd.f32 %v4748_v43, %v12198_v1 }
 0x382   : > { %v12312_v51 = vadd.f32 %v5066_v31, %v4783_v6  ;;  %v9173_v49 = vpop.f32.mrf.mxu1 }
 0x383   : > { %v9135_v36 = vpop.f32.mrf.mxu0  ;;  %v12320_v15 = vadd.f32 %v9173_v49, %v12201_v38 }
 0x384   : > { %v12315_v62 = vadd.f32 %v9135_v36, %v4786_v23  ;;  %v5242_v25 = vpop.f32.mrf.mxu1 }
 0x385   : > { %v5076_v47 = vpop.f32.mrf.mxu0  ;;  %v12325_v7 = vadd.f32 %v5242_v25, %v12206_v58 }
 0x386   : > { %v12317_v55 = vadd.f32 %v5076_v47, %v4785_v17  ;;  %v9176_v8 = vpop.f32.mrf.mxu1 }
 0x387   : > { %v9138_v5 = vpop.f32.mrf.mxu0  ;;  %v12330_v45 = vadd.f32 %v9176_v8, %v12209_v24 }
 0x388   : > { %v12322_v44 = vadd.f32 %v9138_v5, %v4788_v53  ;;  %v5252_v60 = vpop.f32.mrf.mxu1 }
 0x389   : > { %v5086_v0 = vpop.f32.mrf.mxu0  ;;  %v12335_v38 = vadd.f32 %v5252_v60, %v12214_v56 }
 0x38a   : > { %v12327_v1 = vadd.f32 %v5086_v0, %v4787_v11  ;;  %v9179_v30 = vpop.f32.mrf.mxu1 }
 0x38b   : > { %v12332_v57 = vpop.f32.mrf.mxu0  ;;  %v12340_v14 = vadd.f32 %v9179_v30, %v12217_v29 }
 0x38c   : > { %v5262_v9 = vpop.f32.mrf.mxu1 }
 0x38d   : > { %v12337_v63 = vpop.f32.mrf.mxu0  ;;  %v12345_v6 = vadd.f32 %v5262_v9, %v12222_v10 }
 0x38e   : > { %v9182_v41 = vpop.f32.mrf.mxu1 }
 0x38f   : > { %v12342_v58 = vpop.f32.mrf.mxu0  ;;  %v12350_v12 = vadd.f32 %v9182_v41, %v12225_v27 }
 0x390   : > { %v5272_v59 = vpop.f32.mrf.mxu1 }
 0x391   : > { %v12347_v24 = vpop.f32.mrf.mxu0  ;;  %v12355_v23 = vadd.f32 %v5272_v59, %v12230_v19 }
 0x392   : > { %v9185_v32 = vpop.f32.mrf.mxu1 }
 0x393   : > { %v12352_v56 = vpop.f32.mrf.mxu0  ;;  %v12360_v21 = vadd.f32 %v9185_v32, %v12233_v42 }
 0x394   : > { %v5282_v17 = vpop.f32.mrf.mxu1 }
 0x395   : > { %v12357_v29 = vpop.f32.mrf.mxu0  ;;  %v12365_v46 = vadd.f32 %v5282_v17, %v12238_v13 }
 0x397   : > { %v12362_v10 = vpop.f32.mrf.mxu0  ;;  %v9188_v37 = vpop.f32.mrf.mxu1 }
 0x398   : > { %v12370_v35 = vadd.f32 %v9188_v37, %v12241_v3 }
 0x399   : > { %v12367_v27 = vpop.f32.mrf.mxu0  ;;  %v5292_v53 = vpop.f32.mrf.mxu1 }
 0x39a   : > { %v12375_v31 = vadd.f32 %v5292_v53, %v12246_v33 }
 0x39b   : > { %v12372_v19 = vpop.f32.mrf.mxu0  ;;  %v9191_v18 = vpop.f32.mrf.mxu1 }
 0x39c   : > { %v12380_v43 = vadd.f32 %v9191_v18, %v12249_v50 }
 0x39d   : > { %v12377_v42 = vpop.f32.mrf.mxu0  ;;  %v5302_v11 = vpop.f32.mrf.mxu1 }
 0x39e   : > { %v12385_v36 = vadd.f32 %v5302_v11, %v12254_v48 }
 0x39f   : > { %v12382_v13 = vpop.f32.mrf.mxu0  ;;  %v9194_v47 = vpop.f32.mrf.mxu1 }
 0x3a0   : > { %v12390_v49 = vadd.f32 %v9194_v47, %v12257_v22 }
 0x3a1   : > { %v12387_v3 = vpop.f32.mrf.mxu0  ;;  %v5312_v5 = vpop.f32.mrf.mxu1 }
 0x3a2   : > { %13494 = vst [vmem:[#allocation23_spill] sm:$0xff] %v12390_v49  ;;  %v12395_v25 = vadd.f32 %v5312_v5, %v12262_v61 }
 0x3a3   : > { %v12392_v33 = vpop.f32.mrf.mxu0  ;;  %v9197_v0 = vpop.f32.mrf.mxu1 }
 0x3a4   : > { %13495 = vst [vmem:[#allocation117_spill] sm:$0xff] %v12395_v25  ;;  %v12400_v8 = vadd.f32 %v9197_v0, %v12265_v54 }
 0x3a5   : > { %v12397_v50 = vpop.f32.mrf.mxu0  ;;  %v5322_v60 = vpop.f32.mrf.mxu1 }
 0x3a6   : > { %13496 = vst [vmem:[#allocation120_spill] sm:$0xff] %v12400_v8  ;;  %v12405_v30 = vadd.f32 %v5322_v60, %v12270_v4 }
 0x3a7   : > { %v12402_v48 = vpop.f32.mrf.mxu0  ;;  %v9200_v9 = vpop.f32.mrf.mxu1 }
 0x3a8   : > { %13497 = vst [vmem:[#allocation25_spill] sm:$0xff] %v12402_v48  ;;  %13498 = vst [vmem:[#allocation26_spill] sm:$0xff] %v12405_v30  ;;  %v12410_v41 = vadd.f32 %v9200_v9, %v12273_v52 }
 0x3a9   : > { %v12407_v22 = vpop.f32.mrf.mxu0  ;;  %v5332_v59 = vpop.f32.mrf.mxu1 }
 0x3aa   : > { %13499 = vst [vmem:[#allocation34_spill] sm:$0xff] %v12407_v22  ;;  %13500 = vst [vmem:[#allocation35_spill] sm:$0xff] %v12410_v41  ;;  %v12415_v32 = vadd.f32 %v5332_v59, %v12278_v34 }
 0x3ab   : > { %v12412_v61 = vpop.f32.mrf.mxu0  ;;  %v9203_v17 = vpop.f32.mrf.mxu1 }
 0x3ac   : > { %13501 = vst [vmem:[#allocation73_spill] sm:$0xff] %v12412_v61  ;;  %13502 = vst [vmem:[#allocation74_spill] sm:$0xff] %v12415_v32  ;;  %v12420_v37 = vadd.f32 %v9203_v17, %v12281_v16 }
 0x3ad   : > { %v12417_v54 = vpop.f32.mrf.mxu0  ;;  %v5342_v53 = vpop.f32.mrf.mxu1 }
 0x3ae   : > { %13503 = vst [vmem:[#allocation118_spill] sm:$0xff] %v12417_v54  ;;  %13504 = vst [vmem:[#allocation123_spill] sm:$0xff] %v12420_v37  ;;  %v12425_v18 = vadd.f32 %v5342_v53, %v12286_v20 }
 0x3af   : > { %v12422_v4 = vpop.f32.mrf.mxu0  ;;  %v9206_v11 = vpop.f32.mrf.mxu1 }
 0x3b0   : > { %13505 = vst [vmem:[#allocation28_spill] sm:$0xff] %v12422_v4  ;;  %13506 = vst [vmem:[#allocation29_spill] sm:$0xff] %v12425_v18  ;;  %v12430_v47 = vadd.f32 %v9206_v11, %v12289_v39 }
 0x3b1   : > { %v12427_v52 = vpop.f32.mrf.mxu0  ;;  %v5352_v5 = vpop.f32.mrf.mxu1 }
 0x3b2   : > { %13507 = vst [vmem:[#allocation75_spill] sm:$0xff] %v12427_v52  ;;  %13508 = vst [vmem:[#allocation78_spill] sm:$0xff] %v12430_v47  ;;  %v12435_v0 = vadd.f32 %v5352_v5, %v12294_v28 }
 0x3b3   : > { %v12432_v34 = vpop.f32.mrf.mxu0  ;;  %v9209_v60 = vpop.f32.mrf.mxu1 }
 0x3b4   : > { %13509 = vst [vmem:[#allocation126_spill] sm:$0xff] %v12432_v34  ;;  %13510 = vst [vmem:[#allocation119_spill] sm:$0xff] %v12435_v0  ;;  %v12440_v9 = vadd.f32 %v9209_v60, %v12298_v26 }
 0x3b5   : > { %v12437_v16 = vpop.f32.mrf.mxu0  ;;  %v5362_v59 = vpop.f32.mrf.mxu1 }
 0x3b6   : > { %13511 = vst [vmem:[#allocation31_spill] sm:$0xff] %v12437_v16  ;;  %13512 = vst [vmem:[#allocation32_spill] sm:$0xff] %v12440_v9  ;;  %v12445_v17 = vadd.f32 %v5362_v59, %v12304_v40 }
 0x3b7   : > { %v12442_v20 = vpop.f32.mrf.mxu0  ;;  %v9212_v53 = vpop.f32.mrf.mxu1 }
 0x3b8   : > { %13513 = vst [vmem:[#allocation37_spill] sm:$0xff] %v12442_v20  ;;  %13514 = vst [vmem:[#allocation38_spill] sm:$0xff] %v12445_v17  ;;  %v12450_v11 = vadd.f32 %v9212_v53, %v12307_v2 }
 0x3b9   : > { %v12447_v39 = vpop.f32.mrf.mxu0  ;;  %v5372_v5 = vpop.f32.mrf.mxu1 }
 0x3ba   : > { %13515 = vst [vmem:[#allocation76_spill] sm:$0xff] %v12447_v39  ;;  %13516 = vst [vmem:[#allocation77_spill] sm:$0xff] %v12450_v11  ;;  %v12455_v0 = vadd.f32 %v5372_v5, %v12312_v51 }
 0x3bb   : > { %v12452_v28 = vpop.f32.mrf.mxu0  ;;  %v9215_v60 = vpop.f32.mrf.mxu1 }
 0x3bc   : > { %13517 = vst [vmem:[#allocation129_spill] sm:$0xff] %v12452_v28  ;;  %13518 = vst [vmem:[#allocation121_spill] sm:$0xff] %v12455_v0  ;;  %v12460_v9 = vadd.f32 %v9215_v60, %v12315_v62 }
 0x3bd   : > { %v12457_v26 = vpop.f32.mrf.mxu0  ;;  %v5382_v59 = vpop.f32.mrf.mxu1 }
 0x3be   : > { %13519 = vst [vmem:[#allocation79_spill] sm:$0xff] %v12457_v26  ;;  %13520 = vst [vmem:[#allocation82_spill] sm:$0xff] %v12460_v9  ;;  %v12465_v17 = vadd.f32 %v5382_v59, %v12317_v55 }
 0x3bf   : > { %v12462_v40 = vpop.f32.mrf.mxu0  ;;  %v9218_v53 = vpop.f32.mrf.mxu1 }
 0x3c0   : > { %13521 = vst [vmem:[#allocation122_spill] sm:$0xff] %v12462_v40  ;;  %13522 = vst [vmem:[#allocation40_spill] sm:$0xff] %v12465_v17  ;;  %v12470_v11 = vadd.f32 %v9218_v53, %v12322_v44 }
 0x3c1   : > { %v12467_v2 = vpop.f32.mrf.mxu0  ;;  %v5392_v5 = vpop.f32.mrf.mxu1 }
 0x3c2   : > { %13523 = vst [vmem:[#allocation41_spill] sm:$0xff] %v12467_v2  ;;  %13524 = vst [vmem:[#allocation59_spill] sm:$0xff] %v12470_v11  ;;  %v12475_v0 = vadd.f32 %v5392_v5, %v12327_v1 }
 0x3c3   : > { %v12472_v51 = vpop.f32.mrf.mxu0  ;;  %v9333_v60 = vpop.f32.mrf.mxu1 }
 0x3c4   : > { %13525 = vst [vmem:[#allocation80_spill] sm:$0xff] %v12472_v51  ;;  %13526 = vst [vmem:[#allocation81_spill] sm:$0xff] %v12475_v0 }
 0x3c5   : > { %v12477_v62 = vpop.f32.mrf.mxu0  ;;  %v5918_v40 = vpop.f32.mrf.mxu1 }
 0x3c6   : > { %13527 = vst [vmem:[#allocation124_spill] sm:$0xff] %v12477_v62 }
 0x3c7   : > { %v12479_v9 = vpop.f32.mrf.mxu0 }
 0x3c8   : > { %13528 = vst [vmem:[#allocation134_spill] sm:$0xff] %v12479_v9  ;;  %v9336_v59 = vpop.f32.mrf.mxu1 }
 0x3c9   : > { %v12481_v55 = vpop.f32.mrf.mxu0 }
 0x3ca   : > { %13529 = vst [vmem:[#allocation15_spill] sm:$0xff] %v12481_v55  ;;  %v5928_v2 = vpop.f32.mrf.mxu1 }
 0x3cb   : > { %v9413_v17 = vpop.f32.mrf.mxu0 }
 0x3cd   : > { %v6224_v26 = vpop.f32.mrf.mxu0  ;;  %v12483_v44 = vpop.f32.mrf.mxu1 }
 0x3cf   : > { %v9416_v53 = vpop.f32.mrf.mxu0  ;;  %v12485_v11 = vpop.f32.mrf.mxu1 }
 0x3d1   : > { %v12487_v51 = vpop.f32.mrf.mxu0  ;;  %v12489_v1 = vpop.f32.mrf.mxu1 }
 0x3d3   : > { %v12491_v5 = vpop.f32.mrf.mxu0  ;;  %v12493_v0 = vpop.f32.mrf.mxu1 }
 0x3d5   : > { %v12495_v9 = vpop.f32.mrf.mxu1  ;;  %v12497_v55 = vpop.f32.mrf.mxu0 }
 0x3d7   : > { %v12499_v62 = vpop.f32.mrf.mxu1  ;;  %v12503_v39 = vpop.f32.mrf.mxu0 }
 0x3d9   : > { %v12501_v28 = vpop.f32.mrf.mxu1  ;;  %v12509_v16 = vpop.f32.mrf.mxu0 }
 0x3db   : > { %v12505_v20 = vpop.f32.mrf.mxu1  ;;  %v12515_v37 = vpop.f32.mrf.mxu0 }
 0x3dd   : > { %v12507_v47 = vpop.f32.mrf.mxu1  ;;  %v12521_v4 = vpop.f32.mrf.mxu0 }
 0x3df   : > { %v12511_v18 = vpop.f32.mrf.mxu1  ;;  %v12527_v30 = vpop.f32.mrf.mxu0 }
 0x3e0   : > { %13530 = vst [vmem:[#allocation83_spill] sm:$0xff] %v12511_v18 }
 0x3e1   : > { %v12513_v34 = vpop.f32.mrf.mxu1  ;;  %v12533_v22 = vpop.f32.mrf.mxu0 }
 0x3e2   : > { %13531 = vst [vmem:[#allocation86_spill] sm:$0xff] %v12513_v34 }
 0x3e3   : > { %v12517_v52 = vpop.f32.mrf.mxu1 }
 0x3e4   : > { %13532 = vst [vmem:[#allocation137_spill] sm:$0xff] %v12517_v52  ;;  %v12539_v52 = vpop.f32.mrf.mxu0 }
 0x3e5   : > { %v12519_v32 = vpop.f32.mrf.mxu1 }
 0x3e6   : > { %13533 = vst [vmem:[#allocation125_spill] sm:$0xff] %v12519_v32 }
 0x3e7   : > { %v12523_v41 = vpop.f32.mrf.mxu1 }
 0x3e8   : > { %13534 = vst [vmem:[#allocation60_spill] sm:$0xff] %v12523_v41  ;;  %v12545_v41 = vpop.f32.mrf.mxu0 }
 0x3e9   : > { %v12525_v54 = vpop.f32.mrf.mxu1  ;;  %13542 = vst [vmem:[#allocation62_spill] sm:$0xff] %v12545_v41 }
 0x3ea   : > { %13535 = vst [vmem:[#allocation61_spill] sm:$0xff] %v12525_v54 }
 0x3eb   : > { %v12529_v61 = vpop.f32.mrf.mxu1 }
 0x3ec   : > { %13536 = vst [vmem:[#allocation84_spill] sm:$0xff] %v12529_v61  ;;  %v12551_v61 = vpop.f32.mrf.mxu0 }
 0x3ed   : > { %v12531_v8 = vpop.f32.mrf.mxu1  ;;  %13545 = vst [vmem:[#allocation89_spill] sm:$0xff] %v12551_v61 }
 0x3ee   : > { %13537 = vst [vmem:[#allocation85_spill] sm:$0xff] %v12531_v8 }
 0x3ef   : > { %v12535_v34 = vpop.f32.mrf.mxu1 }
 0x3f0   : > { %13538 = vst [vmem:[#allocation127_spill] sm:$0xff] %v12535_v34  ;;  %v12557_v34 = vpop.f32.mrf.mxu0 }
 0x3f1   : > { %v12537_v25 = vpop.f32.mrf.mxu1 }
 0x3f2   : > { %13539 = vst [vmem:[#allocation87_spill] sm:$0xff] %v12537_v25  ;;  %v12567_v41 = vpop.f32.mrf.mxu0 }
 0x3f3   : > { %v12541_v32 = vpop.f32.mrf.mxu1 }
 0x3f4   : > { %13540 = vst [vmem:[#allocation90_spill] sm:$0xff] %v12541_v32  ;;  %v5740_v32 = vadd.f32 %v12332_v57, %v12320_v15  ;;  %v12576_v15 = vld [vmem:[%s12861_s4] ss:$0 sm:$0xff] }
 0x3f5   : > { %v12543_v18 = vpop.f32.mrf.mxu1 }
 0x3f6   : > { %13541 = vst [vmem:[#allocation128_spill] sm:$0xff] %v12543_v18 }
 0x3f7   : > { %v12547_v54 = vpop.f32.mrf.mxu1 }
 0x3f8   : > { %13543 = vst [vmem:[#allocation63_spill] sm:$0xff] %v12547_v54  ;;  %v5739_v54 = vadd.f32 %v12337_v63, %v12325_v7  ;;  %v5741_v7 = vadd.f32 %v12347_v24, %v12335_v38  ;;  %v5743_v38 = vadd.f32 %v12357_v29, %v12345_v6  ;;  %v6794_v29 = vld [vmem:[%s9944_s10 + $0x30] sm:$0xff] }
 0x3f9   : > { %v12549_v48 = vpop.f32.mrf.mxu1 }
 0x3fa   : > { %13544 = vst [vmem:[#allocation88_spill] sm:$0xff] %v12549_v48  ;;  %v6078_v48 = vadd.f32 %v9333_v60, %v5740_v32  ;;  %v12580_v60 = vpop.f32.mrf.mxu0  ;;  %v6081_v6 = vadd.f32 %v12485_v11, %v5743_v38 }
 0x3fb   : > { %v12553_v8 = vpop.f32.mrf.mxu1 }
 0x3fc   : > { %13546 = vst [vmem:[#allocation130_spill] sm:$0xff] %v12553_v8  ;;  %v6384_v8 = vadd.f32 %v9413_v17, %v6078_v48  ;;  %v6079_v17 = vadd.f32 %v5928_v2, %v5741_v7 }
 0x3fd   : > { %v12555_v49 = vpop.f32.mrf.mxu1 }
 0x3fe   : > { %13547 = vst [vmem:[#allocation91_spill] sm:$0xff] %v12555_v49  ;;  %v5742_v49 = vadd.f32 %v12342_v58, %v12330_v45  ;;  %v5744_v45 = vadd.f32 %v12352_v56, %v12340_v14  ;;  %v6792_v58 = vld [vmem:[%s9944_s10 + $0x20] sm:$0xff] }
 0x3ff   : > { %v12559_v25 = vpop.f32.mrf.mxu1 }
 0x400   : > { %13548 = vst [vmem:[#allocation94_spill] sm:$0xff] %v12559_v25  ;;  %v6077_v25 = vadd.f32 %v5918_v40, %v5739_v54  ;;  %v6080_v32 = vadd.f32 %v9336_v59, %v5742_v49  ;;  %v6082_v24 = vadd.f32 %v12483_v44, %v5744_v45  ;;  %v6791_v49 = vld [vmem:[%s9944_s10 + $0x18] sm:$0xff] }
 0x401   : > { %v12563_v18 = vpop.f32.mrf.mxu1 }
 0x402   : > { %13549 = vst [vmem:[#allocation131_spill] sm:$0xff] %v12563_v18  ;;  %v6383_v63 = vadd.f32 %v6224_v26, %v6077_v25  ;;  %v6386_v54 = vadd.f32 %v9416_v53, %v6080_v32  ;;  %v12592_v26 = vpop.f32.mrf.mxu0  ;;  %v6388_v59 = vadd.f32 %v12491_v5, %v6082_v24 }
 0x403   : > { %v12569_v61 = vpop.f32.mrf.mxu1 }
 0x404   : > { %13550 = vst [vmem:[#allocation64_spill] sm:$0xff] %v12569_v61  ;;  %v12606_v5 = vpop.f32.mrf.mxu0 }
 0x405   : > { %v9493_v57 = vpop.f32.mrf.mxu1 }
 0x406   : > { %v6722_v61 = vadd.f32 %v9493_v57, %v6384_v8  ;;  %v6385_v8 = vadd.f32 %v12487_v51, %v6079_v17 }
 0x407   : > { %v6562_v48 = vpop.f32.mrf.mxu1 }
 0x408   : > { %v6760_v40 = vadd.f32 %v12576_v15, %v6722_v61  ;;  %v6721_v18 = vadd.f32 %v6562_v48, %v6383_v63  ;;  %v5746_v61 = vadd.f32 %v12362_v10, %v12350_v12  ;;  %v5745_v63 = vadd.f32 %v12367_v27, %v12355_v23  ;;  %v6793_v12 = vld [vmem:[%s9944_s10 + $0x28] sm:$0xff] }
 0x409   : > { %v9496_v25 = vpop.f32.mrf.mxu1  ;;  %v5748_v23 = vadd.f32 %v12372_v19, %v12360_v21 }
 0x40a   : > { %v6824_v14 = vadd.f32 %v6792_v58, %v6760_v40  ;;  %v6759_v56 = vadd.f32 %v12576_v15, %v6721_v18  ;;  %v6724_v2 = vadd.f32 %v9496_v25, %v6386_v54  ;;  %v6387_v18 = vadd.f32 %v12497_v55, %v6081_v6 }
 0x40b   : > { %v6572_v44 = vpop.f32.mrf.mxu1  ;;  %v6084_v32 = vadd.f32 %v12489_v1, %v5746_v61  ;;  %v6083_v55 = vadd.f32 %v12493_v0, %v5745_v63  ;;  %v6796_v1 = vld [vmem:[%s9944_s10 + $0x40] sm:$0xff]  ;;  %v6086_v19 = vadd.f32 %v12495_v9, %v5748_v23  ;;  %v12624_v0 = vpop.f32.mrf.mxu0  ;;  %v5750_v61 = vadd.f32 %v12382_v13, %v12370_v35 }
 0x40c   : > { %v6856_v53 = vmax.f32 %v6824_v14, 0.0  ;;  %v6823_v57 = vadd.f32 %v6791_v49, %v6759_v56  ;;  %v6762_v51 = vadd.f32 %v12576_v15, %v6724_v2  ;;  %v6723_v7 = vadd.f32 %v6572_v44, %v6385_v8 }
 0x40d   : > { %v9499_v10 = vpop.f32.mrf.mxu1  ;;  %v6390_v27 = vadd.f32 %v12503_v39, %v6084_v32  ;;  %v5747_v49 = vadd.f32 %v12377_v42, %v12365_v46  ;;  %v6389_v21 = vadd.f32 %v12509_v16, %v6083_v55  ;;  %v6795_v39 = vld [vmem:[%s9944_s10 + $0x38] sm:$0xff]  ;;  %v6392_v46 = vadd.f32 %v12515_v37, %v6086_v19  ;;  %v6798_v16 = vld [vmem:[%s9944_s10 + $0x50] sm:$0xff]  ;;  %v6797_v37 = vld [vmem:[%s9944_s10 + $0x48] sm:$0xff] }
 0x40e   : > { %6888 = vst [vmem:[%s12608_s13 + $0x8] sm:$0xff] %v6856_v53  ;;  %v6855_v11 = vmax.f32 %v6823_v57, 0.0  ;;  %v6826_v45 = vadd.f32 %v6794_v29, %v6762_v51  ;;  %v6761_v58 = vadd.f32 %v12576_v15, %v6723_v7  ;;  %v6726_v48 = vadd.f32 %v9499_v10, %v6388_v59 }
 0x40f   : > { %v6582_v54 = vpop.f32.mrf.mxu1  ;;  %v6085_v42 = vadd.f32 %v12499_v62, %v5747_v49  ;;  %v5749_v53 = vadd.f32 %v12387_v3, %v12375_v31  ;;  %v6088_v13 = vadd.f32 %v12501_v28, %v5750_v61  ;;  %v12640_v62 = vpop.f32.mrf.mxu0  ;;  %v5752_v32 = vadd.f32 %v12392_v33, %v12380_v43 }
 0x410   : > { %6887 = vst [vmem:[%s12608_s13] sm:$0xff] %v6855_v11  ;;  %v6858_v17 = vmax.f32 %v6826_v45, 0.0  ;;  %v6825_v40 = vadd.f32 %v6793_v12, %v6761_v58  ;;  %v6764_v38 = vadd.f32 %v12576_v15, %v6726_v48  ;;  %v6725_v24 = vadd.f32 %v6582_v54, %v6387_v18  ;;  %v13551_v54 = vld [vmem:[#allocation23_spill] sm:$0xff] }
 0x411   : > { %v9502_v25 = vpop.f32.mrf.mxu1  ;;  %v6391_v35 = vadd.f32 %v12521_v4, %v6085_v42  ;;  %v6394_v31 = vadd.f32 %v12527_v30, %v6088_v13  ;;  %v6087_v3 = vadd.f32 %v12505_v20, %v5749_v53  ;;  %v6800_v4 = vld [vmem:[%s9944_s10 + $0x60] sm:$0xff]  ;;  %v5751_v58 = vadd.f32 %v12397_v50, %v12385_v36  ;;  %v6799_v30 = vld [vmem:[%s9944_s10 + $0x58] sm:$0xff]  ;;  %v12656_v20 = vpop.f32.mrf.mxu0 }
 0x412   : > { %6890 = vst [vmem:[%s12608_s13 + $0x18] sm:$0xff] %v6858_v17  ;;  %v6857_v8 = vmax.f32 %v6825_v40, 0.0  ;;  %v6828_v14 = vadd.f32 %v6796_v1, %v6764_v38  ;;  %v6763_v56 = vadd.f32 %v12576_v15, %v6725_v24  ;;  %v6728_v2 = vadd.f32 %v9502_v25, %v6390_v27  ;;  %v13552_v17 = vld [vmem:[#allocation25_spill] sm:$0xff]  ;;  %v13553_v50 = vld [vmem:[#allocation83_spill] sm:$0xff]  ;;  %v13555_v25 = vld [vmem:[#allocation34_spill] sm:$0xff] }
 0x413   : > { %v6592_v9 = vpop.f32.mrf.mxu1  ;;  %v6393_v43 = vadd.f32 %v12533_v22, %v6087_v3  ;;  %v6090_v33 = vadd.f32 %v12507_v47, %v5752_v32  ;;  %v5754_v40 = vadd.f32 %v13552_v17, %v13551_v54  ;;  %v6089_v22 = vadd.f32 %v13553_v50, %v5751_v58  ;;  %v6802_v47 = vld [vmem:[%s9944_s10 + $0x70] sm:$0xff]  ;;  %v12672_v42 = vpop.f32.mrf.mxu0  ;;  %v13562_v3 = vld [vmem:[#allocation26_spill] sm:$0xff] }
 0x414   : > { %6889 = vst [vmem:[%s12608_s13 + $0x10] sm:$0xff] %v6857_v8  ;;  %v6860_v59 = vmax.f32 %v6828_v14, 0.0  ;;  %v6827_v6 = vadd.f32 %v6795_v39, %v6763_v56  ;;  %v6766_v29 = vadd.f32 %v12576_v15, %v6728_v2  ;;  %v6727_v44 = vadd.f32 %v6592_v9, %v6389_v21  ;;  %v13554_v39 = vld [vmem:[#allocation117_spill] sm:$0xff]  ;;  %v13556_v14 = vld [vmem:[#allocation62_spill] sm:$0xff] }
 0x415   : > { %v9505_v57 = vpop.f32.mrf.mxu1  ;;  %v6396_v36 = vadd.f32 %v12539_v52, %v6090_v33  ;;  %v5753_v8 = vadd.f32 %v13555_v25, %v13554_v39  ;;  %v6395_v56 = vadd.f32 %v13556_v14, %v6089_v22  ;;  %v13557_v2 = vld [vmem:[#allocation86_spill] sm:$0xff]  ;;  %v13570_v39 = vld [vmem:[#allocation61_spill] sm:$0xff] }
 0x416   : > { %6892 = vst [vmem:[%s12608_s13 + $0x28] sm:$0xff] %v6860_v59  ;;  %v6859_v51 = vmax.f32 %v6827_v6, 0.0  ;;  %v6830_v7 = vadd.f32 %v6798_v16, %v6766_v29  ;;  %v6765_v63 = vadd.f32 %v12576_v15, %v6727_v44  ;;  %v6730_v18 = vadd.f32 %v9505_v57, %v6392_v46  ;;  %v6801_v52 = vld [vmem:[%s9944_s10 + $0x68] sm:$0xff]  ;;  %v13559_v44 = vld [vmem:[#allocation73_spill] sm:$0xff] }
 0x417   : > { %v6602_v28 = vpop.f32.mrf.mxu1  ;;  %v6092_v61 = vadd.f32 %v13557_v2, %v5754_v40  ;;  %v13558_v29 = vld [vmem:[#allocation120_spill] sm:$0xff]  ;;  %v6806_v40 = vld [vmem:[%s9944_s10 + $0x90] sm:$0xff] }
 0x418   : > { %6891 = vst [vmem:[%s12608_s13 + $0x20] sm:$0xff] %v6859_v51  ;;  %v6862_v12 = vmax.f32 %v6830_v7, 0.0  ;;  %v6829_v10 = vadd.f32 %v6797_v37, %v6765_v63  ;;  %v6768_v11 = vadd.f32 %v12576_v15, %v6730_v18  ;;  %v6729_v45 = vadd.f32 %v6602_v28, %v6391_v35  ;;  %v13560_v35 = vld [vmem:[#allocation89_spill] sm:$0xff] }
 0x419   : > { %v9508_v48 = vpop.f32.mrf.mxu1  ;;  %v5756_v53 = vadd.f32 %v13559_v44, %v13558_v29  ;;  %v6398_v13 = vadd.f32 %v13560_v35, %v6092_v61  ;;  %v13561_v37 = vld [vmem:[#allocation137_spill] sm:$0xff] }
 0x41a   : > { %6894 = vst [vmem:[%s12608_s13 + $0x38] sm:$0xff] %v6862_v12  ;;  %v6861_v23 = vmax.f32 %v6829_v10, 0.0  ;;  %v6832_v27 = vadd.f32 %v6800_v4, %v6768_v11  ;;  %v6767_v55 = vadd.f32 %v12576_v15, %v6729_v45  ;;  %v6732_v1 = vadd.f32 %v9508_v48, %v6394_v31  ;;  %v6804_v51 = vld [vmem:[%s9944_s10 + $0x80] sm:$0xff]  ;;  %v13563_v4 = vld [vmem:[#allocation118_spill] sm:$0xff] }
 0x41b   : > { %v6612_v38 = vpop.f32.mrf.mxu1  ;;  %v6091_v57 = vadd.f32 %v13561_v37, %v5753_v8  ;;  %v5755_v28 = vadd.f32 %v13563_v4, %v13562_v3  ;;  %v13564_v10 = vld [vmem:[#allocation125_spill] sm:$0xff]  ;;  %v6803_v45 = vld [vmem:[%s9944_s10 + $0x78] sm:$0xff] }
 0x41c   : > { %6893 = vst [vmem:[%s12608_s13 + $0x30] sm:$0xff] %v6861_v23  ;;  %v6864_v24 = vmax.f32 %v6832_v27, 0.0  ;;  %v6831_v49 = vadd.f32 %v6799_v30, %v6767_v55  ;;  %v6770_v21 = vadd.f32 %v12576_v15, %v6732_v1  ;;  %v6731_v19 = vadd.f32 %v6612_v38, %v6393_v43  ;;  %v12688_v43 = vpop.f32.mrf.mxu0  ;;  %v13565_v27 = vld [vmem:[#allocation35_spill] sm:$0xff]  ;;  %v13566_v55 = vld [vmem:[#allocation28_spill] sm:$0xff] }
 0x41d   : > { %v9511_v46 = vpop.f32.mrf.mxu1  ;;  %v6397_v12 = vadd.f32 %v12557_v34, %v6091_v57  ;;  %v6094_v11 = vadd.f32 %v13564_v10, %v5756_v53  ;;  %v5758_v1 = vadd.f32 %v13566_v55, %v13565_v27  ;;  %v13567_v34 = vld [vmem:[#allocation60_spill] sm:$0xff]  ;;  %v6808_v29 = vld [vmem:[%s9944_s10 + $0xa0] sm:$0xff] }
 0x41e   : > { %6896 = vst [vmem:[%s12608_s13 + $0x48] sm:$0xff] %v6864_v24  ;;  %v6863_v16 = vmax.f32 %v6831_v49, 0.0  ;;  %v6834_v9 = vadd.f32 %v6802_v47, %v6770_v21  ;;  %v6769_v59 = vadd.f32 %v12576_v15, %v6731_v19  ;;  %v6734_v6 = vadd.f32 %v9511_v46, %v6396_v36  ;;  %v13568_v24 = vld [vmem:[#allocation74_spill] sm:$0xff]  ;;  %v13569_v49 = vld [vmem:[#allocation75_spill] sm:$0xff]  ;;  %v12704_v14 = vpop.f32.mrf.mxu0  ;;  %v13574_v57 = vld [vmem:[#allocation29_spill] sm:$0xff] }
 0x41f   : > { %v6622_v7 = vpop.f32.mrf.mxu1  ;;  %v6400_v54 = vadd.f32 %v12567_v41, %v6094_v11  ;;  %v6093_v17 = vadd.f32 %v13567_v34, %v5755_v28  ;;  %v5757_v21 = vadd.f32 %v13569_v49, %v13568_v24  ;;  %v6096_v25 = vadd.f32 %v13570_v39, %v5758_v1  ;;  %v6805_v41 = vld [vmem:[%s9944_s10 + $0x88] sm:$0xff]  ;;  %v13571_v46 = vld [vmem:[#allocation123_spill] sm:$0xff] }
 0x420   : > { %6895 = vst [vmem:[%s12608_s13 + $0x40] sm:$0xff] %v6863_v16  ;;  %v6866_v63 = vmax.f32 %v6834_v9, 0.0  ;;  %v6833_v18 = vadd.f32 %v6801_v52, %v6769_v59  ;;  %v6772_v32 = vadd.f32 %v12576_v15, %v6734_v6  ;;  %v6733_v31 = vadd.f32 %v6622_v7, %v6395_v56  ;;  %v13572_v16 = vld [vmem:[#allocation126_spill] sm:$0xff]  ;;  %v12720_v3 = vpop.f32.mrf.mxu0  ;;  %v13580_v34 = vld [vmem:[#allocation119_spill] sm:$0xff]  ;;  %v13583_v39 = vld [vmem:[#allocation32_spill] sm:$0xff] }
 0x421   : > { %v9514_v58 = vpop.f32.mrf.mxu1  ;;  %v6399_v19 = vadd.f32 %v12580_v60, %v6093_v17  ;;  %v5760_v9 = vadd.f32 %v13572_v16, %v13571_v46  ;;  %v6402_v59 = vadd.f32 %v12592_v26, %v6096_v25  ;;  %v13573_v60 = vld [vmem:[#allocation84_spill] sm:$0xff]  ;;  %v13577_v11 = vld [vmem:[#allocation78_spill] sm:$0xff]  ;;  %v13584_v25 = vld [vmem:[#allocation129_spill] sm:$0xff] }
 0x422   : > { %6898 = vst [vmem:[%s12608_s13 + $0x58] sm:$0xff] %v6866_v63  ;;  %v6865_v33 = vmax.f32 %v6833_v18, 0.0  ;;  %v6836_v30 = vadd.f32 %v6804_v51, %v6772_v32  ;;  %v6771_v48 = vadd.f32 %v12576_v15, %v6733_v31  ;;  %v6736_v23 = vadd.f32 %v9514_v58, %v6398_v13  ;;  %v13575_v51 = vld [vmem:[#allocation31_spill] sm:$0xff]  ;;  %v13576_v18 = vld [vmem:[#allocation85_spill] sm:$0xff]  ;;  %v6807_v26 = vld [vmem:[%s9944_s10 + $0x98] sm:$0xff] }
 0x423   : > { %v6632_v36 = vpop.f32.mrf.mxu1  ;;  %v6095_v6 = vadd.f32 %v13573_v60, %v5757_v21  ;;  %v5759_v7 = vadd.f32 %v13575_v51, %v13574_v57  ;;  %v6098_v32 = vadd.f32 %v13576_v18, %v5760_v9  ;;  %v13581_v17 = vld [vmem:[#allocation76_spill] sm:$0xff]  ;;  %v13587_v60 = vld [vmem:[#allocation79_spill] sm:$0xff]  ;;  %v13590_v18 = vld [vmem:[#allocation122_spill] sm:$0xff] }
 0x424   : > { %6897 = vst [vmem:[%s12608_s13 + $0x50] sm:$0xff] %v6865_v33  ;;  %v6868_v50 = vmax.f32 %v6836_v30, 0.0  ;;  %v6835_v22 = vadd.f32 %v6803_v45, %v6771_v48  ;;  %v6774_v47 = vadd.f32 %v12576_v15, %v6736_v23  ;;  %v6735_v38 = vadd.f32 %v6632_v36, %v6397_v12  ;;  %v13578_v45 = vld [vmem:[#allocation37_spill] sm:$0xff] }
 0x425   : > { %v9517_v8 = vpop.f32.mrf.mxu1  ;;  %v6401_v63 = vadd.f32 %v12606_v5, %v6095_v6  ;;  %v5762_v58 = vadd.f32 %v13578_v45, %v13577_v11  ;;  %v6404_v33 = vadd.f32 %v12624_v0, %v6098_v32  ;;  %v13579_v5 = vld [vmem:[#allocation127_spill] sm:$0xff]  ;;  %v6809_v0 = vld [vmem:[%s9944_s10 + $0xa8] sm:$0xff] }
 0x426   : > { %6900 = vst [vmem:[%s12608_s13 + $0x68] sm:$0xff] %v6868_v50  ;;  %v6867_v56 = vmax.f32 %v6835_v22, 0.0  ;;  %v6838_v2 = vadd.f32 %v6806_v40, %v6774_v47  ;;  %v6773_v61 = vadd.f32 %v12576_v15, %v6735_v38  ;;  %v6738_v52 = vadd.f32 %v9517_v8, %v6400_v54  ;;  %v6810_v48 = vld [vmem:[%s9944_s10 + $0xb0] sm:$0xff]  ;;  %v6354_v38 = vpop.f32.mrf.mxu0 }
 0x427   : > { %v6642_v44 = vpop.f32.mrf.mxu1  ;;  %v6097_v30 = vadd.f32 %v13579_v5, %v5759_v7  ;;  %v5761_v40 = vadd.f32 %v13581_v17, %v13580_v34  ;;  %v13582_v50 = vld [vmem:[#allocation87_spill] sm:$0xff] }
 0x428   : > { %6899 = vst [vmem:[%s12608_s13 + $0x60] sm:$0xff] %v6867_v56  ;;  %v6870_v53 = vmax.f32 %v6838_v2, 0.0  ;;  %v6837_v35 = vadd.f32 %v6805_v41, %v6773_v61  ;;  %v6776_v13 = vadd.f32 %v12576_v15, %v6738_v52  ;;  %v6737_v37 = vadd.f32 %v6642_v44, %v6399_v19  ;;  %v13585_v56 = vld [vmem:[#allocation90_spill] sm:$0xff]  ;;  %v6812_v2 = vld [vmem:[%s9944_s10 + $0xc0] sm:$0xff]  ;;  %v13588_v44 = vld [vmem:[#allocation128_spill] sm:$0xff] }
 0x429   : > { %v9520_v31 = vpop.f32.mrf.mxu1  ;;  %v6403_v36 = vadd.f32 %v12640_v62, %v6097_v30  ;;  %v6100_v22 = vadd.f32 %v13582_v50, %v5762_v58  ;;  %v5764_v41 = vadd.f32 %v13584_v25, %v13583_v39  ;;  %v6099_v62 = vadd.f32 %v13585_v56, %v5761_v40  ;;  %v13592_v58 = vld [vmem:[#allocation121_spill] sm:$0xff]  ;;  %v13595_v40 = vld [vmem:[#allocation82_spill] sm:$0xff]  ;;  %v13598_v25 = vld [vmem:[#allocation40_spill] sm:$0xff] }
 0x42a   : > { %6902 = vst [vmem:[%s12608_s13 + $0x78] sm:$0xff] %v6870_v53  ;;  %v6869_v4 = vmax.f32 %v6837_v35, 0.0  ;;  %v6840_v28 = vadd.f32 %v6808_v29, %v6776_v13  ;;  %v6775_v12 = vadd.f32 %v12576_v15, %v6737_v37  ;;  %v6740_v10 = vadd.f32 %v9520_v31, %v6402_v59  ;;  %v13586_v59 = vld [vmem:[#allocation38_spill] sm:$0xff]  ;;  %v9455_v13 = vpop.f32.mrf.mxu0  ;;  %v13591_v31 = vld [vmem:[#allocation63_spill] sm:$0xff] }
 0x42b   : > { %v6652_v23 = vpop.f32.mrf.mxu1  ;;  %v6406_v8 = vadd.f32 %v12656_v20, %v6100_v22  ;;  %v5763_v6 = vadd.f32 %v13587_v60, %v13586_v59  ;;  %v6405_v29 = vadd.f32 %v12672_v42, %v6099_v62  ;;  %v6102_v53 = vadd.f32 %v13588_v44, %v5764_v41  ;;  %v6811_v20 = vld [vmem:[%s9944_s10 + $0xb8] sm:$0xff]  ;;  %v13600_v62 = vld [vmem:[#allocation91_spill] sm:$0xff] }
 0x42c   : > { %6901 = vst [vmem:[%s12608_s13 + $0x70] sm:$0xff] %v6869_v4  ;;  %v6872_v27 = vmax.f32 %v6840_v28, 0.0  ;;  %v6839_v55 = vadd.f32 %v6807_v26, %v6775_v12  ;;  %v6778_v1 = vadd.f32 %v12576_v15, %v6740_v10  ;;  %v6739_v54 = vadd.f32 %v6652_v23, %v6401_v63  ;;  %v13589_v63 = vld [vmem:[#allocation77_spill] sm:$0xff]  ;;  %v13599_v41 = vld [vmem:[#allocation124_spill] sm:$0xff]  ;;  %v13601_v60 = vld [vmem:[#allocation59_spill] sm:$0xff] }
 0x42d   : > { %v9523_v47 = vpop.f32.mrf.mxu1  ;;  %v5766_v32 = vadd.f32 %v13590_v18, %v13589_v63  ;;  %v6408_v26 = vadd.f32 %v12688_v43, %v6102_v53  ;;  %v6101_v42 = vadd.f32 %v13591_v31, %v5763_v6  ;;  %v6814_v4 = vld [vmem:[%s9944_s10 + $0xd0] sm:$0xff]  ;;  %v6813_v43 = vld [vmem:[%s9944_s10 + $0xc8] sm:$0xff] }
 0x42e   : > { %6904 = vst [vmem:[%s12608_s13 + $0x88] sm:$0xff] %v6872_v27  ;;  %v6871_v24 = vmax.f32 %v6839_v55, 0.0  ;;  %v6842_v49 = vadd.f32 %v6810_v48, %v6778_v1  ;;  %v6777_v21 = vadd.f32 %v12576_v15, %v6739_v54  ;;  %v6742_v19 = vadd.f32 %v9523_v47, %v6404_v33  ;;  %v13593_v33 = vld [vmem:[#allocation41_spill] sm:$0xff]  ;;  %v13594_v48 = vld [vmem:[#allocation88_spill] sm:$0xff]  ;;  %v6364_v55 = vpop.f32.mrf.mxu0  ;;  %v13602_v6 = vld [vmem:[#allocation134_spill] sm:$0xff] }
 0x42f   : > { %v6662_v61 = vpop.f32.mrf.mxu1  ;;  %v5765_v5 = vadd.f32 %v13593_v33, %v13592_v58  ;;  %v6407_v30 = vadd.f32 %v12704_v14, %v6101_v42  ;;  %v6104_v23 = vadd.f32 %v13594_v48, %v5766_v32  ;;  %v6816_v47 = vld [vmem:[%s9944_s10 + $0xe0] sm:$0xff]  ;;  %v13603_v53 = vld [vmem:[#allocation94_spill] sm:$0xff]  ;;  %v13607_v58 = vld [vmem:[#allocation64_spill] sm:$0xff] }
 0x430   : > { %6903 = vst [vmem:[%s12608_s13 + $0x80] sm:$0xff] %v6871_v24  ;;  %v6874_v52 = vmax.f32 %v6842_v49, 0.0  ;;  %v6841_v46 = vadd.f32 %v6809_v0, %v6777_v21  ;;  %v6780_v16 = vadd.f32 %v12576_v15, %v6742_v19  ;;  %v6741_v9 = vadd.f32 %v6662_v61, %v6403_v36  ;;  %v13596_v36 = vld [vmem:[#allocation80_spill] sm:$0xff]  ;;  %v13597_v0 = vld [vmem:[#allocation130_spill] sm:$0xff]  ;;  %v13604_v63 = vld [vmem:[#allocation81_spill] sm:$0xff] }
 0x431   : > { %v9526_v35 = vpop.f32.mrf.mxu1  ;;  %v5768_v50 = vadd.f32 %v13596_v36, %v13595_v40  ;;  %v6410_v22 = vadd.f32 %v12720_v3, %v6104_v23  ;;  %v6103_v14 = vadd.f32 %v13597_v0, %v5765_v5  ;;  %v6815_v61 = vld [vmem:[%s9944_s10 + $0xd8] sm:$0xff]  ;;  %v13605_v18 = vld [vmem:[#allocation15_spill] sm:$0xff] }
 0x432   : > { %6906 = vst [vmem:[%s12608_s13 + $0x98] sm:$0xff] %v6874_v52  ;;  %v6873_v37 = vmax.f32 %v6841_v46, 0.0  ;;  %v6844_v57 = vadd.f32 %v6812_v2, %v6780_v16  ;;  %v6779_v51 = vadd.f32 %v12576_v15, %v6741_v9  ;;  %v6744_v7 = vadd.f32 %v9526_v35, %v6406_v8  ;;  %v9458_v52 = vpop.f32.mrf.mxu0  ;;  %v13606_v31 = vld [vmem:[#allocation131_spill] sm:$0xff] }
 0x433   : > { %v6672_v28 = vpop.f32.mrf.mxu1  ;;  %v5767_v8 = vadd.f32 %v13599_v41, %v13598_v25  ;;  %v6409_v56 = vadd.f32 %v6354_v38, %v6103_v14  ;;  %v6106_v2 = vadd.f32 %v13600_v62, %v5768_v50  ;;  %v6818_v38 = vld [vmem:[%s9944_s10 + $0xf0] sm:$0xff]  ;;  %v5769_v32 = vadd.f32 %v13605_v18, %v13604_v63 }
 0x434   : > { %6905 = vst [vmem:[%s12608_s13 + $0x90] sm:$0xff] %v6873_v37  ;;  %v6876_v12 = vmax.f32 %v6844_v57, 0.0  ;;  %v6843_v10 = vadd.f32 %v6811_v20, %v6779_v51  ;;  %v6782_v11 = vadd.f32 %v12576_v15, %v6744_v7  ;;  %v6743_v45 = vadd.f32 %v6672_v28, %v6405_v29  ;;  %v6374_v28 = vpop.f32.mrf.mxu0 }
 0x435   : > { %v9529_v27 = vpop.f32.mrf.mxu1  ;;  %v5770_v29 = vadd.f32 %v13602_v6, %v13601_v60  ;;  %v6412_v44 = vadd.f32 %v9455_v13, %v6106_v2  ;;  %v6105_v20 = vadd.f32 %v13603_v53, %v5767_v8  ;;  %v6107_v33 = vadd.f32 %v13607_v58, %v5769_v32 }
 0x436   : > { %6908 = vst [vmem:[%s12608_s13 + $0xa8] sm:$0xff] %v6876_v12  ;;  %v6875_v1 = vmax.f32 %v6843_v10, 0.0  ;;  %v6846_v54 = vadd.f32 %v6814_v4, %v6782_v11  ;;  %v6781_v34 = vadd.f32 %v12576_v15, %v6743_v45  ;;  %v6746_v17 = vadd.f32 %v9529_v27, %v6408_v26  ;;  %v6817_v4 = vld [vmem:[%s9944_s10 + $0xe8] sm:$0xff] }
 0x437   : > { %v6682_v24 = vpop.f32.mrf.mxu1  ;;  %v6411_v26 = vadd.f32 %v6364_v55, %v6105_v20  ;;  %v6108_v42 = vadd.f32 %v13606_v31, %v5770_v29 }
 0x438   : > { %6907 = vst [vmem:[%s12608_s13 + $0xa0] sm:$0xff] %v6875_v1  ;;  %v6878_v49 = vmax.f32 %v6846_v54, 0.0  ;;  %v6845_v21 = vadd.f32 %v6813_v43, %v6781_v34  ;;  %v6784_v19 = vadd.f32 %v12576_v15, %v6746_v17  ;;  %v6745_v39 = vadd.f32 %v6682_v24, %v6407_v30  ;;  %v6820_v30 = vld [vmem:[%s9944_s10 + $0x100] sm:$0xff]  ;;  %v6819_v54 = vld [vmem:[%s9944_s10 + $0xf8] sm:$0xff] }
 0x439   : > { %v9532_v3 = vpop.f32.mrf.mxu1  ;;  %v6414_v5 = vadd.f32 %v9458_v52, %v6108_v42  ;;  %v6413_v1 = vadd.f32 %v6374_v28, %v6107_v33 }
 0x43a   : > { %6910 = vst [vmem:[%s12608_s13 + $0xb8] sm:$0xff] %v6878_v49  ;;  %v6877_v46 = vmax.f32 %v6845_v21, 0.0  ;;  %v6848_v16 = vadd.f32 %v6816_v47, %v6784_v19  ;;  %v6783_v9 = vadd.f32 %v12576_v15, %v6745_v39  ;;  %v6748_v59 = vadd.f32 %v9532_v3, %v6410_v22  ;;  %v6822_v22 = vld [vmem:[%s9944_s10 + $0x110] sm:$0xff]  ;;  %v6821_v21 = vld [vmem:[%s9944_s10 + $0x108] sm:$0xff]  ;;  %s9701_s10 = scalar_lea.vmem %s9700_s30, 8192 }
 0x43b   : > { %v6692_v35 = vpop.f32.mrf.mxu1  ;;  %p9703_p0 = scmp.lt.s32.totalorder %s9701_s10, %s9695_s7 }
 0x43c   : > { %6909 = vst [vmem:[%s12608_s13 + $0xb0] sm:$0xff] %v6877_v46  ;;  %v6880_v37 = vmax.f32 %v6848_v16, 0.0  ;;  %v6847_v57 = vadd.f32 %v6815_v61, %v6783_v9  ;;  %v6786_v51 = vadd.f32 %v12576_v15, %v6748_v59  ;;  %v6747_v7 = vadd.f32 %v6692_v35, %v6409_v56 }
 0x43d   : > { %v9535_v13 = vpop.f32.mrf.mxu1  ;;  %p9704_p10 = por %p9703_p0, %p9702_p13 }
 0x43e   : > { %6912 = vst [vmem:[%s12608_s13 + $0xc8] sm:$0xff] %v6880_v37  ;;  %v6879_v12 = vmax.f32 %v6847_v57, 0.0  ;;  %v6850_v10 = vadd.f32 %v6818_v38, %v6786_v51  ;;  %v6785_v11 = vadd.f32 %v12576_v15, %v6747_v7  ;;  %v6750_v45 = vadd.f32 %v9535_v13, %v6412_v44 }
 0x43f   : > { %v6702_v48 = vpop.f32.mrf.mxu1  ;;  %p9705_p3 = pnand %p9704_p10, %p9698_p12 }
 0x440   : > { %6911 = vst [vmem:[%s12608_s13 + $0xc0] sm:$0xff] %v6879_v12  ;;  %v6882_v23 = vmax.f32 %v6850_v10, 0.0  ;;  %v6849_v43 = vadd.f32 %v6817_v4, %v6785_v11  ;;  %v6788_v27 = vadd.f32 %v12576_v15, %v6750_v45  ;;  %v6749_v55 = vadd.f32 %v6702_v48, %v6411_v26 }
 0x441   : > { %v9538_v34 = vpop.f32.mrf.mxu1 }
 0x442   : > { %6914 = vst [vmem:[%s12608_s13 + $0xd8] sm:$0xff] %v6882_v23  ;;  %v6881_v17 = vmax.f32 %v6849_v43, 0.0  ;;  %v6852_v40 = vadd.f32 %v6820_v30, %v6788_v27  ;;  %v6787_v36 = vadd.f32 %v12576_v15, %v6749_v55  ;;  %v6752_v50 = vadd.f32 %v9538_v34, %v6414_v5 }
 0x443   : > { %v6712_v0 = vpop.f32.mrf.mxu1 }
 0x444   : > { %6913 = vst [vmem:[%s12608_s13 + $0xd0] sm:$0xff] %v6881_v17  ;;  %v6884_v14 = vmax.f32 %v6852_v40, 0.0  ;;  %v6851_v47 = vadd.f32 %v6819_v54, %v6787_v36  ;;  %v6790_v24 = vadd.f32 %v12576_v15, %v6752_v50  ;;  %v6751_v49 = vadd.f32 %v6712_v0, %v6413_v1 }
 0x446   : > { %6916 = vst [vmem:[%s12608_s13 + $0xe8] sm:$0xff] %v6884_v14  ;;  %v6883_v19 = vmax.f32 %v6851_v47, 0.0  ;;  %v6854_v39 = vadd.f32 %v6822_v22, %v6790_v24  ;;  %v6789_v25 = vadd.f32 %v12576_v15, %v6751_v49 }
 0x448   : > { %6915 = vst [vmem:[%s12608_s13 + $0xe0] sm:$0xff] %v6883_v19  ;;  %v6886_v41 = vmax.f32 %v6854_v39, 0.0  ;;  %v6853_v8 = vadd.f32 %v6821_v21, %v6789_v25 }
 0x44a   : > { %6918 = vst [vmem:[%s12608_s13 + $0xf8] sm:$0xff] %v6886_v41  ;;  %v6885_v56 = vmax.f32 %v6853_v8, 0.0 }
 0x44c   : > { %6917 = vst [vmem:[%s12608_s13 + $0xf0] sm:$0xff] %v6885_v56 }
 0x44d   : > { %9708 = shalt.err (!%p9705_p3)
}
 0x44e   : > { %s9709_s24 = scalar_lea.hbm %s12810_s17, 4096  ;;  %s9713_s6 = scalar_lea.hbm %s12862_s5, 8192 }
 0x44f   : > { %p9710_p2 = scmp.ne.s32.totalorder %s12810_s17, %s9709_s24  ;;  %p9714_p4 = scmp.lt.s32.totalorder %s12810_s17, %s12862_s5 }
 0x450   : > { %p9715_p6 = scmp.lt.s32.totalorder %s9713_s6, %s9709_s24 }
 0x451   : > { %p9711_p9 = pnand %p9710_p2, %p13608_p11 }
 0x452   : > { %p9716_p8 = por %p9715_p6, %p9714_p4 }
 0x453   : > { %p9712_p1 = pneg %p9711_p9 }
 0x455   : > { %p9717_p5 = pnand %p9716_p8, %p9712_p1 }
 0x457   : > { %9720 = shalt.err (!%p9717_p5)
}
 0x458   : > { %s9772_s14 = smov 128   ;;  %s9773_s29 = smov 8  }
 0x459   : > { %9552 = dma.vmem_to_hbm [thread:$0]  (%p13608_p11), %s12812_s28, 4096, %s12810_s17, %s6920_s8, %s9772_s14, %s9772_s14, %s9773_s29  }
 0x45a PF: > { %s6948_s12 = sand.u32 1, %s9751_s18   ;;  %p13609_p7 = scmp.ne.s32.totalorder %s13025_s25, 0 }
 0x45b   : > { %p13610_p12 = scmp.ge.s32.totalorder %s9763_s21, 2  ;;  %s6949_s7 = scalar_lea.sflag [#allocation5], %s6948_s12 }
 0x45d   : > { %p9566_p13 = pnand %p13610_p12, %p13609_p7 }
 0x45f   : > { %p9567_p0 = pneg %p9566_p13 }
 0x461   : > { %9746 = dma.done.wait (%p9567_p0), %s6949_s7, 4096  }
 0x462   : > { %9748 = vsyncadd (%p9567_p0), %s6949_s7, 4294963200  ;;  %p19_p10 = scmp.ge.s32.totalorder %s9882_s15, 4   ;;  %s13611_s18 = smov %s9755_s19 }
 0x463   : > { %s13612_s19 = smov %s9759_s20  ;;  %s13613_s20 = smov %s9898_s27 }
 0x464   : > { %s13614_s21 = smov %s9882_s15  ;;  %21 = sbr.rel (!%p19_p10) target bundleno = 6 (0x6), region = 109 }
 0x469   :  { %6954 = vsyncpa [#allocation4], 1 }
 0x46a   :  { %6956 = vsyncpa [#allocation4 + $0x1], 1 }
 0x46b   :  { %6957 = vsyncpa [#allocation7], 1 }
 0x46c   :  { %6958 = vsyncpa [#allocation5], 1 }
 0x46d   :  { %6960 = vsyncpa [#allocation5 + $0x1], 1 }

</bundles_post_ra>
